<compile_context>
chip_gen: v5e
topology: v5e:2x2
jax: 0.10.0
libtpu: 0.0.40
codegen_flags: <defaults>
</compile_context>

<pallas_src>
import jax
import jax.numpy as jnp
from jax.experimental import pallas as pl
from jax.experimental.pallas import tpu as pltpu

# ---------------------------------------------------------------------------
# Problem sizes.
# ---------------------------------------------------------------------------
IN_DIM = 32            # observation dim
HIDDEN = 128           # fixed by the nn.Sequential in the module
OUT_DIM = 4            # number of actions
ATOM_SIZE = 51         # categorical atoms
ATOM_PAD = 128         # per-action atoms padded to a full lane tile

B_TOTAL = 512          # states per pallas_call (2 MXU-filling tiles; raise to 1K-4K if the
                       # caller can batch more -- the kernel is launch/DMA-latency bound)
TILE_B = 256           # batch rows per grid step (fills the 256-tall MXU on v6e/v7x)

NEG_INF = -1e30        # bias on padded atom lanes -> exp underflows to exactly 0


def cdqn_kernel(x_ref, w1_ref, b1_ref, w2_ref, b2_ref, w3_ref, b3_ref, sup_ref, q_ref):
    # ---- layer 1: Linear(in_dim, 128) + ReLU --------------------------------
    h1 = jnp.dot(x_ref[...], w1_ref[...], preferred_element_type=jnp.float32) + b1_ref[...]
    h1 = jnp.maximum(h1, 0.0)                                            # f32 on the VPU

    # ---- layer 2: Linear(128, 128) + ReLU -----------------------------------
    h2 = jnp.dot(h1.astype(jnp.bfloat16), w2_ref[...],
                 preferred_element_type=jnp.float32) + b2_ref[...]
    h2 = jnp.maximum(h2, 0.0)

    # ---- layer 3: all 4 action heads in ONE fused MXU matmul ----------------
    # logits: (tile_b, OUT_DIM * ATOM_PAD); padded lanes carry a -1e30 bias.
    logits = jnp.dot(h2.astype(jnp.bfloat16), w3_ref[...],
                     preferred_element_type=jnp.float32) + b3_ref[...]

    sup = sup_ref[...]                               # (1, ATOM_PAD), hoisted out of the loop

    # ---- per-head softmax / clamp / expected value on 128-lane slices -------
    # Static unrolled loop: each slice is an (8,128)-aligned free view; only one head's
    # e/dist are live at a time (no full-width f32 temporaries -> no spill storm).
    for h in range(OUT_DIM):
        lg = logits[:, h * ATOM_PAD:(h + 1) * ATOM_PAD]          # (tile_b, 128)
        m = jnp.max(lg, axis=-1, keepdims=True)
        e = jnp.exp(lg - m)                                      # pad lanes -> exp(-huge) == 0
        s = jnp.sum(e, axis=-1, keepdims=True)
        dist = e * pl.reciprocal(s, approx=True)                 # EUP vrcp, own VLIW slot
        dist = jnp.maximum(dist, 0.001)                          # clamp(min=0.001), no renorm
        # padded support lanes are 0, so clamped pad lanes add nothing to q
        q_ref[h, :] = jnp.sum(dist * sup, axis=-1)               # lane-dense row store


def categorical_dqn_forward(x, w1, b1, w2, b2, w3_pad, b3_pad, support_pad, *, tile_b=TILE_B):
    """x: (B, IN_DIM) f32. Weights bf16 (MXU operands), biases/support f32.

    Returns q with shape (B, OUT_DIM). Internally the kernel emits (OUT_DIM, B) so the q
    store is lane-dense; the transpose back happens outside the kernel (negligible, 8 KB).
    """
    B = x.shape[0]
    assert B % tile_b == 0, (B, tile_b)
    n_b = B // tile_b
    x_bf = x.astype(jnp.bfloat16)            # halve the streaming x DMA; no in-kernel cast
    const = lambda i: (0, 0)                 # weights/biases/support: resident across steps

    q_t = pl.pallas_call(
        cdqn_kernel,
        out_shape=jax.ShapeDtypeStruct((OUT_DIM, B), jnp.float32),
        grid=(n_b,),
        in_specs=[
            pl.BlockSpec((tile_b, IN_DIM), lambda i: (i, 0)),           # x streams
            pl.BlockSpec((IN_DIM, HIDDEN), const),                      # W1
            pl.BlockSpec((1, HIDDEN), const),                           # b1
            pl.BlockSpec((HIDDEN, HIDDEN), const),                      # W2
            pl.BlockSpec((1, HIDDEN), const),                           # b2
            pl.BlockSpec((HIDDEN, OUT_DIM * ATOM_PAD), const),          # W3 (padded heads)
            pl.BlockSpec((1, OUT_DIM * ATOM_PAD), const),               # b3 (padded heads)
            pl.BlockSpec((1, ATOM_PAD), const),                         # support (padded)
        ],
        out_specs=pl.BlockSpec((OUT_DIM, tile_b), lambda i: (0, i)),    # lane-dense q tiles
        compiler_params=pltpu.CompilerParams(
            dimension_semantics=("parallel",)),                         # megacore on v7x
    )(x_bf, w1, b1, w2, b2, w3_pad, b3_pad, support_pad)

    return q_t.T                                                        # (B, OUT_DIM)


def init_params(key):
    """Mimics torch nn.Linear default init: U(-1/sqrt(fan_in), 1/sqrt(fan_in))."""
    ks = jax.random.split(key, 6)

    def lin(kw, kb, fan_in, fan_out):
        bound = 1.0 / (fan_in ** 0.5)
        w = jax.random.uniform(kw, (fan_in, fan_out), jnp.float32, -bound, bound)
        b = jax.random.uniform(kb, (1, fan_out), jnp.float32, -bound, bound)
        return w, b

    w1, b1 = lin(ks[0], ks[1], IN_DIM, HIDDEN)
    w2, b2 = lin(ks[2], ks[3], HIDDEN, HIDDEN)
    w3_flat, b3_flat = lin(ks[4], ks[5], HIDDEN, OUT_DIM * ATOM_SIZE)

    # bf16 MXU operands (accumulation stays f32 in kernel and reference).
    w1_bf = w1.astype(jnp.bfloat16)
    w2_bf = w2.astype(jnp.bfloat16)
    w3_bf = w3_flat.astype(jnp.bfloat16)

    # Pad each action head 51 -> 128 atoms: zero weight columns, -1e30 bias.
    # Column ordering is head-major (OUT_DIM, ATOM_PAD), matching the kernel's static slices.
    w3_pad = jnp.zeros((HIDDEN, OUT_DIM, ATOM_PAD), jnp.bfloat16)
    w3_pad = w3_pad.at[:, :, :ATOM_SIZE].set(w3_bf.reshape(HIDDEN, OUT_DIM, ATOM_SIZE))
    w3_pad = w3_pad.reshape(HIDDEN, OUT_DIM * ATOM_PAD)

    b3_pad = jnp.full((1, OUT_DIM, ATOM_PAD), NEG_INF, jnp.float32)
    b3_pad = b3_pad.at[:, :, :ATOM_SIZE].set(b3_flat.reshape(1, OUT_DIM, ATOM_SIZE))
    b3_pad = b3_pad.reshape(1, OUT_DIM * ATOM_PAD)

    return dict(w1=w1_bf, b1=b1, w2=w2_bf, b2=b2,
                w3_pad=w3_pad, b3_pad=b3_pad,
                w3_flat=w3_bf, b3_flat=b3_flat)


def reference_forward(x, w1, b1, w2, b2, w3_flat, b3_flat, support):
    """Pure-JAX reference mirroring the PyTorch module (same bf16 MXU operands)."""
    h1 = jnp.maximum(jnp.dot(x.astype(jnp.bfloat16), w1,
                             preferred_element_type=jnp.float32) + b1, 0.0)
    h2 = jnp.maximum(jnp.dot(h1.astype(jnp.bfloat16), w2,
                             preferred_element_type=jnp.float32) + b2, 0.0)
    q_atoms = jnp.dot(h2.astype(jnp.bfloat16), w3_flat,
                      preferred_element_type=jnp.float32) + b3_flat
    q_atoms = q_atoms.reshape(-1, OUT_DIM, ATOM_SIZE)
    dist = jax.nn.softmax(q_atoms, axis=-1)
    dist = jnp.maximum(dist, 0.001)   # clamp(min=0.001); no renormalization
    return jnp.sum(dist * support.reshape(1, 1, ATOM_SIZE), axis=2)


if __name__ == "__main__":
    key = jax.random.PRNGKey(0)
    k_x, k_p = jax.random.split(key)

    x = jax.random.normal(k_x, (B_TOTAL, IN_DIM), jnp.float32)
    p = init_params(k_p)

    # Categorical DQN support (v_min=-10, v_max=10, atom_size atoms); pad lanes = 0.
    support = jnp.linspace(-10.0, 10.0, ATOM_SIZE, dtype=jnp.float32).reshape(1, ATOM_SIZE)
    support_pad = jnp.zeros((1, ATOM_PAD), jnp.float32).at[:, :ATOM_SIZE].set(support)

    q = categorical_dqn_forward(x, p["w1"], p["b1"], p["w2"], p["b2"],
                                p["w3_pad"], p["b3_pad"], support_pad)
    q = jax.block_until_ready(q)

    q_ref = reference_forward(x, p["w1"], p["b1"], p["w2"], p["b2"],
                              p["w3_flat"], p["b3_flat"], support)
    assert q.shape == (B_TOTAL, OUT_DIM)
    # approx reciprocal adds ~2^-12 relative error in dist -> error scales with |q|,
    # comfortably inside rtol; slightly widened atol for near-zero q values.
    assert jnp.allclose(q, q_ref, atol=2e-3, rtol=1e-3), (q, q_ref)

    print("KERNEL_OK")
</pallas_src>

<mosaic_0001>
module attributes {stable_mosaic.version = 11 : i64} {
  func.func @cdqn_kernel(%arg0: i32, %arg1: memref<256x32xbf16, #tpu.memory_space<vmem>>, %arg2: memref<32x128xbf16, #tpu.memory_space<vmem>>, %arg3: memref<1x128xf32, #tpu.memory_space<vmem>>, %arg4: memref<128x128xbf16, #tpu.memory_space<vmem>>, %arg5: memref<1x128xf32, #tpu.memory_space<vmem>>, %arg6: memref<128x512xbf16, #tpu.memory_space<vmem>>, %arg7: memref<1x512xf32, #tpu.memory_space<vmem>>, %arg8: memref<1x128xf32, #tpu.memory_space<vmem>>, %arg9: memref<4x256xf32, #tpu.memory_space<vmem>>) attributes {dimension_semantics = [#tpu.dimension_semantics<parallel>], iteration_bounds = array<i64: 2>, scalar_prefetch = 0 : i64, scratch_operands = 0 : i64, tpu.core_type = #tpu.core_type<tc>, window_params = [{transform_indices = @transform_0, window_bounds = array<i64: 256, 32>}, {pipeline_mode = #tpu.pipeline_mode<synchronous>, transform_indices = @transform_1, window_bounds = array<i64: 32, 128>}, {pipeline_mode = #tpu.pipeline_mode<synchronous>, transform_indices = @transform_2, window_bounds = array<i64: 1, 128>}, {pipeline_mode = #tpu.pipeline_mode<synchronous>, transform_indices = @transform_3, window_bounds = array<i64: 128, 128>}, {pipeline_mode = #tpu.pipeline_mode<synchronous>, transform_indices = @transform_4, window_bounds = array<i64: 1, 128>}, {pipeline_mode = #tpu.pipeline_mode<synchronous>, transform_indices = @transform_5, window_bounds = array<i64: 128, 512>}, {pipeline_mode = #tpu.pipeline_mode<synchronous>, transform_indices = @transform_6, window_bounds = array<i64: 1, 512>}, {pipeline_mode = #tpu.pipeline_mode<synchronous>, transform_indices = @transform_7, window_bounds = array<i64: 1, 128>}, {transform_indices = @transform_8, window_bounds = array<i64: 4, 256>}]} {
    %c0 = arith.constant 0 : index
    %c0_0 = arith.constant 0 : index
    %0 = vector.load %arg1[%c0, %c0_0] : memref<256x32xbf16, #tpu.memory_space<vmem>>, vector<256x32xbf16>
    %c0_1 = arith.constant 0 : index
    %c0_2 = arith.constant 0 : index
    %1 = vector.load %arg2[%c0_1, %c0_2] : memref<32x128xbf16, #tpu.memory_space<vmem>>, vector<32x128xbf16>
    %cst = arith.constant dense<0.000000e+00> : vector<256x128xf32>
    %2 = tpu.matmul %0, %1, %cst {dimension_numbers = #tpu.dot_dimension_numbers<[1], [0], [0], [1], [0, 0, 1, 1], [], []>} : vector<256x32xbf16>, vector<32x128xbf16>, vector<256x128xf32> -> vector<256x128xf32>
    %c0_3 = arith.constant 0 : index
    %c0_4 = arith.constant 0 : index
    %3 = vector.load %arg3[%c0_3, %c0_4] : memref<1x128xf32, #tpu.memory_space<vmem>>, vector<1x128xf32>
    %4 = vector.broadcast %3 : vector<1x128xf32> to vector<256x128xf32>
    %5 = arith.addf %2, %4 : vector<256x128xf32>
    %cst_5 = arith.constant 0.000000e+00 : f32
    %6 = vector.broadcast %cst_5 : f32 to vector<256x128xf32>
    %7 = arith.maximumf %5, %6 : vector<256x128xf32>
    %8 = arith.truncf %7 : vector<256x128xf32> to vector<256x128xbf16>
    %c0_6 = arith.constant 0 : index
    %c0_7 = arith.constant 0 : index
    %9 = vector.load %arg4[%c0_6, %c0_7] : memref<128x128xbf16, #tpu.memory_space<vmem>>, vector<128x128xbf16>
    %cst_8 = arith.constant dense<0.000000e+00> : vector<256x128xf32>
    %10 = tpu.matmul %8, %9, %cst_8 {dimension_numbers = #tpu.dot_dimension_numbers<[1], [0], [0], [1], [0, 0, 1, 1], [], []>} : vector<256x128xbf16>, vector<128x128xbf16>, vector<256x128xf32> -> vector<256x128xf32>
    %c0_9 = arith.constant 0 : index
    %c0_10 = arith.constant 0 : index
    %11 = vector.load %arg5[%c0_9, %c0_10] : memref<1x128xf32, #tpu.memory_space<vmem>>, vector<1x128xf32>
    %12 = vector.broadcast %11 : vector<1x128xf32> to vector<256x128xf32>
    %13 = arith.addf %10, %12 : vector<256x128xf32>
    %cst_11 = arith.constant 0.000000e+00 : f32
    %14 = vector.broadcast %cst_11 : f32 to vector<256x128xf32>
    %15 = arith.maximumf %13, %14 : vector<256x128xf32>
    %16 = arith.truncf %15 : vector<256x128xf32> to vector<256x128xbf16>
    %c0_12 = arith.constant 0 : index
    %c0_13 = arith.constant 0 : index
    %17 = vector.load %arg6[%c0_12, %c0_13] : memref<128x512xbf16, #tpu.memory_space<vmem>>, vector<128x512xbf16>
    %cst_14 = arith.constant dense<0.000000e+00> : vector<256x512xf32>
    %18 = tpu.matmul %16, %17, %cst_14 {dimension_numbers = #tpu.dot_dimension_numbers<[1], [0], [0], [1], [0, 0, 1, 1], [], []>} : vector<256x128xbf16>, vector<128x512xbf16>, vector<256x512xf32> -> vector<256x512xf32>
    %c0_15 = arith.constant 0 : index
    %c0_16 = arith.constant 0 : index
    %19 = vector.load %arg7[%c0_15, %c0_16] : memref<1x512xf32, #tpu.memory_space<vmem>>, vector<1x512xf32>
    %20 = vector.broadcast %19 : vector<1x512xf32> to vector<256x512xf32>
    %21 = arith.addf %18, %20 : vector<256x512xf32>
    %c0_17 = arith.constant 0 : index
    %c0_18 = arith.constant 0 : index
    %22 = vector.load %arg8[%c0_17, %c0_18] : memref<1x128xf32, #tpu.memory_space<vmem>>, vector<1x128xf32>
    %23 = vector.extract_strided_slice %21 {offsets = [0, 0], sizes = [256, 128], strides = [1, 1]} : vector<256x512xf32> to vector<256x128xf32>
    %cst_19 = arith.constant dense<0xFF800000> : vector<256xf32>
    %24 = vector.multi_reduction <maximumf>, %23, %cst_19 [1] : vector<256x128xf32> to vector<256xf32>
    %25 = vector.shape_cast %24 : vector<256xf32> to vector<256x1xf32>
    %26 = vector.broadcast %25 : vector<256x1xf32> to vector<256x128xf32>
    %27 = arith.subf %23, %26 : vector<256x128xf32>
    %28 = math.exp %27 : vector<256x128xf32>
    %cst_20 = arith.constant dense<0.000000e+00> : vector<256xf32>
    %29 = vector.multi_reduction <add>, %28, %cst_20 [1] : vector<256x128xf32> to vector<256xf32>
    %30 = vector.shape_cast %29 : vector<256xf32> to vector<256x1xf32>
    %31 = tpu.reciprocal %30 {approx = true} : vector<256x1xf32> -> vector<256x1xf32>
    %32 = vector.broadcast %31 : vector<256x1xf32> to vector<256x128xf32>
    %33 = arith.mulf %28, %32 : vector<256x128xf32>
    %cst_21 = arith.constant 1.000000e-03 : f32
    %34 = vector.broadcast %cst_21 : f32 to vector<256x128xf32>
    %35 = arith.maximumf %33, %34 : vector<256x128xf32>
    %36 = vector.broadcast %22 : vector<1x128xf32> to vector<256x128xf32>
    %37 = arith.mulf %35, %36 : vector<256x128xf32>
    %cst_22 = arith.constant dense<0.000000e+00> : vector<256xf32>
    %38 = vector.multi_reduction <add>, %37, %cst_22 [1] : vector<256x128xf32> to vector<256xf32>
    %c0_23 = arith.constant 0 : index
    %c0_24 = arith.constant 0 : index
    %39 = vector.load %arg9[%c0_23, %c0_24] : memref<4x256xf32, #tpu.memory_space<vmem>>, vector<1x256xf32>
    %40 = vector.shape_cast %39 : vector<1x256xf32> to vector<256xf32>
    %41 = vector.shape_cast %38 : vector<256xf32> to vector<1x256xf32>
    tpu.vector_store %arg9[%c0_23, %c0_24], %41 {strides = array<i32>} : memref<4x256xf32, #tpu.memory_space<vmem>>, vector<1x256xf32>,
    %42 = vector.extract_strided_slice %21 {offsets = [0, 128], sizes = [256, 128], strides = [1, 1]} : vector<256x512xf32> to vector<256x128xf32>
    %cst_25 = arith.constant dense<0xFF800000> : vector<256xf32>
    %43 = vector.multi_reduction <maximumf>, %42, %cst_25 [1] : vector<256x128xf32> to vector<256xf32>
    %44 = vector.shape_cast %43 : vector<256xf32> to vector<256x1xf32>
    %45 = vector.broadcast %44 : vector<256x1xf32> to vector<256x128xf32>
    %46 = arith.subf %42, %45 : vector<256x128xf32>
    %47 = math.exp %46 : vector<256x128xf32>
    %cst_26 = arith.constant dense<0.000000e+00> : vector<256xf32>
    %48 = vector.multi_reduction <add>, %47, %cst_26 [1] : vector<256x128xf32> to vector<256xf32>
    %49 = vector.shape_cast %48 : vector<256xf32> to vector<256x1xf32>
    %50 = tpu.reciprocal %49 {approx = true} : vector<256x1xf32> -> vector<256x1xf32>
    %51 = vector.broadcast %50 : vector<256x1xf32> to vector<256x128xf32>
    %52 = arith.mulf %47, %51 : vector<256x128xf32>
    %cst_27 = arith.constant 1.000000e-03 : f32
    %53 = vector.broadcast %cst_27 : f32 to vector<256x128xf32>
    %54 = arith.maximumf %52, %53 : vector<256x128xf32>
    %55 = vector.broadcast %22 : vector<1x128xf32> to vector<256x128xf32>
    %56 = arith.mulf %54, %55 : vector<256x128xf32>
    %cst_28 = arith.constant dense<0.000000e+00> : vector<256xf32>
    %57 = vector.multi_reduction <add>, %56, %cst_28 [1] : vector<256x128xf32> to vector<256xf32>
    %c1 = arith.constant 1 : index
    %c0_29 = arith.constant 0 : index
    %58 = vector.load %arg9[%c1, %c0_29] : memref<4x256xf32, #tpu.memory_space<vmem>>, vector<1x256xf32>
    %59 = vector.shape_cast %58 : vector<1x256xf32> to vector<256xf32>
    %60 = vector.shape_cast %57 : vector<256xf32> to vector<1x256xf32>
    tpu.vector_store %arg9[%c1, %c0_29], %60 {strides = array<i32>} : memref<4x256xf32, #tpu.memory_space<vmem>>, vector<1x256xf32>,
    %61 = vector.extract_strided_slice %21 {offsets = [0, 256], sizes = [256, 128], strides = [1, 1]} : vector<256x512xf32> to vector<256x128xf32>
    %cst_30 = arith.constant dense<0xFF800000> : vector<256xf32>
    %62 = vector.multi_reduction <maximumf>, %61, %cst_30 [1] : vector<256x128xf32> to vector<256xf32>
    %63 = vector.shape_cast %62 : vector<256xf32> to vector<256x1xf32>
    %64 = vector.broadcast %63 : vector<256x1xf32> to vector<256x128xf32>
    %65 = arith.subf %61, %64 : vector<256x128xf32>
    %66 = math.exp %65 : vector<256x128xf32>
    %cst_31 = arith.constant dense<0.000000e+00> : vector<256xf32>
    %67 = vector.multi_reduction <add>, %66, %cst_31 [1] : vector<256x128xf32> to vector<256xf32>
    %68 = vector.shape_cast %67 : vector<256xf32> to vector<256x1xf32>
    %69 = tpu.reciprocal %68 {approx = true} : vector<256x1xf32> -> vector<256x1xf32>
    %70 = vector.broadcast %69 : vector<256x1xf32> to vector<256x128xf32>
    %71 = arith.mulf %66, %70 : vector<256x128xf32>
    %cst_32 = arith.constant 1.000000e-03 : f32
    %72 = vector.broadcast %cst_32 : f32 to vector<256x128xf32>
    %73 = arith.maximumf %71, %72 : vector<256x128xf32>
    %74 = vector.broadcast %22 : vector<1x128xf32> to vector<256x128xf32>
    %75 = arith.mulf %73, %74 : vector<256x128xf32>
    %cst_33 = arith.constant dense<0.000000e+00> : vector<256xf32>
    %76 = vector.multi_reduction <add>, %75, %cst_33 [1] : vector<256x128xf32> to vector<256xf32>
    %c2 = arith.constant 2 : index
    %c0_34 = arith.constant 0 : index
    %77 = vector.load %arg9[%c2, %c0_34] : memref<4x256xf32, #tpu.memory_space<vmem>>, vector<1x256xf32>
    %78 = vector.shape_cast %77 : vector<1x256xf32> to vector<256xf32>
    %79 = vector.shape_cast %76 : vector<256xf32> to vector<1x256xf32>
    tpu.vector_store %arg9[%c2, %c0_34], %79 {strides = array<i32>} : memref<4x256xf32, #tpu.memory_space<vmem>>, vector<1x256xf32>,
    %80 = vector.extract_strided_slice %21 {offsets = [0, 384], sizes = [256, 128], strides = [1, 1]} : vector<256x512xf32> to vector<256x128xf32>
    %cst_35 = arith.constant dense<0xFF800000> : vector<256xf32>
    %81 = vector.multi_reduction <maximumf>, %80, %cst_35 [1] : vector<256x128xf32> to vector<256xf32>
    %82 = vector.shape_cast %81 : vector<256xf32> to vector<256x1xf32>
    %83 = vector.broadcast %82 : vector<256x1xf32> to vector<256x128xf32>
    %84 = arith.subf %80, %83 : vector<256x128xf32>
    %85 = math.exp %84 : vector<256x128xf32>
    %cst_36 = arith.constant dense<0.000000e+00> : vector<256xf32>
    %86 = vector.multi_reduction <add>, %85, %cst_36 [1] : vector<256x128xf32> to vector<256xf32>
    %87 = vector.shape_cast %86 : vector<256xf32> to vector<256x1xf32>
    %88 = tpu.reciprocal %87 {approx = true} : vector<256x1xf32> -> vector<256x1xf32>
    %89 = vector.broadcast %88 : vector<256x1xf32> to vector<256x128xf32>
    %90 = arith.mulf %85, %89 : vector<256x128xf32>
    %cst_37 = arith.constant 1.000000e-03 : f32
    %91 = vector.broadcast %cst_37 : f32 to vector<256x128xf32>
    %92 = arith.maximumf %90, %91 : vector<256x128xf32>
    %93 = vector.broadcast %22 : vector<1x128xf32> to vector<256x128xf32>
    %94 = arith.mulf %92, %93 : vector<256x128xf32>
    %cst_38 = arith.constant dense<0.000000e+00> : vector<256xf32>
    %95 = vector.multi_reduction <add>, %94, %cst_38 [1] : vector<256x128xf32> to vector<256xf32>
    %c3 = arith.constant 3 : index
    %c0_39 = arith.constant 0 : index
    %96 = vector.load %arg9[%c3, %c0_39] : memref<4x256xf32, #tpu.memory_space<vmem>>, vector<1x256xf32>
    %97 = vector.shape_cast %96 : vector<1x256xf32> to vector<256xf32>
    %98 = vector.shape_cast %95 : vector<256xf32> to vector<1x256xf32>
    tpu.vector_store %arg9[%c3, %c0_39], %98 {strides = array<i32>} : memref<4x256xf32, #tpu.memory_space<vmem>>, vector<1x256xf32>,
    return
  }
  func.func @transform_0(%arg0: i32) -> (i32, i32) {
    %c0_i32 = arith.constant 0 : i32
    %c0_i32_0 = arith.constant 0 : i32
    return %arg0, %c0_i32 : i32, i32
  }
  func.func @transform_1(%arg0: i32) -> (i32, i32) {
    %c0_i32 = arith.constant 0 : i32
    %c0_i32_0 = arith.constant 0 : i32
    %c0_i32_1 = arith.constant 0 : i32
    return %c0_i32, %c0_i32_0 : i32, i32
  }
  func.func @transform_2(%arg0: i32) -> (i32, i32) {
    %c0_i32 = arith.constant 0 : i32
    %c0_i32_0 = arith.constant 0 : i32
    %c0_i32_1 = arith.constant 0 : i32
    return %c0_i32, %c0_i32_0 : i32, i32
  }
  func.func @transform_3(%arg0: i32) -> (i32, i32) {
    %c0_i32 = arith.constant 0 : i32
    %c0_i32_0 = arith.constant 0 : i32
    %c0_i32_1 = arith.constant 0 : i32
    return %c0_i32, %c0_i32_0 : i32, i32
  }
  func.func @transform_4(%arg0: i32) -> (i32, i32) {
    %c0_i32 = arith.constant 0 : i32
    %c0_i32_0 = arith.constant 0 : i32
    %c0_i32_1 = arith.constant 0 : i32
    return %c0_i32, %c0_i32_0 : i32, i32
  }
  func.func @transform_5(%arg0: i32) -> (i32, i32) {
    %c0_i32 = arith.constant 0 : i32
    %c0_i32_0 = arith.constant 0 : i32
    %c0_i32_1 = arith.constant 0 : i32
    return %c0_i32, %c0_i32_0 : i32, i32
  }
  func.func @transform_6(%arg0: i32) -> (i32, i32) {
    %c0_i32 = arith.constant 0 : i32
    %c0_i32_0 = arith.constant 0 : i32
    %c0_i32_1 = arith.constant 0 : i32
    return %c0_i32, %c0_i32_0 : i32, i32
  }
  func.func @transform_7(%arg0: i32) -> (i32, i32) {
    %c0_i32 = arith.constant 0 : i32
    %c0_i32_0 = arith.constant 0 : i32
    %c0_i32_1 = arith.constant 0 : i32
    return %c0_i32, %c0_i32_0 : i32, i32
  }
  func.func @transform_8(%arg0: i32) -> (i32, i32) {
    %c0_i32 = arith.constant 0 : i32
    %c0_i32_0 = arith.constant 0 : i32
    return %c0_i32, %arg0 : i32, i32
  }
}

</mosaic_0001>

<bundles_post_ra>
// kernel: tpu_custom_call.1
= control target key start
LH: loop header
LB: loop body
LE: loop exit
PB: predicated region body
PF: predicated region fallthrough
CT: control target
= control target key end

     0   :  { %s11301_s0 = inlined_call_operand.vmem [shape: bf16[512,32], index: 0, kind: input, shape index: {}]   ;;  %s11302_s1 = inlined_call_operand.hbm [shape: bf16[32,128], index: 1, kind: input, shape index: {}]   ;;  %s11303_s2 = inlined_call_operand.hbm [shape: f32[1,128], index: 2, kind: input, shape index: {}]   ;;  %s11304_s3 = inlined_call_operand.vmem [shape: bf16[128,128], index: 3, kind: input, shape index: {}]   ;;  %s11305_s4 = inlined_call_operand.hbm [shape: f32[1,128], index: 4, kind: input, shape index: {}]   ;;  %s11306_s5 = inlined_call_operand.vmem [shape: bf16[128,512], index: 5, kind: input, shape index: {}]   ;;  %s11307_s6 = inlined_call_operand.vmem [shape: f32[1,512], index: 6, kind: input, shape index: {}]   ;;  %s11308_s7 = inlined_call_operand.hbm [shape: f32[1,128], index: 7, kind: input, shape index: {}]   ;;  %s11309_s8 = inlined_call_operand.hbm [shape: f32[4,512], index: 8, kind: output, shape index: {}]  }
   0x1   :  { %11355 = sst [smem:[#allocation103_spill]] %s11302_s1 }
   0x2   :  { %11356 = sst [smem:[#allocation104_spill]] %s11303_s2 }
   0x3   :  { %13 = vsyncpa [#allocation3], 0 }
   0x4   :  { %14 = vsyncpa [#allocation6], 0 }
   0x5   :  { %15 = vsyncpa [#allocation9], 0 }
   0x6   :  { %16 = vsyncpa [#allocation4], 0 }
   0x7   :  { %18 = vsyncpa [#allocation4 + $0x1], 0  ;;  %s7451_s27 = smov 0   ;;  %s7453_s28 = smov 0  }
   0x8   :  { %s7455_s29 = smov 0   ;;  %s7457_s30 = smov 0  }
   0x9 LB: > { %s7472_s9 = sadd.s32 4294967295, %s7397_s30   ;;  %s6255_s10 = sadd.s32 4294967294, %s7397_s30   ;;  %s7397_s30 = sphi %s7457_s30, %s11699_s30   ;;  %s7393_s29 = sphi %s7455_s29, %s11698_s29   ;;  %s7389_s28 = sphi %s7453_s28, %s11697_s28   ;;  %s7385_s27 = sphi %s7451_s27, %s11696_s27  }
   0xa   : > { %s7476_s11 = sadd.s32 1, %s7397_s30   ;;  %s204_s12 = sadd.s32 1, %s7393_s29 }
   0xb   : > { %s201_s13 = ssub.s32 %s7397_s30, %s7476_s11  ;;  %p214_p0 = scmp.ne.s32.totalorder %s7393_s29, %s7389_s28 }
   0xc   : > { %p202_p1 = scmp.eq.s32.totalorder %s201_s13, 0  ;;  %p215_p2 = scmp.eq.s32.totalorder %s7472_s9, 1 }
   0xd   : > { %p220_p3 = scmp.ne.s32.totalorder %s7389_s28, %s7385_s27  ;;  %p221_p4 = scmp.eq.s32.totalorder %s6255_s10, 1 }
   0xe   : > { %s7487_s14 = scalar_select %p202_p1, %s7393_s29, %s204_s12  }
   0xf   : > { %p7489_p5 = por %p215_p2, %p214_p0  ;;  %p7493_p6 = por %p221_p4, %p220_p3 }
  0x10   : > { %11357 = sst [smem:[#allocation15_spill]] %s7487_s14  ;;  %p6256_p7 = scmp.ge.s32.totalorder %s7397_s30, 1 }
  0x11   : > { %p228_p8 = scmp.lt.s32.totalorder %s7397_s30, 3  ;;  %p6630_p9 = scmp.eq.s32.totalorder %s7472_s9, 0 }
  0x12   : > { %s11361_s2 = sld [smem:[#allocation104_spill]]  ;;  %s7399_s21 = smov [#allocation5]  }
  0x13   : > { %p7500_p10 = pnand %p6256_p7, %p228_p8  ;;  %s256_s22 = sshll.u32 %s7399_s21, 4  ;;  %s257_s22 = int_to_ptr.vmem [resolvable:$true] %s256_s22 }
  0x14   : > { %s11362_s1 = sld [smem:[#allocation103_spill]]  ;;  %s7400_s10 = smov [#allocation2]  }
  0x15   : > { %p6613_p11 = pneg %p7500_p10  ;;  %s241_s12 = sshll.u32 %s7400_s10, 4  ;;  %s242_s12 = int_to_ptr.vmem [resolvable:$true] %s241_s12 }
  0x16   : > { %s7401_s13 = smov 64   ;;  %s7402_s18 = smov 4  }
  0x17   : > { %p7514_p12 = pnand %p6630_p9, %p6613_p11  ;;  %s269_s23 = sshll.u32 %s11305_s4, 4  ;;  %s270_s23 = int_to_ptr.hbm [resolvable:$true] %s269_s23 }
  0x18   : > { %s254_s20 = sshll.u32 %s11361_s2, 4  ;;  %s7403_s24 = smov [#allocation7]   ;;  %s255_s20 = int_to_ptr.hbm [resolvable:$true] %s254_s20 }
  0x19   : > { %6619 = dma.hbm_to_vmem [thread:$0]  (!%p7514_p12), %s255_s20, 16, %s257_s22, [#allocation6]  }
  0x1a   : > { %s239_s25 = sshll.u32 %s11362_s1, 4  ;;  %s271_s1 = sshll.u32 %s7403_s24, 4  ;;  %s240_s25 = int_to_ptr.hbm [resolvable:$true] %s239_s25  ;;  %s272_s1 = int_to_ptr.vmem [resolvable:$true] %s271_s1 }
  0x1b   : > { %6616 = dma.hbm_to_vmem [thread:$0]  (!%p7514_p12), %s240_s25, 256, %s242_s12, [#allocation3], %s7401_s13, %s7401_s13, %s7402_s18  }
  0x1c   : > { %s287_s10 = sshll.u32 %s11308_s7, 4  ;;  %s7404_s20 = smov [#allocation8]   ;;  %s288_s10 = int_to_ptr.hbm [resolvable:$true] %s287_s10 }
  0x1d   : > { %6622 = dma.hbm_to_vmem [thread:$0]  (!%p7514_p12), %s270_s23, 16, %s272_s1, [#allocation6]  }
  0x1e   : > { %s289_s22 = sshll.u32 %s7404_s20, 4  ;;  %311 = sbr.rel (%p7500_p10) target bundleno = 3144 (0xc48), region = 52  ;;  %s290_s22 = int_to_ptr.vmem [resolvable:$true] %s289_s22 }
  0x1f   : > { %6625 = dma.hbm_to_vmem [thread:$0]  (!%p7514_p12), %s288_s10, 16, %s290_s22, [#allocation9]  }
  0x23   : > { %7368 = dma.done.wait (%p6630_p9), [#allocation3], 256  }
  0x24   : > { %7370 = vsyncadd (%p6630_p9), [#allocation3], 4294967040 }
  0x25   : > { %7372 = dma.done.wait (%p6630_p9), [#allocation6], 32  }
  0x26   : > { %7374 = vsyncadd (%p6630_p9), [#allocation6], 4294967264 }
  0x27   : > { %7376 = dma.done.wait (%p6630_p9), [#allocation9], 16  }
  0x28   : > { %7378 = vsyncadd (%p6630_p9), [#allocation9], 4294967280  ;;  %s6268_s1 = sshll.u32 %s7472_s9, 5  ;;  %v6543_v0 = vld [vmem:[#allocation2 + $0x8] sm:$0xff]  ;;  %v6542_v1 = vld [vmem:[#allocation2] sm:$0xff]  ;;  %vm501_vm0 = vcmask 261120  }
  0x29   : > { %p362_p13 = scmp.lt.s32.totalorder %s6268_s1, 63  ;;  %556 = vmatpush.bf16.msra.mxu0 %v6543_v0  ;;  %6585 = vmatpush.bf16.msra.mxu3 %v6543_v0  ;;  %v6551_v7 = vld [vmem:[%s11304_s3 + $0x38] sm:$0xff]  ;;  %v6550_v9 = vld [vmem:[%s11304_s3 + $0x30] sm:$0xff]  ;;  %v6549_v10 = vld [vmem:[%s11304_s3 + $0x28] sm:$0xff]  ;;  %vm2554_vm1 = vcmask 130112   ;;  %vm2558_vm2 = vcmask 195712  }
  0x2a   : > { %755 = vmatpush.bf16.msra.mxu1 %v6551_v7  ;;  %6587 = vmatpush.bf16.msra.mxu2 %v6551_v7  ;;  %v6548_v11 = vld [vmem:[%s11304_s3 + $0x20] sm:$0xff]  ;;  %v6547_v12 = vld [vmem:[%s11304_s3 + $0x18] sm:$0xff]  ;;  %v6546_v14 = vld [vmem:[%s11304_s3 + $0x10] sm:$0xff]  ;;  %vm2562_vm3 = vcmask 261312   ;;  %vm2566_vm4 = vcmask 326912   ;;  %vm2570_vm5 = vcmask 392512  }
  0x2b   : > { %s11701_s1 = smov (!%p362_p13, %s6268_s1), 63  ;;  %v6545_v16 = vld [vmem:[%s11304_s3 + $0x8] sm:$0xff]  ;;  %v6544_v17 = vld [vmem:[%s11304_s3] sm:$0xff]  ;;  %v7597_v22 = vld [vmem:[#allocation5] ss:$0 sm:$0xff]  ;;  %vm2574_vm6 = vcmask 458112  }
  0x2c   : > { %s6269_s2 = sshll.u32 %s11701_s1, 2  ;;  %v6580_v31 = vld [vmem:[%s11306_s5 + $0xe4] sm:$0xf]  ;;  %v6506_v32 = vld [vmem:[%s11306_s5 + $0xf0] sm:$0xf0]  ;;  %vm2578_vm7 = vcmask 523712  }
  0x2d   : > { %s7550_s25 = scalar_lea.vmem %s11301_s0, %s6269_s2  ;;  %557 = vmatpush.bf16.msra.mxu0 %v6542_v1  ;;  %6586 = vmatpush.bf16.msra.mxu3 %v6542_v1  ;;  %v6509_v34 = vor.u32 %v6580_v31, %v6506_v32  ;;  %v6576_v41 = vld [vmem:[%s11306_s5 + $0xc4] sm:$0xf]  ;;  %v6490_v42 = vld [vmem:[%s11306_s5 + $0xd0] sm:$0xf0]  ;;  %v6579_v31 = vld [vmem:[%s11306_s5 + $0xd4] sm:$0xf0] }
  0x2e   : > { %v6526_v2 = vld [vmem:[%s7550_s25] sm:$0xff]  ;;  %v6527_v3 = vld [vmem:[%s7550_s25 + $0x8] sm:$0xff]  ;;  %v6528_v4 = vld [vmem:[%s7550_s25 + $0x10] sm:$0xff]  ;;  %756 = vmatpush.bf16.msra.mxu1 %v6550_v9  ;;  %6588 = vmatpush.bf16.msra.mxu2 %v6550_v9  ;;  %v6493_v44 = vor.u32 %v6576_v41, %v6490_v42  ;;  %vm2582_vm8 = vcmask 589312   ;;  %vm2586_vm9 = vcmask 654912   ;;  %vm11353_vm10 = vcmask 720512  }
  0x2f   : > { %v6529_v5 = vld [vmem:[%s7550_s25 + $0x18] sm:$0xff]  ;;  %v6530_v6 = vld [vmem:[%s7550_s25 + $0x20] sm:$0xff]  ;;  %v6531_v8 = vld [vmem:[%s7550_s25 + $0x28] sm:$0xff]  ;;  %vm11354_vm11 = vcmask 786112   ;;  %vm11352_vm12 = vcmask 851712   ;;  %vm11351_vm13 = vcmask 917312  }
  0x30   : > { %6342 = vmatmul.msk.bf16.vlgmr.msra.gmra.mxu0 %vm501_vm0, %v6526_v2  ;;  %v6532_v13 = vld [vmem:[%s7550_s25 + $0x30] sm:$0xff]  ;;  %v6535_v15 = vld [vmem:[%s7550_s25 + $0x48] sm:$0xff]  ;;  %v6533_v18 = vld [vmem:[%s7550_s25 + $0x38] sm:$0xff]  ;;  %vm2606_vm14 = vcmask 982912   ;;  %vm11350_vm15 = vcmask 1048512   ;;  %s358_s24 = sand.u32 1, %s7389_s28  }
  0x31   : > { %6351 = vmatmul.msk.bf16.vlgmr.msra.gmra.mxu3 %vm501_vm0, %v6535_v15  ;;  %v6536_v19 = vld [vmem:[%s7550_s25 + $0x50] sm:$0xff]  ;;  %v6534_v20 = vld [vmem:[%s7550_s25 + $0x40] sm:$0xff]  ;;  %v6537_v23 = vld [vmem:[%s7550_s25 + $0x58] sm:$0xff]  ;;  %s6267_s10 = sshll.u32 %s358_s24, 3  ;;  %s6584_s22 = sshll.u32 %s7472_s9, 3 }
  0x32   : > { %757 = vmatpush.bf16.msra.mxu1 %v6549_v10  ;;  %6589 = vmatpush.bf16.msra.mxu2 %v6549_v10  ;;  %v6538_v33 = vld [vmem:[%s7550_s25 + $0x60] sm:$0xff]  ;;  %v6539_v45 = vld [vmem:[%s7550_s25 + $0x68] sm:$0xff]  ;;  %v6474_v52 = vld [vmem:[%s11306_s5 + $0xb0] sm:$0xf0]  ;;  %s10885_s20 = scalar_lea.vmem [#allocation10], %s6267_s10  ;;  %s6150_s14 = scalar_lea.hbm %s11309_s8, %s6584_s22 }
  0x33   : > { %1183 = vmatpush.bf16.msrb.mxu3 %v6509_v34  ;;  %v6572_v51 = vld [vmem:[%s11306_s5 + $0xa4] sm:$0xf]  ;;  %v6540_v56 = vld [vmem:[%s7550_s25 + $0x70] sm:$0xff]  ;;  %v6577_v32 = vld [vmem:[%s11306_s5 + $0xcc] sm:$0xf]  ;;  %s6152_s9 = sshll.u32 %s10885_s20, 4  ;;  %s6153_s9 = int_to_ptr.vmem [resolvable:$true] %s6152_s9 }
  0x34   : > { %v6477_v53 = vor.u32 %v6572_v51, %v6474_v52  ;;  %v6568_v62 = vld [vmem:[%s11306_s5 + $0x84] sm:$0xf]  ;;  %v6458_v63 = vld [vmem:[%s11306_s5 + $0x90] sm:$0xf0]  ;;  %v6498_v34 = vld [vmem:[%s11306_s5 + $0xd8] sm:$0xf0] }
  0x35   : > { %v6461_v0 = vor.u32 %v6568_v62, %v6458_v63  ;;  %v6564_v9 = vld [vmem:[%s11306_s5 + $0x64] sm:$0xf]  ;;  %v6442_v10 = vld [vmem:[%s11306_s5 + $0x70] sm:$0xf0]  ;;  %v6482_v41 = vld [vmem:[%s11306_s5 + $0xb8] sm:$0xf0] }
  0x36   : > { %758 = vmatpush.bf16.msra.mxu1 %v6548_v11  ;;  %6590 = vmatpush.bf16.msra.mxu2 %v6548_v11  ;;  %v6445_v11 = vor.u32 %v6564_v9, %v6442_v10  ;;  %v6426_v15 = vld [vmem:[%s11306_s5 + $0x50] sm:$0xf0]  ;;  %s6154_s17 = sshll.u32 %s6150_s14, 4  ;;  %s6139_s26 = scalar_lea.sflag [#allocation4], %s358_s24  ;;  %s6155_s17 = int_to_ptr.hbm [resolvable:$true] %s6154_s17 }
  0x37   : > { %1184 = vmatpush.bf16.msrb.mxu3 %v6493_v44  ;;  %v6410_v44 = vld [vmem:[%s11306_s5 + $0x30] sm:$0xf0]  ;;  %s7337_s12 = sshra.s32 %s6155_s17, 4  ;;  %s7343_s21 = scalar_lea.hbm %s11309_s8, 16  ;;  %s7338_s12 = int_to_ptr.hbm [resolvable:$true] %s7337_s12 }
  0x38   : > { %s7339_s13 = scalar_lea.hbm %s7338_s12, 8  ;;  %p7344_p3 = scmp.lt.s32.totalorder %s7338_s12, %s11309_s8 }
  0x39   : > { %p7340_p0 = scmp.ne.s32.totalorder %s7338_s12, %s7339_s13  ;;  %p7345_p4 = scmp.lt.s32.totalorder %s7343_s21, %s7339_s13 }
  0x3a   : > { %759 = vmatpush.bf16.msra.mxu1 %v6547_v12  ;;  %6591 = vmatpush.bf16.msra.mxu2 %v6547_v12 }
  0x3b   : > { %1185 = vmatpush.bf16.msrb.mxu3 %v6477_v53  ;;  %p7341_p1 = pnand %p7340_p0, %p7489_p5  ;;  %p7346_p7 = por %p7345_p4, %p7344_p3 }
  0x3d   : > { %p7342_p2 = pneg %p7341_p1 }
  0x3e   : > { %760 = vmatpush.bf16.msra.mxu1 %v6546_v14  ;;  %6592 = vmatpush.bf16.msra.mxu2 %v6546_v14  ;;  %v6560_v14 = vld [vmem:[%s11306_s5 + $0x44] sm:$0xf] }
  0x3f   : > { %1186 = vmatpush.bf16.msrb.mxu3 %v6461_v0  ;;  %v6432_v0 = vld [vmem:[%s11306_s5 + $0x48] sm:$0xf]  ;;  %p7347_p8 = pnand %p7346_p7, %p7342_p2 }
  0x40   : > { %6343 = vmatmul.msk.bf16.gmra.mxu0 %vm501_vm0, %v6527_v3  ;;  %v6541_v3 = vld [vmem:[%s7550_s25 + $0x78] sm:$0xff] }
  0x41   : > { %6352 = vmatmul.msk.bf16.gmra.mxu3 %vm501_vm0, %v6536_v19 }
  0x42   : > { %761 = vmatpush.bf16.msra.mxu1 %v6545_v16  ;;  %6593 = vmatpush.bf16.msra.mxu2 %v6545_v16  ;;  %v6429_v16 = vor.u32 %v6560_v14, %v6426_v15  ;;  %v6416_v14 = vld [vmem:[%s11306_s5 + $0x28] sm:$0xf]  ;;  %v6559_v15 = vld [vmem:[%s11306_s5 + $0x34] sm:$0xf0] }
  0x43   : > { %1187 = vmatpush.bf16.msrb.mxu3 %v6445_v11 }
  0x46   : > { %762 = vmatpush.bf16.msra.mxu1 %v6544_v17  ;;  %6594 = vmatpush.bf16.msra.mxu2 %v6544_v17 }
  0x47   : > { %1188 = vmatpush.bf16.msrb.mxu3 %v6429_v16  ;;  %v6557_v16 = vld [vmem:[%s11306_s5 + $0x2c] sm:$0xf] }
  0x50   : > { %6344 = vmatmul.msk.bf16.gmra.mxu0 %vm501_vm0, %v6528_v4 }
  0x51   : > { %6353 = vmatmul.msk.bf16.gmra.mxu3 %vm501_vm0, %v6537_v23  ;;  %v6581_v23 = vld [vmem:[%s11306_s5 + $0xec] sm:$0xf] }
  0x60   : > { %6345 = vmatmul.msk.bf16.gmra.mxu0 %vm501_vm0, %v6529_v5 }
  0x61   : > { %6354 = vmatmul.msk.bf16.gmra.mxu3 %vm501_vm0, %v6538_v33 }
  0x70   : > { %6346 = vmatmul.msk.bf16.gmra.mxu0 %vm501_vm0, %v6530_v6 }
  0x71   : > { %6355 = vmatmul.msk.bf16.gmra.mxu3 %vm501_vm0, %v6539_v45 }
  0x80   : > { %6347 = vmatmul.msk.bf16.gmra.mxu0 %vm501_vm0, %v6531_v8 }
  0x81   : > { %6356 = vmatmul.msk.bf16.gmra.mxu3 %vm501_vm0, %v6540_v56  ;;  %v6567_v56 = vld [vmem:[%s11306_s5 + $0x74] sm:$0xf0] }
  0x90   : > { %6348 = vmatmul.msk.bf16.gmra.mxu0 %vm501_vm0, %v6532_v13 }
  0x91   : > { %6357 = vmatmul.msk.bf16.gmra.mxu3 %vm501_vm0, %v6541_v3  ;;  %v6561_v3 = vld [vmem:[%s11306_s5 + $0x4c] sm:$0xf] }
  0xa0   : > { %6349 = vmatmul.msk.bf16.gmra.mxu0 %vm501_vm0, %v6533_v18 }
  0xad   : > { %v559_v21 = vpop.f32.mrf.mxu0 }
  0xae   : > { %v560_v24 = vadd.f32 %v7597_v22, %v559_v21  ;;  %v6583_v21 = vld [vmem:[%s11306_s5 + $0xf4] sm:$0xf0] }
  0xb0   : > { %6350 = vmatmul.msk.bf16.gmra.mxu0 %vm501_vm0, %v6534_v20  ;;  %v639_v27 = vmax.f32 %v560_v24, 0.0  ;;  %v6512_v20 = vld [vmem:[%s11306_s5 + $0xe8] sm:$0xf]  ;;  %vm2644_vm0 = vcmask 1040384  }
  0xb1   : > { %v6513_v24 = vor.u32 %v6583_v21, %v6512_v20  ;;  %v6400_v20 = vld [vmem:[%s11306_s5 + $0x8] sm:$0xf]  ;;  %v6555_v21 = vld [vmem:[%s11306_s5 + $0x14] sm:$0xf0] }
  0xb3   : > { %1272 = vmatpush.bf16.msrb.mxu0 %v6513_v24  ;;  %v6401_v24 = vor.u32 %v6555_v21, %v6400_v20 }
  0xb4   : > { %v604_v10 = vpop.f32.mrf.mxu3 }
  0xb5   : > { %v561_v25 = vpop.f32.mrf.mxu0 }
  0xb6   : > { %v562_v26 = vadd.f32 %v7597_v22, %v561_v25  ;;  %v6514_v25 = vld [vmem:[%s11306_s5 + $0xf8] sm:$0xf0] }
  0xb8   : > { %v640_v28 = vmax.f32 %v562_v26, 0.0 }
  0xba   : > { %v671_v29 = vpack.c.bf16 %v640_v28, %v639_v27  ;;  %v6517_v28 = vor.u32 %v6581_v23, %v6514_v25  ;;  %v6553_v23 = vld [vmem:[%s11306_s5 + $0xc] sm:$0xf]  ;;  %v6402_v25 = vld [vmem:[%s11306_s5 + $0x18] sm:$0xf0] }
  0xbc   : > { %763 = vmatmul.bf16.vlgmr.msra.gmra.mxu1 %v671_v29 }
  0xbd   : > { %v564_v30 = vpop.f32.mrf.mxu0  ;;  %1361 = vmatpush.bf16.msrb.mxu1 %v6517_v28 }
  0xbe   : > { %v565_v35 = vadd.f32 %v7597_v22, %v564_v30  ;;  %v6496_v30 = vld [vmem:[%s11306_s5 + $0xc8] sm:$0xf] }
  0xbf   : > { %v6497_v33 = vor.u32 %v6579_v31, %v6496_v30  ;;  %v606_v30 = vpop.f32.mrf.mxu3 }
  0xc0   : > { %v641_v38 = vmax.f32 %v565_v35, 0.0  ;;  %v6501_v35 = vor.u32 %v6577_v32, %v6498_v34  ;;  %v6488_v34 = vld [vmem:[%s11306_s5 + $0xc0] sm:$0xf] }
  0xc1   : > { %1273 = vmatpush.bf16.msrb.mxu0 %v6497_v33 }
  0xc2   : > { %1362 = vmatpush.bf16.msrb.mxu1 %v6501_v35  ;;  %v6578_v35 = vld [vmem:[%s11306_s5 + $0xcc] sm:$0xf0] }
  0xc5   : > { %v566_v36 = vpop.f32.mrf.mxu0 }
  0xc6   : > { %v567_v37 = vadd.f32 %v7597_v22, %v566_v36 }
  0xc8   : > { %v642_v39 = vmax.f32 %v567_v37, 0.0  ;;  %v6480_v37 = vld [vmem:[%s11306_s5 + $0xa8] sm:$0xf] }
  0xca   : > { %v672_v40 = vpack.c.bf16 %v642_v39, %v641_v38  ;;  %v6575_v38 = vld [vmem:[%s11306_s5 + $0xb4] sm:$0xf0]  ;;  %v6573_v39 = vld [vmem:[%s11306_s5 + $0xac] sm:$0xf] }
  0xcb   : > { %v6485_v42 = vor.u32 %v6573_v39, %v6482_v41 }
  0xcc   : > { %768 = vmatmul.bf16.gmra.mxu1 %v672_v40  ;;  %v6481_v40 = vor.u32 %v6575_v38, %v6480_v37  ;;  %v6489_v37 = vor.u32 %v6578_v35, %v6488_v34  ;;  %v609_v38 = vpop.f32.mrf.mxu3  ;;  %v6424_v34 = vld [vmem:[%s11306_s5 + $0x40] sm:$0xf]  ;;  %v6562_v35 = vld [vmem:[%s11306_s5 + $0x4c] sm:$0xf0] }
  0xcd   : > { %v569_v43 = vpop.f32.mrf.mxu0  ;;  %1363 = vmatpush.bf16.msrb.mxu1 %v6485_v42 }
  0xce   : > { %v570_v46 = vadd.f32 %v7597_v22, %v569_v43  ;;  %v6556_v43 = vld [vmem:[%s11306_s5 + $0x24] sm:$0xf]  ;;  %1274 = vmatpush.bf16.msrb.mxu0 %v6481_v40 }
  0xcf   : > { %v6413_v45 = vor.u32 %v6556_v43, %v6410_v44 }
  0xd0   : > { %v643_v49 = vmax.f32 %v570_v46, 0.0  ;;  %v6464_v46 = vld [vmem:[%s11306_s5 + $0x88] sm:$0xf] }
  0xd1   : > { %1189 = vmatpush.bf16.msrb.mxu3 %v6413_v45 }
  0xd5   : > { %v571_v47 = vpop.f32.mrf.mxu0 }
  0xd6   : > { %v572_v48 = vadd.f32 %v7597_v22, %v571_v47  ;;  %v6571_v47 = vld [vmem:[%s11306_s5 + $0x94] sm:$0xf0] }
  0xd8   : > { %v644_v50 = vmax.f32 %v572_v48, 0.0  ;;  %v6569_v48 = vld [vmem:[%s11306_s5 + $0x8c] sm:$0xf] }
  0xda   : > { %v673_v54 = vpack.c.bf16 %v644_v50, %v643_v49  ;;  %v6465_v49 = vor.u32 %v6571_v47, %v6464_v46  ;;  %v6466_v50 = vld [vmem:[%s11306_s5 + $0x98] sm:$0xf0]  ;;  %v611_v46 = vpop.f32.mrf.mxu3  ;;  %v7784_v47 = vld [vmem:[#allocation7] ss:$0 sm:$0xff] }
  0xdb   : > { %v6469_v52 = vor.u32 %v6569_v48, %v6466_v50  ;;  %v6472_v48 = vld [vmem:[%s11306_s5 + $0xa0] sm:$0xf] }
  0xdc   : > { %773 = vmatmul.bf16.gmra.mxu1 %v673_v54  ;;  %1275 = vmatpush.bf16.msrb.mxu0 %v6465_v49  ;;  %v6574_v49 = vld [vmem:[%s11306_s5 + $0xac] sm:$0xf0] }
  0xdd   : > { %v574_v55 = vpop.f32.mrf.mxu0  ;;  %1364 = vmatpush.bf16.msrb.mxu1 %v6469_v52  ;;  %v6473_v50 = vor.u32 %v6574_v49, %v6472_v48 }
  0xde   : > { %v575_v57 = vadd.f32 %v7597_v22, %v574_v55  ;;  %v6448_v55 = vld [vmem:[%s11306_s5 + $0x68] sm:$0xf] }
  0xe0   : > { %v645_v60 = vmax.f32 %v575_v57, 0.0  ;;  %v6565_v57 = vld [vmem:[%s11306_s5 + $0x6c] sm:$0xf] }
  0xe5   : > { %v576_v58 = vpop.f32.mrf.mxu0 }
  0xe6   : > { %v577_v59 = vadd.f32 %v7597_v22, %v576_v58  ;;  %v6449_v58 = vor.u32 %v6567_v56, %v6448_v55 }
  0xe8   : > { %v646_v61 = vmax.f32 %v577_v59, 0.0  ;;  %v6450_v59 = vld [vmem:[%s11306_s5 + $0x78] sm:$0xf0]  ;;  %1276 = vmatpush.bf16.msrb.mxu0 %v6449_v58  ;;  %v614_v58 = vpop.f32.mrf.mxu3 }
  0xe9   : > { %v6453_v62 = vor.u32 %v6565_v57, %v6450_v59 }
  0xea   : > { %v674_v1 = vpack.c.bf16 %v646_v61, %v645_v60 }
  0xeb   : > { %1365 = vmatpush.bf16.msrb.mxu1 %v6453_v62 }
  0xec   : > { %778 = vmatmul.bf16.gmra.mxu1 %v674_v1  ;;  %v6563_v1 = vld [vmem:[%s11306_s5 + $0x54] sm:$0xf0] }
  0xed   : > { %v579_v2 = vpop.f32.mrf.mxu0 }
  0xee   : > { %v580_v4 = vadd.f32 %v7597_v22, %v579_v2  ;;  %v6433_v2 = vor.u32 %v6563_v1, %v6432_v0  ;;  %v6456_v0 = vld [vmem:[%s11306_s5 + $0x80] sm:$0xf]  ;;  %v6570_v1 = vld [vmem:[%s11306_s5 + $0x8c] sm:$0xf0] }
  0xf0   : > { %v647_v7 = vmax.f32 %v580_v4, 0.0  ;;  %v6434_v4 = vld [vmem:[%s11306_s5 + $0x58] sm:$0xf0]  ;;  %1277 = vmatpush.bf16.msrb.mxu0 %v6433_v2  ;;  %v6457_v2 = vor.u32 %v6570_v1, %v6456_v0 }
  0xf5   : > { %v581_v5 = vpop.f32.mrf.mxu0 }
  0xf6   : > { %v582_v6 = vadd.f32 %v7597_v22, %v581_v5  ;;  %v6504_v5 = vld [vmem:[%s11306_s5 + $0xe0] sm:$0xf] }
  0xf8   : > { %v648_v8 = vmax.f32 %v582_v6, 0.0  ;;  %v6582_v6 = vld [vmem:[%s11306_s5 + $0xec] sm:$0xf0] }
  0xf9   : > { %v6505_v11 = vor.u32 %v6582_v6, %v6504_v5  ;;  %v610_v6 = vadd.f32 %v7597_v22, %v609_v38 }
  0xfa   : > { %v675_v12 = vpack.c.bf16 %v648_v8, %v647_v7  ;;  %v6437_v7 = vor.u32 %v6561_v3, %v6434_v4  ;;  %v6552_v8 = vld [vmem:[%s11306_s5 + $0x4] sm:$0xf]  ;;  %v616_v3 = vpop.f32.mrf.mxu3 }
  0xfb   : > { %1094 = vmatpush.bf16.msrb.mxu2 %v6505_v11  ;;  %v659_v11 = vmax.f32 %v610_v6, 0.0  ;;  %v6392_v6 = vld [vmem:[%s11306_s5] sm:$0xf] }
  0xfc   : > { %783 = vmatmul.bf16.gmra.mxu1 %v675_v12  ;;  %v6394_v12 = vld [vmem:[%s11306_s5 + $0x10] sm:$0xf0] }
  0xfd   : > { %v584_v13 = vpop.f32.mrf.mxu0  ;;  %1366 = vmatpush.bf16.msrb.mxu1 %v6437_v7  ;;  %v612_v7 = vadd.f32 %v7597_v22, %v611_v46 }
  0xfe   : > { %v585_v17 = vadd.f32 %v7597_v22, %v584_v13  ;;  %v6397_v13 = vor.u32 %v6552_v8, %v6394_v12 }
  0xff   : > { %1095 = vmatpush.bf16.msrb.mxu2 %v6489_v37  ;;  %v660_v12 = vmax.f32 %v612_v7, 0.0  ;;  %v6425_v37 = vor.u32 %v6562_v35, %v6424_v34  ;;  %v6554_v7 = vld [vmem:[%s11306_s5 + $0xc] sm:$0xf0] }
 0x100   : > { %v649_v26 = vmax.f32 %v585_v17, 0.0  ;;  %v6417_v17 = vor.u32 %v6559_v15, %v6416_v14  ;;  %1190 = vmatpush.bf16.msrb.mxu3 %v6397_v13 }
 0x102   : > { %1278 = vmatpush.bf16.msrb.mxu0 %v6417_v17  ;;  %v619_v15 = vpop.f32.mrf.mxu3  ;;  %v6440_v17 = vld [vmem:[%s11306_s5 + $0x60] sm:$0xf] }
 0x103   : > { %1096 = vmatpush.bf16.msrb.mxu2 %v6473_v50 }
 0x105   : > { %v586_v18 = vpop.f32.mrf.mxu0 }
 0x106   : > { %v587_v19 = vadd.f32 %v7597_v22, %v586_v18  ;;  %v6418_v18 = vld [vmem:[%s11306_s5 + $0x38] sm:$0xf0]  ;;  %1279 = vmatpush.bf16.msrb.mxu0 %v6401_v24  ;;  %v617_v24 = vadd.f32 %v7597_v22, %v616_v3 }
 0x107   : > { %1097 = vmatpush.bf16.msrb.mxu2 %v6457_v2 }
 0x108   : > { %v650_v27 = vmax.f32 %v587_v19, 0.0  ;;  %v6421_v19 = vor.u32 %v6557_v16, %v6418_v18  ;;  %v681_v16 = vpack.c.bf16 %v660_v12, %v659_v11  ;;  %v6566_v18 = vld [vmem:[%s11306_s5 + $0x6c] sm:$0xf0] }
 0x10a   : > { %v676_v29 = vpack.c.bf16 %v650_v27, %v649_v26  ;;  %1367 = vmatpush.bf16.msrb.mxu1 %v6421_v19  ;;  %v6405_v27 = vor.u32 %v6553_v23, %v6402_v25  ;;  %v6441_v19 = vor.u32 %v6566_v18, %v6440_v17  ;;  %v615_v23 = vadd.f32 %v7597_v22, %v614_v58 }
 0x10c   : > { %788 = vmatmul.bf16.gmra.mxu1 %v676_v29  ;;  %1098 = vmatpush.bf16.msrb.mxu2 %v6441_v19 }
 0x10d   : > { %v589_v36 = vpop.f32.mrf.mxu0 }
 0x10e   : > { %v590_v51 = vadd.f32 %v7597_v22, %v589_v36  ;;  %1368 = vmatpush.bf16.msrb.mxu1 %v6405_v27 }
 0x110   : > { %v651_v60 = vmax.f32 %v590_v51, 0.0  ;;  %1099 = vmatpush.bf16.msrb.mxu2 %v6425_v37 }
 0x115   : > { %v591_v53 = vpop.f32.mrf.mxu0 }
 0x116   : > { %v592_v54 = vadd.f32 %v7597_v22, %v591_v53  ;;  %v605_v53 = vadd.f32 %v7597_v22, %v604_v10 }
 0x118   : > { %v652_v61 = vmax.f32 %v592_v54, 0.0  ;;  %v607_v54 = vadd.f32 %v7597_v22, %v606_v30  ;;  %v657_v59 = vmax.f32 %v605_v53, 0.0  ;;  %v662_v30 = vmax.f32 %v617_v24, 0.0  ;;  %v6558_v53 = vld [vmem:[%s11306_s5 + $0x2c] sm:$0xf0] }
 0x11a   : > { %v677_v63 = vpack.c.bf16 %v652_v61, %v651_v60  ;;  %v658_v60 = vmax.f32 %v607_v54, 0.0 }
 0x11c   : > { %793 = vmatmul.bf16.gmra.mxu1 %v677_v63  ;;  %v680_v63 = vpack.c.bf16 %v658_v60, %v657_v59 }
 0x11d   : > { %v594_v9 = vpop.f32.mrf.mxu0 }
 0x11e   : > { %v595_v26 = vadd.f32 %v7597_v22, %v594_v9 }
 0x120   : > { %v653_v31 = vmax.f32 %v595_v26, 0.0  ;;  %v621_v26 = vpop.f32.mrf.mxu3 }
 0x125   : > { %v596_v28 = vpop.f32.mrf.mxu0 }
 0x126   : > { %v597_v29 = vadd.f32 %v7597_v22, %v596_v28 }
 0x128   : > { %v654_v32 = vmax.f32 %v597_v29, 0.0  ;;  %v661_v29 = vmax.f32 %v615_v23, 0.0 }
 0x12a   : > { %v678_v33 = vpack.c.bf16 %v654_v32, %v653_v31 }
 0x12c   : > { %798 = vmatmul.bf16.gmra.mxu1 %v678_v33  ;;  %v682_v33 = vpack.c.bf16 %v662_v30, %v661_v29 }
 0x12d   : > { %v599_v36 = vpop.f32.mrf.mxu0 }
 0x12e   : > { %v600_v39 = vadd.f32 %v7597_v22, %v599_v36  ;;  %v624_v36 = vpop.f32.mrf.mxu3 }
 0x12f   : > { %v625_v58 = vadd.f32 %v7597_v22, %v624_v36 }
 0x130   : > { %v655_v42 = vmax.f32 %v600_v39, 0.0 }
 0x131   : > { %v665_v0 = vmax.f32 %v625_v58, 0.0 }
 0x135   : > { %v601_v40 = vpop.f32.mrf.mxu0 }
 0x136   : > { %v602_v41 = vadd.f32 %v7597_v22, %v601_v40  ;;  %v620_v40 = vadd.f32 %v7597_v22, %v619_v15  ;;  %v626_v49 = vpop.f32.mrf.mxu3 }
 0x137   : > { %v627_v59 = vadd.f32 %v7597_v22, %v626_v49 }
 0x138   : > { %v656_v43 = vmax.f32 %v602_v41, 0.0  ;;  %v622_v41 = vadd.f32 %v7597_v22, %v621_v26 }
 0x139   : > { %v764_v44 = vpop.f32.mrf.mxu1  ;;  %v666_v1 = vmax.f32 %v627_v59, 0.0 }
 0x13a   : > { %v679_v45 = vpack.c.bf16 %v656_v43, %v655_v42  ;;  %v765_v51 = vadd.f32 %v7784_v47, %v764_v44  ;;  %v664_v46 = vmax.f32 %v622_v41, 0.0 }
 0x13c   : > { %803 = vmatmul.bf16.vlgmr.msra.gmra.mxu2 %v679_v45  ;;  %v844_v56 = vmax.f32 %v765_v51, 0.0  ;;  %v663_v45 = vmax.f32 %v620_v40, 0.0 }
 0x13e   : > { %v683_v51 = vpack.c.bf16 %v664_v46, %v663_v45  ;;  %v7897_v45 = vld [vmem:[%s11307_s6] sm:$0xf] }
 0x141   : > { %v766_v52 = vpop.f32.mrf.mxu1 }
 0x142   : > { %v767_v55 = vadd.f32 %v7784_v47, %v766_v52  ;;  %v6408_v52 = vld [vmem:[%s11306_s5 + $0x20] sm:$0xf] }
 0x143   : > { %v6409_v54 = vor.u32 %v6558_v53, %v6408_v52 }
 0x144   : > { %v845_v57 = vmax.f32 %v767_v55, 0.0 }
 0x145   : > { %1100 = vmatpush.bf16.msrb.mxu2 %v6409_v54 }
 0x146   : > { %v7796_v61 = vpack.c.bf16 %v845_v57, %v844_v56  ;;  %v629_v57 = vpop.f32.mrf.mxu3 }
 0x147   : > { %v630_v11 = vadd.f32 %v7597_v22, %v629_v57 }
 0x148   : > { %1191 = vmatmul.bf16.vlgmr.msrb.gmra.mxu3 %v7796_v61  ;;  %1280 = vmatmul.bf16.vlgmr.msrb.gmra.mxu0 %v7796_v61 }
 0x149   : > { %1369 = vmatmul.bf16.vlgmr.msrb.gmra.mxu1 %v7796_v61  ;;  %v769_v62 = vpop.f32.mrf.mxu1  ;;  %v667_v18 = vmax.f32 %v630_v11, 0.0 }
 0x14a   : > { %v770_v4 = vadd.f32 %v7784_v47, %v769_v62 }
 0x14c   : > { %808 = vmatmul.bf16.gmra.mxu2 %v680_v63  ;;  %v846_v9 = vmax.f32 %v770_v4, 0.0  ;;  %v684_v4 = vpack.c.bf16 %v666_v1, %v665_v0 }
 0x151   : > { %v771_v5 = vpop.f32.mrf.mxu1 }
 0x152   : > { %v772_v8 = vadd.f32 %v7784_v47, %v771_v5  ;;  %v631_v5 = vpop.f32.mrf.mxu3 }
 0x153   : > { %v632_v12 = vadd.f32 %v7597_v22, %v631_v5 }
 0x154   : > { %v847_v10 = vmax.f32 %v772_v8, 0.0  ;;  %v6393_v8 = vor.u32 %v6554_v7, %v6392_v6 }
 0x155   : > { %v668_v19 = vmax.f32 %v632_v12, 0.0 }
 0x156   : > { %v7811_v13 = vpack.c.bf16 %v847_v10, %v846_v9  ;;  %1101 = vmatpush.bf16.msrb.mxu2 %v6393_v8 }
 0x157   : > { %v685_v23 = vpack.c.bf16 %v668_v19, %v667_v18 }
 0x158   : > { %1196 = vmatmul.bf16.gmra.mxu3 %v7811_v13  ;;  %1285 = vmatmul.bf16.gmra.mxu0 %v7811_v13 }
 0x159   : > { %1374 = vmatmul.bf16.gmra.mxu1 %v7811_v13  ;;  %v774_v14 = vpop.f32.mrf.mxu1 }
 0x15a   : > { %v775_v20 = vadd.f32 %v7784_v47, %v774_v14  ;;  %v634_v17 = vpop.f32.mrf.mxu3 }
 0x15c   : > { %813 = vmatmul.bf16.gmra.mxu2 %v681_v16  ;;  %v848_v27 = vmax.f32 %v775_v20, 0.0 }
 0x161   : > { %v776_v21 = vpop.f32.mrf.mxu1 }
 0x162   : > { %v777_v25 = vadd.f32 %v7784_v47, %v776_v21  ;;  %v636_v24 = vpop.f32.mrf.mxu3 }
 0x164   : > { %v849_v28 = vmax.f32 %v777_v25, 0.0 }
 0x166   : > { %v7826_v31 = vpack.c.bf16 %v849_v28, %v848_v27  ;;  %v635_v27 = vadd.f32 %v7597_v22, %v634_v17  ;;  %v637_v28 = vadd.f32 %v7597_v22, %v636_v24 }
 0x168   : > { %1201 = vmatmul.bf16.gmra.mxu3 %v7826_v31  ;;  %1290 = vmatmul.bf16.gmra.mxu0 %v7826_v31  ;;  %v670_v34 = vmax.f32 %v637_v28, 0.0 }
 0x169   : > { %1379 = vmatmul.bf16.gmra.mxu1 %v7826_v31  ;;  %v779_v32 = vpop.f32.mrf.mxu1 }
 0x16a   : > { %v780_v38 = vadd.f32 %v7784_v47, %v779_v32 }
 0x16c   : > { %818 = vmatmul.bf16.gmra.mxu2 %v682_v33  ;;  %v850_v43 = vmax.f32 %v780_v38, 0.0  ;;  %v669_v33 = vmax.f32 %v635_v27, 0.0 }
 0x16e   : > { %v686_v37 = vpack.c.bf16 %v670_v34, %v669_v33 }
 0x171   : > { %v781_v39 = vpop.f32.mrf.mxu1 }
 0x172   : > { %v782_v42 = vadd.f32 %v7784_v47, %v781_v39 }
 0x174   : > { %v851_v44 = vmax.f32 %v782_v42, 0.0 }
 0x176   : > { %v7841_v48 = vpack.c.bf16 %v851_v44, %v850_v43 }
 0x178   : > { %1206 = vmatmul.bf16.gmra.mxu3 %v7841_v48  ;;  %1295 = vmatmul.bf16.gmra.mxu0 %v7841_v48 }
 0x179   : > { %1384 = vmatmul.bf16.gmra.mxu1 %v7841_v48  ;;  %v784_v50 = vpop.f32.mrf.mxu1 }
 0x17a   : > { %v785_v55 = vadd.f32 %v7784_v47, %v784_v50  ;;  %v7901_v50 = vperm.slane %v7897_v45, 1 }
 0x17c   : > { %823 = vmatmul.bf16.gmra.mxu2 %v683_v51  ;;  %v852_v62 = vmax.f32 %v785_v55, 0.0 }
 0x181   : > { %v786_v56 = vpop.f32.mrf.mxu1 }
 0x182   : > { %v787_v60 = vadd.f32 %v7784_v47, %v786_v56 }
 0x184   : > { %v853_v63 = vmax.f32 %v787_v60, 0.0 }
 0x186   : > { %v7856_v2 = vpack.c.bf16 %v853_v63, %v852_v62 }
 0x188   : > { %1211 = vmatmul.bf16.gmra.mxu3 %v7856_v2  ;;  %1300 = vmatmul.bf16.gmra.mxu0 %v7856_v2 }
 0x189   : > { %1389 = vmatmul.bf16.gmra.mxu1 %v7856_v2  ;;  %v789_v3 = vpop.f32.mrf.mxu1 }
 0x18a   : > { %v790_v9 = vadd.f32 %v7784_v47, %v789_v3 }
 0x18c   : > { %828 = vmatmul.bf16.gmra.mxu2 %v684_v4  ;;  %v854_v15 = vmax.f32 %v790_v9, 0.0 }
 0x191   : > { %v791_v10 = vpop.f32.mrf.mxu1 }
 0x192   : > { %v792_v14 = vadd.f32 %v7784_v47, %v791_v10 }
 0x194   : > { %v855_v16 = vmax.f32 %v792_v14, 0.0 }
 0x196   : > { %v7871_v20 = vpack.c.bf16 %v855_v16, %v854_v15 }
 0x198   : > { %1216 = vmatmul.bf16.gmra.mxu3 %v7871_v20  ;;  %1305 = vmatmul.bf16.gmra.mxu0 %v7871_v20 }
 0x199   : > { %1394 = vmatmul.bf16.gmra.mxu1 %v7871_v20  ;;  %v794_v21 = vpop.f32.mrf.mxu1 }
 0x19a   : > { %v795_v25 = vadd.f32 %v7784_v47, %v794_v21 }
 0x19c   : > { %833 = vmatmul.bf16.gmra.mxu2 %v685_v23  ;;  %v856_v30 = vmax.f32 %v795_v25, 0.0 }
 0x1a1   : > { %v796_v26 = vpop.f32.mrf.mxu1 }
 0x1a2   : > { %v797_v29 = vadd.f32 %v7784_v47, %v796_v26 }
 0x1a4   : > { %v857_v32 = vmax.f32 %v797_v29, 0.0 }
 0x1a6   : > { %v7880_v35 = vpack.c.bf16 %v857_v32, %v856_v30 }
 0x1a8   : > { %1221 = vmatmul.bf16.gmra.mxu3 %v7880_v35  ;;  %1310 = vmatmul.bf16.gmra.mxu0 %v7880_v35 }
 0x1a9   : > { %1399 = vmatmul.bf16.gmra.mxu1 %v7880_v35  ;;  %v799_v36 = vpop.f32.mrf.mxu1 }
 0x1aa   : > { %v800_v38 = vadd.f32 %v7784_v47, %v799_v36 }
 0x1ac   : > { %838 = vmatmul.bf16.gmra.mxu2 %v686_v37  ;;  %v858_v40 = vmax.f32 %v800_v38, 0.0 }
 0x1b1   : > { %v801_v22 = vpop.f32.mrf.mxu1 }
 0x1b2   : > { %v802_v39 = vadd.f32 %v7784_v47, %v801_v22 }
 0x1b4   : > { %v859_v41 = vmax.f32 %v802_v39, 0.0 }
 0x1b6   : > { %v7887_v42 = vpack.c.bf16 %v859_v41, %v858_v40 }
 0x1b8   : > { %1226 = vmatmul.bf16.gmra.mxu3 %v7887_v42  ;;  %1315 = vmatmul.bf16.gmra.mxu0 %v7887_v42 }
 0x1b9   : > { %1404 = vmatmul.bf16.gmra.mxu1 %v7887_v42 }
 0x1bc   : > { %1102 = vmatmul.bf16.vlgmr.msrb.gmra.mxu2 %v7796_v61 }
 0x1bf   : > { %v804_v43 = vpop.f32.mrf.mxu2 }
 0x1c0   : > { %v805_v44 = vadd.f32 %v7784_v47, %v804_v43 }
 0x1c2   : > { %v860_v51 = vmax.f32 %v805_v44, 0.0 }
 0x1c5   : > { %v7950_v19 = vpop.f32.mrf.mxu0 }
 0x1c6   : > { %11364 = vst [vmem:[#allocation16_spill] sm:$0xff] %v7950_v19  ;;  %v7953_v21 = vpop.f32.mrf.mxu1 }
 0x1c7   : > { %v806_v46 = vpop.f32.mrf.mxu2  ;;  %11365 = vst [vmem:[#allocation17_spill] sm:$0xff] %v7953_v21 }
 0x1c8   : > { %v807_v49 = vadd.f32 %v7784_v47, %v806_v46 }
 0x1ca   : > { %v861_v52 = vmax.f32 %v807_v49, 0.0 }
 0x1cb   : > { %v1192_v53 = vpop.f32.mrf.mxu3 }
 0x1cc   : > { %v7903_v54 = vpack.c.bf16 %v861_v52, %v860_v51  ;;  %v7906_v61 = vadd.f32 %v1192_v53, %v7901_v50  ;;  %1107 = vmatmul.bf16.gmra.mxu2 %v7811_v13 }
 0x1cd   : > { %v7965_v29 = vpop.f32.mrf.mxu0 }
 0x1ce   : > { %1231 = vmatmul.bf16.gmra.mxu3 %v7903_v54  ;;  %1320 = vmatmul.bf16.gmra.mxu0 %v7903_v54  ;;  %11366 = vst [vmem:[#allocation18_spill] sm:$0xff] %v7965_v29  ;;  %v7967_v30 = vpop.f32.mrf.mxu1 }
 0x1cf   : > { %1409 = vmatmul.bf16.gmra.mxu1 %v7903_v54  ;;  %2652 = vmax.xlane.f32.xlu2 %v7906_v61  ;;  %v809_v55 = vpop.f32.mrf.mxu2  ;;  %11367 = vst [vmem:[#allocation19_spill] sm:$0xff] %v7967_v30 }
 0x1d0   : > { %v810_v58 = vadd.f32 %v7784_v47, %v809_v55 }
 0x1d2   : > { %v862_v60 = vmax.f32 %v810_v58, 0.0 }
 0x1d3   : > { %v1194_v56 = vpop.f32.mrf.mxu3 }
 0x1d4   : > { %v7914_v57 = vadd.f32 %v1194_v56, %v7901_v50 }
 0x1d5   : > { %v7975_v39 = vpop.f32.mrf.mxu0 }
 0x1d6   : > { %2654 = vmax.xlane.f32.xlu1 %v7914_v57  ;;  %11368 = vst [vmem:[#allocation20_spill] sm:$0xff] %v7975_v39  ;;  %v7983_v43 = vpop.f32.mrf.mxu1 }
 0x1d7   : > { %v811_v59 = vpop.f32.mrf.mxu2  ;;  %11369 = vst [vmem:[#allocation21_spill] sm:$0xff] %v7983_v43 }
 0x1d8   : > { %v812_v13 = vadd.f32 %v7784_v47, %v811_v59 }
 0x1da   : > { %v863_v62 = vmax.f32 %v812_v13, 0.0 }
 0x1db   : > { %v1197_v63 = vpop.f32.mrf.mxu3 }
 0x1dc   : > { %v7919_v0 = vpack.c.bf16 %v863_v62, %v862_v60  ;;  %v7922_v1 = vadd.f32 %v1197_v63, %v7901_v50  ;;  %1112 = vmatmul.bf16.gmra.mxu2 %v7826_v31 }
 0x1dd   : > { %v7992_v51 = vpop.f32.mrf.mxu0 }
 0x1de   : > { %1236 = vmatmul.bf16.gmra.mxu3 %v7919_v0  ;;  %1325 = vmatmul.bf16.gmra.mxu0 %v7919_v0  ;;  %11370 = vst [vmem:[#allocation22_spill] sm:$0xff] %v7992_v51 }
 0x1df   : > { %1414 = vmatmul.bf16.gmra.mxu1 %v7919_v0  ;;  %2656 = vmax.xlane.f32.xlu0 %v7922_v1  ;;  %v814_v3 = vpop.f32.mrf.mxu2 }
 0x1e0   : > { %v815_v6 = vadd.f32 %v7784_v47, %v814_v3 }
 0x1e2   : > { %v864_v8 = vmax.f32 %v815_v6, 0.0 }
 0x1e3   : > { %v1199_v4 = vpop.f32.mrf.mxu3 }
 0x1e4   : > { %v7930_v5 = vadd.f32 %v1199_v4, %v7901_v50 }
 0x1e5   : > { %v8009_v63 = vpop.f32.mrf.mxu0 }
 0x1e6   : > { %2658 = vmax.xlane.f32.xlu2 %v7930_v5  ;;  %11372 = vst [vmem:[#allocation24_spill] sm:$0xff] %v8009_v63 }
 0x1e7   : > { %v816_v7 = vpop.f32.mrf.mxu2 }
 0x1e8   : > { %v817_v31 = vadd.f32 %v7784_v47, %v816_v7 }
 0x1ea   : > { %v865_v9 = vmax.f32 %v817_v31, 0.0 }
 0x1eb   : > { %v1202_v10 = vpop.f32.mrf.mxu3 }
 0x1ec   : > { %v7935_v11 = vpack.c.bf16 %v865_v9, %v864_v8  ;;  %v7938_v12 = vadd.f32 %v1202_v10, %v7901_v50  ;;  %1117 = vmatmul.bf16.gmra.mxu2 %v7841_v48 }
 0x1ed   : > { %v8019_v8 = vpop.f32.mrf.mxu0 }
 0x1ee   : > { %1241 = vmatmul.bf16.gmra.mxu3 %v7935_v11  ;;  %1330 = vmatmul.bf16.gmra.mxu0 %v7935_v11  ;;  %11374 = vst [vmem:[#allocation26_spill] sm:$0xff] %v8019_v8 }
 0x1ef   : > { %1419 = vmatmul.bf16.gmra.mxu1 %v7935_v11  ;;  %2660 = vmax.xlane.f32.xlu1 %v7938_v12  ;;  %v819_v14 = vpop.f32.mrf.mxu2 }
 0x1f0   : > { %v820_v17 = vadd.f32 %v7784_v47, %v819_v14 }
 0x1f2   : > { %v866_v23 = vmax.f32 %v820_v17, 0.0 }
 0x1f3   : > { %v1204_v15 = vpop.f32.mrf.mxu3 }
 0x1f4   : > { %v7946_v16 = vadd.f32 %v1204_v15, %v7901_v50 }
 0x1f6   : > { %2662 = vmax.xlane.f32.xlu2 %v7946_v16 }
 0x1f7   : > { %v821_v18 = vpop.f32.mrf.mxu2 }
 0x1f8   : > { %v822_v48 = vadd.f32 %v7784_v47, %v821_v18 }
 0x1fa   : > { %v867_v24 = vmax.f32 %v822_v48, 0.0 }
 0x1fb   : > { %v1207_v25 = vpop.f32.mrf.mxu3 }
 0x1fc   : > { %v7955_v26 = vpack.c.bf16 %v867_v24, %v866_v23  ;;  %v7958_v27 = vadd.f32 %v1207_v25, %v7901_v50  ;;  %1122 = vmatmul.bf16.gmra.mxu2 %v7856_v2  ;;  %v8033_v24 = vpop.f32.mrf.mxu0 }
 0x1fd   : > { %11376 = vst [vmem:[#allocation28_spill] sm:$0xff] %v8033_v24 }
 0x1fe   : > { %1246 = vmatmul.bf16.gmra.mxu3 %v7955_v26  ;;  %1335 = vmatmul.bf16.gmra.mxu0 %v7955_v26 }
 0x1ff   : > { %1424 = vmatmul.bf16.gmra.mxu1 %v7955_v26  ;;  %2664 = vmax.xlane.f32.xlu0 %v7958_v27  ;;  %v824_v28 = vpop.f32.mrf.mxu2 }
 0x200   : > { %v825_v34 = vadd.f32 %v7784_v47, %v824_v28 }
 0x202   : > { %v868_v37 = vmax.f32 %v825_v34, 0.0 }
 0x203   : > { %v1209_v32 = vpop.f32.mrf.mxu3 }
 0x204   : > { %v7970_v33 = vadd.f32 %v1209_v32, %v7901_v50 }
 0x206   : > { %2666 = vmax.xlane.f32.xlu1 %v7970_v33 }
 0x207   : > { %v826_v2 = vpop.f32.mrf.mxu2 }
 0x208   : > { %v827_v36 = vadd.f32 %v7784_v47, %v826_v2 }
 0x20a   : > { %v869_v38 = vmax.f32 %v827_v36, 0.0 }
 0x20b   : > { %v1212_v22 = vpop.f32.mrf.mxu3 }
 0x20c   : > { %v7977_v40 = vpack.c.bf16 %v869_v38, %v868_v37  ;;  %v7980_v41 = vadd.f32 %v1212_v22, %v7901_v50  ;;  %1127 = vmatmul.bf16.gmra.mxu2 %v7871_v20  ;;  %v7996_v20 = vpop.f32.mrf.mxu1 }
 0x20d   : > { %11371 = vst [vmem:[#allocation23_spill] sm:$0xff] %v7996_v20 }
 0x20e   : > { %1251 = vmatmul.bf16.gmra.mxu3 %v7977_v40  ;;  %1340 = vmatmul.bf16.gmra.mxu0 %v7977_v40 }
 0x20f   : > { %1429 = vmatmul.bf16.gmra.mxu1 %v7977_v40  ;;  %2668 = vmax.xlane.f32.xlu2 %v7980_v41  ;;  %v829_v44 = vpop.f32.mrf.mxu2 }
 0x210   : > { %v830_v52 = vadd.f32 %v7784_v47, %v829_v44  ;;  %v8050_v44 = vperm.slane %v7897_v45, 0 }
 0x212   : > { %v870_v56 = vmax.f32 %v830_v52, 0.0 }
 0x213   : > { %v1214_v46 = vpop.f32.mrf.mxu3 }
 0x214   : > { %v7990_v49 = vadd.f32 %v1214_v46, %v7901_v50  ;;  %v8011_v3 = vpop.f32.mrf.mxu1  ;;  %v8052_v46 = vpop.f32.mrf.mxu0 }
 0x215   : > { %11373 = vst [vmem:[#allocation25_spill] sm:$0xff] %v8011_v3 }
 0x216   : > { %2670 = vmax.xlane.f32.xlu0 %v7990_v49  ;;  %11378 = vst [vmem:[#allocation30_spill] sm:$0xff] %v8052_v46 }
 0x217   : > { %v831_v53 = vpop.f32.mrf.mxu2 }
 0x218   : > { %v832_v55 = vadd.f32 %v7784_v47, %v831_v53 }
 0x21a   : > { %v871_v58 = vmax.f32 %v832_v55, 0.0 }
 0x21b   : > { %v1217_v59 = vpop.f32.mrf.mxu3 }
 0x21c   : > { %v7999_v13 = vpack.c.bf16 %v871_v58, %v870_v56  ;;  %v8002_v60 = vadd.f32 %v1217_v59, %v7901_v50  ;;  %1132 = vmatmul.bf16.gmra.mxu2 %v7880_v35  ;;  %v8021_v14 = vpop.f32.mrf.mxu1 }
 0x21d   : > { %11375 = vst [vmem:[#allocation27_spill] sm:$0xff] %v8021_v14 }
 0x21e   : > { %1256 = vmatmul.bf16.gmra.mxu3 %v7999_v13  ;;  %1345 = vmatmul.bf16.gmra.mxu0 %v7999_v13 }
 0x21f   : > { %1434 = vmatmul.bf16.gmra.mxu1 %v7999_v13  ;;  %2672 = vmax.xlane.f32.xlu1 %v8002_v60  ;;  %v834_v62 = vpop.f32.mrf.mxu2 }
 0x220   : > { %v835_v7 = vadd.f32 %v7784_v47, %v834_v62 }
 0x222   : > { %v872_v9 = vmax.f32 %v835_v7, 0.0 }
 0x223   : > { %v1219_v4 = vpop.f32.mrf.mxu3 }
 0x224   : > { %v8014_v6 = vadd.f32 %v1219_v4, %v7901_v50  ;;  %v8038_v28 = vpop.f32.mrf.mxu1 }
 0x225   : > { %11377 = vst [vmem:[#allocation29_spill] sm:$0xff] %v8038_v28 }
 0x226   : > { %2674 = vmax.xlane.f32.xlu2 %v8014_v6 }
 0x227   : > { %v836_v35 = vpop.f32.mrf.mxu2 }
 0x228   : > { %v837_v31 = vadd.f32 %v7784_v47, %v836_v35 }
 0x22a   : > { %v873_v10 = vmax.f32 %v837_v31, 0.0 }
 0x22b   : > { %v1222_v15 = vpop.f32.mrf.mxu3 }
 0x22c   : > { %v8023_v17 = vpack.c.bf16 %v873_v10, %v872_v9  ;;  %v8026_v18 = vadd.f32 %v1222_v15, %v7901_v50  ;;  %1137 = vmatmul.bf16.gmra.mxu2 %v7887_v42 }
 0x22e   : > { %1261 = vmatmul.bf16.gmra.mxu3 %v8023_v17  ;;  %1350 = vmatmul.bf16.gmra.mxu0 %v8023_v17 }
 0x22f   : > { %1439 = vmatmul.bf16.gmra.mxu1 %v8023_v17  ;;  %2676 = vmax.xlane.f32.xlu0 %v8026_v18  ;;  %v839_v48 = vpop.f32.mrf.mxu2 }
 0x230   : > { %v840_v32 = vadd.f32 %v7784_v47, %v839_v48 }
 0x232   : > { %v874_v2 = vmax.f32 %v840_v32, 0.0 }
 0x233   : > { %v1224_v23 = vpop.f32.mrf.mxu3 }
 0x234   : > { %v8036_v25 = vadd.f32 %v1224_v23, %v7901_v50 }
 0x236   : > { %2678 = vmax.xlane.f32.xlu1 %v8036_v25 }
 0x237   : > { %v841_v42 = vpop.f32.mrf.mxu2 }
 0x238   : > { %v842_v34 = vadd.f32 %v7784_v47, %v841_v42  ;;  %v8056_v47 = vpop.f32.mrf.mxu1 }
 0x239   : > { %11379 = vst [vmem:[#allocation31_spill] sm:$0xff] %v8056_v47 }
 0x23a   : > { %v875_v36 = vmax.f32 %v842_v34, 0.0 }
 0x23b   : > { %v1227_v37 = vpop.f32.mrf.mxu3 }
 0x23c   : > { %v8043_v38 = vpack.c.bf16 %v875_v36, %v874_v2  ;;  %v8046_v22 = vadd.f32 %v1227_v37, %v7901_v50  ;;  %1142 = vmatmul.bf16.gmra.mxu2 %v7903_v54 }
 0x23e   : > { %1266 = vmatmul.bf16.gmra.mxu3 %v8043_v38  ;;  %1355 = vmatmul.bf16.gmra.mxu0 %v8043_v38 }
 0x23f   : > { %1444 = vmatmul.bf16.gmra.mxu1 %v8043_v38  ;;  %2680 = vmax.xlane.f32.xlu2 %v8046_v22  ;;  %v1103_v52 = vpop.f32.mrf.mxu2 }
 0x240   : > { %v8061_v53 = vadd.f32 %v1103_v52, %v8050_v44 }
 0x242   : > { %v2653_v54 = vpop.xlane.xlu2 %2652  ;;  %1451 = vmax.xlane.f32.xlu0 %v8061_v53 }
 0x243   : > { %v2716_v45 = vsub.f32 %v7906_v61, %v2653_v54  ;;  %v1229_v56 = vpop.f32.mrf.mxu3 }
 0x244   : > { %v8066_v59 = vadd.f32 %v1229_v56, %v7901_v50 }
 0x245   : > { %v2748_v55 = vmul.f32 1.442695, %v2716_v45 }
 0x247   : > { %6684 = vpow2.f32 %v2748_v55  ;;  %v1105_v58 = vpop.f32.mrf.mxu2 }
 0x248   : > { %v8078_v9 = vadd.f32 %v1105_v58, %v8050_v44 }
 0x249   : > { %v2655_v62 = vpop.xlane.xlu1 %2654 }
 0x24a   : > { %2682 = vmax.xlane.f32.xlu0 %v8066_v59  ;;  %v2717_v4 = vsub.f32 %v7914_v57, %v2655_v62 }
 0x24c   : > { %1147 = vmatmul.bf16.gmra.mxu2 %v7919_v0  ;;  %v2750_v35 = vmul.f32 1.442695, %v2717_v4 }
 0x24d   : > { %v8071_v7 = vpop.eup %6684 }
 0x24e   : > { %2812 = vadd.xlane.f32.xlu2 %v8071_v7  ;;  %6686 = vpow2.f32 %v2750_v35 }
 0x24f   : > { %v1108_v61 = vpop.f32.mrf.mxu2 }
 0x250   : > { %v8075_v31 = vadd.f32 %v1108_v61, %v8050_v44 }
 0x251   : > { %v1232_v10 = vpop.f32.mrf.mxu3 }
 0x252   : > { %1455 = vmax.xlane.f32.xlu1 %v8075_v31  ;;  %1453 = vmax.xlane.f32.xlu0 %v8078_v9  ;;  %v8083_v0 = vadd.f32 %v1232_v10, %v7901_v50  ;;  %v2657_v15 = vpop.xlane.xlu0 %2656 }
 0x253   : > { %v2718_v34 = vsub.f32 %v7922_v1, %v2657_v15 }
 0x254   : > { %v8085_v48 = vpop.eup %6686 }
 0x255   : > { %v2752_v36 = vmul.f32 1.442695, %v2718_v34 }
 0x257   : > { %v1110_v57 = vpop.f32.mrf.mxu2  ;;  %6688 = vpow2.f32 %v2752_v36 }
 0x258   : > { %v8097_v52 = vadd.f32 %v1110_v57, %v8050_v44 }
 0x259   : > { %v1234_v23 = vpop.f32.mrf.mxu3  ;;  %v2659_v42 = vpop.xlane.xlu2 %2658 }
 0x25a   : > { %v8088_v32 = vadd.f32 %v1234_v23, %v7901_v50  ;;  %2684 = vmax.xlane.f32.xlu1 %v8083_v0  ;;  %2814 = vadd.xlane.f32.xlu0 %v8085_v48  ;;  %v2719_v2 = vsub.f32 %v7930_v5, %v2659_v42 }
 0x25c   : > { %2686 = vmax.xlane.f32.xlu2 %v8088_v32  ;;  %1152 = vmatmul.bf16.gmra.mxu2 %v7935_v11  ;;  %v2754_v54 = vmul.f32 1.442695, %v2719_v2 }
 0x25d   : > { %v8109_v62 = vpop.eup %6688 }
 0x25e   : > { %6690 = vpow2.f32 %v2754_v54 }
 0x25f   : > { %v1113_v37 = vpop.f32.mrf.mxu2 }
 0x260   : > { %v8100_v55 = vadd.f32 %v1113_v37, %v8050_v44 }
 0x261   : > { %v1237_v45 = vpop.f32.mrf.mxu3 }
 0x262   : > { %v8103_v56 = vadd.f32 %v1237_v45, %v7901_v50  ;;  %v2661_v1 = vpop.xlane.xlu1 %2660  ;;  %1457 = vmax.xlane.f32.xlu1 %v8097_v52 }
 0x263   : > { %v2720_v11 = vsub.f32 %v7938_v12, %v2661_v1 }
 0x264   : > { %1459 = vmax.xlane.f32.xlu2 %v8100_v55  ;;  %2688 = vmax.xlane.f32.xlu0 %v8103_v56  ;;  %v8112_v61 = vpop.eup %6690 }
 0x265   : > { %v2756_v5 = vmul.f32 1.442695, %v2720_v11 }
 0x267   : > { %6692 = vpow2.f32 %v2756_v5  ;;  %v1115_v58 = vpop.f32.mrf.mxu2 }
 0x268   : > { %v8125_v2 = vadd.f32 %v1115_v58, %v8050_v44 }
 0x269   : > { %v1239_v4 = vpop.f32.mrf.mxu3  ;;  %v2663_v35 = vpop.xlane.xlu2 %2662 }
 0x26a   : > { %2816 = vadd.xlane.f32.xlu1 %v8109_v62  ;;  %v2721_v10 = vsub.f32 %v7946_v16, %v2663_v35  ;;  %v8121_v23 = vadd.f32 %v1239_v4, %v7901_v50 }
 0x26c   : > { %1157 = vmatmul.bf16.gmra.mxu2 %v7955_v26  ;;  %2818 = vadd.xlane.f32.xlu2 %v8112_v61  ;;  %v2758_v57 = vmul.f32 1.442695, %v2721_v10 }
 0x26d   : > { %v8117_v12 = vpop.eup %6692 }
 0x26e   : > { %2820 = vadd.xlane.f32.xlu0 %v8117_v12  ;;  %6694 = vpow2.f32 %v2758_v57 }
 0x26f   : > { %v1118_v15 = vpop.f32.mrf.mxu2 }
 0x270   : > { %v8128_v16 = vadd.f32 %v1118_v15, %v8050_v44 }
 0x271   : > { %v1242_v42 = vpop.f32.mrf.mxu3 }
 0x272   : > { %v2665_v34 = vpop.xlane.xlu0 %2664  ;;  %2690 = vmax.xlane.f32.xlu1 %v8121_v23  ;;  %v8136_v11 = vadd.f32 %v1242_v42, %v7901_v50 }
 0x273   : > { %v2722_v26 = vsub.f32 %v7958_v27, %v2665_v34 }
 0x274   : > { %1461 = vmax.xlane.f32.xlu2 %v8125_v2  ;;  %v8133_v37 = vpop.eup %6694 }
 0x275   : > { %v2760_v54 = vmul.f32 1.442695, %v2722_v26 }
 0x276   : > { %1463 = vmax.xlane.f32.xlu0 %v8128_v16 }
 0x277   : > { %v1120_v36 = vpop.f32.mrf.mxu2  ;;  %6696 = vpow2.f32 %v2760_v54 }
 0x278   : > { %v8147_v35 = vadd.f32 %v1120_v36, %v8050_v44 }
 0x279   : > { %v1244_v45 = vpop.f32.mrf.mxu3  ;;  %v2667_v1 = vpop.xlane.xlu1 %2666 }
 0x27a   : > { %v8139_v5 = vadd.f32 %v1244_v45, %v7901_v50  ;;  %v2723_v58 = vsub.f32 %v7970_v33, %v2667_v1  ;;  %2822 = vadd.xlane.f32.xlu1 %v8133_v37 }
 0x27c   : > { %v2762_v4 = vmul.f32 1.442695, %v2723_v58  ;;  %1162 = vmatmul.bf16.gmra.mxu2 %v7977_v40  ;;  %2692 = vmax.xlane.f32.xlu2 %v8136_v11 }
 0x27d   : > { %v8150_v33 = vpop.eup %6696 }
 0x27e   : > { %6698 = vpow2.f32 %v2762_v4  ;;  %2694 = vmax.xlane.f32.xlu0 %v8139_v5 }
 0x27f   : > { %v1123_v27 = vpop.f32.mrf.mxu2 }
 0x280   : > { %v8161_v54 = vadd.f32 %v1123_v27, %v8050_v44 }
 0x281   : > { %v1247_v10 = vpop.f32.mrf.mxu3 }
 0x282   : > { %v2669_v57 = vpop.xlane.xlu2 %2668  ;;  %1465 = vmax.xlane.f32.xlu1 %v8147_v35  ;;  %v8158_v26 = vadd.f32 %v1247_v10, %v7901_v50 }
 0x283   : > { %v2724_v15 = vsub.f32 %v7980_v41, %v2669_v57 }
 0x284   : > { %v8153_v42 = vpop.eup %6698  ;;  %2824 = vadd.xlane.f32.xlu2 %v8150_v33 }
 0x285   : > { %v2764_v40 = vmul.f32 1.442695, %v2724_v15 }
 0x286   : > { %2826 = vadd.xlane.f32.xlu0 %v8153_v42 }
 0x287   : > { %v1125_v34 = vpop.f32.mrf.mxu2  ;;  %6700 = vpow2.f32 %v2764_v40 }
 0x288   : > { %v8165_v41 = vadd.f32 %v1125_v34, %v8050_v44 }
 0x289   : > { %v1249_v36 = vpop.f32.mrf.mxu3  ;;  %v2671_v45 = vpop.xlane.xlu0 %2670 }
 0x28a   : > { %2696 = vmax.xlane.f32.xlu1 %v8158_v26  ;;  %v2725_v1 = vsub.f32 %v7990_v49, %v2671_v45  ;;  %v8174_v57 = vadd.f32 %v1249_v36, %v7901_v50 }
 0x28c   : > { %1167 = vmatmul.bf16.gmra.mxu2 %v7999_v13  ;;  %1467 = vmax.xlane.f32.xlu2 %v8161_v54  ;;  %v2766_v27 = vmul.f32 1.442695, %v2725_v1 }
 0x28d   : > { %v8171_v4 = vpop.eup %6700 }
 0x28e   : > { %1469 = vmax.xlane.f32.xlu0 %v8165_v41  ;;  %6702 = vpow2.f32 %v2766_v27 }
 0x28f   : > { %v1128_v58 = vpop.f32.mrf.mxu2 }
 0x290   : > { %v8184_v45 = vadd.f32 %v1128_v58, %v8050_v44 }
 0x291   : > { %v1252_v10 = vpop.f32.mrf.mxu3 }
 0x292   : > { %v8177_v15 = vadd.f32 %v1252_v10, %v7901_v50  ;;  %v2673_v40 = vpop.xlane.xlu1 %2672  ;;  %2828 = vadd.xlane.f32.xlu1 %v8171_v4 }
 0x293   : > { %v2726_v13 = vsub.f32 %v8002_v60, %v2673_v40 }
 0x294   : > { %2698 = vmax.xlane.f32.xlu2 %v8174_v57  ;;  %v8187_v10 = vpop.eup %6702 }
 0x295   : > { %v2768_v49 = vmul.f32 1.442695, %v2726_v13 }
 0x296   : > { %2700 = vmax.xlane.f32.xlu0 %v8177_v15 }
 0x297   : > { %6704 = vpow2.f32 %v2768_v49  ;;  %v1130_v34 = vpop.f32.mrf.mxu2 }
 0x298   : > { %v8199_v49 = vadd.f32 %v1130_v34, %v8050_v44 }
 0x299   : > { %v1254_v36 = vpop.f32.mrf.mxu3  ;;  %v2675_v1 = vpop.xlane.xlu2 %2674 }
 0x29a   : > { %1471 = vmax.xlane.f32.xlu1 %v8184_v45  ;;  %v2727_v47 = vsub.f32 %v8014_v6, %v2675_v1  ;;  %v8196_v58 = vadd.f32 %v1254_v36, %v7901_v50 }
 0x29c   : > { %1172 = vmatmul.bf16.gmra.mxu2 %v8023_v17  ;;  %2830 = vadd.xlane.f32.xlu2 %v8187_v10  ;;  %v2770_v27 = vmul.f32 1.442695, %v2727_v47 }
 0x29d   : > { %v8192_v60 = vpop.eup %6704 }
 0x29e   : > { %2832 = vadd.xlane.f32.xlu0 %v8192_v60  ;;  %6706 = vpow2.f32 %v2770_v27 }
 0x29f   : > { %v1133_v40 = vpop.f32.mrf.mxu2 }
 0x2a0   : > { %v8203_v6 = vadd.f32 %v1133_v40, %v8050_v44 }
 0x2a1   : > { %v1257_v13 = vpop.f32.mrf.mxu3 }
 0x2a2   : > { %v2677_v3 = vpop.xlane.xlu0 %2676  ;;  %2702 = vmax.xlane.f32.xlu1 %v8196_v58  ;;  %v8211_v28 = vadd.f32 %v1257_v13, %v7901_v50 }
 0x2a3   : > { %v2728_v17 = vsub.f32 %v8026_v18, %v2677_v3 }
 0x2a4   : > { %1473 = vmax.xlane.f32.xlu2 %v8199_v49  ;;  %v8208_v36 = vpop.eup %6706 }
 0x2a5   : > { %v2772_v1 = vmul.f32 1.442695, %v2728_v17 }
 0x2a6   : > { %1475 = vmax.xlane.f32.xlu0 %v8203_v6 }
 0x2a7   : > { %v1135_v47 = vpop.f32.mrf.mxu2  ;;  %6708 = vpow2.f32 %v2772_v1 }
 0x2a8   : > { %v8222_v18 = vadd.f32 %v1135_v47, %v8050_v44 }
 0x2a9   : > { %v1259_v30 = vpop.f32.mrf.mxu3  ;;  %v2679_v34 = vpop.xlane.xlu1 %2678 }
 0x2aa   : > { %v8214_v27 = vadd.f32 %v1259_v30, %v7901_v50  ;;  %v2729_v40 = vsub.f32 %v8036_v25, %v2679_v34  ;;  %2834 = vadd.xlane.f32.xlu1 %v8208_v36 }
 0x2ac   : > { %v2774_v20 = vmul.f32 1.442695, %v2729_v40  ;;  %1177 = vmatmul.bf16.gmra.mxu2 %v8043_v38  ;;  %2704 = vmax.xlane.f32.xlu2 %v8211_v28 }
 0x2ad   : > { %v8225_v25 = vpop.eup %6708 }
 0x2ae   : > { %6710 = vpow2.f32 %v2774_v20  ;;  %2706 = vmax.xlane.f32.xlu0 %v8214_v27  ;;  %11380 = vst [vmem:[#allocation32_spill] sm:$0xff] %v8225_v25 }
 0x2af   : > { %v1138_v3 = vpop.f32.mrf.mxu2 }
 0x2b0   : > { %v8236_v14 = vadd.f32 %v1138_v3, %v8050_v44 }
 0x2b1   : > { %v1262_v13 = vpop.f32.mrf.mxu3 }
 0x2b2   : > { %v2681_v30 = vpop.xlane.xlu2 %2680  ;;  %1477 = vmax.xlane.f32.xlu1 %v8222_v18  ;;  %v8233_v47 = vadd.f32 %v1262_v13, %v7901_v50 }
 0x2b3   : > { %v2730_v17 = vsub.f32 %v8046_v22, %v2681_v30 }
 0x2b4   : > { %v8228_v34 = vpop.eup %6710  ;;  %2836 = vadd.xlane.f32.xlu2 %v8225_v25 }
 0x2b5   : > { %11381 = vst [vmem:[#allocation33_spill] sm:$0xff] %v8228_v34  ;;  %v1452_v38 = vpop.xlane.xlu0 %1451  ;;  %v2776_v20 = vmul.f32 1.442695, %v2730_v17 }
 0x2b6   : > { %2838 = vadd.xlane.f32.xlu0 %v8228_v34  ;;  %v1515_v30 = vsub.f32 %v8061_v53, %v1452_v38 }
 0x2b7   : > { %v1140_v1 = vpop.f32.mrf.mxu2  ;;  %6712 = vpow2.f32 %v2776_v20 }
 0x2b8   : > { %v8240_v22 = vadd.f32 %v1140_v1, %v8050_v44  ;;  %v1547_v43 = vmul.f32 1.442695, %v1515_v30 }
 0x2b9   : > { %v1264_v40 = vpop.f32.mrf.mxu3 }
 0x2ba   : > { %2708 = vmax.xlane.f32.xlu1 %v8233_v47  ;;  %v8248_v3 = vadd.f32 %v1264_v40, %v7901_v50  ;;  %6714 = vpow2.f32 %v1547_v43 }
 0x2bc   : > { %1479 = vmax.xlane.f32.xlu2 %v8236_v14 }
 0x2bd   : > { %v2683_v21 = vpop.xlane.xlu0 %2682  ;;  %v8245_v13 = vpop.eup %6712 }
 0x2be   : > { %1481 = vmax.xlane.f32.xlu0 %v8240_v22  ;;  %11382 = vst [vmem:[#allocation34_spill] sm:$0xff] %v8245_v13  ;;  %v2731_v53 = vsub.f32 %v8066_v59, %v2683_v21 }
 0x2bf   : > { %v1143_v17 = vpop.f32.mrf.mxu2 }
 0x2c0   : > { %v8259_v40 = vadd.f32 %v1143_v17, %v8050_v44  ;;  %v2778_v24 = vmul.f32 1.442695, %v2731_v53  ;;  %v8262_v39 = vpop.eup %6714 }
 0x2c1   : > { %v1267_v46 = vpop.f32.mrf.mxu3  ;;  %v2813_v1 = vpop.xlane.xlu2 %2812 }
 0x2c2   : > { %v8251_v20 = vadd.f32 %v1267_v46, %v7901_v50  ;;  %2840 = vadd.xlane.f32.xlu1 %v8245_v13  ;;  %6716 = vrcp.f32 %v2813_v1 }
 0x2c4   : > { %2710 = vmax.xlane.f32.xlu2 %v8248_v3 }
 0x2c5   : > { %v1456_v38 = vpop.xlane.xlu1 %1455  ;;  %v1454_v8 = vpop.xlane.xlu0 %1453 }
 0x2c6   : > { %2712 = vmax.xlane.f32.xlu0 %v8251_v20  ;;  %v1516_v30 = vsub.f32 %v8078_v9, %v1454_v8  ;;  %v1517_v53 = vsub.f32 %v8075_v31, %v1456_v38 }
 0x2c7   : > { %v1145_v63 = vpop.f32.mrf.mxu2 }
 0x2c8   : > { %v1549_v46 = vmul.f32 1.442695, %v1516_v30  ;;  %v6717_v21 = vpop.eup %6716 }
 0x2c9   : > { %v1269_v43 = vpop.f32.mrf.mxu3  ;;  %v2908_v17 = vmul.f32 %v6717_v21, %v8071_v7  ;;  %v1551_v21 = vmul.f32 1.442695, %v1517_v53 }
 0x2ca   : > { %1483 = vmax.xlane.f32.xlu1 %v8259_v40  ;;  %6718 = vpow2.f32 %v1549_v46  ;;  %v8266_v9 = vadd.f32 %v1269_v43, %v7901_v50  ;;  %v8278_v50 = vld [vmem:[#allocation8] ss:$0 sm:$0xff] }
 0x2cb   : > { %6720 = vpow2.f32 %v2778_v24  ;;  %v2940_v43 = vmax.f32 %v2908_v17, 0.001 }
 0x2cc   : > { %1611 = vadd.xlane.f32.xlu2 %v8262_v39 }
 0x2cd   : > { %v2685_v59 = vpop.xlane.xlu1 %2684  ;;  %v2815_v29 = vpop.xlane.xlu0 %2814  ;;  %v2972_v13 = vmul.f32 %v8278_v50, %v2940_v43 }
 0x2ce   : > { %6722 = vrcp.f32 %v2815_v29  ;;  %v2732_v24 = vsub.f32 %v8083_v0, %v2685_v59  ;;  %v8285_v0 = vadd.f32 %v1145_v63, %v8050_v44 }
 0x2cf   : > { %v2687_v8 = vpop.xlane.xlu2 %2686  ;;  %v1148_v46 = vpop.f32.mrf.mxu2  ;;  %6724 = vpow2.f32 %v1551_v21 }
 0x2d0   : > { %v8269_v1 = vpop.eup %6718  ;;  %v2780_v29 = vmul.f32 1.442695, %v2732_v24  ;;  %v8281_v31 = vadd.f32 %v1148_v46, %v8050_v44 }
 0x2d1   : > { %1613 = vadd.xlane.f32.xlu0 %v8269_v1  ;;  %v8274_v30 = vpop.eup %6720 }
 0x2d2   : > { %2714 = vmax.xlane.f32.xlu1 %v8266_v9  ;;  %11383 = vst [vmem:[#allocation35_spill] sm:$0xff] %v8274_v30  ;;  %6726 = vpow2.f32 %v2780_v29 }
 0x2d4   : > { %2842 = vadd.xlane.f32.xlu2 %v8274_v30  ;;  %v6723_v51 = vpop.eup %6722 }
 0x2d5   : > { %v1458_v7 = vpop.xlane.xlu1 %1457  ;;  %v2909_v59 = vmul.f32 %v6723_v51, %v8085_v48  ;;  %v8291_v43 = vpop.eup %6724  ;;  %v2733_v48 = vsub.f32 %v8088_v32, %v2687_v8 }
 0x2d6   : > { %v1518_v17 = vsub.f32 %v8097_v52, %v1458_v7  ;;  %11384 = vst [vmem:[#allocation36_spill] sm:$0xff] %v8291_v43 }
 0x2d7   : > { %v1460_v19 = vpop.xlane.xlu2 %1459  ;;  %v2689_v38 = vpop.xlane.xlu0 %2688  ;;  %v2941_v46 = vmax.f32 %v2909_v59, 0.001  ;;  %v2782_v59 = vmul.f32 1.442695, %v2733_v48 }
 0x2d8   : > { %v1150_v53 = vpop.f32.mrf.mxu2  ;;  %v8293_v21 = vpop.eup %6726  ;;  %v1553_v63 = vmul.f32 1.442695, %v1518_v17 }
 0x2d9   : > { %1487 = vmax.xlane.f32.xlu0 %v8281_v31  ;;  %11385 = vst [vmem:[#allocation37_spill] sm:$0xff] %v8293_v21  ;;  %v2973_v51 = vmul.f32 %v8278_v50, %v2941_v46 }
 0x2da   : > { %3004 = vadd.xlane.f32.xlu1 %v2972_v13  ;;  %v1519_v13 = vsub.f32 %v8100_v55, %v1460_v19 }
 0x2dc   : > { %1485 = vmax.xlane.f32.xlu2 %v8285_v0 }
 0x2dd   : > { %v2817_v24 = vpop.xlane.xlu1 %2816 }
 0x2de   : > { %6728 = vrcp.f32 %v2817_v24 }
 0x2df   : > { %v2819_v30 = vpop.xlane.xlu2 %2818  ;;  %6730 = vpow2.f32 %v1553_v63 }
 0x2e0   : > { %v1153_v24 = vpop.f32.mrf.mxu2  ;;  %6732 = vrcp.f32 %v2819_v30 }
 0x2e1   : > { %v2821_v25 = vpop.xlane.xlu0 %2820  ;;  %2844 = vadd.xlane.f32.xlu0 %v8293_v21  ;;  %v8302_v21 = vadd.f32 %v1150_v53, %v8050_v44  ;;  %6734 = vpow2.f32 %v2782_v59 }
 0x2e2   : > { %1615 = vadd.xlane.f32.xlu1 %v8291_v43  ;;  %v1555_v43 = vmul.f32 1.442695, %v1519_v13 }
 0x2e4   : > { %v6729_v52 = vpop.eup %6728  ;;  %3006 = vadd.xlane.f32.xlu2 %v2973_v51  ;;  %6736 = vpow2.f32 %v1555_v43  ;;  %v8318_v43 = vadd.f32 %v1153_v24, %v8050_v44 }
 0x2e5   : > { %v2691_v7 = vpop.xlane.xlu1 %2690  ;;  %v2910_v29 = vmul.f32 %v6729_v52, %v8109_v62  ;;  %v8306_v19 = vpop.eup %6730  ;;  %v2734_v62 = vsub.f32 %v8103_v56, %v2689_v38  ;;  %6738 = vrcp.f32 %v2821_v25 }
 0x2e6   : > { %v6733_v55 = vpop.eup %6732 }
 0x2e7   : > { %v1462_v17 = vpop.xlane.xlu2 %1461  ;;  %v2942_v34 = vmax.f32 %v2910_v29, 0.001  ;;  %v2911_v53 = vmul.f32 %v6733_v55, %v8112_v61  ;;  %v8311_v63 = vpop.eup %6734  ;;  %v2784_v51 = vmul.f32 1.442695, %v2734_v62  ;;  %v2735_v61 = vsub.f32 %v8121_v23, %v2691_v7 }
 0x2e8   : > { %v1520_v56 = vsub.f32 %v8125_v2, %v1462_v17 }
 0x2e9   : > { %v1464_v46 = vpop.xlane.xlu0 %1463  ;;  %v2974_v32 = vmul.f32 %v8278_v50, %v2942_v34  ;;  %v1155_v34 = vpop.f32.mrf.mxu2  ;;  %v2943_v38 = vmax.f32 %v2911_v53, 0.001  ;;  %6740 = vpow2.f32 %v2784_v51 }
 0x2ea   : > { %1489 = vmax.xlane.f32.xlu1 %v8302_v21  ;;  %v8315_v52 = vpop.eup %6736  ;;  %v1557_v29 = vmul.f32 1.442695, %v1520_v56  ;;  %v8327_v55 = vadd.f32 %v1155_v34, %v8050_v44  ;;  %v1521_v62 = vsub.f32 %v8128_v16, %v1464_v46 }
 0x2eb   : > { %3008 = vadd.xlane.f32.xlu0 %v2974_v32  ;;  %v6739_v13 = vpop.eup %6738  ;;  %v2786_v32 = vmul.f32 1.442695, %v2735_v61  ;;  %v2975_v24 = vmul.f32 %v8278_v50, %v2943_v38 }
 0x2ec   : > { %1617 = vadd.xlane.f32.xlu2 %v8306_v19  ;;  %v2912_v17 = vmul.f32 %v6739_v13, %v8117_v12  ;;  %v1559_v61 = vmul.f32 1.442695, %v1521_v62 }
 0x2ed   : > { %v2823_v8 = vpop.xlane.xlu1 %2822 }
 0x2ee   : > { %6742 = vrcp.f32 %v2823_v8  ;;  %v2944_v51 = vmax.f32 %v2912_v17, 0.001 }
 0x2ef   : > { %v2693_v30 = vpop.xlane.xlu2 %2692  ;;  %v8330_v23 = vpop.eup %6740  ;;  %6744 = vpow2.f32 %v1557_v29 }
 0x2f0   : > { %11386 = vst [vmem:[#allocation38_spill] sm:$0xff] %v8330_v23  ;;  %6746 = vpow2.f32 %v2786_v32  ;;  %v2976_v29 = vmul.f32 %v8278_v50, %v2944_v51  ;;  %v2736_v32 = vsub.f32 %v8136_v11, %v2693_v30 }
 0x2f1   : > { %v8313_v48 = vpop.xlane.xlu0 %2694  ;;  %v1158_v7 = vpop.f32.mrf.mxu2  ;;  %6748 = vpow2.f32 %v1559_v61 }
 0x2f2   : > { %2846 = vadd.xlane.f32.xlu1 %v8311_v63  ;;  %v2788_v62 = vmul.f32 1.442695, %v2736_v32 }
 0x2f3   : > { %1619 = vadd.xlane.f32.xlu0 %v8315_v52 }
 0x2f4   : > { %1491 = vmax.xlane.f32.xlu2 %v8318_v43  ;;  %v6743_v53 = vpop.eup %6742 }
 0x2f5   : > { %v1466_v25 = vpop.xlane.xlu1 %1465  ;;  %v8335_v56 = vpop.eup %6744  ;;  %v2913_v12 = vmul.f32 %v6743_v53, %v8133_v37  ;;  %v8350_v53 = vadd.f32 %v1158_v7, %v8050_v44 }
 0x2f6   : > { %v8340_v13 = vpop.eup %6746  ;;  %v1522_v16 = vsub.f32 %v8147_v35, %v1466_v25  ;;  %v2737_v25 = vsub.f32 %v8139_v5, %v8313_v48 }
 0x2f7   : > { %v2825_v59 = vpop.xlane.xlu2 %2824  ;;  %11387 = vst [vmem:[#allocation39_spill] sm:$0xff] %v8340_v13  ;;  %v2945_v17 = vmax.f32 %v2913_v12, 0.001  ;;  %v8356_v35 = vpop.eup %6748 }
 0x2f8   : > { %6750 = vrcp.f32 %v2825_v59  ;;  %v2790_v32 = vmul.f32 1.442695, %v2737_v25 }
 0x2f9   : > { %v2827_v2 = vpop.xlane.xlu0 %2826  ;;  %v1160_v46 = vpop.f32.mrf.mxu2  ;;  %v2977_v11 = vmul.f32 %v8278_v50, %v2945_v17  ;;  %6752 = vpow2.f32 %v2788_v62 }
 0x2fa   : > { %3010 = vadd.xlane.f32.xlu1 %v2975_v24 }
 0x2fb   : > { %1493 = vmax.xlane.f32.xlu0 %v8327_v55 }
 0x2fc   : > { %2848 = vadd.xlane.f32.xlu2 %v8330_v23  ;;  %v1561_v23 = vmul.f32 1.442695, %v1522_v16 }
 0x2fd   : > { %v2697_v8 = vpop.xlane.xlu1 %2696 }
 0x2fe   : > { %6754 = vpow2.f32 %v1561_v23  ;;  %v6751_v30 = vpop.eup %6750  ;;  %v8371_v23 = vadd.f32 %v1160_v46, %v8050_v44  ;;  %v2738_v48 = vsub.f32 %v8158_v26, %v2697_v8 }
 0x2ff   : > { %v1468_v34 = vpop.xlane.xlu2 %1467  ;;  %v2914_v12 = vmul.f32 %v6751_v30, %v8150_v33  ;;  %6756 = vrcp.f32 %v2827_v2 }
 0x300   : > { %v1523_v5 = vsub.f32 %v8161_v54, %v1468_v34  ;;  %6758 = vpow2.f32 %v2790_v32  ;;  %v2792_v25 = vmul.f32 1.442695, %v2738_v48 }
 0x301   : > { %v8337_v38 = vpop.xlane.xlu0 %1469  ;;  %v1163_v7 = vpop.f32.mrf.mxu2  ;;  %v2946_v33 = vmax.f32 %v2914_v12, 0.001 }
 0x302   : > { %1621 = vadd.xlane.f32.xlu1 %v8335_v56 }
 0x303   : > { %2850 = vadd.xlane.f32.xlu0 %v8340_v13  ;;  %v2978_v46 = vmul.f32 %v8278_v50, %v2946_v33 }
 0x304   : > { %3012 = vadd.xlane.f32.xlu2 %v2976_v29  ;;  %v8364_v29 = vpop.eup %6752 }
 0x305   : > { %v2829_v24 = vpop.xlane.xlu1 %2828  ;;  %11388 = vst [vmem:[#allocation40_spill] sm:$0xff] %v8364_v29  ;;  %v8368_v17 = vpop.eup %6754 }
 0x306   : > { %v6757_v62 = vpop.eup %6756  ;;  %6760 = vrcp.f32 %v2829_v24  ;;  %v1524_v24 = vsub.f32 %v8165_v41, %v8337_v38 }
 0x307   : > { %v8347_v37 = vpop.xlane.xlu2 %2698  ;;  %v2915_v26 = vmul.f32 %v6757_v62, %v8153_v42  ;;  %v8387_v8 = vpop.eup %6758 }
 0x308   : > { %11389 = vst [vmem:[#allocation41_spill] sm:$0xff] %v8387_v8  ;;  %v1565_v42 = vmul.f32 1.442695, %v1524_v24  ;;  %v2739_v41 = vsub.f32 %v8174_v57, %v8347_v37 }
 0x309   : > { %v8352_v51 = vpop.xlane.xlu0 %2700  ;;  %v1165_v54 = vpop.f32.mrf.mxu2  ;;  %v2947_v32 = vmax.f32 %v2915_v26, 0.001 }
 0x30a   : > { %1495 = vmax.xlane.f32.xlu1 %v8350_v53 }
 0x30b   : > { %3014 = vadd.xlane.f32.xlu0 %v2977_v11  ;;  %v1563_v11 = vmul.f32 1.442695, %v1523_v5 }
 0x30c   : > { %1623 = vadd.xlane.f32.xlu2 %v8356_v35 }
 0x30d   : > { %v1472_v59 = vpop.xlane.xlu1 %1471  ;;  %6762 = vpow2.f32 %v1563_v11 }
 0x30e   : > { %6764 = vpow2.f32 %v2792_v25  ;;  %v2979_v25 = vmul.f32 %v8278_v50, %v2947_v32 }
 0x30f   : > { %v8361_v61 = vpop.xlane.xlu2 %2830  ;;  %6766 = vpow2.f32 %v1565_v42 }
 0x311   : > { %v8366_v16 = vpop.xlane.xlu0 %2832  ;;  %v1168_v38 = vpop.f32.mrf.mxu2 }
 0x312   : > { %2852 = vadd.xlane.f32.xlu1 %v8364_v29  ;;  %v8382_v29 = vadd.f32 %v1163_v7, %v8050_v44  ;;  %v6761_v7 = vpop.eup %6760 }
 0x313   : > { %1625 = vadd.xlane.f32.xlu0 %v8368_v17  ;;  %v8397_v48 = vpop.eup %6762  ;;  %v2916_v62 = vmul.f32 %v6761_v7, %v8171_v4  ;;  %v8413_v7 = vadd.f32 %v1165_v54, %v8050_v44 }
 0x314   : > { %1497 = vmax.xlane.f32.xlu2 %v8371_v23  ;;  %v8402_v11 = vpop.eup %6764 }
 0x315   : > { %v8378_v2 = vpop.xlane.xlu1 %2702  ;;  %11390 = vst [vmem:[#allocation42_spill] sm:$0xff] %v8402_v11  ;;  %v2948_v24 = vmax.f32 %v2916_v62, 0.001  ;;  %v8419_v37 = vpop.eup %6766 }
 0x317   : > { %v1474_v30 = vpop.xlane.xlu2 %1473  ;;  %v2980_v57 = vmul.f32 %v8278_v50, %v2948_v24 }
 0x319   : > { %v8384_v34 = vpop.xlane.xlu0 %1475  ;;  %v1170_v54 = vpop.f32.mrf.mxu2 }
 0x31a   : > { %3016 = vadd.xlane.f32.xlu1 %v2978_v46  ;;  %v1525_v46 = vsub.f32 %v8184_v45, %v1472_v59  ;;  %v1526_v45 = vsub.f32 %v8199_v49, %v1474_v30  ;;  %v2740_v59 = vsub.f32 %v8177_v15, %v8352_v51  ;;  %v2741_v15 = vsub.f32 %v8196_v58, %v8378_v2 }
 0x31b   : > { %1499 = vmax.xlane.f32.xlu0 %v8382_v29 }
 0x31c   : > { %2854 = vadd.xlane.f32.xlu2 %v8387_v8  ;;  %v2794_v8 = vmul.f32 1.442695, %v2739_v41  ;;  %v1567_v13 = vmul.f32 1.442695, %v1525_v46  ;;  %v1569_v62 = vmul.f32 1.442695, %v1526_v45 }
 0x31d   : > { %v8393_v12 = vpop.xlane.xlu1 %2834  ;;  %v2796_v46 = vmul.f32 1.442695, %v2740_v59  ;;  %v8448_v59 = vadd.f32 %v1170_v54, %v8050_v44 }
 0x31e   : > { %6768 = vpow2.f32 %v2794_v8  ;;  %v8432_v8 = vadd.f32 %v1168_v38, %v8050_v44 }
 0x31f   : > { %v8395_v5 = vpop.xlane.xlu2 %2704  ;;  %6770 = vpow2.f32 %v1567_v13  ;;  %v1527_v13 = vsub.f32 %v8203_v6, %v8384_v34 }
 0x320   : > { %6772 = vpow2.f32 %v1569_v62  ;;  %v2742_v2 = vsub.f32 %v8211_v28, %v8395_v5 }
 0x321   : > { %v8399_v33 = vpop.xlane.xlu0 %2706  ;;  %6774 = vpow2.f32 %v2796_v46  ;;  %v1173_v30 = vpop.f32.mrf.mxu2  ;;  %v1571_v62 = vmul.f32 1.442695, %v1527_v13 }
 0x322   : > { %1627 = vadd.xlane.f32.xlu1 %v8397_v48  ;;  %v2800_v46 = vmul.f32 1.442695, %v2742_v2  ;;  %v8461_v13 = vadd.f32 %v1173_v30, %v8050_v44  ;;  %v2743_v5 = vsub.f32 %v8214_v27, %v8399_v33 }
 0x323   : > { %2856 = vadd.xlane.f32.xlu0 %v8402_v11 }
 0x324   : > { %3018 = vadd.xlane.f32.xlu2 %v2979_v25  ;;  %v8427_v41 = vpop.eup %6768 }
 0x325   : > { %v1478_v26 = vpop.xlane.xlu1 %1477  ;;  %11391 = vst [vmem:[#allocation43_spill] sm:$0xff] %v8427_v41  ;;  %v8429_v24 = vpop.eup %6770 }
 0x326   : > { %v8445_v45 = vpop.eup %6772  ;;  %v1528_v6 = vsub.f32 %v8222_v18, %v1478_v26 }
 0x327   : > { %v8410_v4 = vpop.xlane.xlu2 %2836  ;;  %11392 = vst [vmem:[#allocation44_spill] sm:$0xff] %v8445_v45  ;;  %v8451_v58 = vpop.eup %6774 }
 0x329   : > { %v8415_v32 = vpop.xlane.xlu0 %2838  ;;  %v1175_v11 = vpop.f32.mrf.mxu2 }
 0x32a   : > { %1501 = vmax.xlane.f32.xlu1 %v8413_v7 }
 0x32b   : > { %3020 = vadd.xlane.f32.xlu0 %v2980_v57  ;;  %v2798_v57 = vmul.f32 1.442695, %v2741_v15 }
 0x32c   : > { %1629 = vadd.xlane.f32.xlu2 %v8419_v37 }
 0x32d   : > { %v8425_v42 = vpop.xlane.xlu1 %2708  ;;  %6776 = vpow2.f32 %v2798_v57 }
 0x32e   : > { %6778 = vpow2.f32 %v1571_v62  ;;  %v2744_v27 = vsub.f32 %v8233_v47, %v8425_v42 }
 0x32f   : > { %v1480_v25 = vpop.xlane.xlu2 %1479  ;;  %6780 = vpow2.f32 %v2800_v46 }
 0x330   : > { %v1529_v18 = vsub.f32 %v8236_v14, %v1480_v25  ;;  %v8482_v14 = vadd.f32 %v1175_v11, %v8050_v44 }
 0x331   : > { %v1482_v49 = vpop.xlane.xlu0 %1481  ;;  %v1178_v25 = vpop.f32.mrf.mxu2 }
 0x332   : > { %2858 = vadd.xlane.f32.xlu1 %v8427_v41  ;;  %v1573_v41 = vmul.f32 1.442695, %v1528_v6  ;;  %v1575_v57 = vmul.f32 1.442695, %v1529_v18  ;;  %v2802_v6 = vmul.f32 1.442695, %v2743_v5  ;;  %v1530_v33 = vsub.f32 %v8240_v22, %v1482_v49 }
 0x333   : > { %1631 = vadd.xlane.f32.xlu0 %v8429_v24  ;;  %v2804_v5 = vmul.f32 1.442695, %v2744_v27 }
 0x334   : > { %1503 = vmax.xlane.f32.xlu2 %v8432_v8  ;;  %6782 = vpow2.f32 %v1573_v41  ;;  %v1577_v47 = vmul.f32 1.442695, %v1530_v33 }
 0x335   : > { %v8441_v51 = vpop.xlane.xlu1 %2840  ;;  %6784 = vpow2.f32 %v1575_v57  ;;  %v8500_v57 = vadd.f32 %v1178_v25, %v8050_v44 }
 0x336   : > { %6786 = vpow2.f32 %v2802_v6 }
 0x337   : > { %v8443_v38 = vpop.xlane.xlu2 %2710  ;;  %6788 = vrcp.f32 %v8366_v16 }
 0x338   : > { %v2745_v22 = vsub.f32 %v8248_v3, %v8443_v38  ;;  %6790 = vpow2.f32 %v2804_v5 }
 0x339   : > { %v8458_v34 = vpop.xlane.xlu0 %2712  ;;  %6792 = vpow2.f32 %v1577_v47  ;;  %v1180_v16 = vpop.f32.mrf.mxu2 }
 0x33a   : > { %1633 = vadd.xlane.f32.xlu1 %v8445_v45  ;;  %v8463_v45 = vpop.eup %6776  ;;  %v2806_v33 = vmul.f32 1.442695, %v2745_v22  ;;  %v8516_v3 = vadd.f32 %v1180_v16, %v8050_v44  ;;  %v2746_v44 = vsub.f32 %v8251_v20, %v8458_v34 }
 0x33b   : > { %1505 = vmax.xlane.f32.xlu0 %v8448_v59  ;;  %v8466_v28 = vpop.eup %6778 }
 0x33c   : > { %2860 = vadd.xlane.f32.xlu2 %v8451_v58  ;;  %v8477_v2 = vpop.eup %6780 }
 0x33d   : > { %v1484_v54 = vpop.xlane.xlu1 %1483  ;;  %11393 = vst [vmem:[#allocation45_spill] sm:$0xff] %v8477_v2  ;;  %v8479_v46 = vpop.eup %6782 }
 0x33e   : > { %v1531_v49 = vsub.f32 %v8259_v40, %v1484_v54 }
 0x33f   : > { %v1612_v15 = vpop.xlane.xlu2 %1611 }
 0x340   : > { %6794 = vrcp.f32 %v1612_v15  ;;  %v1579_v38 = vmul.f32 1.442695, %v1531_v49 }
 0x341   : > { %6796 = vrcp.f32 %v8393_v12 }
 0x342   : > { %1507 = vmax.xlane.f32.xlu1 %v8461_v13  ;;  %6798 = vpow2.f32 %v2806_v33  ;;  %v2808_v33 = vmul.f32 1.442695, %v2746_v44 }
 0x343   : > { %2862 = vadd.xlane.f32.xlu0 %v8463_v45  ;;  %6800 = vpow2.f32 %v1579_v38 }
 0x344   : > { %1635 = vadd.xlane.f32.xlu2 %v8466_v28  ;;  %v1614_v26 = vpop.xlane.xlu0 %1613  ;;  %6802 = vrcp.f32 %v8361_v61 }
 0x345   : > { %v8473_v30 = vpop.xlane.xlu1 %2714  ;;  %6804 = vrcp.f32 %v1614_v26 }
 0x346   : > { %v2747_v61 = vsub.f32 %v8266_v9, %v8473_v30  ;;  %6806 = vpow2.f32 %v2808_v33 }
 0x347   : > { %v8475_v62 = vpop.xlane.xlu2 %2842 }
 0x34a   : > { %2864 = vadd.xlane.f32.xlu1 %v8477_v2  ;;  %v8496_v2 = vpop.eup %6784 }
 0x34b   : > { %1637 = vadd.xlane.f32.xlu0 %v8479_v46  ;;  %v8503_v42 = vpop.eup %6786 }
 0x34c   : > { %1509 = vmax.xlane.f32.xlu2 %v8482_v14  ;;  %v8490_v41 = vpop.xlane.xlu0 %1487  ;;  %v6789_v27 = vpop.eup %6788 }
 0x34d   : > { %v8492_v18 = vpop.xlane.xlu1 %3004  ;;  %v8518_v5 = vpop.eup %6790  ;;  %v2918_v40 = vmul.f32 %v6789_v27, %v8192_v60 }
 0x34e   : > { %11394 = vst [vmem:[#allocation46_spill] sm:$0xff] %v8492_v18  ;;  %v8522_v54 = vpop.eup %6792 }
 0x34f   : > { %v8494_v11 = vpop.xlane.xlu2 %1485  ;;  %11396 = vst [vmem:[#allocation48_spill] sm:$0xff] %v8518_v5  ;;  %v6795_v15 = vpop.eup %6794  ;;  %v2950_v49 = vmax.f32 %v2918_v40, 0.001 }
 0x350   : > { %v6797_v47 = vpop.eup %6796  ;;  %v1707_v16 = vmul.f32 %v6795_v15, %v8262_v39 }
 0x351   : > { %v8534_v27 = vpop.eup %6798  ;;  %v2919_v38 = vmul.f32 %v6797_v47, %v8208_v36  ;;  %v2982_v20 = vmul.f32 %v8278_v50, %v2950_v49  ;;  %v2810_v47 = vmul.f32 1.442695, %v2747_v61 }
 0x352   : > { %1639 = vadd.xlane.f32.xlu1 %v8496_v2  ;;  %v1739_v34 = vmax.f32 %v1707_v16, 0.001  ;;  %v1532_v16 = vsub.f32 %v8285_v0, %v8494_v11 }
 0x353   : > { %1511 = vmax.xlane.f32.xlu0 %v8500_v57  ;;  %v2951_v26 = vmax.f32 %v2919_v38, 0.001 }
 0x354   : > { %2866 = vadd.xlane.f32.xlu2 %v8503_v42  ;;  %v8510_v25 = vpop.xlane.xlu0 %2844  ;;  %v1774_v49 = vmul.f32 %v8278_v50, %v1739_v34 }
 0x355   : > { %v1616_v6 = vpop.xlane.xlu1 %1615 }
 0x356   : > { %6808 = vrcp.f32 %v1616_v6  ;;  %v1533_v6 = vsub.f32 %v8281_v31, %v8490_v41 }
 0x357   : > { %v8512_v18 = vpop.xlane.xlu2 %3006  ;;  %6810 = vpow2.f32 %v2810_v47 }
 0x358   : > { %11395 = vst [vmem:[#allocation47_spill] sm:$0xff] %v8512_v18  ;;  %v8537_v18 = vpop.eup %6800  ;;  %v1583_v11 = vmul.f32 1.442695, %v1533_v6 }
 0x359   : > { %v6803_v39 = vpop.eup %6802 }
 0x35a   : > { %1513 = vmax.xlane.f32.xlu1 %v8516_v3  ;;  %v6805_v36 = vpop.eup %6804 }
 0x35b   : > { %2868 = vadd.xlane.f32.xlu0 %v8518_v5  ;;  %v2983_v5 = vmul.f32 %v8278_v50, %v2951_v26  ;;  %v1708_v9 = vmul.f32 %v6805_v36, %v8269_v1  ;;  %v8552_v30 = vpop.eup %6806  ;;  %v1581_v1 = vmul.f32 1.442695, %v1532_v16 }
 0x35c   : > { %1641 = vadd.xlane.f32.xlu2 %v8522_v54 }
 0x35d   : > { %v8528_v12 = vpop.xlane.xlu1 %1489  ;;  %v1740_v61 = vmax.f32 %v1708_v9, 0.001 }
 0x35e   : > { %v8530_v22 = vpop.xlane.xlu0 %3008  ;;  %v1534_v41 = vsub.f32 %v8302_v21, %v8528_v12  ;;  %v11399_v12 = vld [vmem:[#allocation33_spill] sm:$0xff] }
 0x35f   : > { %11397 = vst [vmem:[#allocation49_spill] sm:$0xff] %v8530_v22  ;;  %v1618_v60 = vpop.xlane.xlu2 %1617  ;;  %v2917_v22 = vmul.f32 %v6803_v39, %v8187_v10  ;;  %v6809_v10 = vpop.eup %6808  ;;  %v1775_v31 = vmul.f32 %v8278_v50, %v1740_v61 }
 0x360   : > { %6812 = vrcp.f32 %v1618_v60  ;;  %v8568_v39 = vpop.eup %6810  ;;  %v1585_v9 = vmul.f32 1.442695, %v1534_v41  ;;  %v11401_v41 = vld [vmem:[#allocation34_spill] sm:$0xff] }
 0x361   : > { %v2949_v33 = vmax.f32 %v2917_v22, 0.001  ;;  %6814 = vrcp.f32 %v8415_v32 }
 0x362   : > { %2870 = vadd.xlane.f32.xlu1 %v8534_v27  ;;  %6816 = vpow2.f32 %v1581_v1 }
 0x363   : > { %1643 = vadd.xlane.f32.xlu0 %v8537_v18  ;;  %v2981_v0 = vmul.f32 %v8278_v50, %v2949_v33  ;;  %6818 = vpow2.f32 %v1583_v11 }
 0x364   : > { %3024 = vadd.xlane.f32.xlu2 %v2982_v20  ;;  %6820 = vrcp.f32 %v8410_v4 }
 0x365   : > { %v8544_v40 = vpop.xlane.xlu1 %2846  ;;  %6822 = vrcp.f32 %v8441_v51 }
 0x366   : > { %v1620_v15 = vpop.xlane.xlu0 %1619  ;;  %v6813_v60 = vpop.eup %6812 }
 0x367   : > { %v8546_v44 = vpop.xlane.xlu2 %1491  ;;  %v6815_v47 = vpop.eup %6814  ;;  %v1710_v16 = vmul.f32 %v6813_v60, %v8306_v19  ;;  %6824 = vrcp.f32 %v1620_v15 }
 0x368   : > { %v8581_v33 = vpop.eup %6816  ;;  %v2921_v6 = vmul.f32 %v6815_v47, %v11399_v12  ;;  %6826 = vpow2.f32 %v1585_v9 }
 0x369   : > { %v1742_v4 = vmax.f32 %v1710_v16, 0.001  ;;  %v1535_v16 = vsub.f32 %v8318_v43, %v8546_v44 }
 0x36a   : > { %1806 = vadd.xlane.f32.xlu1 %v1774_v49 }
 0x36b   : > { %3026 = vadd.xlane.f32.xlu0 %v2983_v5  ;;  %v11398_v5 = vld [vmem:[#allocation36_spill] sm:$0xff] }
 0x36c   : > { %2872 = vadd.xlane.f32.xlu2 %v8552_v30  ;;  %v1709_v22 = vmul.f32 %v6809_v10, %v11398_v5  ;;  %v8586_v10 = vpop.eup %6818  ;;  %v1777_v5 = vmul.f32 %v8278_v50, %v1742_v4 }
 0x36d   : > { %v8559_v38 = vpop.xlane.xlu1 %3010  ;;  %v6821_v51 = vpop.eup %6820 }
 0x36e   : > { %v8561_v20 = vpop.xlane.xlu0 %1493  ;;  %v1741_v36 = vmax.f32 %v1709_v22, 0.001  ;;  %v6823_v1 = vpop.eup %6822  ;;  %v11400_v22 = vld [vmem:[#allocation32_spill] sm:$0xff] }
 0x36f   : > { %v8563_v34 = vpop.xlane.xlu2 %2848  ;;  %v6825_v15 = vpop.eup %6824  ;;  %v2922_v60 = vmul.f32 %v6823_v1, %v11401_v41 }
 0x370   : > { %v1776_v21 = vmul.f32 %v8278_v50, %v1741_v36  ;;  %v8594_v36 = vpop.eup %6826  ;;  %v1711_v9 = vmul.f32 %v6825_v15, %v8315_v52 }
 0x372   : > { %3022 = vadd.xlane.f32.xlu1 %v2981_v0  ;;  %v2953_v0 = vmax.f32 %v2921_v6, 0.001  ;;  %v2954_v6 = vmax.f32 %v2922_v60, 0.001  ;;  %v1743_v1 = vmax.f32 %v1711_v9, 0.001 }
 0x373   : > { %2874 = vadd.xlane.f32.xlu0 %v8568_v39 }
 0x374   : > { %1808 = vadd.xlane.f32.xlu2 %v1775_v31  ;;  %v2920_v31 = vmul.f32 %v6821_v51, %v11400_v22  ;;  %v2985_v47 = vmul.f32 %v8278_v50, %v2953_v0  ;;  %v2986_v44 = vmul.f32 %v8278_v50, %v2954_v6 }
 0x375   : > { %v1622_v26 = vpop.xlane.xlu1 %1621 }
 0x376   : > { %v8574_v32 = vpop.xlane.xlu0 %2850  ;;  %6828 = vrcp.f32 %v1622_v26  ;;  %v2952_v26 = vmax.f32 %v2920_v31, 0.001 }
 0x377   : > { %v8577_v49 = vpop.xlane.xlu2 %3012 }
 0x378   : > { %v2984_v52 = vmul.f32 %v8278_v50, %v2952_v26 }
 0x37a   : > { %1645 = vadd.xlane.f32.xlu1 %v8581_v33 }
 0x37b   : > { %1810 = vadd.xlane.f32.xlu0 %v1776_v21  ;;  %v1536_v21 = vsub.f32 %v8327_v55, %v8561_v20  ;;  %v1778_v55 = vmul.f32 %v8278_v50, %v1743_v1 }
 0x37c   : > { %1647 = vadd.xlane.f32.xlu2 %v8586_v10  ;;  %v6829_v4 = vpop.eup %6828 }
 0x37d   : > { %v1496_v61 = vpop.xlane.xlu1 %1495  ;;  %v1589_v43 = vmul.f32 1.442695, %v1536_v21  ;;  %v1712_v15 = vmul.f32 %v6829_v4, %v8335_v56 }
 0x37e   : > { %v8589_v19 = vpop.xlane.xlu0 %3014  ;;  %v1537_v20 = vsub.f32 %v8350_v53, %v1496_v61  ;;  %v11402_v61 = vld [vmem:[#allocation37_spill] sm:$0xff] }
 0x37f   : > { %v1624_v11 = vpop.xlane.xlu2 %1623  ;;  %v1744_v31 = vmax.f32 %v1712_v15, 0.001 }
 0x380   : > { %6830 = vrcp.f32 %v1624_v11  ;;  %v1591_v56 = vmul.f32 1.442695, %v1537_v20 }
 0x381   : > { %6832 = vrcp.f32 %v8510_v25  ;;  %v1779_v53 = vmul.f32 %v8278_v50, %v1744_v31 }
 0x382   : > { %1812 = vadd.xlane.f32.xlu1 %v1777_v5  ;;  %v1587_v5 = vmul.f32 1.442695, %v1535_v16 }
 0x383   : > { %1649 = vadd.xlane.f32.xlu0 %v8594_v36 }
 0x384   : > { %3030 = vadd.xlane.f32.xlu2 %v2985_v47  ;;  %6834 = vpow2.f32 %v1587_v5 }
 0x385   : > { %v8603_v12 = vpop.xlane.xlu1 %2852  ;;  %6836 = vpow2.f32 %v1589_v43 }
 0x386   : > { %v1626_v51 = vpop.xlane.xlu0 %1625  ;;  %v6831_v22 = vpop.eup %6830  ;;  %6838 = vrcp.f32 %v8475_v62 }
 0x387   : > { %v1498_v0 = vpop.xlane.xlu2 %1497  ;;  %v6833_v25 = vpop.eup %6832  ;;  %6840 = vrcp.f32 %v8544_v40  ;;  %v1713_v47 = vmul.f32 %v6831_v22, %v8356_v35 }
 0x388   : > { %6842 = vrcp.f32 %v1626_v51  ;;  %v2924_v16 = vmul.f32 %v6833_v25, %v11402_v61  ;;  %v1538_v22 = vsub.f32 %v8371_v23, %v1498_v0 }
 0x389   : > { %6844 = vpow2.f32 %v1591_v56  ;;  %v1745_v62 = vmax.f32 %v1713_v47, 0.001 }
 0x38a   : > { %3028 = vadd.xlane.f32.xlu1 %v2984_v52  ;;  %v8618_v9 = vpop.eup %6834  ;;  %v2956_v4 = vmax.f32 %v2924_v16, 0.001  ;;  %v11403_v52 = vld [vmem:[#allocation35_spill] sm:$0xff]  ;;  %v1593_v16 = vmul.f32 1.442695, %v1538_v22 }
 0x38b   : > { %3032 = vadd.xlane.f32.xlu0 %v2986_v44  ;;  %v8623_v26 = vpop.eup %6836  ;;  %v1780_v5 = vmul.f32 %v8278_v50, %v1745_v62 }
 0x38c   : > { %1814 = vadd.xlane.f32.xlu2 %v1778_v55  ;;  %v6839_v40 = vpop.eup %6838  ;;  %v2988_v55 = vmul.f32 %v8278_v50, %v2956_v4 }
 0x38d   : > { %v8611_v11 = vpop.xlane.xlu1 %3016  ;;  %v6841_v6 = vpop.eup %6840  ;;  %v2923_v43 = vmul.f32 %v6839_v40, %v11403_v52 }
 0x38e   : > { %v1500_v41 = vpop.xlane.xlu0 %1499  ;;  %v6843_v51 = vpop.eup %6842  ;;  %v2925_v44 = vmul.f32 %v6841_v6, %v8311_v63 }
 0x38f   : > { %v8614_v60 = vpop.xlane.xlu2 %2854  ;;  %v8633_v15 = vpop.eup %6844  ;;  %v1714_v20 = vmul.f32 %v6843_v51, %v8368_v17  ;;  %v2955_v31 = vmax.f32 %v2923_v43, 0.001  ;;  %v1539_v25 = vsub.f32 %v8382_v29, %v1500_v41 }
 0x390   : > { %v2957_v47 = vmax.f32 %v2925_v44, 0.001  ;;  %v11404_v44 = vld [vmem:[#allocation39_spill] sm:$0xff] }
 0x391   : > { %v1746_v63 = vmax.f32 %v1714_v20, 0.001  ;;  %v2987_v17 = vmul.f32 %v8278_v50, %v2955_v31  ;;  %v1595_v40 = vmul.f32 1.442695, %v1539_v25 }
 0x392   : > { %1651 = vadd.xlane.f32.xlu1 %v8618_v9  ;;  %v2989_v23 = vmul.f32 %v8278_v50, %v2957_v47 }
 0x393   : > { %1816 = vadd.xlane.f32.xlu0 %v1779_v53  ;;  %v1781_v29 = vmul.f32 %v8278_v50, %v1746_v63  ;;  %v11405_v63 = vld [vmem:[#allocation38_spill] sm:$0xff] }
 0x394   : > { %1653 = vadd.xlane.f32.xlu2 %v8623_v26 }
 0x395   : > { %v1628_v21 = vpop.xlane.xlu1 %1627 }
 0x396   : > { %v8626_v35 = vpop.xlane.xlu0 %2856  ;;  %6846 = vrcp.f32 %v1628_v21 }
 0x397   : > { %v8628_v1 = vpop.xlane.xlu2 %3018  ;;  %6848 = vrcp.f32 %v8574_v32 }
 0x39a   : > { %1818 = vadd.xlane.f32.xlu1 %v1780_v5 }
 0x39b   : > { %1655 = vadd.xlane.f32.xlu0 %v8633_v15 }
 0x39c   : > { %3036 = vadd.xlane.f32.xlu2 %v2988_v55  ;;  %v6847_v53 = vpop.eup %6846 }
 0x39d   : > { %v1502_v56 = vpop.xlane.xlu1 %1501  ;;  %v1715_v0 = vmul.f32 %v6847_v53, %v8397_v48  ;;  %v6849_v6 = vpop.eup %6848 }
 0x39e   : > { %v8640_v61 = vpop.xlane.xlu0 %3020  ;;  %v1540_v41 = vsub.f32 %v8413_v7, %v1502_v56  ;;  %v2927_v55 = vmul.f32 %v6849_v6, %v11404_v44 }
 0x39f   : > { %v1630_v62 = vpop.xlane.xlu2 %1629  ;;  %v1747_v32 = vmax.f32 %v1715_v0, 0.001 }
 0x3a0   : > { %6850 = vrcp.f32 %v1630_v62  ;;  %v1597_v48 = vmul.f32 1.442695, %v1540_v41  ;;  %v2959_v25 = vmax.f32 %v2927_v55, 0.001  ;;  %v11406_v62 = vld [vmem:[#allocation40_spill] sm:$0xff] }
 0x3a1   : > { %6852 = vpow2.f32 %v1593_v16  ;;  %v1782_v7 = vmul.f32 %v8278_v50, %v1747_v32  ;;  %v11407_v55 = vld [vmem:[#allocation44_spill] sm:$0xff] }
 0x3a2   : > { %3034 = vadd.xlane.f32.xlu1 %v2987_v17  ;;  %6854 = vpow2.f32 %v1595_v40 }
 0x3a3   : > { %3038 = vadd.xlane.f32.xlu0 %v2989_v23  ;;  %6856 = vrcp.f32 %v8563_v34  ;;  %v2991_v23 = vmul.f32 %v8278_v50, %v2959_v25 }
 0x3a4   : > { %1820 = vadd.xlane.f32.xlu2 %v1781_v29  ;;  %6858 = vrcp.f32 %v8603_v12 }
 0x3a5   : > { %v8648_v21 = vpop.xlane.xlu1 %2858 }
 0x3a6   : > { %v1632_v4 = vpop.xlane.xlu0 %1631  ;;  %v6851_v51 = vpop.eup %6850 }
 0x3a7   : > { %v1504_v5 = vpop.xlane.xlu2 %1503  ;;  %v1716_v52 = vmul.f32 %v6851_v51, %v8419_v37  ;;  %v8653_v43 = vpop.eup %6852  ;;  %6860 = vrcp.f32 %v1632_v4 }
 0x3a8   : > { %v8658_v20 = vpop.eup %6854  ;;  %6862 = vpow2.f32 %v1597_v48  ;;  %v1541_v29 = vsub.f32 %v8432_v8, %v1504_v5 }
 0x3a9   : > { %v1748_v34 = vmax.f32 %v1716_v52, 0.001  ;;  %v6857_v12 = vpop.eup %6856 }
 0x3aa   : > { %1657 = vadd.xlane.f32.xlu1 %v8653_v43  ;;  %v6859_v31 = vpop.eup %6858  ;;  %v2926_v16 = vmul.f32 %v6857_v12, %v11405_v63 }
 0x3ab   : > { %1822 = vadd.xlane.f32.xlu0 %v1782_v7  ;;  %v1783_v53 = vmul.f32 %v8278_v50, %v1748_v34  ;;  %v2928_v17 = vmul.f32 %v6859_v31, %v11406_v62  ;;  %v1599_v7 = vmul.f32 1.442695, %v1541_v29  ;;  %v8675_v50 = vld [vmem:[#allocation8] ss:$0 sm:$0xff]  ;;  %v11408_v62 = vld [vmem:[#allocation42_spill] sm:$0xff] }
 0x3ac   : > { %1659 = vadd.xlane.f32.xlu2 %v8658_v20  ;;  %v2958_v41 = vmax.f32 %v2926_v16, 0.001 }
 0x3ad   : > { %v1634_v22 = vpop.xlane.xlu1 %1633  ;;  %v6861_v56 = vpop.eup %6860  ;;  %v2960_v4 = vmax.f32 %v2928_v17, 0.001 }
 0x3ae   : > { %v1506_v37 = vpop.xlane.xlu0 %1505  ;;  %6864 = vrcp.f32 %v1634_v22  ;;  %v8666_v40 = vpop.eup %6862  ;;  %v1717_v0 = vmul.f32 %v6861_v56, %v8429_v24  ;;  %v2990_v24 = vmul.f32 %v8675_v50, %v2958_v41 }
 0x3af   : > { %v8661_v47 = vpop.xlane.xlu2 %2860  ;;  %v1542_v32 = vsub.f32 %v8448_v59, %v1506_v37  ;;  %v2992_v5 = vmul.f32 %v8675_v50, %v2960_v4 }
 0x3b0   : > { %v1749_v52 = vmax.f32 %v1717_v0, 0.001 }
 0x3b1   : > { %v1601_v8 = vmul.f32 1.442695, %v1542_v32 }
 0x3b2   : > { %1824 = vadd.xlane.f32.xlu1 %v1783_v53  ;;  %v1784_v34 = vmul.f32 %v8675_v50, %v1749_v52 }
 0x3b3   : > { %1661 = vadd.xlane.f32.xlu0 %v8666_v40 }
 0x3b4   : > { %3042 = vadd.xlane.f32.xlu2 %v2991_v23  ;;  %v6865_v51 = vpop.eup %6864 }
 0x3b5   : > { %v1508_v6 = vpop.xlane.xlu1 %1507  ;;  %v1718_v59 = vmul.f32 %v6865_v51, %v11407_v55  ;;  %v11409_v51 = vld [vmem:[#allocation41_spill] sm:$0xff] }
 0x3b6   : > { %v8673_v48 = vpop.xlane.xlu0 %2862  ;;  %v1543_v12 = vsub.f32 %v8461_v13, %v1508_v6 }
 0x3b7   : > { %v1636_v44 = vpop.xlane.xlu2 %1635  ;;  %v1750_v31 = vmax.f32 %v1718_v59, 0.001 }
 0x3b8   : > { %6866 = vrcp.f32 %v1636_v44  ;;  %v1603_v53 = vmul.f32 1.442695, %v1543_v12 }
 0x3b9   : > { %6868 = vrcp.f32 %v8626_v35  ;;  %v1785_v13 = vmul.f32 %v8675_v50, %v1750_v31 }
 0x3ba   : > { %3040 = vadd.xlane.f32.xlu1 %v2990_v24  ;;  %6870 = vpow2.f32 %v1599_v7  ;;  %v11410_v7 = vld [vmem:[#allocation43_spill] sm:$0xff] }
 0x3bb   : > { %3044 = vadd.xlane.f32.xlu0 %v2992_v5  ;;  %6872 = vpow2.f32 %v1601_v8 }
 0x3bc   : > { %1826 = vadd.xlane.f32.xlu2 %v1784_v34  ;;  %6874 = vrcp.f32 %v8614_v60 }
 0x3bd   : > { %v8683_v22 = vpop.xlane.xlu1 %2864  ;;  %6876 = vrcp.f32 %v8648_v21 }
 0x3be   : > { %v6867_v37 = vpop.eup %6866  ;;  %v1638_v25 = vpop.xlane.xlu0 %1637 }
 0x3bf   : > { %v6869_v35 = vpop.eup %6868  ;;  %v1510_v56 = vpop.xlane.xlu2 %1509  ;;  %v1719_v63 = vmul.f32 %v6867_v37, %v8466_v28  ;;  %6878 = vrcp.f32 %v1638_v25 }
 0x3c0   : > { %v8688_v16 = vpop.eup %6870  ;;  %v2930_v17 = vmul.f32 %v6869_v35, %v11408_v62  ;;  %6880 = vpow2.f32 %v1603_v53  ;;  %v1544_v55 = vsub.f32 %v8482_v14, %v1510_v56 }
 0x3c1   : > { %v8693_v23 = vpop.eup %6872  ;;  %v1751_v60 = vmax.f32 %v1719_v63, 0.001 }
 0x3c2   : > { %1663 = vadd.xlane.f32.xlu1 %v8688_v16  ;;  %v6875_v21 = vpop.eup %6874  ;;  %v2962_v41 = vmax.f32 %v2930_v17, 0.001  ;;  %v1605_v53 = vmul.f32 1.442695, %v1544_v55 }
 0x3c3   : > { %1828 = vadd.xlane.f32.xlu0 %v1785_v13  ;;  %v6877_v29 = vpop.eup %6876  ;;  %v1786_v4 = vmul.f32 %v8675_v50, %v1751_v60  ;;  %v2929_v52 = vmul.f32 %v6875_v21, %v11409_v51 }
 0x3c4   : > { %1665 = vadd.xlane.f32.xlu2 %v8693_v23  ;;  %v2931_v44 = vmul.f32 %v6877_v29, %v11410_v7  ;;  %v2994_v8 = vmul.f32 %v8675_v50, %v2962_v41 }
 0x3c5   : > { %v1640_v0 = vpop.xlane.xlu1 %1639  ;;  %v6879_v32 = vpop.eup %6878  ;;  %v2961_v59 = vmax.f32 %v2929_v52, 0.001 }
 0x3c6   : > { %v1512_v28 = vpop.xlane.xlu0 %1511  ;;  %6882 = vrcp.f32 %v1640_v0  ;;  %v8699_v24 = vpop.eup %6880  ;;  %v1720_v5 = vmul.f32 %v6879_v32, %v8479_v46  ;;  %v2963_v31 = vmax.f32 %v2931_v44, 0.001 }
 0x3c7   : > { %v2867_v6 = vpop.xlane.xlu2 %2866  ;;  %v1545_v34 = vsub.f32 %v8500_v57, %v1512_v28  ;;  %v2993_v13 = vmul.f32 %v8675_v50, %v2961_v59 }
 0x3c8   : > { %v1752_v35 = vmax.f32 %v1720_v5, 0.001  ;;  %v2995_v14 = vmul.f32 %v8675_v50, %v2963_v31 }
 0x3c9   : > { %v1607_v46 = vmul.f32 1.442695, %v1545_v34 }
 0x3ca   : > { %1830 = vadd.xlane.f32.xlu1 %v1786_v4  ;;  %v1787_v57 = vmul.f32 %v8675_v50, %v1752_v35  ;;  %v11411_v35 = vld [vmem:[#allocation45_spill] sm:$0xff] }
 0x3cb   : > { %1667 = vadd.xlane.f32.xlu0 %v8699_v24 }
 0x3cc   : > { %3048 = vadd.xlane.f32.xlu2 %v2994_v8  ;;  %v6883_v37 = vpop.eup %6882 }
 0x3cd   : > { %v1514_v12 = vpop.xlane.xlu1 %1513  ;;  %v1721_v56 = vmul.f32 %v6883_v37, %v8496_v2 }
 0x3ce   : > { %v2869_v25 = vpop.xlane.xlu0 %2868  ;;  %v1546_v62 = vsub.f32 %v8516_v3, %v1514_v12 }
 0x3cf   : > { %v1642_v63 = vpop.xlane.xlu2 %1641  ;;  %v1753_v60 = vmax.f32 %v1721_v56, 0.001 }
 0x3d0   : > { %6884 = vrcp.f32 %v1642_v63  ;;  %v1609_v2 = vmul.f32 1.442695, %v1546_v62 }
 0x3d1   : > { %6886 = vrcp.f32 %v8673_v48  ;;  %v1788_v3 = vmul.f32 %v8675_v50, %v1753_v60 }
 0x3d2   : > { %3046 = vadd.xlane.f32.xlu1 %v2993_v13  ;;  %6888 = vpow2.f32 %v1605_v53 }
 0x3d3   : > { %3050 = vadd.xlane.f32.xlu0 %v2995_v14  ;;  %6890 = vpow2.f32 %v1607_v46  ;;  %v8736_v14 = vpop.f32.mrf.mxu0 }
 0x3d4   : > { %1832 = vadd.xlane.f32.xlu2 %v1787_v57  ;;  %6892 = vrcp.f32 %v8661_v47 }
 0x3d5   : > { %v2871_v17 = vpop.xlane.xlu1 %2870  ;;  %6894 = vrcp.f32 %v8683_v22 }
 0x3d6   : > { %v6885_v21 = vpop.eup %6884  ;;  %v1644_v0 = vpop.xlane.xlu0 %1643 }
 0x3d7   : > { %v6887_v29 = vpop.eup %6886  ;;  %v8713_v48 = vpop.xlane.xlu2 %3024  ;;  %v1722_v28 = vmul.f32 %v6885_v21, %v8522_v54  ;;  %6896 = vrcp.f32 %v1644_v0 }
 0x3d8   : > { %v8717_v41 = vpop.eup %6888  ;;  %v2933_v32 = vmul.f32 %v6887_v29, %v8463_v45  ;;  %6898 = vpow2.f32 %v1609_v2 }
 0x3d9   : > { %v8722_v4 = vpop.eup %6890  ;;  %v1754_v47 = vmax.f32 %v1722_v28, 0.001  ;;  %6900 = vrcp.f32 %v2867_v6 }
 0x3da   : > { %1669 = vadd.xlane.f32.xlu1 %v8717_v41  ;;  %v6893_v22 = vpop.eup %6892  ;;  %v2965_v5 = vmax.f32 %v2933_v32, 0.001  ;;  %6902 = vrcp.f32 %v2871_v17 }
 0x3db   : > { %1834 = vadd.xlane.f32.xlu0 %v1788_v3  ;;  %v6895_v52 = vpop.eup %6894  ;;  %v1789_v12 = vmul.f32 %v8675_v50, %v1754_v47  ;;  %v2932_v31 = vmul.f32 %v6893_v22, %v8451_v58  ;;  %6904 = vrcp.f32 %v2869_v25  ;;  %v11412_v47 = vld [vmem:[#allocation48_spill] sm:$0xff] }
 0x3dc   : > { %1671 = vadd.xlane.f32.xlu2 %v8722_v4  ;;  %v2934_v53 = vmul.f32 %v6895_v52, %v11411_v35  ;;  %v2997_v6 = vmul.f32 %v8675_v50, %v2965_v5 }
 0x3dd   : > { %v1807_v51 = vpop.xlane.xlu1 %1806  ;;  %v6897_v55 = vpop.eup %6896  ;;  %v2964_v58 = vmax.f32 %v2932_v31, 0.001 }
 0x3de   : > { %v1902_v54 = vperm.slane %v1807_v51, 0  ;;  %v1903_v7 = vperm.slane %v1807_v51, 1  ;;  %v1904_v44 = vperm.slane %v1807_v51, 2  ;;  %v8725_v8 = vpop.xlane.xlu0 %3026  ;;  %v1905_v59 = vperm.slane %v1807_v51, 3  ;;  %v8732_v63 = vpop.eup %6898 }
 0x3df   : > { %v8727_v45 = vpop.xlane.xlu2 %2872  ;;  %v1906_v34 = vperm.slane %v1807_v51, 4  ;;  %v1907_v37 = vperm.slane %v1807_v51, 5  ;;  %v1908_v13 = vperm.slane %v1807_v51, 6  ;;  %v1723_v46 = vmul.f32 %v6897_v55, %v8537_v18  ;;  %v6901_v25 = vpop.eup %6900 }
 0x3e0   : > { %2158 = vst [vmem:[#allocation1] ss:$9 sm:$0xff] %v1902_v54  ;;  %v1909_v56 = vperm.slane %v1807_v51, 7  ;;  %v2966_v62 = vmax.f32 %v2934_v53, 0.001  ;;  %v6903_v17 = vpop.eup %6902  ;;  %v2996_v29 = vmul.f32 %v8675_v50, %v2964_v58  ;;  %v2935_v2 = vmul.f32 %v6901_v25, %v8503_v42 }
 0x3e1   : > { %2160 = vst [vmem:[#allocation1 + $0x1] ss:$9 sm:$0xff] %v1903_v7  ;;  %v1755_v21 = vmax.f32 %v1723_v46, 0.001  ;;  %v6905_v0 = vpop.eup %6904  ;;  %v2937_v3 = vmul.f32 %v6903_v17, %v8534_v27  ;;  %v8747_v7 = vpop.f32.mrf.mxu0 }
 0x3e2   : > { %2162 = vst [vmem:[#allocation1 + $0x2] ss:$9 sm:$0xff] %v1904_v44  ;;  %1836 = vadd.xlane.f32.xlu1 %v1789_v12  ;;  %v2998_v28 = vmul.f32 %v8675_v50, %v2966_v62  ;;  %v2936_v22 = vmul.f32 %v6905_v0, %v11412_v47  ;;  %v2967_v54 = vmax.f32 %v2935_v2, 0.001 }
 0x3e3   : > { %2164 = vst [vmem:[#allocation1 + $0x3] ss:$9 sm:$0xff] %v1905_v59  ;;  %1673 = vadd.xlane.f32.xlu0 %v8732_v63  ;;  %v1790_v32 = vmul.f32 %v8675_v50, %v1755_v21  ;;  %v2969_v42 = vmax.f32 %v2937_v3, 0.001 }
 0x3e4   : > { %2166 = vst [vmem:[#allocation1 + $0x4] ss:$9 sm:$0xff] %v1906_v34  ;;  %3054 = vadd.xlane.f32.xlu2 %v2997_v6  ;;  %v2968_v34 = vmax.f32 %v2936_v22, 0.001  ;;  %v2999_v53 = vmul.f32 %v8675_v50, %v2967_v54 }
 0x3e5   : > { %2168 = vst [vmem:[#allocation1 + $0x5] ss:$9 sm:$0xff] %v1907_v37  ;;  %v8739_v57 = vpop.xlane.xlu1 %3022  ;;  %v3001_v6 = vmul.f32 %v8675_v50, %v2969_v42 }
 0x3e6   : > { %2170 = vst [vmem:[#allocation1 + $0x6] ss:$9 sm:$0xff] %v1908_v13  ;;  %v2875_v60 = vpop.xlane.xlu0 %2874 }
 0x3e7   : > { %2172 = vst [vmem:[#allocation1 + $0x7] ss:$9 sm:$0xff] %v1909_v56  ;;  %v1809_v18 = vpop.xlane.xlu2 %1808  ;;  %6906 = vrcp.f32 %v2875_v60  ;;  %v3000_v56 = vmul.f32 %v8675_v50, %v2968_v34 }
 0x3e8   : > { %v1910_v51 = vperm.slane %v1809_v18, 0  ;;  %v1911_v52 = vperm.slane %v1809_v18, 1  ;;  %v1912_v44 = vperm.slane %v1809_v18, 2  ;;  %v1913_v59 = vperm.slane %v1809_v18, 3 }
 0x3e9   : > { %v1914_v31 = vperm.slane %v1809_v18, 4  ;;  %v1915_v35 = vperm.slane %v1809_v18, 5  ;;  %v1916_v13 = vperm.slane %v1809_v18, 6  ;;  %v1917_v46 = vperm.slane %v1809_v18, 7  ;;  %v8758_v21 = vpop.f32.mrf.mxu0 }
 0x3ea   : > { %3052 = vadd.xlane.f32.xlu1 %v2996_v29 }
 0x3eb   : > { %3056 = vadd.xlane.f32.xlu0 %v2998_v28 }
 0x3ec   : > { %1838 = vadd.xlane.f32.xlu2 %v1790_v32 }
 0x3ed   : > { %v1646_v5 = vpop.xlane.xlu1 %1645  ;;  %v6907_v12 = vpop.eup %6906 }
 0x3ee   : > { %v8749_v55 = vld [vmem:[#allocation1] sm:$0xff]  ;;  %6908 = vrcp.f32 %v1646_v5  ;;  %v8751_v27 = vpop.xlane.xlu0 %1810  ;;  %v2939_v58 = vmul.f32 %v6907_v12, %v8568_v39 }
 0x3ef   : > { %11413 = vst [vmem:[#allocation36_spill] sm:$0xff] %v8749_v55  ;;  %v1648_v37 = vpop.xlane.xlu2 %1647  ;;  %v1918_v18 = vperm.slane %v8751_v27, 0  ;;  %v1919_v28 = vperm.slane %v8751_v27, 1  ;;  %v1920_v3 = vperm.slane %v8751_v27, 2  ;;  %v1923_v54 = vperm.slane %v8751_v27, 5 }
 0x3f0   : > { %2174 = vst [vmem:[#allocation1] ss:$9 sm:$0xff] %v1910_v51  ;;  %6910 = vrcp.f32 %v1648_v37  ;;  %v2971_v17 = vmax.f32 %v2939_v58, 0.001  ;;  %v1921_v51 = vperm.slane %v8751_v27, 3  ;;  %v1924_v42 = vperm.slane %v8751_v27, 6 }
 0x3f1   : > { %2175 = vst [vmem:[#allocation1 + $0x1] ss:$9 sm:$0xff] %v1911_v52  ;;  %6912 = vrcp.f32 %v8727_v45  ;;  %v1922_v52 = vperm.slane %v8751_v27, 4  ;;  %v1925_v37 = vperm.slane %v8751_v27, 7 }
 0x3f2   : > { %2176 = vst [vmem:[#allocation1 + $0x2] ss:$9 sm:$0xff] %v1912_v44  ;;  %3058 = vadd.xlane.f32.xlu1 %v2999_v53  ;;  %v3003_v39 = vmul.f32 %v8675_v50, %v2971_v17  ;;  %v7197_v44 = vld [vmem:[%s11307_s6] sm:$0xf] }
 0x3f3   : > { %2177 = vst [vmem:[#allocation1 + $0x3] ss:$9 sm:$0xff] %v1913_v59  ;;  %3062 = vadd.xlane.f32.xlu0 %v3001_v6  ;;  %v8779_v5 = vperm.slane %v7197_v44, 2 }
 0x3f4   : > { %2178 = vst [vmem:[#allocation1 + $0x4] ss:$9 sm:$0xff] %v1914_v31  ;;  %v6909_v25 = vpop.eup %6908  ;;  %3060 = vadd.xlane.f32.xlu2 %v3000_v56  ;;  %v8784_v31 = vpop.f32.mrf.mxu0 }
 0x3f5   : > { %2179 = vst [vmem:[#allocation1 + $0x5] ss:$9 sm:$0xff] %v1915_v35  ;;  %v1724_v62 = vmul.f32 %v6909_v25, %v8581_v33  ;;  %v8766_v33 = vpop.xlane.xlu1 %1812  ;;  %v11415_v35 = vld [vmem:[#allocation16_spill] sm:$0xff] }
 0x3f6   : > { %2180 = vst [vmem:[#allocation1 + $0x6] ss:$9 sm:$0xff] %v1916_v13  ;;  %v6911_v60 = vpop.eup %6910  ;;  %v1650_v0 = vpop.xlane.xlu0 %1649  ;;  %v8789_v53 = vadd.f32 %v11415_v35, %v8779_v5 }
 0x3f7   : > { %2181 = vst [vmem:[#allocation1 + $0x7] ss:$9 sm:$0xff] %v1917_v46  ;;  %v1756_v29 = vmax.f32 %v1724_v62, 0.001  ;;  %v1725_v2 = vmul.f32 %v6911_v60, %v8586_v10  ;;  %6914 = vrcp.f32 %v1650_v0  ;;  %v6913_v45 = vpop.eup %6912  ;;  %v8773_v10 = vpop.xlane.xlu2 %3030  ;;  %v1926_v62 = vperm.slane %v8766_v33, 0 }
 0x3f8   : > { %v2938_v34 = vmul.f32 %v6913_v45, %v8552_v30  ;;  %v1927_v0 = vperm.slane %v8766_v33, 1  ;;  %v1931_v45 = vperm.slane %v8766_v33, 5 }
 0x3f9   : > { %v1791_v32 = vmul.f32 %v8675_v50, %v1756_v29  ;;  %v1757_v47 = vmax.f32 %v1725_v2, 0.001  ;;  %v1928_v29 = vperm.slane %v8766_v33, 2  ;;  %v1930_v2 = vperm.slane %v8766_v33, 4 }
 0x3fa   : > { %v2970_v6 = vmax.f32 %v2938_v34, 0.001  ;;  %v11420_v34 = vld [vmem:[#allocation24_spill] sm:$0xff] }
 0x3fb   : > { %1840 = vadd.xlane.f32.xlu0 %v1791_v32  ;;  %v1792_v59 = vmul.f32 %v8675_v50, %v1757_v47  ;;  %v11419_v32 = vld [vmem:[#allocation20_spill] sm:$0xff] }
 0x3fc   : > { %3066 = vadd.xlane.f32.xlu2 %v3003_v39  ;;  %v3002_v58 = vmul.f32 %v8675_v50, %v2970_v6  ;;  %v8799_v25 = vpop.f32.mrf.mxu0  ;;  %v1929_v39 = vperm.slane %v8766_v33, 3  ;;  %v8821_v47 = vadd.f32 %v11419_v32, %v8779_v5 }
 0x3fd   : > { %v6915_v12 = vpop.eup %6914  ;;  %1842 = vadd.xlane.f32.xlu1 %v1792_v59  ;;  %v8792_v46 = vpop.xlane.xlu1 %3028 }
 0x3fe   : > { %v8769_v22 = vld [vmem:[#allocation1] sm:$0xff]  ;;  %v1726_v13 = vmul.f32 %v6915_v12, %v8594_v36  ;;  %v8832_v12 = vadd.f32 %v11420_v34, %v8779_v5 }
 0x3ff   : > { %11414 = vst [vmem:[#allocation33_spill] sm:$0xff] %v8769_v22  ;;  %v8795_v56 = vpop.xlane.xlu2 %1814  ;;  %v11416_v36 = vld [vmem:[#allocation22_spill] sm:$0xff] }
 0x400   : > { %2183 = vst [vmem:[#allocation1] ss:$9 sm:$0xff] %v1918_v18  ;;  %v1758_v30 = vmax.f32 %v1726_v13, 0.001  ;;  %v8804_v17 = vadd.f32 %v11416_v36, %v8779_v5  ;;  %v8809_v18 = vpop.xlane.xlu0 %3032  ;;  %v1935_v35 = vperm.slane %v8795_v56, 1  ;;  %v1936_v13 = vperm.slane %v8795_v56, 2 }
 0x401   : > { %2184 = vst [vmem:[#allocation1 + $0x1] ss:$9 sm:$0xff] %v1919_v28  ;;  %v11418_v28 = vld [vmem:[#allocation18_spill] sm:$0xff]  ;;  %v1939_v36 = vperm.slane %v8795_v56, 5 }
 0x402   : > { %2185 = vst [vmem:[#allocation1 + $0x2] ss:$9 sm:$0xff] %v1920_v3  ;;  %v1793_v27 = vmul.f32 %v8675_v50, %v1758_v30  ;;  %v8817_v3 = vadd.f32 %v11418_v28, %v8779_v5  ;;  %v1941_v28 = vperm.slane %v8795_v56, 7 }
 0x403   : > { %2186 = vst [vmem:[#allocation1 + $0x3] ss:$9 sm:$0xff] %v1921_v51  ;;  %3814 = vmax.xlane.f32.xlu0 %v8789_v53 }
 0x404   : > { %2187 = vst [vmem:[#allocation1 + $0x4] ss:$9 sm:$0xff] %v1922_v52  ;;  %1844 = vadd.xlane.f32.xlu2 %v1793_v27  ;;  %v1932_v52 = vperm.slane %v8766_v33, 6  ;;  %v1937_v27 = vperm.slane %v8795_v56, 3 }
 0x405   : > { %2188 = vst [vmem:[#allocation1 + $0x5] ss:$9 sm:$0xff] %v1923_v54  ;;  %3064 = vadd.xlane.f32.xlu1 %v3002_v58  ;;  %v1652_v51 = vpop.xlane.xlu1 %1651  ;;  %v1933_v54 = vperm.slane %v8766_v33, 7  ;;  %v1938_v58 = vperm.slane %v8795_v56, 4 }
 0x406   : > { %2189 = vst [vmem:[#allocation1 + $0x6] ss:$9 sm:$0xff] %v1924_v42  ;;  %6916 = vrcp.f32 %v1652_v51  ;;  %v8828_v42 = vpop.f32.mrf.mxu0 }
 0x407   : > { %2190 = vst [vmem:[#allocation1 + $0x7] ss:$9 sm:$0xff] %v1925_v37  ;;  %v1654_v44 = vpop.xlane.xlu2 %1653  ;;  %v1934_v37 = vperm.slane %v8795_v56, 0 }
 0x408   : > { %6918 = vrcp.f32 %v1654_v44  ;;  %v1817_v59 = vpop.xlane.xlu0 %1816  ;;  %v11422_v44 = vld [vmem:[#allocation28_spill] sm:$0xff] }
 0x40b   : > { %3820 = vmax.xlane.f32.xlu0 %v8804_v17 }
 0x40c   : > { %3816 = vmax.xlane.f32.xlu2 %v8817_v3  ;;  %v6917_v33 = vpop.eup %6916 }
 0x40d   : > { %3818 = vmax.xlane.f32.xlu1 %v8821_v47 }
 0x40e   : > { %v8806_v60 = vld [vmem:[#allocation1] sm:$0xff]  ;;  %v6919_v6 = vpop.eup %6918 }
 0x40f   : > { %11417 = vst [vmem:[#allocation32_spill] sm:$0xff] %v8806_v60 }
 0x410   : > { %2192 = vst [vmem:[#allocation1] ss:$9 sm:$0xff] %v1926_v62  ;;  %v1727_v62 = vmul.f32 %v6917_v33, %v8618_v9  ;;  %v1656_v32 = vpop.xlane.xlu0 %1655  ;;  %v1819_v33 = vpop.xlane.xlu1 %1818 }
 0x411   : > { %2193 = vst [vmem:[#allocation1 + $0x1] ss:$9 sm:$0xff] %v1927_v0  ;;  %v1940_v0 = vperm.slane %v8795_v56, 6  ;;  %6920 = vrcp.f32 %v1656_v32  ;;  %v8853_v56 = vadd.f32 %v11422_v44, %v8779_v5  ;;  %v1951_v44 = vperm.slane %v1819_v33, 1 }
 0x412   : > { %2194 = vst [vmem:[#allocation1 + $0x2] ss:$9 sm:$0xff] %v1928_v29  ;;  %v1759_v29 = vmax.f32 %v1727_v62, 0.001  ;;  %v8863_v62 = vpop.xlane.xlu2 %3036 }
 0x413   : > { %2195 = vst [vmem:[#allocation1 + $0x3] ss:$9 sm:$0xff] %v1929_v39  ;;  %v1728_v39 = vmul.f32 %v6919_v6, %v8623_v26  ;;  %v1943_v26 = vperm.slane %v1817_v59, 1  ;;  %v11424_v6 = vld [vmem:[#allocation26_spill] sm:$0xff] }
 0x414   : > { %2196 = vst [vmem:[#allocation1 + $0x4] ss:$9 sm:$0xff] %v1930_v2  ;;  %3822 = vmax.xlane.f32.xlu2 %v8832_v12  ;;  %v8846_v2 = vpop.f32.mrf.mxu0 }
 0x415   : > { %2197 = vst [vmem:[#allocation1 + $0x5] ss:$9 sm:$0xff] %v1931_v45  ;;  %v1794_v45 = vmul.f32 %v8675_v50, %v1759_v29  ;;  %v1760_v9 = vmax.f32 %v1728_v39, 0.001  ;;  %v1948_v29 = vperm.slane %v1817_v59, 6  ;;  %v1949_v39 = vperm.slane %v1817_v59, 7 }
 0x416   : > { %2198 = vst [vmem:[#allocation1 + $0x6] ss:$9 sm:$0xff] %v1932_v52  ;;  %v1942_v52 = vperm.slane %v1817_v59, 0 }
 0x417   : > { %2199 = vst [vmem:[#allocation1 + $0x7] ss:$9 sm:$0xff] %v1933_v54  ;;  %1846 = vadd.xlane.f32.xlu0 %v1794_v45  ;;  %v1795_v51 = vmul.f32 %v8675_v50, %v1760_v9  ;;  %v6921_v54 = vpop.eup %6920  ;;  %v8871_v45 = vadd.f32 %v8747_v7, %v8779_v5 }
 0x418   : > { %11425 = vst [vmem:[#allocation35_spill] sm:$0xff] %v8863_v62 }
 0x419   : > { %1848 = vadd.xlane.f32.xlu1 %v1795_v51 }
 0x41a   : > { %v1821_v51 = vpop.xlane.xlu2 %1820 }
 0x41c   : > { %v8855_v34 = vpop.f32.mrf.mxu0 }
 0x41e   : > { %v8838_v30 = vld [vmem:[#allocation1] sm:$0xff] }
 0x41f   : > { %11421 = vst [vmem:[#allocation34_spill] sm:$0xff] %v8838_v30  ;;  %3826 = vmax.xlane.f32.xlu0 %v8853_v56  ;;  %v1965_v30 = vperm.slane %v1821_v51, 7 }
 0x420   : > { %2201 = vst [vmem:[#allocation1] ss:$9 sm:$0xff] %v1934_v37  ;;  %v1944_v37 = vperm.slane %v1817_v59, 2 }
 0x421   : > { %2202 = vst [vmem:[#allocation1 + $0x1] ss:$9 sm:$0xff] %v1935_v35 }
 0x422   : > { %2203 = vst [vmem:[#allocation1 + $0x2] ss:$9 sm:$0xff] %v1936_v13  ;;  %v1945_v13 = vperm.slane %v1817_v59, 3 }
 0x423   : > { %2204 = vst [vmem:[#allocation1 + $0x3] ss:$9 sm:$0xff] %v1937_v27  ;;  %v8861_v27 = vadd.f32 %v11424_v6, %v8779_v5  ;;  %v1953_v6 = vperm.slane %v1819_v33, 3 }
 0x424   : > { %2205 = vst [vmem:[#allocation1 + $0x4] ss:$9 sm:$0xff] %v1938_v58  ;;  %v1946_v58 = vperm.slane %v1817_v59, 4  ;;  %v8873_v9 = vpop.f32.mrf.mxu0 }
 0x425   : > { %2206 = vst [vmem:[#allocation1 + $0x5] ss:$9 sm:$0xff] %v1939_v36  ;;  %v1947_v36 = vperm.slane %v1817_v59, 5  ;;  %3824 = vmax.xlane.f32.xlu1 %v8861_v27  ;;  %v8879_v59 = vpop.xlane.xlu1 %3034 }
 0x426   : > { %2207 = vst [vmem:[#allocation1 + $0x6] ss:$9 sm:$0xff] %v1940_v0  ;;  %v1729_v0 = vmul.f32 %v6921_v54, %v8633_v15  ;;  %v8877_v15 = vadd.f32 %v8736_v14, %v8779_v5 }
 0x427   : > { %2208 = vst [vmem:[#allocation1 + $0x7] ss:$9 sm:$0xff] %v1941_v28  ;;  %3832 = vmax.xlane.f32.xlu0 %v8871_v45 }
 0x428   : > { %v1761_v28 = vmax.f32 %v1729_v0, 0.001  ;;  %11426 = vst [vmem:[#allocation39_spill] sm:$0xff] %v8879_v59 }
 0x42a   : > { %v1796_v32 = vmul.f32 %v8675_v50, %v1761_v28  ;;  %v1660_v28 = vpop.xlane.xlu2 %1659 }
 0x42c   : > { %1850 = vadd.xlane.f32.xlu2 %v1796_v32  ;;  %v8892_v14 = vpop.f32.mrf.mxu0  ;;  %v8896_v32 = vadd.f32 %v8758_v21, %v8779_v5 }
 0x42d   : > { %3830 = vmax.xlane.f32.xlu1 %v8877_v15  ;;  %v1658_v0 = vpop.xlane.xlu1 %1657 }
 0x42e   : > { %v8857_v35 = vld [vmem:[#allocation1] sm:$0xff]  ;;  %6922 = vrcp.f32 %v1658_v0  ;;  %v1963_v0 = vperm.slane %v1821_v51, 5 }
 0x42f   : > { %11423 = vst [vmem:[#allocation37_spill] sm:$0xff] %v8857_v35  ;;  %6924 = vrcp.f32 %v1660_v28  ;;  %v1962_v35 = vperm.slane %v1821_v51, 4 }
 0x430   : > { %2210 = vst [vmem:[#allocation1] ss:$9 sm:$0xff] %v1942_v52  ;;  %v11427_v52 = vld [vmem:[#allocation30_spill] sm:$0xff] }
 0x431   : > { %2211 = vst [vmem:[#allocation1 + $0x1] ss:$9 sm:$0xff] %v1943_v26  ;;  %v8885_v7 = vadd.f32 %v11427_v52, %v8779_v5  ;;  %v1950_v26 = vperm.slane %v1819_v33, 0 }
 0x432   : > { %2212 = vst [vmem:[#allocation1 + $0x2] ss:$9 sm:$0xff] %v1944_v37  ;;  %v8889_v37 = vpop.xlane.xlu0 %3038 }
 0x433   : > { %2213 = vst [vmem:[#allocation1 + $0x3] ss:$9 sm:$0xff] %v1945_v13  ;;  %v1952_v13 = vperm.slane %v1819_v33, 2 }
 0x434   : > { %2214 = vst [vmem:[#allocation1 + $0x4] ss:$9 sm:$0xff] %v1946_v58  ;;  %3828 = vmax.xlane.f32.xlu2 %v8885_v7  ;;  %v1954_v58 = vperm.slane %v1819_v33, 4 }
 0x435   : > { %2215 = vst [vmem:[#allocation1 + $0x5] ss:$9 sm:$0xff] %v1947_v36  ;;  %v1955_v36 = vperm.slane %v1819_v33, 5 }
 0x436   : > { %2216 = vst [vmem:[#allocation1 + $0x6] ss:$9 sm:$0xff] %v1948_v29  ;;  %v1956_v29 = vperm.slane %v1819_v33, 6 }
 0x437   : > { %2217 = vst [vmem:[#allocation1 + $0x7] ss:$9 sm:$0xff] %v1949_v39  ;;  %v1957_v39 = vperm.slane %v1819_v33, 7 }
 0x438   : > { %11429 = vst [vmem:[#allocation40_spill] sm:$0xff] %v8889_v37 }
 0x43a   : > { %v1823_v52 = vpop.xlane.xlu0 %1822 }
 0x43c   : > { %3834 = vmax.xlane.f32.xlu2 %v8896_v32 }
 0x43e   : > { %v8887_v54 = vld [vmem:[#allocation1] sm:$0xff] }
 0x43f   : > { %11428 = vst [vmem:[#allocation38_spill] sm:$0xff] %v8887_v54  ;;  %v1961_v54 = vperm.slane %v1821_v51, 3 }
 0x440   : > { %2219 = vst [vmem:[#allocation1] ss:$9 sm:$0xff] %v1950_v26  ;;  %v8899_v26 = vpop.f32.mrf.mxu0 }
 0x441   : > { %2220 = vst [vmem:[#allocation1 + $0x1] ss:$9 sm:$0xff] %v1951_v44  ;;  %v1958_v44 = vperm.slane %v1821_v51, 0 }
 0x442   : > { %2221 = vst [vmem:[#allocation1 + $0x2] ss:$9 sm:$0xff] %v1952_v13  ;;  %v6923_v13 = vpop.eup %6922  ;;  %v1662_v22 = vpop.xlane.xlu0 %1661 }
 0x443   : > { %2222 = vst [vmem:[#allocation1 + $0x3] ss:$9 sm:$0xff] %v1953_v6  ;;  %v1959_v6 = vperm.slane %v1821_v51, 1  ;;  %v6925_v33 = vpop.eup %6924  ;;  %v1730_v21 = vmul.f32 %v6923_v13, %v8653_v43  ;;  %6926 = vrcp.f32 %v1662_v22  ;;  %v1967_v13 = vperm.slane %v1823_v52, 1 }
 0x444   : > { %2223 = vst [vmem:[#allocation1 + $0x4] ss:$9 sm:$0xff] %v1954_v58  ;;  %v1960_v58 = vperm.slane %v1821_v51, 2  ;;  %v1731_v28 = vmul.f32 %v6925_v33, %v8658_v20  ;;  %v1970_v22 = vperm.slane %v1823_v52, 4 }
 0x445   : > { %2224 = vst [vmem:[#allocation1 + $0x5] ss:$9 sm:$0xff] %v1955_v36 }
 0x446   : > { %2225 = vst [vmem:[#allocation1 + $0x6] ss:$9 sm:$0xff] %v1956_v29  ;;  %v1964_v29 = vperm.slane %v1821_v51, 6  ;;  %v1968_v51 = vperm.slane %v1823_v52, 2 }
 0x447   : > { %2226 = vst [vmem:[#allocation1 + $0x7] ss:$9 sm:$0xff] %v1957_v39  ;;  %v1762_v39 = vmax.f32 %v1730_v21, 0.001  ;;  %v1972_v21 = vperm.slane %v1823_v52, 6 }
 0x448   : > { %v8906_v55 = vpop.f32.mrf.mxu0 }
 0x449   : > { %v1797_v60 = vmul.f32 %v8675_v50, %v1762_v39  ;;  %v6927_v20 = vpop.eup %6926  ;;  %v8929_v39 = vadd.f32 %v8855_v34, %v8779_v5  ;;  %v8943_v34 = vadd.f32 %v8828_v42, %v8779_v5 }
 0x44b   : > { %1852 = vadd.xlane.f32.xlu0 %v1797_v60  ;;  %v8919_v60 = vpop.xlane.xlu2 %3042 }
 0x44c   : > { %11432 = vst [vmem:[#allocation41_spill] sm:$0xff] %v8919_v60 }
 0x44e   : > { %v8901_v36 = vld [vmem:[#allocation1] sm:$0xff] }
 0x44f   : > { %11430 = vst [vmem:[#allocation44_spill] sm:$0xff] %v8901_v36  ;;  %v1763_v36 = vmax.f32 %v1731_v28, 0.001 }
 0x450   : > { %2228 = vst [vmem:[#allocation1] ss:$9 sm:$0xff] %v1958_v44  ;;  %v1966_v44 = vperm.slane %v1823_v52, 0  ;;  %v8922_v33 = vpop.f32.mrf.mxu0 }
 0x451   : > { %2229 = vst [vmem:[#allocation1 + $0x1] ss:$9 sm:$0xff] %v1959_v6  ;;  %v1798_v43 = vmul.f32 %v8675_v50, %v1763_v36  ;;  %v1971_v36 = vperm.slane %v1823_v52, 5 }
 0x452   : > { %2230 = vst [vmem:[#allocation1 + $0x2] ss:$9 sm:$0xff] %v1960_v58  ;;  %v1969_v58 = vperm.slane %v1823_v52, 3 }
 0x453   : > { %2231 = vst [vmem:[#allocation1 + $0x3] ss:$9 sm:$0xff] %v1961_v54  ;;  %1854 = vadd.xlane.f32.xlu1 %v1798_v43  ;;  %v1825_v54 = vpop.xlane.xlu1 %1824 }
 0x454   : > { %2232 = vst [vmem:[#allocation1 + $0x4] ss:$9 sm:$0xff] %v1962_v35  ;;  %v8911_v35 = vadd.f32 %v8799_v25, %v8779_v5  ;;  %v1732_v25 = vmul.f32 %v6927_v20, %v8666_v40  ;;  %v8933_v40 = vadd.f32 %v8846_v2, %v8779_v5  ;;  %v1975_v20 = vperm.slane %v1825_v54, 1 }
 0x455   : > { %2233 = vst [vmem:[#allocation1 + $0x5] ss:$9 sm:$0xff] %v1963_v0  ;;  %v1973_v0 = vperm.slane %v1823_v52, 7  ;;  %v1827_v52 = vpop.xlane.xlu2 %1826  ;;  %v1976_v2 = vperm.slane %v1825_v54, 2  ;;  %v1981_v42 = vperm.slane %v1825_v54, 7 }
 0x456   : > { %2234 = vst [vmem:[#allocation1 + $0x6] ss:$9 sm:$0xff] %v1964_v29  ;;  %3838 = vmax.xlane.f32.xlu0 %v8911_v35  ;;  %v1989_v60 = vperm.slane %v1827_v52, 7 }
 0x457   : > { %2235 = vst [vmem:[#allocation1 + $0x7] ss:$9 sm:$0xff] %v1965_v30  ;;  %v8917_v30 = vadd.f32 %v8784_v31, %v8779_v5  ;;  %v1764_v31 = vmax.f32 %v1732_v25, 0.001 }
 0x458   : > { %v8939_v43 = vpop.f32.mrf.mxu0 }
 0x459   : > { %v1799_v29 = vmul.f32 %v8675_v50, %v1764_v31  ;;  %v8952_v31 = vadd.f32 %v8873_v9, %v8779_v5 }
 0x45b   : > { %3836 = vmax.xlane.f32.xlu1 %v8917_v30  ;;  %1856 = vadd.xlane.f32.xlu2 %v1799_v29  ;;  %v8935_v28 = vpop.xlane.xlu1 %3040 }
 0x45c   : > { %11433 = vst [vmem:[#allocation43_spill] sm:$0xff] %v8935_v28 }
 0x45e   : > { %v8913_v6 = vld [vmem:[#allocation1] sm:$0xff]  ;;  %3844 = vmax.xlane.f32.xlu0 %v8929_v39 }
 0x45f   : > { %11431 = vst [vmem:[#allocation42_spill] sm:$0xff] %v8913_v6  ;;  %v1986_v6 = vperm.slane %v1827_v52, 4 }
 0x460   : > { %2237 = vst [vmem:[#allocation1] ss:$9 sm:$0xff] %v1966_v44  ;;  %v1974_v44 = vperm.slane %v1825_v54, 0  ;;  %v8954_v29 = vpop.f32.mrf.mxu0 }
 0x461   : > { %2238 = vst [vmem:[#allocation1 + $0x1] ss:$9 sm:$0xff] %v1967_v13 }
 0x462   : > { %2239 = vst [vmem:[#allocation1 + $0x2] ss:$9 sm:$0xff] %v1968_v51  ;;  %v8947_v51 = vpop.xlane.xlu0 %3044 }
 0x463   : > { %2240 = vst [vmem:[#allocation1 + $0x3] ss:$9 sm:$0xff] %v1969_v58  ;;  %3842 = vmax.xlane.f32.xlu1 %v8933_v40  ;;  %3840 = vmax.xlane.f32.xlu2 %v8943_v34  ;;  %v1977_v58 = vperm.slane %v1825_v54, 3  ;;  %v1664_v25 = vpop.xlane.xlu1 %1663 }
 0x464   : > { %2241 = vst [vmem:[#allocation1 + $0x4] ss:$9 sm:$0xff] %v1970_v22  ;;  %v1978_v22 = vperm.slane %v1825_v54, 4  ;;  %6928 = vrcp.f32 %v1664_v25  ;;  %v1987_v25 = vperm.slane %v1827_v52, 5 }
 0x465   : > { %2242 = vst [vmem:[#allocation1 + $0x5] ss:$9 sm:$0xff] %v1971_v36  ;;  %v1979_v36 = vperm.slane %v1825_v54, 5 }
 0x466   : > { %2243 = vst [vmem:[#allocation1 + $0x6] ss:$9 sm:$0xff] %v1972_v21  ;;  %v1980_v21 = vperm.slane %v1825_v54, 6 }
 0x467   : > { %2244 = vst [vmem:[#allocation1 + $0x7] ss:$9 sm:$0xff] %v1973_v0  ;;  %v1666_v0 = vpop.xlane.xlu2 %1665 }
 0x468   : > { %11435 = vst [vmem:[#allocation48_spill] sm:$0xff] %v8947_v51  ;;  %6930 = vrcp.f32 %v1666_v0  ;;  %v8960_v51 = vpop.f32.mrf.mxu0 }
 0x46b   : > { %3846 = vmax.xlane.f32.xlu2 %v8952_v31 }
 0x46e   : > { %v8945_v13 = vld [vmem:[#allocation1] sm:$0xff] }
 0x46f   : > { %11434 = vst [vmem:[#allocation45_spill] sm:$0xff] %v8945_v13  ;;  %v1985_v13 = vperm.slane %v1827_v52, 3 }
 0x470   : > { %2246 = vst [vmem:[#allocation1] ss:$9 sm:$0xff] %v1974_v44  ;;  %v1829_v44 = vpop.xlane.xlu0 %1828 }
 0x471   : > { %2247 = vst [vmem:[#allocation1 + $0x1] ss:$9 sm:$0xff] %v1975_v20  ;;  %v1982_v20 = vperm.slane %v1827_v52, 0 }
 0x472   : > { %2248 = vst [vmem:[#allocation1 + $0x2] ss:$9 sm:$0xff] %v1976_v2  ;;  %v6929_v2 = vpop.eup %6928 }
 0x473   : > { %2249 = vst [vmem:[#allocation1 + $0x3] ss:$9 sm:$0xff] %v1977_v58  ;;  %v1983_v58 = vperm.slane %v1827_v52, 1  ;;  %v6931_v54 = vpop.eup %6930  ;;  %v1733_v9 = vmul.f32 %v6929_v2, %v8688_v16  ;;  %v1990_v2 = vperm.slane %v1829_v44, 0 }
 0x474   : > { %2250 = vst [vmem:[#allocation1 + $0x4] ss:$9 sm:$0xff] %v1978_v22  ;;  %v1984_v22 = vperm.slane %v1827_v52, 2  ;;  %v1734_v0 = vmul.f32 %v6931_v54, %v8693_v23  ;;  %v1993_v54 = vperm.slane %v1829_v44, 3 }
 0x475   : > { %2251 = vst [vmem:[#allocation1 + $0x5] ss:$9 sm:$0xff] %v1979_v36 }
 0x476   : > { %2252 = vst [vmem:[#allocation1 + $0x6] ss:$9 sm:$0xff] %v1980_v21  ;;  %v1988_v21 = vperm.slane %v1827_v52, 6  ;;  %v1766_v37 = vmax.f32 %v1734_v0, 0.001  ;;  %v1992_v52 = vperm.slane %v1829_v44, 2 }
 0x477   : > { %2253 = vst [vmem:[#allocation1 + $0x7] ss:$9 sm:$0xff] %v1981_v42  ;;  %v1765_v42 = vmax.f32 %v1733_v9, 0.001  ;;  %v1996_v9 = vperm.slane %v1829_v44, 6 }
 0x478   : > { %v1668_v28 = vpop.xlane.xlu0 %1667  ;;  %v1801_v16 = vmul.f32 %v8675_v50, %v1766_v37  ;;  %v1994_v37 = vperm.slane %v1829_v44, 4 }
 0x479   : > { %6932 = vrcp.f32 %v1668_v28  ;;  %v8977_v28 = vpop.xlane.xlu2 %3048 }
 0x47a   : > { %1860 = vadd.xlane.f32.xlu1 %v1801_v16  ;;  %11438 = vst [vmem:[#allocation18_spill] sm:$0xff] %v8977_v28 }
 0x47e   : > { %v8957_v36 = vld [vmem:[#allocation1] sm:$0xff] }
 0x47f   : > { %11436 = vst [vmem:[#allocation16_spill] sm:$0xff] %v8957_v36  ;;  %v1800_v36 = vmul.f32 %v8675_v50, %v1765_v42  ;;  %v6933_v23 = vpop.eup %6932  ;;  %v8985_v42 = vadd.f32 %v8939_v43, %v8779_v5 }
 0x480   : > { %2255 = vst [vmem:[#allocation1] ss:$9 sm:$0xff] %v1982_v20  ;;  %v8965_v20 = vpop.f32.mrf.mxu0 }
 0x481   : > { %2256 = vst [vmem:[#allocation1 + $0x1] ss:$9 sm:$0xff] %v1983_v58  ;;  %1858 = vadd.xlane.f32.xlu0 %v1800_v36  ;;  %v1991_v58 = vperm.slane %v1829_v44, 1  ;;  %v1995_v36 = vperm.slane %v1829_v44, 5  ;;  %v1833_v16 = vpop.xlane.xlu2 %1832 }
 0x482   : > { %2257 = vst [vmem:[#allocation1 + $0x2] ss:$9 sm:$0xff] %v1984_v22 }
 0x483   : > { %2258 = vst [vmem:[#allocation1 + $0x3] ss:$9 sm:$0xff] %v1985_v13  ;;  %v1831_v13 = vpop.xlane.xlu1 %1830 }
 0x484   : > { %2259 = vst [vmem:[#allocation1 + $0x4] ss:$9 sm:$0xff] %v1986_v6  ;;  %v8969_v6 = vadd.f32 %v8899_v26, %v8779_v5  ;;  %v1735_v26 = vmul.f32 %v6933_v23, %v8699_v24  ;;  %v8991_v24 = vadd.f32 %v8922_v33, %v8779_v5  ;;  %v1998_v43 = vperm.slane %v1831_v13, 0  ;;  %v9003_v23 = vpop.xlane.xlu0 %3050 }
 0x485   : > { %2260 = vst [vmem:[#allocation1 + $0x5] ss:$9 sm:$0xff] %v1987_v25  ;;  %v1997_v25 = vperm.slane %v1829_v44, 7 }
 0x486   : > { %2261 = vst [vmem:[#allocation1 + $0x6] ss:$9 sm:$0xff] %v1988_v21  ;;  %v1767_v21 = vmax.f32 %v1735_v26, 0.001  ;;  %v2004_v26 = vperm.slane %v1831_v13, 6 }
 0x487   : > { %2262 = vst [vmem:[#allocation1 + $0x7] ss:$9 sm:$0xff] %v1989_v60  ;;  %v8975_v60 = vadd.f32 %v8892_v14, %v8779_v5 }
 0x488   : > { %v1802_v14 = vmul.f32 %v8675_v50, %v1767_v21  ;;  %v8987_v0 = vpop.f32.mrf.mxu0  ;;  %v8999_v50 = vadd.f32 %v8906_v55, %v8779_v5  ;;  %11441 = vst [vmem:[#allocation28_spill] sm:$0xff] %v9003_v23  ;;  %v9010_v21 = vadd.f32 %v8954_v29, %v8779_v5  ;;  %v2013_v23 = vperm.slane %v1833_v16, 7 }
 0x489   : > { %3850 = vmax.xlane.f32.xlu0 %v8969_v6  ;;  %3848 = vmax.xlane.f32.xlu1 %v8975_v60 }
 0x48a   : > { %1862 = vadd.xlane.f32.xlu2 %v1802_v14 }
 0x48b   : > { %v8993_v44 = vpop.xlane.xlu1 %3046 }
 0x48c   : > { %11439 = vst [vmem:[#allocation20_spill] sm:$0xff] %v8993_v44  ;;  %v1835_v14 = vpop.xlane.xlu0 %1834  ;;  %v7198_v44 = vld [vmem:[#allocation8] ss:$0 sm:$0xff] }
 0x48e   : > { %v8971_v22 = vld [vmem:[#allocation1] sm:$0xff] }
 0x48f   : > { %11437 = vst [vmem:[#allocation22_spill] sm:$0xff] %v8971_v22  ;;  %v2010_v22 = vperm.slane %v1833_v16, 4 }
 0x490   : > { %2264 = vst [vmem:[#allocation1] ss:$9 sm:$0xff] %v1990_v2  ;;  %v9006_v33 = vpop.f32.mrf.mxu0 }
 0x491   : > { %2265 = vst [vmem:[#allocation1 + $0x1] ss:$9 sm:$0xff] %v1991_v58  ;;  %3856 = vmax.xlane.f32.xlu0 %v8985_v42  ;;  %3854 = vmax.xlane.f32.xlu1 %v8991_v24  ;;  %v1999_v58 = vperm.slane %v1831_v13, 1 }
 0x492   : > { %2266 = vst [vmem:[#allocation1 + $0x2] ss:$9 sm:$0xff] %v1992_v52  ;;  %v2000_v52 = vperm.slane %v1831_v13, 2  ;;  %3852 = vmax.xlane.f32.xlu2 %v8999_v50 }
 0x493   : > { %2267 = vst [vmem:[#allocation1 + $0x3] ss:$9 sm:$0xff] %v1993_v54  ;;  %v2001_v54 = vperm.slane %v1831_v13, 3  ;;  %v1670_v55 = vpop.xlane.xlu1 %1669 }
 0x494   : > { %2268 = vst [vmem:[#allocation1 + $0x4] ss:$9 sm:$0xff] %v1994_v37  ;;  %v2002_v37 = vperm.slane %v1831_v13, 4  ;;  %6934 = vrcp.f32 %v1670_v55  ;;  %v2012_v55 = vperm.slane %v1833_v16, 6  ;;  %v1674_v28 = vpop.xlane.xlu0 %1673 }
 0x495   : > { %2269 = vst [vmem:[#allocation1 + $0x5] ss:$9 sm:$0xff] %v1995_v36  ;;  %v2003_v36 = vperm.slane %v1831_v13, 5 }
 0x496   : > { %2270 = vst [vmem:[#allocation1 + $0x6] ss:$9 sm:$0xff] %v1996_v9  ;;  %v2005_v9 = vperm.slane %v1831_v13, 7 }
 0x497   : > { %2271 = vst [vmem:[#allocation1 + $0x7] ss:$9 sm:$0xff] %v1997_v25  ;;  %v1672_v25 = vpop.xlane.xlu2 %1671 }
 0x498   : > { %6936 = vrcp.f32 %v1672_v25 }
 0x499   : > { %6938 = vrcp.f32 %v1674_v28 }
 0x49a   : > { %3858 = vmax.xlane.f32.xlu2 %v9010_v21 }
 0x49e   : > { %v9001_v2 = vld [vmem:[#allocation1] sm:$0xff] }
 0x49f   : > { %11440 = vst [vmem:[#allocation24_spill] sm:$0xff] %v9001_v2  ;;  %v2008_v2 = vperm.slane %v1833_v16, 2 }
 0x4a0   : > { %2273 = vst [vmem:[#allocation1] ss:$9 sm:$0xff] %v1998_v43  ;;  %v1348_v43 = vpop.f32.mrf.mxu0 }
 0x4a1   : > { %2274 = vst [vmem:[#allocation1 + $0x1] ss:$9 sm:$0xff] %v1999_v58  ;;  %v2006_v58 = vperm.slane %v1833_v16, 0 }
 0x4a2   : > { %2275 = vst [vmem:[#allocation1 + $0x2] ss:$9 sm:$0xff] %v2000_v52  ;;  %v6935_v52 = vpop.eup %6934 }
 0x4a3   : > { %2276 = vst [vmem:[#allocation1 + $0x3] ss:$9 sm:$0xff] %v2001_v54  ;;  %v2007_v54 = vperm.slane %v1833_v16, 1  ;;  %v1736_v29 = vmul.f32 %v6935_v52, %v8717_v41 }
 0x4a4   : > { %2277 = vst [vmem:[#allocation1 + $0x4] ss:$9 sm:$0xff] %v2002_v37  ;;  %v6937_v37 = vpop.eup %6936 }
 0x4a5   : > { %2278 = vst [vmem:[#allocation1 + $0x5] ss:$9 sm:$0xff] %v2003_v36  ;;  %v2009_v36 = vperm.slane %v1833_v16, 3  ;;  %v1737_v25 = vmul.f32 %v6937_v37, %v8722_v4  ;;  %v6939_v52 = vpop.eup %6938  ;;  %v9021_v4 = vadd.f32 %v8965_v20, %v8779_v5  ;;  %v2017_v37 = vperm.slane %v1835_v14, 3 }
 0x4a6   : > { %2279 = vst [vmem:[#allocation1 + $0x6] ss:$9 sm:$0xff] %v2004_v26  ;;  %v2011_v26 = vperm.slane %v1833_v16, 5  ;;  %v9023_v16 = vpop.xlane.xlu2 %3054  ;;  %v1738_v20 = vmul.f32 %v6939_v52, %v8732_v63  ;;  %v9041_v63 = vadd.f32 %v9006_v33, %v8779_v5 }
 0x4a7   : > { %2280 = vst [vmem:[#allocation1 + $0x7] ss:$9 sm:$0xff] %v2005_v9  ;;  %v1768_v9 = vmax.f32 %v1736_v29, 0.001  ;;  %v9033_v29 = vpop.xlane.xlu0 %3056 }
 0x4a8   : > { %v9017_v59 = vpop.f32.mrf.mxu0  ;;  %11444 = vst [vmem:[#allocation50_spill] sm:$0xff] %v9033_v29 }
 0x4a9   : > { %v1803_v62 = vmul.f32 %v7198_v44, %v1768_v9 }
 0x4ab   : > { %1864 = vadd.xlane.f32.xlu0 %v1803_v62  ;;  %v2018_v62 = vperm.slane %v1835_v14, 4 }
 0x4ae   : > { %v9013_v13 = vld [vmem:[#allocation1] sm:$0xff] }
 0x4af   : > { %11442 = vst [vmem:[#allocation26_spill] sm:$0xff] %v9013_v13  ;;  %v1769_v13 = vmax.f32 %v1737_v25, 0.001  ;;  %v9037_v25 = vadd.f32 %v1348_v43, %v8779_v5 }
 0x4b0   : > { %2282 = vst [vmem:[#allocation1] ss:$9 sm:$0xff] %v2006_v58  ;;  %v2015_v58 = vperm.slane %v1835_v14, 1  ;;  %v1353_v28 = vpop.f32.mrf.mxu0 }
 0x4b1   : > { %2283 = vst [vmem:[#allocation1 + $0x1] ss:$9 sm:$0xff] %v2007_v54  ;;  %v1804_v41 = vmul.f32 %v7198_v44, %v1769_v13  ;;  %v2019_v13 = vperm.slane %v1835_v14, 5 }
 0x4b2   : > { %2284 = vst [vmem:[#allocation1 + $0x2] ss:$9 sm:$0xff] %v2008_v2  ;;  %v2014_v2 = vperm.slane %v1835_v14, 0 }
 0x4b3   : > { %2285 = vst [vmem:[#allocation1 + $0x3] ss:$9 sm:$0xff] %v2009_v36  ;;  %1866 = vadd.xlane.f32.xlu1 %v1804_v41  ;;  %3862 = vmax.xlane.f32.xlu0 %v9021_v4  ;;  %v2020_v36 = vperm.slane %v1835_v14, 6  ;;  %v1839_v41 = vpop.xlane.xlu2 %1838 }
 0x4b4   : > { %2286 = vst [vmem:[#allocation1 + $0x4] ss:$9 sm:$0xff] %v2010_v22  ;;  %v2016_v22 = vperm.slane %v1835_v14, 2 }
 0x4b5   : > { %2287 = vst [vmem:[#allocation1 + $0x5] ss:$9 sm:$0xff] %v2011_v26  ;;  %v2021_v26 = vperm.slane %v1835_v14, 7 }
 0x4b6   : > { %2288 = vst [vmem:[#allocation1 + $0x6] ss:$9 sm:$0xff] %v2012_v55  ;;  %v1837_v55 = vpop.xlane.xlu1 %1836 }
 0x4b7   : > { %2289 = vst [vmem:[#allocation1 + $0x7] ss:$9 sm:$0xff] %v2013_v23  ;;  %v9029_v23 = vadd.f32 %v8960_v51, %v8779_v5  ;;  %v1770_v51 = vmax.f32 %v1738_v20, 0.001  ;;  %v2022_v43 = vperm.slane %v1837_v55, 0  ;;  %v2027_v20 = vperm.slane %v1837_v55, 5 }
 0x4b8   : > { %v1356_v14 = vpop.f32.mrf.mxu0 }
 0x4b9   : > { %v1805_v9 = vmul.f32 %v7198_v44, %v1770_v51  ;;  %v9049_v44 = vadd.f32 %v8987_v0, %v8779_v5  ;;  %v9054_v52 = vadd.f32 %v1356_v14, %v8779_v5  ;;  %v2026_v0 = vperm.slane %v1837_v55, 4 }
 0x4ba   : > { %v2029_v51 = vperm.slane %v1837_v55, 7 }
 0x4bb   : > { %3860 = vmax.xlane.f32.xlu1 %v9029_v23  ;;  %1868 = vadd.xlane.f32.xlu2 %v1805_v9 }
 0x4bc   : > { %3868 = vmax.xlane.f32.xlu0 %v9037_v25 }
 0x4be   : > { %v9025_v54 = vld [vmem:[#allocation1] sm:$0xff] }
 0x4bf   : > { %11443 = vst [vmem:[#allocation30_spill] sm:$0xff] %v9025_v54  ;;  %v2036_v54 = vperm.slane %v1839_v41, 6 }
 0x4c0   : > { %2291 = vst [vmem:[#allocation1] ss:$9 sm:$0xff] %v2014_v2  ;;  %v9045_v2 = vpop.xlane.xlu0 %3062 }
 0x4c1   : > { %2292 = vst [vmem:[#allocation1 + $0x1] ss:$9 sm:$0xff] %v2015_v58  ;;  %v9051_v58 = vpop.xlane.xlu1 %3052 }
 0x4c2   : > { %2293 = vst [vmem:[#allocation1 + $0x2] ss:$9 sm:$0xff] %v2016_v22  ;;  %v2023_v22 = vperm.slane %v1837_v55, 1 }
 0x4c3   : > { %2294 = vst [vmem:[#allocation1 + $0x3] ss:$9 sm:$0xff] %v2017_v37  ;;  %3866 = vmax.xlane.f32.xlu1 %v9041_v63  ;;  %v2024_v37 = vperm.slane %v1837_v55, 2  ;;  %3864 = vmax.xlane.f32.xlu2 %v9049_v44 }
 0x4c4   : > { %2295 = vst [vmem:[#allocation1 + $0x4] ss:$9 sm:$0xff] %v2018_v62  ;;  %v9060_v62 = vadd.f32 %v1353_v28, %v8779_v5  ;;  %3874 = vmax.xlane.f32.xlu0 %v9054_v52  ;;  %v9068_v28 = vadd.f32 %v9017_v59, %v8779_v5  ;;  %v2033_v59 = vperm.slane %v1839_v41, 3 }
 0x4c5   : > { %2296 = vst [vmem:[#allocation1 + $0x5] ss:$9 sm:$0xff] %v2019_v13  ;;  %v2025_v13 = vperm.slane %v1837_v55, 3 }
 0x4c6   : > { %2297 = vst [vmem:[#allocation1 + $0x6] ss:$9 sm:$0xff] %v2020_v36  ;;  %v9063_v36 = vpop.xlane.xlu2 %3060 }
 0x4c7   : > { %2298 = vst [vmem:[#allocation1 + $0x7] ss:$9 sm:$0xff] %v2021_v26  ;;  %v2028_v26 = vperm.slane %v1837_v55, 6 }
 0x4c8   : > { %11445 = vst [vmem:[#allocation51_spill] sm:$0xff] %v9045_v2  ;;  %v1841_v9 = vpop.xlane.xlu0 %1840 }
 0x4c9   : > { %11447 = vst [vmem:[#allocation53_spill] sm:$0xff] %v9063_v36  ;;  %v9070_v14 = vpop.xlane.xlu1 %3058  ;;  %v2037_v36 = vperm.slane %v1839_v41, 7 }
 0x4ca   : > { %11448 = vst [vmem:[#allocation54_spill] sm:$0xff] %v9070_v14 }
 0x4cb   : > { %3872 = vmax.xlane.f32.xlu1 %v9060_v62  ;;  %3870 = vmax.xlane.f32.xlu2 %v9068_v28 }
 0x4ce   : > { %v9056_v33 = vld [vmem:[#allocation1] sm:$0xff] }
 0x4cf   : > { %11446 = vst [vmem:[#allocation52_spill] sm:$0xff] %v9056_v33  ;;  %v9073_v33 = vpop.xlane.xlu2 %3066 }
 0x4d0   : > { %2300 = vst [vmem:[#allocation1] ss:$9 sm:$0xff] %v2022_v43  ;;  %v1358_v43 = vpop.f32.mrf.mxu0  ;;  %v3815_v2 = vpop.xlane.xlu0 %3814 }
 0x4d1   : > { %2301 = vst [vmem:[#allocation1 + $0x1] ss:$9 sm:$0xff] %v2023_v22  ;;  %v2030_v22 = vperm.slane %v1839_v41, 0  ;;  %v9076_v55 = vadd.f32 %v1358_v43, %v8779_v5 }
 0x4d2   : > { %2302 = vst [vmem:[#allocation1 + $0x2] ss:$9 sm:$0xff] %v2024_v37  ;;  %v2031_v37 = vperm.slane %v1839_v41, 1 }
 0x4d3   : > { %2303 = vst [vmem:[#allocation1 + $0x3] ss:$9 sm:$0xff] %v2025_v13  ;;  %v2032_v13 = vperm.slane %v1839_v41, 2  ;;  %3876 = vmax.xlane.f32.xlu2 %v9076_v55 }
 0x4d4   : > { %2304 = vst [vmem:[#allocation1 + $0x4] ss:$9 sm:$0xff] %v2026_v0 }
 0x4d5   : > { %2305 = vst [vmem:[#allocation1 + $0x5] ss:$9 sm:$0xff] %v2027_v20  ;;  %v2034_v20 = vperm.slane %v1839_v41, 4 }
 0x4d6   : > { %2306 = vst [vmem:[#allocation1 + $0x6] ss:$9 sm:$0xff] %v2028_v26  ;;  %v2035_v26 = vperm.slane %v1839_v41, 5  ;;  %v2041_v41 = vperm.slane %v1841_v9, 3 }
 0x4d7   : > { %2307 = vst [vmem:[#allocation1 + $0x7] ss:$9 sm:$0xff] %v2029_v51  ;;  %v9080_v51 = vpop.xlane.xlu1 %1842  ;;  %v9084_v43 = vpop.xlane.xlu2 %1844 }
 0x4d8   : > { %11449 = vst [vmem:[#allocation55_spill] sm:$0xff] %v9073_v33  ;;  %v3878_v33 = vsub.f32 %v8789_v53, %v3815_v2  ;;  %v2042_v53 = vperm.slane %v1841_v9, 4  ;;  %v2043_v2 = vperm.slane %v1841_v9, 5 }
 0x4da   : > { %v3910_v5 = vmul.f32 1.442695, %v3878_v33  ;;  %v3821_v33 = vpop.xlane.xlu0 %3820 }
 0x4dc   : > { %6940 = vpow2.f32 %v3910_v5 }
 0x4de   : > { %v9078_v0 = vld [vmem:[#allocation1] sm:$0xff] }
 0x4df   : > { %11450 = vst [vmem:[#allocation56_spill] sm:$0xff] %v9078_v0  ;;  %v2039_v0 = vperm.slane %v1841_v9, 1 }
 0x4e0   : > { %2309 = vst [vmem:[#allocation1] ss:$9 sm:$0xff] %v2030_v22  ;;  %v2038_v22 = vperm.slane %v1841_v9, 0 }
 0x4e1   : > { %2310 = vst [vmem:[#allocation1 + $0x1] ss:$9 sm:$0xff] %v2031_v37  ;;  %v9086_v37 = vpop.xlane.xlu1 %3064 }
 0x4e2   : > { %2311 = vst [vmem:[#allocation1 + $0x2] ss:$9 sm:$0xff] %v2032_v13  ;;  %v9088_v14 = vpop.eup %6940  ;;  %v2040_v13 = vperm.slane %v1841_v9, 2 }
 0x4e3   : > { %2312 = vst [vmem:[#allocation1 + $0x3] ss:$9 sm:$0xff] %v2033_v59  ;;  %3974 = vadd.xlane.f32.xlu1 %v9088_v14  ;;  %v3881_v59 = vsub.f32 %v8804_v17, %v3821_v33  ;;  %v2046_v17 = vperm.slane %v9080_v51, 0  ;;  %v2052_v33 = vperm.slane %v9080_v51, 6 }
 0x4e4   : > { %2313 = vst [vmem:[#allocation1 + $0x4] ss:$9 sm:$0xff] %v2034_v20  ;;  %v3817_v20 = vpop.xlane.xlu2 %3816 }
 0x4e5   : > { %2314 = vst [vmem:[#allocation1 + $0x5] ss:$9 sm:$0xff] %v2035_v26  ;;  %v3879_v26 = vsub.f32 %v8817_v3, %v3817_v20  ;;  %v2047_v3 = vperm.slane %v9080_v51, 1 }
 0x4e6   : > { %2315 = vst [vmem:[#allocation1 + $0x6] ss:$9 sm:$0xff] %v2036_v54  ;;  %v2044_v54 = vperm.slane %v1841_v9, 6 }
 0x4e7   : > { %2316 = vst [vmem:[#allocation1 + $0x7] ss:$9 sm:$0xff] %v2037_v36  ;;  %v2045_v36 = vperm.slane %v1841_v9, 7 }
 0x4e8   : > { %11451 = vst [vmem:[#allocation57_spill] sm:$0xff] %v9086_v37 }
 0x4e9   : > { %v3819_v5 = vpop.xlane.xlu1 %3818 }
 0x4ea   : > { %v3880_v37 = vsub.f32 %v8821_v47, %v3819_v5  ;;  %v2054_v5 = vperm.slane %v9084_v43, 0 }
 0x4ee   : > { %v9090_v29 = vld [vmem:[#allocation1] sm:$0xff] }
 0x4ef   : > { %11452 = vst [vmem:[#allocation58_spill] sm:$0xff] %v9090_v29  ;;  %v3916_v29 = vmul.f32 1.442695, %v3881_v59  ;;  %v2053_v59 = vperm.slane %v9080_v51, 7 }
 0x4f0   : > { %2318 = vst [vmem:[#allocation1] ss:$9 sm:$0xff] %v2038_v22  ;;  %v3912_v22 = vmul.f32 1.442695, %v3879_v26  ;;  %v1847_v26 = vpop.xlane.xlu0 %1846 }
 0x4f1   : > { %2319 = vst [vmem:[#allocation1 + $0x1] ss:$9 sm:$0xff] %v2039_v0  ;;  %6942 = vpow2.f32 %v3916_v29  ;;  %v3914_v0 = vmul.f32 1.442695, %v3880_v37  ;;  %v2049_v29 = vperm.slane %v9080_v51, 3  ;;  %v2050_v37 = vperm.slane %v9080_v51, 4 }
 0x4f2   : > { %2320 = vst [vmem:[#allocation1 + $0x2] ss:$9 sm:$0xff] %v2040_v13  ;;  %6944 = vpow2.f32 %v3912_v22 }
 0x4f3   : > { %2321 = vst [vmem:[#allocation1 + $0x3] ss:$9 sm:$0xff] %v2041_v41  ;;  %6946 = vpow2.f32 %v3914_v0 }
 0x4f4   : > { %2322 = vst [vmem:[#allocation1 + $0x4] ss:$9 sm:$0xff] %v2042_v53  ;;  %v2048_v53 = vperm.slane %v9080_v51, 2 }
 0x4f5   : > { %2323 = vst [vmem:[#allocation1 + $0x5] ss:$9 sm:$0xff] %v2043_v2  ;;  %v2051_v2 = vperm.slane %v9080_v51, 5  ;;  %v9125_v51 = vpop.xlane.xlu1 %1848 }
 0x4f6   : > { %2324 = vst [vmem:[#allocation1 + $0x6] ss:$9 sm:$0xff] %v2044_v54  ;;  %v3823_v54 = vpop.xlane.xlu2 %3822 }
 0x4f7   : > { %2325 = vst [vmem:[#allocation1 + $0x7] ss:$9 sm:$0xff] %v2045_v36  ;;  %v9096_v9 = vpop.eup %6942  ;;  %v3882_v36 = vsub.f32 %v8832_v12, %v3823_v54  ;;  %v2057_v12 = vperm.slane %v9084_v43, 3  ;;  %v2060_v54 = vperm.slane %v9084_v43, 6 }
 0x4f8   : > { %v9099_v13 = vpop.eup %6944  ;;  %3980 = vadd.xlane.f32.xlu1 %v9096_v9 }
 0x4f9   : > { %v9105_v47 = vpop.eup %6946  ;;  %3976 = vadd.xlane.f32.xlu0 %v9099_v13  ;;  %v3918_v20 = vmul.f32 1.442695, %v3882_v36 }
 0x4fa   : > { %3978 = vadd.xlane.f32.xlu2 %v9105_v47 }
 0x4fb   : > { %6948 = vpow2.f32 %v3918_v20  ;;  %v2062_v20 = vperm.slane %v1847_v26, 0 }
 0x4fe   : > { %v9101_v41 = vld [vmem:[#allocation1] sm:$0xff] }
 0x4ff   : > { %11453 = vst [vmem:[#allocation59_spill] sm:$0xff] %v9101_v41 }
 0x500   : > { %2327 = vst [vmem:[#allocation1] ss:$9 sm:$0xff] %v2046_v17  ;;  %v2055_v17 = vperm.slane %v9084_v43, 1 }
 0x501   : > { %2328 = vst [vmem:[#allocation1 + $0x1] ss:$9 sm:$0xff] %v2047_v3  ;;  %v9117_v22 = vpop.eup %6948  ;;  %v2056_v3 = vperm.slane %v9084_v43, 2 }
 0x502   : > { %2329 = vst [vmem:[#allocation1 + $0x2] ss:$9 sm:$0xff] %v2048_v53  ;;  %3982 = vadd.xlane.f32.xlu0 %v9117_v22  ;;  %v2058_v53 = vperm.slane %v9084_v43, 4 }
 0x503   : > { %2330 = vst [vmem:[#allocation1 + $0x3] ss:$9 sm:$0xff] %v2049_v29  ;;  %v3827_v29 = vpop.xlane.xlu0 %3826 }
 0x504   : > { %2331 = vst [vmem:[#allocation1 + $0x4] ss:$9 sm:$0xff] %v2050_v37  ;;  %v2059_v37 = vperm.slane %v9084_v43, 5 }
 0x505   : > { %2332 = vst [vmem:[#allocation1 + $0x5] ss:$9 sm:$0xff] %v2051_v2  ;;  %v3884_v2 = vsub.f32 %v8853_v56, %v3827_v29  ;;  %v2064_v56 = vperm.slane %v1847_v26, 2 }
 0x506   : > { %2333 = vst [vmem:[#allocation1 + $0x6] ss:$9 sm:$0xff] %v2052_v33  ;;  %v2061_v33 = vperm.slane %v9084_v43, 7  ;;  %v2066_v43 = vperm.slane %v1847_v26, 4 }
 0x507   : > { %2334 = vst [vmem:[#allocation1 + $0x7] ss:$9 sm:$0xff] %v2053_v59  ;;  %v3922_v36 = vmul.f32 1.442695, %v3884_v2  ;;  %v9132_v59 = vpop.xlane.xlu2 %1850  ;;  %v2068_v2 = vperm.slane %v1847_v26, 6 }
 0x509   : > { %6950 = vpow2.f32 %v3922_v36 }
 0x50e   : > { %v9119_v0 = vld [vmem:[#allocation1] sm:$0xff] }
 0x50f   : > { %11454 = vst [vmem:[#allocation60_spill] sm:$0xff] %v9119_v0  ;;  %v3829_v36 = vpop.xlane.xlu2 %3828 }
 0x510   : > { %2336 = vst [vmem:[#allocation1] ss:$9 sm:$0xff] %v2054_v5  ;;  %v3825_v5 = vpop.xlane.xlu1 %3824 }
 0x511   : > { %2337 = vst [vmem:[#allocation1 + $0x1] ss:$9 sm:$0xff] %v2055_v17  ;;  %v2063_v17 = vperm.slane %v1847_v26, 1 }
 0x512   : > { %2338 = vst [vmem:[#allocation1 + $0x2] ss:$9 sm:$0xff] %v2056_v3  ;;  %v3883_v3 = vsub.f32 %v8861_v27, %v3825_v5  ;;  %v3885_v5 = vsub.f32 %v8885_v7, %v3829_v36  ;;  %v2070_v7 = vperm.slane %v9125_v51, 0 }
 0x513   : > { %2339 = vst [vmem:[#allocation1 + $0x3] ss:$9 sm:$0xff] %v2057_v12  ;;  %v9135_v12 = vpop.eup %6950 }
 0x514   : > { %2340 = vst [vmem:[#allocation1 + $0x4] ss:$9 sm:$0xff] %v2058_v53  ;;  %v2065_v53 = vperm.slane %v1847_v26, 3  ;;  %v3920_v0 = vmul.f32 1.442695, %v3883_v3  ;;  %3986 = vadd.xlane.f32.xlu1 %v9135_v12 }
 0x515   : > { %2341 = vst [vmem:[#allocation1 + $0x5] ss:$9 sm:$0xff] %v2059_v37  ;;  %v2067_v37 = vperm.slane %v1847_v26, 5 }
 0x516   : > { %2342 = vst [vmem:[#allocation1 + $0x6] ss:$9 sm:$0xff] %v2060_v54  ;;  %6952 = vpow2.f32 %v3920_v0  ;;  %v3833_v54 = vpop.xlane.xlu0 %3832 }
 0x517   : > { %2343 = vst [vmem:[#allocation1 + $0x7] ss:$9 sm:$0xff] %v2061_v33  ;;  %v2069_v33 = vperm.slane %v1847_v26, 7  ;;  %v3887_v27 = vsub.f32 %v8871_v45, %v3833_v54  ;;  %v2076_v54 = vperm.slane %v9125_v51, 6 }
 0x518   : > { %v3831_v41 = vpop.xlane.xlu1 %3830 }
 0x519   : > { %v3928_v3 = vmul.f32 1.442695, %v3887_v27  ;;  %v2077_v27 = vperm.slane %v9125_v51, 7 }
 0x51b   : > { %6954 = vpow2.f32 %v3928_v3  ;;  %v2078_v3 = vperm.slane %v9132_v59, 0 }
 0x51e   : > { %v9137_v29 = vld [vmem:[#allocation1] sm:$0xff] }
 0x51f   : > { %11455 = vst [vmem:[#allocation61_spill] sm:$0xff] %v9137_v29  ;;  %v3886_v29 = vsub.f32 %v8877_v15, %v3831_v41  ;;  %v2071_v15 = vperm.slane %v9125_v51, 1 }
 0x520   : > { %2345 = vst [vmem:[#allocation1] ss:$9 sm:$0xff] %v2062_v20  ;;  %v3924_v20 = vmul.f32 1.442695, %v3885_v5  ;;  %v1853_v5 = vpop.xlane.xlu0 %1852 }
 0x521   : > { %2346 = vst [vmem:[#allocation1 + $0x1] ss:$9 sm:$0xff] %v2063_v17  ;;  %v9143_v17 = vpop.eup %6952  ;;  %v3926_v0 = vmul.f32 1.442695, %v3886_v29  ;;  %v2072_v29 = vperm.slane %v9125_v51, 2 }
 0x522   : > { %2347 = vst [vmem:[#allocation1 + $0x2] ss:$9 sm:$0xff] %v2064_v56  ;;  %6956 = vpow2.f32 %v3924_v20  ;;  %3984 = vadd.xlane.f32.xlu2 %v9143_v17  ;;  %v9146_v45 = vpop.eup %6954 }
 0x523   : > { %2348 = vst [vmem:[#allocation1 + $0x3] ss:$9 sm:$0xff] %v2065_v53  ;;  %6958 = vpow2.f32 %v3926_v0  ;;  %3992 = vadd.xlane.f32.xlu1 %v9146_v45  ;;  %v2073_v53 = vperm.slane %v9125_v51, 3 }
 0x524   : > { %2349 = vst [vmem:[#allocation1 + $0x4] ss:$9 sm:$0xff] %v2066_v43  ;;  %v2074_v43 = vperm.slane %v9125_v51, 4 }
 0x525   : > { %2350 = vst [vmem:[#allocation1 + $0x5] ss:$9 sm:$0xff] %v2067_v37  ;;  %v2075_v37 = vperm.slane %v9125_v51, 5  ;;  %v9175_v51 = vpop.xlane.xlu1 %1854 }
 0x526   : > { %2351 = vst [vmem:[#allocation1 + $0x6] ss:$9 sm:$0xff] %v2068_v2  ;;  %v3835_v2 = vpop.xlane.xlu2 %3834 }
 0x527   : > { %2352 = vst [vmem:[#allocation1 + $0x7] ss:$9 sm:$0xff] %v2069_v33  ;;  %v3888_v33 = vsub.f32 %v8896_v32, %v3835_v2  ;;  %v2081_v32 = vperm.slane %v9132_v59, 3  ;;  %v2084_v2 = vperm.slane %v9132_v59, 6 }
 0x528   : > { %v9149_v26 = vpop.eup %6956 }
 0x529   : > { %v9155_v41 = vpop.eup %6958  ;;  %3988 = vadd.xlane.f32.xlu0 %v9149_v26  ;;  %v3930_v36 = vmul.f32 1.442695, %v3888_v33 }
 0x52a   : > { %3990 = vadd.xlane.f32.xlu2 %v9155_v41 }
 0x52b   : > { %6960 = vpow2.f32 %v3930_v36  ;;  %v2086_v36 = vperm.slane %v1853_v5, 0 }
 0x52e   : > { %v9151_v56 = vld [vmem:[#allocation1] sm:$0xff] }
 0x52f   : > { %11456 = vst [vmem:[#allocation62_spill] sm:$0xff] %v9151_v56 }
 0x530   : > { %2354 = vst [vmem:[#allocation1] ss:$9 sm:$0xff] %v2070_v7  ;;  %v2079_v7 = vperm.slane %v9132_v59, 1 }
 0x531   : > { %2355 = vst [vmem:[#allocation1 + $0x1] ss:$9 sm:$0xff] %v2071_v15  ;;  %v9167_v20 = vpop.eup %6960  ;;  %v2080_v15 = vperm.slane %v9132_v59, 2 }
 0x532   : > { %2356 = vst [vmem:[#allocation1 + $0x2] ss:$9 sm:$0xff] %v2072_v29  ;;  %3994 = vadd.xlane.f32.xlu0 %v9167_v20  ;;  %v2082_v29 = vperm.slane %v9132_v59, 4 }
 0x533   : > { %2357 = vst [vmem:[#allocation1 + $0x3] ss:$9 sm:$0xff] %v2073_v53  ;;  %v3839_v53 = vpop.xlane.xlu0 %3838 }
 0x534   : > { %2358 = vst [vmem:[#allocation1 + $0x4] ss:$9 sm:$0xff] %v2074_v43  ;;  %v2083_v43 = vperm.slane %v9132_v59, 5 }
 0x535   : > { %2359 = vst [vmem:[#allocation1 + $0x5] ss:$9 sm:$0xff] %v2075_v37  ;;  %v3890_v37 = vsub.f32 %v8911_v35, %v3839_v53  ;;  %v2088_v35 = vperm.slane %v1853_v5, 2 }
 0x536   : > { %2360 = vst [vmem:[#allocation1 + $0x6] ss:$9 sm:$0xff] %v2076_v54  ;;  %v2085_v54 = vperm.slane %v9132_v59, 7  ;;  %v2090_v59 = vperm.slane %v1853_v5, 4 }
 0x537   : > { %2361 = vst [vmem:[#allocation1 + $0x7] ss:$9 sm:$0xff] %v2077_v27  ;;  %v3934_v33 = vmul.f32 1.442695, %v3890_v37  ;;  %v9182_v27 = vpop.xlane.xlu2 %1856  ;;  %v2092_v37 = vperm.slane %v1853_v5, 6 }
 0x539   : > { %6962 = vpow2.f32 %v3934_v33 }
 0x53e   : > { %v9169_v0 = vld [vmem:[#allocation1] sm:$0xff] }
 0x53f   : > { %11457 = vst [vmem:[#allocation63_spill] sm:$0xff] %v9169_v0  ;;  %v3841_v33 = vpop.xlane.xlu2 %3840 }
 0x540   : > { %2363 = vst [vmem:[#allocation1] ss:$9 sm:$0xff] %v2078_v3  ;;  %v3837_v3 = vpop.xlane.xlu1 %3836 }
 0x541   : > { %2364 = vst [vmem:[#allocation1 + $0x1] ss:$9 sm:$0xff] %v2079_v7  ;;  %v2087_v7 = vperm.slane %v1853_v5, 1 }
 0x542   : > { %2365 = vst [vmem:[#allocation1 + $0x2] ss:$9 sm:$0xff] %v2080_v15  ;;  %v3889_v15 = vsub.f32 %v8917_v30, %v3837_v3  ;;  %v3891_v3 = vsub.f32 %v8943_v34, %v3841_v33  ;;  %v2094_v34 = vperm.slane %v9175_v51, 0 }
 0x543   : > { %2366 = vst [vmem:[#allocation1 + $0x3] ss:$9 sm:$0xff] %v2081_v32  ;;  %v9185_v32 = vpop.eup %6962 }
 0x544   : > { %2367 = vst [vmem:[#allocation1 + $0x4] ss:$9 sm:$0xff] %v2082_v29  ;;  %v2089_v29 = vperm.slane %v1853_v5, 3  ;;  %v3932_v0 = vmul.f32 1.442695, %v3889_v15  ;;  %3998 = vadd.xlane.f32.xlu1 %v9185_v32 }
 0x545   : > { %2368 = vst [vmem:[#allocation1 + $0x5] ss:$9 sm:$0xff] %v2083_v43  ;;  %v2091_v43 = vperm.slane %v1853_v5, 5 }
 0x546   : > { %2369 = vst [vmem:[#allocation1 + $0x6] ss:$9 sm:$0xff] %v2084_v2  ;;  %6964 = vpow2.f32 %v3932_v0  ;;  %v3845_v2 = vpop.xlane.xlu0 %3844 }
 0x547   : > { %2370 = vst [vmem:[#allocation1 + $0x7] ss:$9 sm:$0xff] %v2085_v54  ;;  %v2093_v54 = vperm.slane %v1853_v5, 7  ;;  %v3893_v30 = vsub.f32 %v8929_v39, %v3845_v2  ;;  %v2100_v2 = vperm.slane %v9175_v51, 6 }
 0x548   : > { %v3843_v56 = vpop.xlane.xlu1 %3842 }
 0x549   : > { %v3940_v15 = vmul.f32 1.442695, %v3893_v30  ;;  %v2101_v30 = vperm.slane %v9175_v51, 7 }
 0x54b   : > { %6966 = vpow2.f32 %v3940_v15  ;;  %v2102_v15 = vperm.slane %v9182_v27, 0 }
 0x54e   : > { %v9187_v53 = vld [vmem:[#allocation1] sm:$0xff] }
 0x54f   : > { %11458 = vst [vmem:[#allocation64_spill] sm:$0xff] %v9187_v53  ;;  %v3892_v53 = vsub.f32 %v8933_v40, %v3843_v56  ;;  %v2095_v40 = vperm.slane %v9175_v51, 1 }
 0x550   : > { %2372 = vst [vmem:[#allocation1] ss:$9 sm:$0xff] %v2086_v36  ;;  %v3936_v36 = vmul.f32 1.442695, %v3891_v3  ;;  %v1859_v3 = vpop.xlane.xlu0 %1858 }
 0x551   : > { %2373 = vst [vmem:[#allocation1 + $0x1] ss:$9 sm:$0xff] %v2087_v7  ;;  %v9193_v7 = vpop.eup %6964  ;;  %v3938_v0 = vmul.f32 1.442695, %v3892_v53  ;;  %v2096_v53 = vperm.slane %v9175_v51, 2 }
 0x552   : > { %2374 = vst [vmem:[#allocation1 + $0x2] ss:$9 sm:$0xff] %v2088_v35  ;;  %6968 = vpow2.f32 %v3936_v36  ;;  %3996 = vadd.xlane.f32.xlu2 %v9193_v7  ;;  %v9196_v39 = vpop.eup %6966 }
 0x553   : > { %2375 = vst [vmem:[#allocation1 + $0x3] ss:$9 sm:$0xff] %v2089_v29  ;;  %6970 = vpow2.f32 %v3938_v0  ;;  %4004 = vadd.xlane.f32.xlu1 %v9196_v39  ;;  %v2097_v29 = vperm.slane %v9175_v51, 3 }
 0x554   : > { %2376 = vst [vmem:[#allocation1 + $0x4] ss:$9 sm:$0xff] %v2090_v59  ;;  %v2098_v59 = vperm.slane %v9175_v51, 4 }
 0x555   : > { %2377 = vst [vmem:[#allocation1 + $0x5] ss:$9 sm:$0xff] %v2091_v43  ;;  %v2099_v43 = vperm.slane %v9175_v51, 5  ;;  %v9225_v51 = vpop.xlane.xlu1 %1860 }
 0x556   : > { %2378 = vst [vmem:[#allocation1 + $0x6] ss:$9 sm:$0xff] %v2092_v37  ;;  %v3847_v37 = vpop.xlane.xlu2 %3846 }
 0x557   : > { %2379 = vst [vmem:[#allocation1 + $0x7] ss:$9 sm:$0xff] %v2093_v54  ;;  %v3894_v54 = vsub.f32 %v8952_v31, %v3847_v37  ;;  %v2105_v31 = vperm.slane %v9182_v27, 3  ;;  %v2108_v37 = vperm.slane %v9182_v27, 6 }
 0x558   : > { %v9199_v5 = vpop.eup %6968 }
 0x559   : > { %v9205_v56 = vpop.eup %6970  ;;  %4000 = vadd.xlane.f32.xlu0 %v9199_v5  ;;  %v3942_v33 = vmul.f32 1.442695, %v3894_v54 }
 0x55a   : > { %4002 = vadd.xlane.f32.xlu2 %v9205_v56 }
 0x55b   : > { %6972 = vpow2.f32 %v3942_v33  ;;  %v2110_v33 = vperm.slane %v1859_v3, 0 }
 0x55e   : > { %v9201_v35 = vld [vmem:[#allocation1] sm:$0xff] }
 0x55f   : > { %11459 = vst [vmem:[#allocation65_spill] sm:$0xff] %v9201_v35 }
 0x560   : > { %2381 = vst [vmem:[#allocation1] ss:$9 sm:$0xff] %v2094_v34  ;;  %v2103_v34 = vperm.slane %v9182_v27, 1 }
 0x561   : > { %2382 = vst [vmem:[#allocation1 + $0x1] ss:$9 sm:$0xff] %v2095_v40  ;;  %v9217_v36 = vpop.eup %6972  ;;  %v2104_v40 = vperm.slane %v9182_v27, 2 }
 0x562   : > { %2383 = vst [vmem:[#allocation1 + $0x2] ss:$9 sm:$0xff] %v2096_v53  ;;  %4006 = vadd.xlane.f32.xlu0 %v9217_v36  ;;  %v2106_v53 = vperm.slane %v9182_v27, 4 }
 0x563   : > { %2384 = vst [vmem:[#allocation1 + $0x3] ss:$9 sm:$0xff] %v2097_v29  ;;  %v3851_v29 = vpop.xlane.xlu0 %3850 }
 0x564   : > { %2385 = vst [vmem:[#allocation1 + $0x4] ss:$9 sm:$0xff] %v2098_v59  ;;  %v2107_v59 = vperm.slane %v9182_v27, 5 }
 0x565   : > { %2386 = vst [vmem:[#allocation1 + $0x5] ss:$9 sm:$0xff] %v2099_v43  ;;  %v3896_v43 = vsub.f32 %v8969_v6, %v3851_v29  ;;  %v2112_v6 = vperm.slane %v1859_v3, 2 }
 0x566   : > { %2387 = vst [vmem:[#allocation1 + $0x6] ss:$9 sm:$0xff] %v2100_v2  ;;  %v2109_v2 = vperm.slane %v9182_v27, 7  ;;  %v2114_v27 = vperm.slane %v1859_v3, 4 }
 0x567   : > { %2388 = vst [vmem:[#allocation1 + $0x7] ss:$9 sm:$0xff] %v2101_v30  ;;  %v3946_v54 = vmul.f32 1.442695, %v3896_v43  ;;  %v9232_v30 = vpop.xlane.xlu2 %1862  ;;  %v2116_v43 = vperm.slane %v1859_v3, 6 }
 0x569   : > { %6974 = vpow2.f32 %v3946_v54 }
 0x56e   : > { %v9219_v0 = vld [vmem:[#allocation1] sm:$0xff] }
 0x56f   : > { %11460 = vst [vmem:[#allocation66_spill] sm:$0xff] %v9219_v0  ;;  %v3853_v54 = vpop.xlane.xlu2 %3852 }
 0x570   : > { %2390 = vst [vmem:[#allocation1] ss:$9 sm:$0xff] %v2102_v15  ;;  %v3849_v15 = vpop.xlane.xlu1 %3848 }
 0x571   : > { %2391 = vst [vmem:[#allocation1 + $0x1] ss:$9 sm:$0xff] %v2103_v34  ;;  %v2111_v34 = vperm.slane %v1859_v3, 1 }
 0x572   : > { %2392 = vst [vmem:[#allocation1 + $0x2] ss:$9 sm:$0xff] %v2104_v40  ;;  %v3895_v40 = vsub.f32 %v8975_v60, %v3849_v15  ;;  %v3897_v15 = vsub.f32 %v8999_v50, %v3853_v54  ;;  %v2118_v50 = vperm.slane %v9225_v51, 0 }
 0x573   : > { %2393 = vst [vmem:[#allocation1 + $0x3] ss:$9 sm:$0xff] %v2105_v31  ;;  %v9235_v31 = vpop.eup %6974 }
 0x574   : > { %2394 = vst [vmem:[#allocation1 + $0x4] ss:$9 sm:$0xff] %v2106_v53  ;;  %v2113_v53 = vperm.slane %v1859_v3, 3  ;;  %v3944_v0 = vmul.f32 1.442695, %v3895_v40  ;;  %4010 = vadd.xlane.f32.xlu1 %v9235_v31 }
 0x575   : > { %2395 = vst [vmem:[#allocation1 + $0x5] ss:$9 sm:$0xff] %v2107_v59  ;;  %v2115_v59 = vperm.slane %v1859_v3, 5 }
 0x576   : > { %2396 = vst [vmem:[#allocation1 + $0x6] ss:$9 sm:$0xff] %v2108_v37  ;;  %6976 = vpow2.f32 %v3944_v0  ;;  %v3857_v37 = vpop.xlane.xlu0 %3856 }
 0x577   : > { %2397 = vst [vmem:[#allocation1 + $0x7] ss:$9 sm:$0xff] %v2109_v2  ;;  %v2117_v2 = vperm.slane %v1859_v3, 7  ;;  %v3899_v60 = vsub.f32 %v8985_v42, %v3857_v37  ;;  %v2124_v37 = vperm.slane %v9225_v51, 6 }
 0x578   : > { %v3855_v35 = vpop.xlane.xlu1 %3854 }
 0x579   : > { %v3952_v40 = vmul.f32 1.442695, %v3899_v60  ;;  %v2125_v60 = vperm.slane %v9225_v51, 7 }
 0x57b   : > { %6978 = vpow2.f32 %v3952_v40  ;;  %v2126_v40 = vperm.slane %v9232_v30, 0 }
 0x57e   : > { %v9237_v29 = vld [vmem:[#allocation1] sm:$0xff] }
 0x57f   : > { %11461 = vst [vmem:[#allocation67_spill] sm:$0xff] %v9237_v29  ;;  %v3898_v29 = vsub.f32 %v8991_v24, %v3855_v35  ;;  %v2119_v24 = vperm.slane %v9225_v51, 1 }
 0x580   : > { %2399 = vst [vmem:[#allocation1] ss:$9 sm:$0xff] %v2110_v33  ;;  %v3948_v33 = vmul.f32 1.442695, %v3897_v15  ;;  %v1865_v15 = vpop.xlane.xlu0 %1864 }
 0x581   : > { %2400 = vst [vmem:[#allocation1 + $0x1] ss:$9 sm:$0xff] %v2111_v34  ;;  %v9243_v34 = vpop.eup %6976  ;;  %v3950_v0 = vmul.f32 1.442695, %v3898_v29  ;;  %v2120_v29 = vperm.slane %v9225_v51, 2 }
 0x582   : > { %2401 = vst [vmem:[#allocation1 + $0x2] ss:$9 sm:$0xff] %v2112_v6  ;;  %6980 = vpow2.f32 %v3948_v33  ;;  %4008 = vadd.xlane.f32.xlu2 %v9243_v34  ;;  %v9246_v42 = vpop.eup %6978 }
 0x583   : > { %2402 = vst [vmem:[#allocation1 + $0x3] ss:$9 sm:$0xff] %v2113_v53  ;;  %6982 = vpow2.f32 %v3950_v0  ;;  %4016 = vadd.xlane.f32.xlu1 %v9246_v42  ;;  %v2121_v53 = vperm.slane %v9225_v51, 3 }
 0x584   : > { %2403 = vst [vmem:[#allocation1 + $0x4] ss:$9 sm:$0xff] %v2114_v27  ;;  %v2122_v27 = vperm.slane %v9225_v51, 4 }
 0x585   : > { %2404 = vst [vmem:[#allocation1 + $0x5] ss:$9 sm:$0xff] %v2115_v59  ;;  %v2123_v59 = vperm.slane %v9225_v51, 5  ;;  %v2130_v51 = vperm.slane %v9232_v30, 4 }
 0x586   : > { %2405 = vst [vmem:[#allocation1 + $0x6] ss:$9 sm:$0xff] %v2116_v43  ;;  %v3859_v43 = vpop.xlane.xlu2 %3858 }
 0x587   : > { %2406 = vst [vmem:[#allocation1 + $0x7] ss:$9 sm:$0xff] %v2117_v2  ;;  %v3900_v2 = vsub.f32 %v9010_v21, %v3859_v43  ;;  %v2129_v21 = vperm.slane %v9232_v30, 3  ;;  %v2133_v43 = vperm.slane %v9232_v30, 7 }
 0x588   : > { %v9249_v3 = vpop.eup %6980 }
 0x589   : > { %v9255_v35 = vpop.eup %6982  ;;  %4012 = vadd.xlane.f32.xlu0 %v9249_v3  ;;  %v3954_v54 = vmul.f32 1.442695, %v3900_v2  ;;  %v2134_v2 = vperm.slane %v1865_v15, 0 }
 0x58a   : > { %4014 = vadd.xlane.f32.xlu2 %v9255_v35 }
 0x58b   : > { %6984 = vpow2.f32 %v3954_v54 }
 0x58e   : > { %v9251_v6 = vld [vmem:[#allocation1] sm:$0xff] }
 0x58f   : > { %11462 = vst [vmem:[#allocation68_spill] sm:$0xff] %v9251_v6 }
 0x590   : > { %2408 = vst [vmem:[#allocation1] ss:$9 sm:$0xff] %v2118_v50  ;;  %v2127_v50 = vperm.slane %v9232_v30, 1 }
 0x591   : > { %2409 = vst [vmem:[#allocation1 + $0x1] ss:$9 sm:$0xff] %v2119_v24  ;;  %v9267_v33 = vpop.eup %6984  ;;  %v2128_v24 = vperm.slane %v9232_v30, 2 }
 0x592   : > { %2410 = vst [vmem:[#allocation1 + $0x2] ss:$9 sm:$0xff] %v2120_v29  ;;  %4018 = vadd.xlane.f32.xlu0 %v9267_v33  ;;  %v3863_v29 = vpop.xlane.xlu0 %3862 }
 0x593   : > { %2411 = vst [vmem:[#allocation1 + $0x3] ss:$9 sm:$0xff] %v2121_v53  ;;  %v2131_v53 = vperm.slane %v9232_v30, 5 }
 0x594   : > { %2412 = vst [vmem:[#allocation1 + $0x4] ss:$9 sm:$0xff] %v2122_v27  ;;  %v3902_v27 = vsub.f32 %v9021_v4, %v3863_v29  ;;  %v2138_v4 = vperm.slane %v1865_v15, 4  ;;  %v1867_v29 = vpop.xlane.xlu1 %1866 }
 0x595   : > { %2413 = vst [vmem:[#allocation1 + $0x5] ss:$9 sm:$0xff] %v2123_v59  ;;  %v2132_v59 = vperm.slane %v9232_v30, 6  ;;  %v2140_v30 = vperm.slane %v1865_v15, 6 }
 0x596   : > { %2414 = vst [vmem:[#allocation1 + $0x6] ss:$9 sm:$0xff] %v2124_v37  ;;  %v3958_v37 = vmul.f32 1.442695, %v3902_v27 }
 0x597   : > { %2415 = vst [vmem:[#allocation1 + $0x7] ss:$9 sm:$0xff] %v2125_v60  ;;  %v2135_v60 = vperm.slane %v1865_v15, 1 }
 0x598   : > { %6986 = vpow2.f32 %v3958_v37  ;;  %v2145_v37 = vperm.slane %v1867_v29, 3 }
 0x59e   : > { %v9269_v0 = vld [vmem:[#allocation1] sm:$0xff]  ;;  %v9280_v54 = vpop.eup %6986 }
 0x59f   : > { %11463 = vst [vmem:[#allocation69_spill] sm:$0xff] %v9269_v0  ;;  %4022 = vadd.xlane.f32.xlu1 %v9280_v54 }
 0x5a0   : > { %2417 = vst [vmem:[#allocation1] ss:$9 sm:$0xff] %v2126_v40  ;;  %v2136_v40 = vperm.slane %v1865_v15, 2 }
 0x5a1   : > { %2418 = vst [vmem:[#allocation1 + $0x1] ss:$9 sm:$0xff] %v2127_v50 }
 0x5a2   : > { %2419 = vst [vmem:[#allocation1 + $0x2] ss:$9 sm:$0xff] %v2128_v24  ;;  %v2137_v24 = vperm.slane %v1865_v15, 3 }
 0x5a3   : > { %2420 = vst [vmem:[#allocation1 + $0x3] ss:$9 sm:$0xff] %v2129_v21  ;;  %v2139_v21 = vperm.slane %v1865_v15, 5 }
 0x5a4   : > { %2421 = vst [vmem:[#allocation1 + $0x4] ss:$9 sm:$0xff] %v2130_v51  ;;  %v2141_v51 = vperm.slane %v1865_v15, 7  ;;  %v2149_v15 = vperm.slane %v1867_v29, 7 }
 0x5a5   : > { %2422 = vst [vmem:[#allocation1 + $0x5] ss:$9 sm:$0xff] %v2131_v53  ;;  %v2142_v53 = vperm.slane %v1867_v29, 0 }
 0x5a6   : > { %2423 = vst [vmem:[#allocation1 + $0x6] ss:$9 sm:$0xff] %v2132_v59  ;;  %v2143_v59 = vperm.slane %v1867_v29, 1 }
 0x5a7   : > { %2424 = vst [vmem:[#allocation1 + $0x7] ss:$9 sm:$0xff] %v2133_v43  ;;  %v2144_v43 = vperm.slane %v1867_v29, 2 }
 0x5ae   : > { %v9282_v50 = vld [vmem:[#allocation1] sm:$0xff] }
 0x5af   : > { %11464 = vst [vmem:[#allocation70_spill] sm:$0xff] %v9282_v50 }
 0x5b0   : > { %2426 = vst [vmem:[#allocation1] ss:$9 sm:$0xff] %v2134_v2  ;;  %v2146_v2 = vperm.slane %v1867_v29, 4 }
 0x5b1   : > { %2427 = vst [vmem:[#allocation1 + $0x1] ss:$9 sm:$0xff] %v2135_v60  ;;  %v2147_v60 = vperm.slane %v1867_v29, 5 }
 0x5b2   : > { %2428 = vst [vmem:[#allocation1 + $0x2] ss:$9 sm:$0xff] %v2136_v40  ;;  %v2148_v40 = vperm.slane %v1867_v29, 6  ;;  %v11467_v29 = vld [vmem:[#allocation46_spill] sm:$0xff] }
 0x5b3   : > { %2429 = vst [vmem:[#allocation1 + $0x3] ss:$9 sm:$0xff] %v2137_v24  ;;  %v1869_v24 = vpop.xlane.xlu2 %1868 }
 0x5b4   : > { %2430 = vst [vmem:[#allocation1 + $0x4] ss:$9 sm:$0xff] %v2138_v4  ;;  %v2150_v4 = vperm.slane %v1869_v24, 0 }
 0x5b5   : > { %2431 = vst [vmem:[#allocation1 + $0x5] ss:$9 sm:$0xff] %v2139_v21 }
 0x5b6   : > { %2432 = vst [vmem:[#allocation1 + $0x6] ss:$9 sm:$0xff] %v2140_v30  ;;  %v2151_v30 = vperm.slane %v1869_v24, 1 }
 0x5b7   : > { %2433 = vst [vmem:[#allocation1 + $0x7] ss:$9 sm:$0xff] %v2141_v51  ;;  %v2152_v51 = vperm.slane %v1869_v24, 2 }
 0x5be   : > { %v9285_v27 = vld [vmem:[#allocation1] sm:$0xff] }
 0x5bf   : > { %11465 = vst [vmem:[#allocation71_spill] sm:$0xff] %v9285_v27 }
 0x5c0   : > { %2435 = vst [vmem:[#allocation1] ss:$9 sm:$0xff] %v2142_v53  ;;  %v2153_v53 = vperm.slane %v1869_v24, 3 }
 0x5c1   : > { %2436 = vst [vmem:[#allocation1 + $0x1] ss:$9 sm:$0xff] %v2143_v59  ;;  %v2154_v59 = vperm.slane %v1869_v24, 4 }
 0x5c2   : > { %2437 = vst [vmem:[#allocation1 + $0x2] ss:$9 sm:$0xff] %v2144_v43  ;;  %v2155_v43 = vperm.slane %v1869_v24, 5 }
 0x5c3   : > { %2438 = vst [vmem:[#allocation1 + $0x3] ss:$9 sm:$0xff] %v2145_v37  ;;  %v2156_v37 = vperm.slane %v1869_v24, 6 }
 0x5c4   : > { %2439 = vst [vmem:[#allocation1 + $0x4] ss:$9 sm:$0xff] %v2146_v2  ;;  %v2157_v2 = vperm.slane %v1869_v24, 7  ;;  %v3105_v24 = vperm.slane %v11467_v29, 5 }
 0x5c5   : > { %2440 = vst [vmem:[#allocation1 + $0x5] ss:$9 sm:$0xff] %v2147_v60  ;;  %v3100_v60 = vperm.slane %v11467_v29, 0 }
 0x5c6   : > { %2441 = vst [vmem:[#allocation1 + $0x6] ss:$9 sm:$0xff] %v2148_v40  ;;  %v3101_v40 = vperm.slane %v11467_v29, 1 }
 0x5c7   : > { %2442 = vst [vmem:[#allocation1 + $0x7] ss:$9 sm:$0xff] %v2149_v15 }
 0x5ce   : > { %v9287_v21 = vld [vmem:[#allocation1] sm:$0xff] }
 0x5cf   : > { %11466 = vst [vmem:[#allocation72_spill] sm:$0xff] %v9287_v21 }
 0x5d0   : > { %2444 = vst [vmem:[#allocation1] ss:$9 sm:$0xff] %v2150_v4  ;;  %v3102_v4 = vperm.slane %v11467_v29, 2 }
 0x5d1   : > { %2445 = vst [vmem:[#allocation1 + $0x1] ss:$9 sm:$0xff] %v2151_v30  ;;  %v3103_v30 = vperm.slane %v11467_v29, 3 }
 0x5d2   : > { %2446 = vst [vmem:[#allocation1 + $0x2] ss:$9 sm:$0xff] %v2152_v51  ;;  %v3104_v51 = vperm.slane %v11467_v29, 4 }
 0x5d3   : > { %2447 = vst [vmem:[#allocation1 + $0x3] ss:$9 sm:$0xff] %v2153_v53  ;;  %v3106_v53 = vperm.slane %v11467_v29, 6 }
 0x5d4   : > { %2448 = vst [vmem:[#allocation1 + $0x4] ss:$9 sm:$0xff] %v2154_v59  ;;  %v3107_v59 = vperm.slane %v11467_v29, 7 }
 0x5d5   : > { %2449 = vst [vmem:[#allocation1 + $0x5] ss:$9 sm:$0xff] %v2155_v43  ;;  %v11469_v43 = vld [vmem:[#allocation47_spill] sm:$0xff] }
 0x5d6   : > { %2450 = vst [vmem:[#allocation1 + $0x6] ss:$9 sm:$0xff] %v2156_v37  ;;  %v3108_v37 = vperm.slane %v11469_v43, 0  ;;  %v3113_v29 = vperm.slane %v11469_v43, 5 }
 0x5d7   : > { %2451 = vst [vmem:[#allocation1 + $0x7] ss:$9 sm:$0xff] %v2157_v2  ;;  %v3109_v2 = vperm.slane %v11469_v43, 1 }
 0x5de   : > { %v9291_v15 = vld [vmem:[#allocation1] sm:$0xff] }
 0x5df   : > { %11468 = vst [vmem:[#allocation46_spill] sm:$0xff] %v9291_v15 }
 0x5e0   : > { %3356 = vst [vmem:[#allocation1] ss:$9 sm:$0xff] %v3100_v60 }
 0x5e1   : > { %3358 = vst [vmem:[#allocation1 + $0x1] ss:$9 sm:$0xff] %v3101_v40  ;;  %v3110_v40 = vperm.slane %v11469_v43, 2 }
 0x5e2   : > { %3360 = vst [vmem:[#allocation1 + $0x2] ss:$9 sm:$0xff] %v3102_v4  ;;  %v3111_v4 = vperm.slane %v11469_v43, 3 }
 0x5e3   : > { %3362 = vst [vmem:[#allocation1 + $0x3] ss:$9 sm:$0xff] %v3103_v30  ;;  %v3112_v30 = vperm.slane %v11469_v43, 4 }
 0x5e4   : > { %3364 = vst [vmem:[#allocation1 + $0x4] ss:$9 sm:$0xff] %v3104_v51  ;;  %v3114_v51 = vperm.slane %v11469_v43, 6 }
 0x5e5   : > { %3366 = vst [vmem:[#allocation1 + $0x5] ss:$9 sm:$0xff] %v3105_v24  ;;  %v3115_v24 = vperm.slane %v11469_v43, 7 }
 0x5e6   : > { %3368 = vst [vmem:[#allocation1 + $0x6] ss:$9 sm:$0xff] %v3106_v53  ;;  %v11471_v53 = vld [vmem:[#allocation49_spill] sm:$0xff] }
 0x5e7   : > { %3370 = vst [vmem:[#allocation1 + $0x7] ss:$9 sm:$0xff] %v3107_v59  ;;  %v3116_v59 = vperm.slane %v11471_v53, 0  ;;  %v3121_v43 = vperm.slane %v11471_v53, 5 }
 0x5ee   : > { %v9301_v60 = vld [vmem:[#allocation1] sm:$0xff] }
 0x5ef   : > { %11470 = vst [vmem:[#allocation47_spill] sm:$0xff] %v9301_v60 }
 0x5f0   : > { %3372 = vst [vmem:[#allocation1] ss:$9 sm:$0xff] %v3108_v37  ;;  %v3117_v37 = vperm.slane %v11471_v53, 1 }
 0x5f1   : > { %3373 = vst [vmem:[#allocation1 + $0x1] ss:$9 sm:$0xff] %v3109_v2  ;;  %v3118_v2 = vperm.slane %v11471_v53, 2 }
 0x5f2   : > { %3374 = vst [vmem:[#allocation1 + $0x2] ss:$9 sm:$0xff] %v3110_v40  ;;  %v3119_v40 = vperm.slane %v11471_v53, 3 }
 0x5f3   : > { %3375 = vst [vmem:[#allocation1 + $0x3] ss:$9 sm:$0xff] %v3111_v4  ;;  %v3120_v4 = vperm.slane %v11471_v53, 4 }
 0x5f4   : > { %3376 = vst [vmem:[#allocation1 + $0x4] ss:$9 sm:$0xff] %v3112_v30  ;;  %v3122_v30 = vperm.slane %v11471_v53, 6 }
 0x5f5   : > { %3377 = vst [vmem:[#allocation1 + $0x5] ss:$9 sm:$0xff] %v3113_v29  ;;  %v3123_v29 = vperm.slane %v11471_v53, 7  ;;  %v3129_v53 = vperm.slane %v8559_v38, 5 }
 0x5f6   : > { %3378 = vst [vmem:[#allocation1 + $0x6] ss:$9 sm:$0xff] %v3114_v51  ;;  %v3124_v51 = vperm.slane %v8559_v38, 0 }
 0x5f7   : > { %3379 = vst [vmem:[#allocation1 + $0x7] ss:$9 sm:$0xff] %v3115_v24  ;;  %v3125_v24 = vperm.slane %v8559_v38, 1 }
 0x5fe   : > { %v9311_v21 = vld [vmem:[#allocation1] sm:$0xff] }
 0x5ff   : > { %11472 = vst [vmem:[#allocation49_spill] sm:$0xff] %v9311_v21 }
 0x600   : > { %3381 = vst [vmem:[#allocation1] ss:$9 sm:$0xff] %v3116_v59 }
 0x601   : > { %3382 = vst [vmem:[#allocation1 + $0x1] ss:$9 sm:$0xff] %v3117_v37  ;;  %v3126_v37 = vperm.slane %v8559_v38, 2 }
 0x602   : > { %3383 = vst [vmem:[#allocation1 + $0x2] ss:$9 sm:$0xff] %v3118_v2  ;;  %v3127_v2 = vperm.slane %v8559_v38, 3 }
 0x603   : > { %3384 = vst [vmem:[#allocation1 + $0x3] ss:$9 sm:$0xff] %v3119_v40  ;;  %v3128_v40 = vperm.slane %v8559_v38, 4 }
 0x604   : > { %3385 = vst [vmem:[#allocation1 + $0x4] ss:$9 sm:$0xff] %v3120_v4  ;;  %v3130_v4 = vperm.slane %v8559_v38, 6 }
 0x605   : > { %3386 = vst [vmem:[#allocation1 + $0x5] ss:$9 sm:$0xff] %v3121_v43  ;;  %v3131_v43 = vperm.slane %v8559_v38, 7  ;;  %v3137_v38 = vperm.slane %v8577_v49, 5 }
 0x606   : > { %3387 = vst [vmem:[#allocation1 + $0x6] ss:$9 sm:$0xff] %v3122_v30  ;;  %v3132_v30 = vperm.slane %v8577_v49, 0 }
 0x607   : > { %3388 = vst [vmem:[#allocation1 + $0x7] ss:$9 sm:$0xff] %v3123_v29  ;;  %v3133_v29 = vperm.slane %v8577_v49, 1 }
 0x60e   : > { %v9321_v59 = vld [vmem:[#allocation1] sm:$0xff] }
 0x60f   : > { %11473 = vst [vmem:[#allocation73_spill] sm:$0xff] %v9321_v59 }
 0x610   : > { %3390 = vst [vmem:[#allocation1] ss:$9 sm:$0xff] %v3124_v51 }
 0x611   : > { %3391 = vst [vmem:[#allocation1 + $0x1] ss:$9 sm:$0xff] %v3125_v24  ;;  %v3134_v24 = vperm.slane %v8577_v49, 2 }
 0x612   : > { %3392 = vst [vmem:[#allocation1 + $0x2] ss:$9 sm:$0xff] %v3126_v37  ;;  %v3135_v37 = vperm.slane %v8577_v49, 3 }
 0x613   : > { %3393 = vst [vmem:[#allocation1 + $0x3] ss:$9 sm:$0xff] %v3127_v2  ;;  %v3136_v2 = vperm.slane %v8577_v49, 4 }
 0x614   : > { %3394 = vst [vmem:[#allocation1 + $0x4] ss:$9 sm:$0xff] %v3128_v40  ;;  %v3138_v40 = vperm.slane %v8577_v49, 6 }
 0x615   : > { %3395 = vst [vmem:[#allocation1 + $0x5] ss:$9 sm:$0xff] %v3129_v53  ;;  %v3139_v53 = vperm.slane %v8577_v49, 7  ;;  %v3145_v49 = vperm.slane %v8589_v19, 5 }
 0x616   : > { %3396 = vst [vmem:[#allocation1 + $0x6] ss:$9 sm:$0xff] %v3130_v4  ;;  %v3140_v4 = vperm.slane %v8589_v19, 0 }
 0x617   : > { %3397 = vst [vmem:[#allocation1 + $0x7] ss:$9 sm:$0xff] %v3131_v43  ;;  %v3141_v43 = vperm.slane %v8589_v19, 1 }
 0x61e   : > { %v9331_v51 = vld [vmem:[#allocation1] sm:$0xff] }
 0x61f   : > { %11474 = vst [vmem:[#allocation74_spill] sm:$0xff] %v9331_v51 }
 0x620   : > { %3399 = vst [vmem:[#allocation1] ss:$9 sm:$0xff] %v3132_v30 }
 0x621   : > { %3400 = vst [vmem:[#allocation1 + $0x1] ss:$9 sm:$0xff] %v3133_v29  ;;  %v3142_v29 = vperm.slane %v8589_v19, 2 }
 0x622   : > { %3401 = vst [vmem:[#allocation1 + $0x2] ss:$9 sm:$0xff] %v3134_v24  ;;  %v3143_v24 = vperm.slane %v8589_v19, 3 }
 0x623   : > { %3402 = vst [vmem:[#allocation1 + $0x3] ss:$9 sm:$0xff] %v3135_v37  ;;  %v3144_v37 = vperm.slane %v8589_v19, 4 }
 0x624   : > { %3403 = vst [vmem:[#allocation1 + $0x4] ss:$9 sm:$0xff] %v3136_v2  ;;  %v3146_v2 = vperm.slane %v8589_v19, 6 }
 0x625   : > { %3404 = vst [vmem:[#allocation1 + $0x5] ss:$9 sm:$0xff] %v3137_v38  ;;  %v3147_v38 = vperm.slane %v8589_v19, 7  ;;  %v3153_v19 = vperm.slane %v8611_v11, 5 }
 0x626   : > { %3405 = vst [vmem:[#allocation1 + $0x6] ss:$9 sm:$0xff] %v3138_v40  ;;  %v3148_v40 = vperm.slane %v8611_v11, 0 }
 0x627   : > { %3406 = vst [vmem:[#allocation1 + $0x7] ss:$9 sm:$0xff] %v3139_v53  ;;  %v3149_v53 = vperm.slane %v8611_v11, 1 }
 0x62e   : > { %v9341_v30 = vld [vmem:[#allocation1] sm:$0xff] }
 0x62f   : > { %11475 = vst [vmem:[#allocation75_spill] sm:$0xff] %v9341_v30  ;;  %v3869_v30 = vpop.xlane.xlu0 %3868 }
 0x630   : > { %3408 = vst [vmem:[#allocation1] ss:$9 sm:$0xff] %v3140_v4 }
 0x631   : > { %3409 = vst [vmem:[#allocation1 + $0x1] ss:$9 sm:$0xff] %v3141_v43  ;;  %v3150_v43 = vperm.slane %v8611_v11, 2 }
 0x632   : > { %3410 = vst [vmem:[#allocation1 + $0x2] ss:$9 sm:$0xff] %v3142_v29  ;;  %v3151_v29 = vperm.slane %v8611_v11, 3 }
 0x633   : > { %3411 = vst [vmem:[#allocation1 + $0x3] ss:$9 sm:$0xff] %v3143_v24  ;;  %v3152_v24 = vperm.slane %v8611_v11, 4 }
 0x634   : > { %3412 = vst [vmem:[#allocation1 + $0x4] ss:$9 sm:$0xff] %v3144_v37  ;;  %v3154_v37 = vperm.slane %v8611_v11, 6 }
 0x635   : > { %3413 = vst [vmem:[#allocation1 + $0x5] ss:$9 sm:$0xff] %v3145_v49  ;;  %v3155_v49 = vperm.slane %v8611_v11, 7  ;;  %v3161_v11 = vperm.slane %v8628_v1, 5 }
 0x636   : > { %3414 = vst [vmem:[#allocation1 + $0x6] ss:$9 sm:$0xff] %v3146_v2  ;;  %v3156_v2 = vperm.slane %v8628_v1, 0 }
 0x637   : > { %3415 = vst [vmem:[#allocation1 + $0x7] ss:$9 sm:$0xff] %v3147_v38  ;;  %v3157_v38 = vperm.slane %v8628_v1, 1 }
 0x63e   : > { %v9351_v4 = vld [vmem:[#allocation1] sm:$0xff] }
 0x63f   : > { %11476 = vst [vmem:[#allocation76_spill] sm:$0xff] %v9351_v4  ;;  %v3184_v4 = vperm.slane %v8713_v48, 4 }
 0x640   : > { %3417 = vst [vmem:[#allocation1] ss:$9 sm:$0xff] %v3148_v40 }
 0x641   : > { %3418 = vst [vmem:[#allocation1 + $0x1] ss:$9 sm:$0xff] %v3149_v53  ;;  %v3158_v53 = vperm.slane %v8628_v1, 2 }
 0x642   : > { %3419 = vst [vmem:[#allocation1 + $0x2] ss:$9 sm:$0xff] %v3150_v43  ;;  %v3159_v43 = vperm.slane %v8628_v1, 3 }
 0x643   : > { %3420 = vst [vmem:[#allocation1 + $0x3] ss:$9 sm:$0xff] %v3151_v29  ;;  %v3160_v29 = vperm.slane %v8628_v1, 4 }
 0x644   : > { %3421 = vst [vmem:[#allocation1 + $0x4] ss:$9 sm:$0xff] %v3152_v24  ;;  %v3162_v24 = vperm.slane %v8628_v1, 6 }
 0x645   : > { %3422 = vst [vmem:[#allocation1 + $0x5] ss:$9 sm:$0xff] %v3153_v19  ;;  %v3163_v19 = vperm.slane %v8628_v1, 7  ;;  %v3166_v1 = vperm.slane %v8640_v61, 2 }
 0x646   : > { %3423 = vst [vmem:[#allocation1 + $0x6] ss:$9 sm:$0xff] %v3154_v37  ;;  %v3861_v37 = vpop.xlane.xlu1 %3860 }
 0x647   : > { %3424 = vst [vmem:[#allocation1 + $0x7] ss:$9 sm:$0xff] %v3155_v49  ;;  %v3901_v49 = vsub.f32 %v9029_v23, %v3861_v37  ;;  %v3167_v23 = vperm.slane %v8640_v61, 3 }
 0x64e   : > { %v9361_v40 = vld [vmem:[#allocation1] sm:$0xff] }
 0x64f   : > { %11477 = vst [vmem:[#allocation77_spill] sm:$0xff] %v9361_v40 }
 0x650   : > { %3426 = vst [vmem:[#allocation1] ss:$9 sm:$0xff] %v3156_v2  ;;  %v3956_v2 = vmul.f32 1.442695, %v3901_v49  ;;  %v9379_v49 = vpop.f32.mrf.mxu1 }
 0x651   : > { %3427 = vst [vmem:[#allocation1 + $0x1] ss:$9 sm:$0xff] %v3157_v38  ;;  %v3164_v38 = vperm.slane %v8640_v61, 0 }
 0x652   : > { %3428 = vst [vmem:[#allocation1 + $0x2] ss:$9 sm:$0xff] %v3158_v53  ;;  %6988 = vpow2.f32 %v3956_v2  ;;  %v3165_v53 = vperm.slane %v8640_v61, 1  ;;  %v3168_v2 = vperm.slane %v8640_v61, 4 }
 0x653   : > { %3429 = vst [vmem:[#allocation1 + $0x3] ss:$9 sm:$0xff] %v3159_v43  ;;  %v3905_v43 = vsub.f32 %v9037_v25, %v3869_v30  ;;  %v3169_v30 = vperm.slane %v8640_v61, 5 }
 0x654   : > { %3430 = vst [vmem:[#allocation1 + $0x4] ss:$9 sm:$0xff] %v3160_v29  ;;  %v3865_v29 = vpop.xlane.xlu2 %3864 }
 0x655   : > { %3431 = vst [vmem:[#allocation1 + $0x5] ss:$9 sm:$0xff] %v3161_v11  ;;  %v3903_v11 = vsub.f32 %v9049_v44, %v3865_v29 }
 0x656   : > { %3432 = vst [vmem:[#allocation1 + $0x6] ss:$9 sm:$0xff] %v3162_v24  ;;  %v3867_v24 = vpop.xlane.xlu1 %3866 }
 0x657   : > { %3433 = vst [vmem:[#allocation1 + $0x7] ss:$9 sm:$0xff] %v3163_v19  ;;  %v3964_v19 = vmul.f32 1.442695, %v3905_v43  ;;  %v3904_v37 = vsub.f32 %v9041_v63, %v3867_v24  ;;  %v3171_v63 = vperm.slane %v8640_v61, 7 }
 0x658   : > { %v9382_v25 = vpop.eup %6988 }
 0x659   : > { %6990 = vpow2.f32 %v3964_v19  ;;  %v3962_v44 = vmul.f32 1.442695, %v3904_v37  ;;  %4020 = vadd.xlane.f32.xlu2 %v9382_v25 }
 0x65c   : > { %v3871_v29 = vpop.xlane.xlu2 %3870 }
 0x65e   : > { %v9372_v40 = vld [vmem:[#allocation1] sm:$0xff] }
 0x65f   : > { %11478 = vst [vmem:[#allocation78_spill] sm:$0xff] %v9372_v40  ;;  %v3960_v40 = vmul.f32 1.442695, %v3903_v11  ;;  %v3873_v11 = vpop.xlane.xlu1 %3872  ;;  %v9390_v24 = vpop.eup %6990 }
 0x660   : > { %3435 = vst [vmem:[#allocation1] ss:$9 sm:$0xff] %v3164_v38  ;;  %v3170_v38 = vperm.slane %v8640_v61, 6  ;;  %4028 = vadd.xlane.f32.xlu1 %v9390_v24 }
 0x661   : > { %3436 = vst [vmem:[#allocation1 + $0x1] ss:$9 sm:$0xff] %v3165_v53  ;;  %6992 = vpow2.f32 %v3960_v40  ;;  %v3875_v53 = vpop.xlane.xlu0 %3874  ;;  %v3907_v40 = vsub.f32 %v9060_v62, %v3873_v11  ;;  %v3173_v62 = vperm.slane %v8739_v57, 1  ;;  %v3177_v11 = vperm.slane %v8739_v57, 5 }
 0x662   : > { %3437 = vst [vmem:[#allocation1 + $0x2] ss:$9 sm:$0xff] %v3166_v1  ;;  %6994 = vpow2.f32 %v3962_v44  ;;  %v3908_v43 = vsub.f32 %v9054_v52, %v3875_v53  ;;  %v3906_v1 = vsub.f32 %v9068_v28, %v3871_v29  ;;  %v9399_v52 = vpop.f32.mrf.mxu1  ;;  %v3172_v28 = vperm.slane %v8739_v57, 0 }
 0x663   : > { %3438 = vst [vmem:[#allocation1 + $0x3] ss:$9 sm:$0xff] %v3167_v23  ;;  %v3174_v44 = vperm.slane %v8739_v57, 2  ;;  %v3176_v29 = vperm.slane %v8739_v57, 4 }
 0x664   : > { %3439 = vst [vmem:[#allocation1 + $0x4] ss:$9 sm:$0xff] %v3168_v2  ;;  %v3970_v23 = vmul.f32 1.442695, %v3908_v43  ;;  %v3966_v37 = vmul.f32 1.442695, %v3906_v1 }
 0x665   : > { %3440 = vst [vmem:[#allocation1 + $0x5] ss:$9 sm:$0xff] %v3169_v30  ;;  %v3968_v2 = vmul.f32 1.442695, %v3907_v40 }
 0x666   : > { %3441 = vst [vmem:[#allocation1 + $0x6] ss:$9 sm:$0xff] %v3170_v38  ;;  %6996 = vpow2.f32 %v3970_v23  ;;  %v3877_v38 = vpop.xlane.xlu2 %3876 }
 0x667   : > { %3442 = vst [vmem:[#allocation1 + $0x7] ss:$9 sm:$0xff] %v3171_v63  ;;  %v9393_v19 = vpop.eup %6992  ;;  %6998 = vpow2.f32 %v3966_v37  ;;  %v3175_v63 = vperm.slane %v8739_v57, 3  ;;  %v3909_v53 = vsub.f32 %v9076_v55, %v3877_v38  ;;  %v3178_v37 = vperm.slane %v8739_v57, 6 }
 0x668   : > { %v9396_v61 = vpop.eup %6994  ;;  %4024 = vadd.xlane.f32.xlu0 %v9393_v19  ;;  %7000 = vpow2.f32 %v3968_v2  ;;  %v3179_v55 = vperm.slane %v8739_v57, 7  ;;  %v3975_v2 = vpop.xlane.xlu1 %3974  ;;  %v3180_v38 = vperm.slane %v8713_v48, 0 }
 0x669   : > { %4026 = vadd.xlane.f32.xlu2 %v9396_v61  ;;  %v3972_v23 = vmul.f32 1.442695, %v3909_v53 }
 0x66b   : > { %7002 = vpow2.f32 %v3972_v23  ;;  %v3977_v23 = vpop.xlane.xlu0 %3976 }
 0x66c   : > { %v9409_v43 = vpop.eup %6996  ;;  %7004 = vrcp.f32 %v3975_v2 }
 0x66d   : > { %v9412_v1 = vpop.eup %6998  ;;  %4034 = vadd.xlane.f32.xlu1 %v9409_v43 }
 0x66e   : > { %v9404_v30 = vld [vmem:[#allocation1] sm:$0xff]  ;;  %v9416_v40 = vpop.eup %7000 }
 0x66f   : > { %11479 = vst [vmem:[#allocation79_spill] sm:$0xff] %v9404_v30 }
 0x670   : > { %3444 = vst [vmem:[#allocation1] ss:$9 sm:$0xff] %v3172_v28  ;;  %4030 = vadd.xlane.f32.xlu0 %v9412_v1  ;;  %v9422_v28 = vpop.f32.mrf.mxu1  ;;  %v3981_v53 = vpop.xlane.xlu1 %3980 }
 0x671   : > { %3445 = vst [vmem:[#allocation1 + $0x1] ss:$9 sm:$0xff] %v3173_v62  ;;  %4032 = vadd.xlane.f32.xlu2 %v9416_v40  ;;  %v9424_v62 = vpop.eup %7002  ;;  %7006 = vrcp.f32 %v3981_v53 }
 0x672   : > { %3446 = vst [vmem:[#allocation1 + $0x2] ss:$9 sm:$0xff] %v3174_v44  ;;  %v7005_v44 = vpop.eup %7004  ;;  %7008 = vrcp.f32 %v3977_v23 }
 0x673   : > { %3447 = vst [vmem:[#allocation1 + $0x3] ss:$9 sm:$0xff] %v3175_v63  ;;  %v3181_v63 = vperm.slane %v8713_v48, 1 }
 0x674   : > { %3448 = vst [vmem:[#allocation1 + $0x4] ss:$9 sm:$0xff] %v3176_v29  ;;  %v4070_v29 = vmul.f32 %v7005_v44, %v9088_v14  ;;  %v9438_v14 = vld [vmem:[#allocation8] ss:$0 sm:$0xff] }
 0x675   : > { %3449 = vst [vmem:[#allocation1 + $0x5] ss:$9 sm:$0xff] %v3177_v11  ;;  %v3182_v11 = vperm.slane %v8713_v48, 2 }
 0x676   : > { %3450 = vst [vmem:[#allocation1 + $0x6] ss:$9 sm:$0xff] %v3178_v37  ;;  %v3183_v37 = vperm.slane %v8713_v48, 3  ;;  %v4102_v2 = vmax.f32 %v4070_v29, 0.001 }
 0x677   : > { %3451 = vst [vmem:[#allocation1 + $0x7] ss:$9 sm:$0xff] %v3179_v55  ;;  %v3979_v55 = vpop.xlane.xlu2 %3978  ;;  %v7007_v53 = vpop.eup %7006 }
 0x678   : > { %4036 = vadd.xlane.f32.xlu0 %v9424_v62  ;;  %v9434_v30 = vpop.f32.mrf.mxu1  ;;  %7010 = vrcp.f32 %v3979_v55  ;;  %v4134_v44 = vmul.f32 %v9438_v14, %v4102_v2  ;;  %v7009_v29 = vpop.eup %7008 }
 0x679   : > { %v3983_v55 = vpop.xlane.xlu0 %3982 }
 0x67a   : > { %4166 = vadd.xlane.f32.xlu2 %v4134_v44  ;;  %7012 = vrcp.f32 %v3983_v55  ;;  %v3193_v55 = vperm.slane %v8725_v8, 5 }
 0x67e   : > { %v9429_v57 = vld [vmem:[#allocation1] sm:$0xff]  ;;  %v7011_v23 = vpop.eup %7010 }
 0x67f   : > { %11480 = vst [vmem:[#allocation80_spill] sm:$0xff] %v9429_v57  ;;  %v3185_v57 = vperm.slane %v8713_v48, 5  ;;  %v4072_v2 = vmul.f32 %v7011_v23, %v9105_v47  ;;  %v3190_v47 = vperm.slane %v8725_v8, 2  ;;  %v3985_v23 = vpop.xlane.xlu2 %3984 }
 0x680   : > { %3453 = vst [vmem:[#allocation1] ss:$9 sm:$0xff] %v3180_v38  ;;  %v3186_v38 = vperm.slane %v8713_v48, 6 }
 0x681   : > { %3454 = vst [vmem:[#allocation1 + $0x1] ss:$9 sm:$0xff] %v3181_v63  ;;  %v3187_v63 = vperm.slane %v8713_v48, 7  ;;  %v4104_v48 = vmax.f32 %v4072_v2, 0.001  ;;  %v3194_v2 = vperm.slane %v8725_v8, 6 }
 0x682   : > { %3455 = vst [vmem:[#allocation1 + $0x2] ss:$9 sm:$0xff] %v3182_v11  ;;  %v4073_v11 = vmul.f32 %v7007_v53, %v9096_v9  ;;  %v7013_v53 = vpop.eup %7012 }
 0x683   : > { %3456 = vst [vmem:[#allocation1 + $0x3] ss:$9 sm:$0xff] %v3183_v37  ;;  %v4071_v37 = vmul.f32 %v7009_v29, %v9099_v13  ;;  %v4136_v9 = vmul.f32 %v9438_v14, %v4104_v48  ;;  %v3191_v29 = vperm.slane %v8725_v8, 3 }
 0x684   : > { %3457 = vst [vmem:[#allocation1 + $0x4] ss:$9 sm:$0xff] %v3184_v4  ;;  %v4105_v21 = vmax.f32 %v4073_v11, 0.001  ;;  %v3192_v11 = vperm.slane %v8725_v8, 4 }
 0x685   : > { %3458 = vst [vmem:[#allocation1 + $0x5] ss:$9 sm:$0xff] %v3185_v57  ;;  %v4103_v59 = vmax.f32 %v4071_v37, 0.001  ;;  %v9447_v57 = vpop.f32.mrf.mxu1  ;;  %4170 = vadd.xlane.f32.xlu0 %v4136_v9 }
 0x686   : > { %3459 = vst [vmem:[#allocation1 + $0x6] ss:$9 sm:$0xff] %v3186_v38  ;;  %v4137_v4 = vmul.f32 %v9438_v14, %v4105_v21  ;;  %v3188_v38 = vperm.slane %v8725_v8, 0  ;;  %v3987_v21 = vpop.xlane.xlu1 %3986 }
 0x687   : > { %3460 = vst [vmem:[#allocation1 + $0x7] ss:$9 sm:$0xff] %v3187_v63  ;;  %v4135_v44 = vmul.f32 %v9438_v14, %v4103_v59  ;;  %v3189_v63 = vperm.slane %v8725_v8, 1  ;;  %7014 = vrcp.f32 %v3987_v21  ;;  %v4074_v59 = vmul.f32 %v7013_v53, %v9117_v22  ;;  %v3989_v53 = vpop.xlane.xlu0 %3988 }
 0x688   : > { %4172 = vadd.xlane.f32.xlu2 %v4137_v4  ;;  %7016 = vrcp.f32 %v3985_v23  ;;  %v3195_v4 = vperm.slane %v8725_v8, 7  ;;  %v3197_v23 = vperm.slane %v8792_v46, 1 }
 0x689   : > { %4168 = vadd.xlane.f32.xlu1 %v4135_v44  ;;  %v4106_v37 = vmax.f32 %v4074_v59, 0.001 }
 0x68b   : > { %v4138_v48 = vmul.f32 %v9438_v14, %v4106_v37 }
 0x68d   : > { %v7015_v44 = vpop.eup %7014  ;;  %v9463_v22 = vpop.f32.mrf.mxu1 }
 0x68e   : > { %v9453_v13 = vld [vmem:[#allocation1] sm:$0xff]  ;;  %v4076_v9 = vmul.f32 %v7015_v44, %v9135_v12 }
 0x68f   : > { %11481 = vst [vmem:[#allocation81_spill] sm:$0xff] %v9453_v13 }
 0x690   : > { %3462 = vst [vmem:[#allocation1] ss:$9 sm:$0xff] %v3188_v38  ;;  %v3993_v38 = vpop.xlane.xlu1 %3992  ;;  %v4108_v21 = vmax.f32 %v4076_v9, 0.001  ;;  %v3200_v9 = vperm.slane %v8792_v46, 4 }
 0x691   : > { %3463 = vst [vmem:[#allocation1 + $0x1] ss:$9 sm:$0xff] %v3189_v63  ;;  %4174 = vadd.xlane.f32.xlu1 %v4138_v48  ;;  %v7017_v63 = vpop.eup %7016  ;;  %7018 = vrcp.f32 %v3993_v38 }
 0x692   : > { %3464 = vst [vmem:[#allocation1 + $0x2] ss:$9 sm:$0xff] %v3190_v47  ;;  %7020 = vrcp.f32 %v3989_v53  ;;  %v3991_v47 = vpop.xlane.xlu2 %3990  ;;  %v4075_v8 = vmul.f32 %v7017_v63, %v9143_v17  ;;  %v3199_v17 = vperm.slane %v8792_v46, 3  ;;  %v3995_v63 = vpop.xlane.xlu0 %3994 }
 0x693   : > { %3465 = vst [vmem:[#allocation1 + $0x3] ss:$9 sm:$0xff] %v3191_v29  ;;  %7022 = vrcp.f32 %v3991_v47  ;;  %v4140_v29 = vmul.f32 %v9438_v14, %v4108_v21  ;;  %v3201_v47 = vperm.slane %v8792_v46, 5 }
 0x694   : > { %3466 = vst [vmem:[#allocation1 + $0x4] ss:$9 sm:$0xff] %v3192_v11  ;;  %v4107_v59 = vmax.f32 %v4075_v8, 0.001  ;;  %v3196_v11 = vperm.slane %v8792_v46, 0  ;;  %7024 = vrcp.f32 %v3995_v63 }
 0x695   : > { %3467 = vst [vmem:[#allocation1 + $0x5] ss:$9 sm:$0xff] %v3193_v55  ;;  %4178 = vadd.xlane.f32.xlu2 %v4140_v29  ;;  %v9476_v38 = vpop.f32.mrf.mxu1  ;;  %v3202_v29 = vperm.slane %v8792_v46, 6 }
 0x696   : > { %3468 = vst [vmem:[#allocation1 + $0x6] ss:$9 sm:$0xff] %v3194_v2  ;;  %v4139_v12 = vmul.f32 %v9438_v14, %v4107_v59  ;;  %v3198_v2 = vperm.slane %v8792_v46, 2  ;;  %v3203_v59 = vperm.slane %v8792_v46, 7 }
 0x697   : > { %3469 = vst [vmem:[#allocation1 + $0x7] ss:$9 sm:$0xff] %v3195_v4  ;;  %v7019_v37 = vpop.eup %7018 }
 0x698   : > { %v7021_v4 = vpop.eup %7020  ;;  %4176 = vadd.xlane.f32.xlu0 %v4139_v12  ;;  %v4079_v48 = vmul.f32 %v7019_v37, %v9146_v45 }
 0x699   : > { %v7023_v44 = vpop.eup %7022  ;;  %v4077_v53 = vmul.f32 %v7021_v4, %v9149_v26 }
 0x69a   : > { %v4111_v21 = vmax.f32 %v4079_v48, 0.001  ;;  %v4078_v8 = vmul.f32 %v7023_v44, %v9155_v41  ;;  %v7025_v37 = vpop.eup %7024  ;;  %v3999_v41 = vpop.xlane.xlu1 %3998  ;;  %v3204_v48 = vperm.slane %v8773_v10, 0  ;;  %v3205_v44 = vperm.slane %v8773_v10, 1 }
 0x69b   : > { %v4109_v45 = vmax.f32 %v4077_v53, 0.001  ;;  %7026 = vrcp.f32 %v3999_v41  ;;  %v3997_v4 = vpop.xlane.xlu2 %3996  ;;  %v3206_v53 = vperm.slane %v8773_v10, 2 }
 0x69c   : > { %7028 = vrcp.f32 %v3997_v4 }
 0x69d   : > { %v4141_v26 = vmul.f32 %v9438_v14, %v4109_v45  ;;  %v9488_v46 = vpop.f32.mrf.mxu1 }
 0x69e   : > { %v9470_v55 = vld [vmem:[#allocation1] sm:$0xff] }
 0x69f   : > { %11482 = vst [vmem:[#allocation82_spill] sm:$0xff] %v9470_v55  ;;  %4180 = vadd.xlane.f32.xlu1 %v4141_v26 }
 0x6a0   : > { %3471 = vst [vmem:[#allocation1] ss:$9 sm:$0xff] %v3196_v11  ;;  %v4143_v11 = vmul.f32 %v9438_v14, %v4111_v21  ;;  %v3207_v21 = vperm.slane %v8773_v10, 3 }
 0x6a1   : > { %3472 = vst [vmem:[#allocation1 + $0x1] ss:$9 sm:$0xff] %v3197_v23  ;;  %v4110_v23 = vmax.f32 %v4078_v8, 0.001 }
 0x6a2   : > { %3473 = vst [vmem:[#allocation1 + $0x2] ss:$9 sm:$0xff] %v3198_v2  ;;  %4184 = vadd.xlane.f32.xlu2 %v4143_v11  ;;  %v4080_v2 = vmul.f32 %v7025_v37, %v9167_v20  ;;  %v3208_v20 = vperm.slane %v8773_v10, 4  ;;  %v4005_v8 = vpop.xlane.xlu1 %4004  ;;  %v4001_v11 = vpop.xlane.xlu0 %4000 }
 0x6a3   : > { %3474 = vst [vmem:[#allocation1 + $0x3] ss:$9 sm:$0xff] %v3199_v17  ;;  %v4142_v12 = vmul.f32 %v9438_v14, %v4110_v23  ;;  %7030 = vrcp.f32 %v4005_v8  ;;  %v3210_v23 = vperm.slane %v8773_v10, 6  ;;  %v4003_v26 = vpop.xlane.xlu2 %4002 }
 0x6a4   : > { %3475 = vst [vmem:[#allocation1 + $0x4] ss:$9 sm:$0xff] %v3200_v9  ;;  %v4112_v17 = vmax.f32 %v4080_v2, 0.001  ;;  %7032 = vrcp.f32 %v4001_v11  ;;  %v3211_v2 = vperm.slane %v8773_v10, 7 }
 0x6a5   : > { %3476 = vst [vmem:[#allocation1 + $0x5] ss:$9 sm:$0xff] %v3201_v47  ;;  %4182 = vadd.xlane.f32.xlu0 %v4142_v12  ;;  %v7027_v47 = vpop.eup %7026  ;;  %v9502_v41 = vpop.f32.mrf.mxu1  ;;  %7034 = vrcp.f32 %v4003_v26  ;;  %v3215_v26 = vperm.slane %v8809_v18, 3 }
 0x6a6   : > { %3477 = vst [vmem:[#allocation1 + $0x6] ss:$9 sm:$0xff] %v3202_v29  ;;  %v4144_v63 = vmul.f32 %v9438_v14, %v4112_v17  ;;  %v4082_v29 = vmul.f32 %v7027_v47, %v9185_v32  ;;  %v7029_v45 = vpop.eup %7028 }
 0x6a7   : > { %3478 = vst [vmem:[#allocation1 + $0x7] ss:$9 sm:$0xff] %v3203_v59  ;;  %v3209_v59 = vperm.slane %v8773_v10, 5  ;;  %v4081_v37 = vmul.f32 %v7029_v45, %v9193_v7 }
 0x6a8   : > { %4186 = vadd.xlane.f32.xlu1 %v4144_v63  ;;  %v4114_v12 = vmax.f32 %v4082_v29, 0.001  ;;  %v3213_v29 = vperm.slane %v8809_v18, 1 }
 0x6a9   : > { %v4113_v4 = vmax.f32 %v4081_v37, 0.001 }
 0x6aa   : > { %v4146_v32 = vmul.f32 %v9438_v14, %v4114_v12  ;;  %v3216_v12 = vperm.slane %v8809_v18, 4 }
 0x6ab   : > { %v4145_v17 = vmul.f32 %v9438_v14, %v4113_v4  ;;  %v3218_v4 = vperm.slane %v8809_v18, 6 }
 0x6ac   : > { %4190 = vadd.xlane.f32.xlu2 %v4146_v32  ;;  %v4011_v32 = vpop.xlane.xlu1 %4010 }
 0x6ad   : > { %4188 = vadd.xlane.f32.xlu0 %v4145_v17 }
 0x6ae   : > { %v9492_v9 = vld [vmem:[#allocation1] sm:$0xff] }
 0x6af   : > { %11483 = vst [vmem:[#allocation83_spill] sm:$0xff] %v9492_v9 }
 0x6b0   : > { %3480 = vst [vmem:[#allocation1] ss:$9 sm:$0xff] %v3204_v48  ;;  %v7031_v48 = vpop.eup %7030 }
 0x6b1   : > { %3481 = vst [vmem:[#allocation1 + $0x1] ss:$9 sm:$0xff] %v3205_v44  ;;  %v7033_v44 = vpop.eup %7032  ;;  %v4085_v63 = vmul.f32 %v7031_v48, %v9196_v39  ;;  %v3214_v39 = vperm.slane %v8809_v18, 2  ;;  %v3219_v48 = vperm.slane %v8809_v18, 7 }
 0x6b2   : > { %3482 = vst [vmem:[#allocation1 + $0x2] ss:$9 sm:$0xff] %v3206_v53  ;;  %v7035_v7 = vpop.eup %7034  ;;  %v4007_v53 = vpop.xlane.xlu0 %4006  ;;  %v4083_v47 = vmul.f32 %v7033_v44, %v9199_v5 }
 0x6b3   : > { %3483 = vst [vmem:[#allocation1 + $0x3] ss:$9 sm:$0xff] %v3207_v21  ;;  %7036 = vrcp.f32 %v4007_v53  ;;  %v4117_v10 = vmax.f32 %v4085_v63, 0.001  ;;  %v4084_v21 = vmul.f32 %v7035_v7, %v9205_v56  ;;  %v4009_v44 = vpop.xlane.xlu2 %4008 }
 0x6b4   : > { %3484 = vst [vmem:[#allocation1 + $0x4] ss:$9 sm:$0xff] %v3208_v20  ;;  %v3212_v20 = vperm.slane %v8809_v18, 0  ;;  %v4115_v8 = vmax.f32 %v4083_v47, 0.001  ;;  %7038 = vrcp.f32 %v4011_v32 }
 0x6b5   : > { %3485 = vst [vmem:[#allocation1 + $0x5] ss:$9 sm:$0xff] %v3209_v59  ;;  %v4149_v59 = vmul.f32 %v9438_v14, %v4117_v10  ;;  %v4116_v11 = vmax.f32 %v4084_v21, 0.001  ;;  %7040 = vrcp.f32 %v4009_v44  ;;  %v4017_v10 = vpop.xlane.xlu1 %4016 }
 0x6b6   : > { %3486 = vst [vmem:[#allocation1 + $0x6] ss:$9 sm:$0xff] %v3210_v23  ;;  %v9515_v23 = vpop.f32.mrf.mxu1  ;;  %v4147_v5 = vmul.f32 %v9438_v14, %v4115_v8  ;;  %7042 = vrcp.f32 %v4017_v10  ;;  %v11485_v8 = vld [vmem:[#allocation39_spill] sm:$0xff] }
 0x6b7   : > { %3487 = vst [vmem:[#allocation1 + $0x7] ss:$9 sm:$0xff] %v3211_v2  ;;  %4196 = vadd.xlane.f32.xlu2 %v4149_v59  ;;  %v4148_v56 = vmul.f32 %v9438_v14, %v4116_v11  ;;  %v3217_v2 = vperm.slane %v8809_v18, 5  ;;  %v3220_v18 = vperm.slane %v11485_v8, 0  ;;  %v3225_v32 = vperm.slane %v11485_v8, 5 }
 0x6b8   : > { %4192 = vadd.xlane.f32.xlu1 %v4147_v5 }
 0x6b9   : > { %v7037_v37 = vpop.eup %7036  ;;  %4194 = vadd.xlane.f32.xlu0 %v4148_v56 }
 0x6ba   : > { %v4086_v17 = vmul.f32 %v7037_v37, %v9217_v36  ;;  %v7039_v53 = vpop.eup %7038  ;;  %v4013_v36 = vpop.xlane.xlu0 %4012  ;;  %v3224_v37 = vperm.slane %v11485_v8, 4 }
 0x6bb   : > { %v4088_v21 = vmul.f32 %v7039_v53, %v9235_v31  ;;  %7044 = vrcp.f32 %v4013_v36 }
 0x6bc   : > { %v4118_v63 = vmax.f32 %v4086_v17, 0.001  ;;  %v3226_v17 = vperm.slane %v11485_v8, 6 }
 0x6bd   : > { %v4120_v59 = vmax.f32 %v4088_v21, 0.001 }
 0x6be   : > { %v9512_v45 = vld [vmem:[#allocation1] sm:$0xff]  ;;  %v4150_v7 = vmul.f32 %v9438_v14, %v4118_v63  ;;  %v9527_v47 = vpop.f32.mrf.mxu1 }
 0x6bf   : > { %11484 = vst [vmem:[#allocation84_spill] sm:$0xff] %v9512_v45  ;;  %v4152_v31 = vmul.f32 %v9438_v14, %v4120_v59 }
 0x6c0   : > { %3489 = vst [vmem:[#allocation1] ss:$9 sm:$0xff] %v3212_v20  ;;  %4198 = vadd.xlane.f32.xlu1 %v4150_v7  ;;  %v7041_v20 = vpop.eup %7040  ;;  %v3227_v7 = vperm.slane %v11485_v8, 7 }
 0x6c1   : > { %3490 = vst [vmem:[#allocation1 + $0x1] ss:$9 sm:$0xff] %v3213_v29  ;;  %v4015_v29 = vpop.xlane.xlu2 %4014  ;;  %v4087_v11 = vmul.f32 %v7041_v20, %v9243_v34  ;;  %4202 = vadd.xlane.f32.xlu2 %v4152_v31 }
 0x6c2   : > { %3491 = vst [vmem:[#allocation1 + $0x2] ss:$9 sm:$0xff] %v3214_v39  ;;  %v3221_v39 = vperm.slane %v11485_v8, 1  ;;  %7046 = vrcp.f32 %v4015_v29  ;;  %v4019_v53 = vpop.xlane.xlu0 %4018 }
 0x6c3   : > { %3492 = vst [vmem:[#allocation1 + $0x3] ss:$9 sm:$0xff] %v3215_v26  ;;  %v3222_v26 = vperm.slane %v11485_v8, 2  ;;  %v4119_v56 = vmax.f32 %v4087_v11, 0.001  ;;  %7048 = vrcp.f32 %v4019_v53  ;;  %v4023_v11 = vpop.xlane.xlu1 %4022 }
 0x6c4   : > { %3493 = vst [vmem:[#allocation1 + $0x4] ss:$9 sm:$0xff] %v3216_v12  ;;  %v3223_v12 = vperm.slane %v11485_v8, 3  ;;  %7050 = vrcp.f32 %v4023_v11 }
 0x6c5   : > { %3494 = vst [vmem:[#allocation1 + $0x5] ss:$9 sm:$0xff] %v3217_v2  ;;  %v4151_v34 = vmul.f32 %v9438_v14, %v4119_v56  ;;  %v7043_v2 = vpop.eup %7042 }
 0x6c6   : > { %3495 = vst [vmem:[#allocation1 + $0x6] ss:$9 sm:$0xff] %v3218_v4  ;;  %v7045_v4 = vpop.eup %7044  ;;  %v9543_v63 = vpop.f32.mrf.mxu1 }
 0x6c7   : > { %3496 = vst [vmem:[#allocation1 + $0x7] ss:$9 sm:$0xff] %v3219_v48  ;;  %4200 = vadd.xlane.f32.xlu0 %v4151_v34  ;;  %v4091_v48 = vmul.f32 %v7043_v2, %v9246_v42  ;;  %v4089_v10 = vmul.f32 %v7045_v4, %v9249_v3  ;;  %v11487_v3 = vld [vmem:[#allocation35_spill] sm:$0xff] }
 0x6c8   : > { %v7047_v44 = vpop.eup %7046  ;;  %v3231_v2 = vperm.slane %v11487_v3, 3  ;;  %v3233_v4 = vperm.slane %v11487_v3, 5 }
 0x6c9   : > { %v4123_v21 = vmax.f32 %v4091_v48, 0.001  ;;  %v4090_v20 = vmul.f32 %v7047_v44, %v9255_v35  ;;  %v4121_v36 = vmax.f32 %v4089_v10, 0.001  ;;  %v7049_v8 = vpop.eup %7048  ;;  %v3229_v35 = vperm.slane %v11487_v3, 1 }
 0x6ca   : > { %v3234_v48 = vperm.slane %v11487_v3, 6  ;;  %v3235_v44 = vperm.slane %v11487_v3, 7 }
 0x6cb   : > { %v4122_v29 = vmax.f32 %v4090_v20, 0.001  ;;  %v4153_v42 = vmul.f32 %v9438_v14, %v4121_v36 }
 0x6cc   : > { %v4021_v56 = vpop.xlane.xlu2 %4020 }
 0x6cd   : > { %v4154_v59 = vmul.f32 %v9438_v14, %v4122_v29  ;;  %4204 = vadd.xlane.f32.xlu1 %v4153_v42  ;;  %7052 = vrcp.f32 %v4021_v56 }
 0x6ce   : > { %v9533_v5 = vld [vmem:[#allocation1] sm:$0xff] }
 0x6cf   : > { %11486 = vst [vmem:[#allocation39_spill] sm:$0xff] %v9533_v5  ;;  %4206 = vadd.xlane.f32.xlu0 %v4154_v59 }
 0x6d0   : > { %3498 = vst [vmem:[#allocation1] ss:$9 sm:$0xff] %v3220_v18  ;;  %v4155_v18 = vmul.f32 %v9438_v14, %v4123_v21 }
 0x6d1   : > { %3499 = vst [vmem:[#allocation1 + $0x1] ss:$9 sm:$0xff] %v3221_v39  ;;  %v3228_v39 = vperm.slane %v11487_v3, 0 }
 0x6d2   : > { %3500 = vst [vmem:[#allocation1 + $0x2] ss:$9 sm:$0xff] %v3222_v26  ;;  %4208 = vadd.xlane.f32.xlu2 %v4155_v18  ;;  %v4092_v26 = vmul.f32 %v7049_v8, %v9267_v33 }
 0x6d3   : > { %3501 = vst [vmem:[#allocation1 + $0x3] ss:$9 sm:$0xff] %v3223_v12  ;;  %v9556_v12 = vpop.f32.mrf.mxu1 }
 0x6d4   : > { %3502 = vst [vmem:[#allocation1 + $0x4] ss:$9 sm:$0xff] %v3224_v37  ;;  %v3230_v37 = vperm.slane %v11487_v3, 2  ;;  %v4124_v34 = vmax.f32 %v4092_v26, 0.001 }
 0x6d5   : > { %3503 = vst [vmem:[#allocation1 + $0x5] ss:$9 sm:$0xff] %v3225_v32  ;;  %v3232_v32 = vperm.slane %v11487_v3, 4  ;;  %v11489_v3 = vld [vmem:[#allocation40_spill] sm:$0xff] }
 0x6d6   : > { %3504 = vst [vmem:[#allocation1 + $0x6] ss:$9 sm:$0xff] %v3226_v17  ;;  %v4156_v33 = vmul.f32 %v9438_v14, %v4124_v34  ;;  %v7051_v17 = vpop.eup %7050 }
 0x6d7   : > { %3505 = vst [vmem:[#allocation1 + $0x7] ss:$9 sm:$0xff] %v3227_v7  ;;  %v4029_v7 = vpop.xlane.xlu1 %4028  ;;  %v4094_v53 = vmul.f32 %v7051_v17, %v9280_v54  ;;  %v7053_v10 = vpop.eup %7052 }
 0x6d8   : > { %4210 = vadd.xlane.f32.xlu1 %v4156_v33  ;;  %7054 = vrcp.f32 %v4029_v7  ;;  %v4093_v18 = vmul.f32 %v7053_v10, %v9382_v25  ;;  %v3237_v25 = vperm.slane %v11489_v3, 1 }
 0x6d9   : > { %v4126_v36 = vmax.f32 %v4094_v53, 0.001 }
 0x6da   : > { %v4125_v42 = vmax.f32 %v4093_v18, 0.001  ;;  %v3243_v18 = vperm.slane %v11489_v3, 7 }
 0x6db   : > { %v4025_v21 = vpop.xlane.xlu0 %4024  ;;  %v4158_v29 = vmul.f32 %v9438_v14, %v4126_v36  ;;  %v9568_v59 = vpop.f32.mrf.mxu1 }
 0x6dc   : > { %7056 = vrcp.f32 %v4025_v21  ;;  %v4027_v20 = vpop.xlane.xlu2 %4026  ;;  %v4157_v8 = vmul.f32 %v9438_v14, %v4125_v42  ;;  %v3242_v21 = vperm.slane %v11489_v3, 6 }
 0x6dd   : > { %7058 = vrcp.f32 %v4027_v20  ;;  %4214 = vadd.xlane.f32.xlu2 %v4158_v29 }
 0x6de   : > { %v9554_v31 = vld [vmem:[#allocation1] sm:$0xff]  ;;  %v7055_v54 = vpop.eup %7054  ;;  %4212 = vadd.xlane.f32.xlu0 %v4157_v8 }
 0x6df   : > { %11488 = vst [vmem:[#allocation35_spill] sm:$0xff] %v9554_v31 }
 0x6e0   : > { %3507 = vst [vmem:[#allocation1] ss:$9 sm:$0xff] %v3228_v39  ;;  %v3236_v39 = vperm.slane %v11489_v3, 0  ;;  %v4035_v26 = vpop.xlane.xlu1 %4034 }
 0x6e1   : > { %3508 = vst [vmem:[#allocation1 + $0x1] ss:$9 sm:$0xff] %v3229_v35  ;;  %v4097_v35 = vmul.f32 %v7055_v54, %v9390_v24  ;;  %7060 = vrcp.f32 %v4035_v26 }
 0x6e2   : > { %3509 = vst [vmem:[#allocation1 + $0x2] ss:$9 sm:$0xff] %v3230_v37  ;;  %v7057_v11 = vpop.eup %7056 }
 0x6e3   : > { %3510 = vst [vmem:[#allocation1 + $0x3] ss:$9 sm:$0xff] %v3231_v2  ;;  %v7059_v56 = vpop.eup %7058  ;;  %v4031_v34 = vpop.xlane.xlu0 %4030  ;;  %v4095_v2 = vmul.f32 %v7057_v11, %v9393_v19  ;;  %v3241_v19 = vperm.slane %v11489_v3, 5 }
 0x6e4   : > { %3511 = vst [vmem:[#allocation1 + $0x4] ss:$9 sm:$0xff] %v3232_v32  ;;  %v3238_v32 = vperm.slane %v11489_v3, 2  ;;  %7062 = vrcp.f32 %v4031_v34  ;;  %v4033_v33 = vpop.xlane.xlu2 %4032  ;;  %v4096_v17 = vmul.f32 %v7059_v56, %v9396_v61  ;;  %v9586_v36 = vpop.f32.mrf.mxu1  ;;  %v11491_v34 = vld [vmem:[#allocation43_spill] sm:$0xff] }
 0x6e5   : > { %3512 = vst [vmem:[#allocation1 + $0x5] ss:$9 sm:$0xff] %v3233_v4  ;;  %v4129_v4 = vmax.f32 %v4097_v35, 0.001  ;;  %7064 = vrcp.f32 %v4033_v33  ;;  %v4127_v24 = vmax.f32 %v4095_v2, 0.001 }
 0x6e6   : > { %3513 = vst [vmem:[#allocation1 + $0x6] ss:$9 sm:$0xff] %v3234_v48  ;;  %v3239_v48 = vperm.slane %v11489_v3, 3  ;;  %v4128_v53 = vmax.f32 %v4096_v17, 0.001  ;;  %v3244_v2 = vperm.slane %v11491_v34, 0 }
 0x6e7   : > { %3514 = vst [vmem:[#allocation1 + $0x7] ss:$9 sm:$0xff] %v3235_v44  ;;  %v3240_v44 = vperm.slane %v11489_v3, 4  ;;  %v4161_v7 = vmul.f32 %v9438_v14, %v4129_v4  ;;  %v4159_v10 = vmul.f32 %v9438_v14, %v4127_v24  ;;  %v7061_v20 = vpop.eup %7060  ;;  %v7200_v33 = vld [vmem:[%s11307_s6] sm:$0xf]  ;;  %v3247_v17 = vperm.slane %v11491_v34, 3 }
 0x6e8   : > { %v4160_v61 = vmul.f32 %v9438_v14, %v4128_v53  ;;  %v4100_v42 = vmul.f32 %v7061_v20, %v9409_v43  ;;  %v3245_v43 = vperm.slane %v11491_v34, 1  ;;  %v9605_v4 = vperm.slane %v7200_v33, 3  ;;  %v11493_v24 = vld [vmem:[#allocation21_spill] sm:$0xff]  ;;  %v11495_v20 = vld [vmem:[#allocation27_spill] sm:$0xff] }
 0x6e9   : > { %4220 = vadd.xlane.f32.xlu2 %v4161_v7  ;;  %4216 = vadd.xlane.f32.xlu1 %v4159_v10  ;;  %v3249_v7 = vperm.slane %v11491_v34, 5  ;;  %v3250_v53 = vperm.slane %v11491_v34, 6 }
 0x6ea   : > { %v7063_v29 = vpop.eup %7062  ;;  %4218 = vadd.xlane.f32.xlu0 %v4160_v61  ;;  %v4132_v11 = vmax.f32 %v4100_v42, 0.001 }
 0x6eb   : > { %v7065_v8 = vpop.eup %7064  ;;  %v4098_v54 = vmul.f32 %v7063_v29, %v9412_v1  ;;  %v11496_v29 = vld [vmem:[#allocation23_spill] sm:$0xff] }
 0x6ec   : > { %v4164_v35 = vmul.f32 %v9438_v14, %v4132_v11  ;;  %v9599_v1 = vpop.f32.mrf.mxu1  ;;  %v9630_v42 = vadd.f32 %v11496_v29, %v9605_v4 }
 0x6ed   : > { %v4130_v26 = vmax.f32 %v4098_v54, 0.001 }
 0x6ee   : > { %v9574_v37 = vld [vmem:[#allocation1] sm:$0xff] }
 0x6ef   : > { %11490 = vst [vmem:[#allocation40_spill] sm:$0xff] %v9574_v37  ;;  %v4162_v3 = vmul.f32 %v9438_v14, %v4130_v26 }
 0x6f0   : > { %3516 = vst [vmem:[#allocation1] ss:$9 sm:$0xff] %v3236_v39  ;;  %v4099_v39 = vmul.f32 %v7065_v8, %v9416_v40  ;;  %v3246_v40 = vperm.slane %v11491_v34, 2  ;;  %v11497_v8 = vld [vmem:[#allocation41_spill] sm:$0xff] }
 0x6f1   : > { %3517 = vst [vmem:[#allocation1 + $0x1] ss:$9 sm:$0xff] %v3237_v25  ;;  %4226 = vadd.xlane.f32.xlu2 %v4164_v35  ;;  %4222 = vadd.xlane.f32.xlu1 %v4162_v3  ;;  %v3252_v54 = vperm.slane %v11497_v8, 0  ;;  %v3253_v11 = vperm.slane %v11497_v8, 1  ;;  %v3254_v26 = vperm.slane %v11497_v8, 2  ;;  %v3255_v35 = vperm.slane %v11497_v8, 3 }
 0x6f2   : > { %3518 = vst [vmem:[#allocation1 + $0x2] ss:$9 sm:$0xff] %v3238_v32  ;;  %v4131_v56 = vmax.f32 %v4099_v39, 0.001  ;;  %v3257_v3 = vperm.slane %v11497_v8, 5 }
 0x6f3   : > { %3519 = vst [vmem:[#allocation1 + $0x3] ss:$9 sm:$0xff] %v3239_v48  ;;  %v3248_v48 = vperm.slane %v11491_v34, 4 }
 0x6f4   : > { %3520 = vst [vmem:[#allocation1 + $0x4] ss:$9 sm:$0xff] %v3240_v44  ;;  %v4163_v25 = vmul.f32 %v9438_v14, %v4131_v56  ;;  %v9611_v44 = vadd.f32 %v11493_v24, %v9605_v4  ;;  %v9622_v61 = vpop.f32.mrf.mxu1  ;;  %v3256_v56 = vperm.slane %v11497_v8, 4  ;;  %v9663_v24 = vadd.f32 %v9399_v52, %v9605_v4 }
 0x6f5   : > { %3521 = vst [vmem:[#allocation1 + $0x5] ss:$9 sm:$0xff] %v3241_v19  ;;  %v11494_v19 = vld [vmem:[#allocation17_spill] sm:$0xff] }
 0x6f6   : > { %3522 = vst [vmem:[#allocation1 + $0x6] ss:$9 sm:$0xff] %v3242_v21  ;;  %4224 = vadd.xlane.f32.xlu0 %v4163_v25  ;;  %v9617_v10 = vadd.f32 %v11494_v19, %v9605_v4  ;;  %v3251_v21 = vperm.slane %v11491_v34, 7  ;;  %v9644_v25 = vadd.f32 %v9379_v49, %v9605_v4  ;;  %v3258_v34 = vperm.slane %v11497_v8, 6 }
 0x6f7   : > { %3523 = vst [vmem:[#allocation1 + $0x7] ss:$9 sm:$0xff] %v3243_v18  ;;  %v9626_v18 = vadd.f32 %v11495_v20, %v9605_v4  ;;  %v9658_v49 = vadd.f32 %v9434_v30, %v9605_v4 }
 0x6f9   : > { %4980 = vmax.xlane.f32.xlu2 %v9611_v44 }
 0x6fe   : > { %v9597_v32 = vld [vmem:[#allocation1] sm:$0xff]  ;;  %4976 = vmax.xlane.f32.xlu0 %v9617_v10 }
 0x6ff   : > { %11492 = vst [vmem:[#allocation43_spill] sm:$0xff] %v9597_v32 }
 0x700   : > { %3525 = vst [vmem:[#allocation1] ss:$9 sm:$0xff] %v3244_v2  ;;  %v9647_v2 = vpop.f32.mrf.mxu1 }
 0x701   : > { %3526 = vst [vmem:[#allocation1 + $0x1] ss:$9 sm:$0xff] %v3245_v43  ;;  %4986 = vmax.xlane.f32.xlu2 %v9626_v18  ;;  %v3259_v43 = vperm.slane %v11497_v8, 7  ;;  %v9679_v8 = vadd.f32 %v9476_v38, %v9605_v4  ;;  %v11502_v38 = vld [vmem:[#allocation20_spill] sm:$0xff] }
 0x702   : > { %3527 = vst [vmem:[#allocation1 + $0x2] ss:$9 sm:$0xff] %v3246_v40  ;;  %v11499_v40 = vld [vmem:[#allocation29_spill] sm:$0xff] }
 0x703   : > { %3528 = vst [vmem:[#allocation1 + $0x3] ss:$9 sm:$0xff] %v3247_v17  ;;  %v9652_v33 = vadd.f32 %v11499_v40, %v9605_v4  ;;  %v11500_v17 = vld [vmem:[#allocation48_spill] sm:$0xff]  ;;  %v3271_v40 = vperm.slane %v11502_v38, 3 }
 0x704   : > { %3529 = vst [vmem:[#allocation1 + $0x4] ss:$9 sm:$0xff] %v3248_v48  ;;  %v3260_v48 = vperm.slane %v11500_v17, 0  ;;  %v3263_v30 = vperm.slane %v11500_v17, 3  ;;  %v3264_v20 = vperm.slane %v11500_v17, 4  ;;  %v3265_v52 = vperm.slane %v11500_v17, 5 }
 0x705   : > { %3530 = vst [vmem:[#allocation1 + $0x5] ss:$9 sm:$0xff] %v3249_v7  ;;  %v3261_v7 = vperm.slane %v11500_v17, 1  ;;  %v3266_v29 = vperm.slane %v11500_v17, 6 }
 0x706   : > { %3531 = vst [vmem:[#allocation1 + $0x6] ss:$9 sm:$0xff] %v3250_v53  ;;  %4982 = vmax.xlane.f32.xlu0 %v9630_v42 }
 0x707   : > { %3532 = vst [vmem:[#allocation1 + $0x7] ss:$9 sm:$0xff] %v3251_v21  ;;  %v3262_v21 = vperm.slane %v11500_v17, 2 }
 0x708   : > { %v9669_v19 = vpop.f32.mrf.mxu1 }
 0x709   : > { %4992 = vmax.xlane.f32.xlu2 %v9644_v25 }
 0x70e   : > { %v9635_v39 = vld [vmem:[#allocation1] sm:$0xff]  ;;  %4988 = vmax.xlane.f32.xlu0 %v9652_v33 }
 0x70f   : > { %11498 = vst [vmem:[#allocation21_spill] sm:$0xff] %v9635_v39 }
 0x710   : > { %3534 = vst [vmem:[#allocation1] ss:$9 sm:$0xff] %v3252_v54  ;;  %v3267_v54 = vperm.slane %v11500_v17, 7  ;;  %v3273_v17 = vperm.slane %v11502_v38, 5 }
 0x711   : > { %3535 = vst [vmem:[#allocation1 + $0x1] ss:$9 sm:$0xff] %v3253_v11  ;;  %4998 = vmax.xlane.f32.xlu2 %v9658_v49  ;;  %v9684_v11 = vadd.f32 %v9447_v57, %v9605_v4  ;;  %v9700_v57 = vadd.f32 %v9488_v46, %v9605_v4 }
 0x712   : > { %3536 = vst [vmem:[#allocation1 + $0x2] ss:$9 sm:$0xff] %v3254_v26  ;;  %v9688_v26 = vpop.f32.mrf.mxu1 }
 0x713   : > { %3537 = vst [vmem:[#allocation1 + $0x3] ss:$9 sm:$0xff] %v3255_v35  ;;  %v9692_v35 = vadd.f32 %v9515_v23, %v9605_v4  ;;  %v3272_v23 = vperm.slane %v11502_v38, 4 }
 0x714   : > { %3538 = vst [vmem:[#allocation1 + $0x4] ss:$9 sm:$0xff] %v3256_v56  ;;  %v3268_v56 = vperm.slane %v11502_v38, 0 }
 0x715   : > { %3539 = vst [vmem:[#allocation1 + $0x5] ss:$9 sm:$0xff] %v3257_v3  ;;  %v3269_v3 = vperm.slane %v11502_v38, 1 }
 0x716   : > { %3540 = vst [vmem:[#allocation1 + $0x6] ss:$9 sm:$0xff] %v3258_v34  ;;  %4994 = vmax.xlane.f32.xlu0 %v9663_v24 }
 0x717   : > { %3541 = vst [vmem:[#allocation1 + $0x7] ss:$9 sm:$0xff] %v3259_v43  ;;  %v3270_v43 = vperm.slane %v11502_v38, 2 }
 0x719   : > { %5004 = vmax.xlane.f32.xlu2 %v9679_v8 }
 0x71a   : > { %v9709_v46 = vpop.f32.mrf.mxu1 }
 0x71e   : > { %v9666_v53 = vld [vmem:[#allocation1] sm:$0xff]  ;;  %5000 = vmax.xlane.f32.xlu0 %v9684_v11 }
 0x71f   : > { %11501 = vst [vmem:[#allocation17_spill] sm:$0xff] %v9666_v53 }
 0x720   : > { %3543 = vst [vmem:[#allocation1] ss:$9 sm:$0xff] %v3260_v48  ;;  %v3274_v48 = vperm.slane %v11502_v38, 6 }
 0x721   : > { %3544 = vst [vmem:[#allocation1 + $0x1] ss:$9 sm:$0xff] %v3261_v7  ;;  %5010 = vmax.xlane.f32.xlu2 %v9692_v35  ;;  %v3275_v7 = vperm.slane %v11502_v38, 7 }
 0x722   : > { %3545 = vst [vmem:[#allocation1 + $0x2] ss:$9 sm:$0xff] %v3262_v21  ;;  %v9714_v21 = vadd.f32 %v9556_v12, %v9605_v4 }
 0x723   : > { %3546 = vst [vmem:[#allocation1 + $0x3] ss:$9 sm:$0xff] %v3263_v30  ;;  %v9718_v30 = vadd.f32 %v9527_v47, %v9605_v4  ;;  %v9733_v47 = vadd.f32 %v9568_v59, %v9605_v4 }
 0x724   : > { %3547 = vst [vmem:[#allocation1 + $0x4] ss:$9 sm:$0xff] %v3264_v20  ;;  %v11504_v20 = vld [vmem:[#allocation18_spill] sm:$0xff] }
 0x725   : > { %3548 = vst [vmem:[#allocation1 + $0x5] ss:$9 sm:$0xff] %v3265_v52  ;;  %v3276_v52 = vperm.slane %v11504_v20, 0  ;;  %v3277_v12 = vperm.slane %v11504_v20, 1  ;;  %v3283_v59 = vperm.slane %v11504_v20, 7 }
 0x726   : > { %3549 = vst [vmem:[#allocation1 + $0x6] ss:$9 sm:$0xff] %v3266_v29  ;;  %5006 = vmax.xlane.f32.xlu0 %v9700_v57  ;;  %v4037_v29 = vpop.xlane.xlu0 %4036 }
 0x727   : > { %3550 = vst [vmem:[#allocation1 + $0x7] ss:$9 sm:$0xff] %v3267_v54  ;;  %v9725_v54 = vadd.f32 %v9599_v1, %v9605_v4  ;;  %7066 = vrcp.f32 %v4037_v29  ;;  %v3280_v1 = vperm.slane %v11504_v20, 4 }
 0x729   : > { %5016 = vmax.xlane.f32.xlu2 %v9714_v21 }
 0x72e   : > { %v9696_v34 = vld [vmem:[#allocation1] sm:$0xff]  ;;  %5012 = vmax.xlane.f32.xlu0 %v9718_v30 }
 0x72f   : > { %11503 = vst [vmem:[#allocation27_spill] sm:$0xff] %v9696_v34 }
 0x730   : > { %3552 = vst [vmem:[#allocation1] ss:$9 sm:$0xff] %v3268_v56  ;;  %v1442_v56 = vpop.f32.mrf.mxu1 }
 0x731   : > { %3553 = vst [vmem:[#allocation1 + $0x1] ss:$9 sm:$0xff] %v3269_v3  ;;  %v3278_v3 = vperm.slane %v11504_v20, 2  ;;  %5022 = vmax.xlane.f32.xlu2 %v9725_v54 }
 0x732   : > { %3554 = vst [vmem:[#allocation1 + $0x2] ss:$9 sm:$0xff] %v3270_v43  ;;  %v3279_v43 = vperm.slane %v11504_v20, 3 }
 0x733   : > { %3555 = vst [vmem:[#allocation1 + $0x3] ss:$9 sm:$0xff] %v3271_v40  ;;  %v3281_v40 = vperm.slane %v11504_v20, 5 }
 0x734   : > { %3556 = vst [vmem:[#allocation1 + $0x4] ss:$9 sm:$0xff] %v3272_v23  ;;  %v3282_v23 = vperm.slane %v11504_v20, 6 }
 0x735   : > { %3557 = vst [vmem:[#allocation1 + $0x5] ss:$9 sm:$0xff] %v3273_v17  ;;  %v7067_v17 = vpop.eup %7066 }
 0x736   : > { %3558 = vst [vmem:[#allocation1 + $0x6] ss:$9 sm:$0xff] %v3274_v48  ;;  %5018 = vmax.xlane.f32.xlu0 %v9733_v47  ;;  %v9744_v48 = vadd.f32 %v9669_v19, %v9605_v4  ;;  %v4101_v29 = vmul.f32 %v7067_v17, %v9424_v62  ;;  %v9765_v62 = vadd.f32 %v9688_v26, %v9605_v4  ;;  %v11508_v26 = vld [vmem:[#allocation19_spill] sm:$0xff] }
 0x737   : > { %3559 = vst [vmem:[#allocation1 + $0x7] ss:$9 sm:$0xff] %v3275_v7  ;;  %v9748_v7 = vadd.f32 %v9622_v61, %v9605_v4 }
 0x738   : > { %v4133_v20 = vmax.f32 %v4101_v29, 0.001 }
 0x739   : > { %5028 = vmax.xlane.f32.xlu2 %v9744_v48 }
 0x73a   : > { %v4165_v19 = vmul.f32 %v9438_v14, %v4133_v20  ;;  %v9775_v20 = vadd.f32 %v11508_v26, %v9605_v4  ;;  %v3299_v26 = vperm.slane %v9051_v58, 7 }
 0x73c   : > { %4228 = vadd.xlane.f32.xlu1 %v4165_v19  ;;  %v3293_v19 = vperm.slane %v9051_v58, 1 }
 0x73e   : > { %v9728_v38 = vld [vmem:[#allocation1] sm:$0xff]  ;;  %5024 = vmax.xlane.f32.xlu0 %v9748_v7 }
 0x73f   : > { %11505 = vst [vmem:[#allocation23_spill] sm:$0xff] %v9728_v38 }
 0x740   : > { %3561 = vst [vmem:[#allocation1] ss:$9 sm:$0xff] %v3276_v52  ;;  %v1445_v52 = vpop.f32.mrf.mxu1 }
 0x741   : > { %3562 = vst [vmem:[#allocation1 + $0x1] ss:$9 sm:$0xff] %v3277_v12  ;;  %v11506_v12 = vld [vmem:[#allocation28_spill] sm:$0xff] }
 0x742   : > { %3563 = vst [vmem:[#allocation1 + $0x2] ss:$9 sm:$0xff] %v3278_v3  ;;  %v3284_v3 = vperm.slane %v11506_v12, 0  ;;  %v3286_v61 = vperm.slane %v11506_v12, 2  ;;  %v3289_v14 = vperm.slane %v11506_v12, 5  ;;  %v3291_v29 = vperm.slane %v11506_v12, 7 }
 0x743   : > { %3564 = vst [vmem:[#allocation1 + $0x3] ss:$9 sm:$0xff] %v3279_v43  ;;  %v3285_v43 = vperm.slane %v11506_v12, 1 }
 0x744   : > { %3565 = vst [vmem:[#allocation1 + $0x4] ss:$9 sm:$0xff] %v3280_v1  ;;  %4978 = vmax.xlane.f32.xlu1 %v9775_v20 }
 0x745   : > { %3566 = vst [vmem:[#allocation1 + $0x5] ss:$9 sm:$0xff] %v3281_v40  ;;  %v9759_v40 = vadd.f32 %v1442_v56, %v9605_v4  ;;  %v3290_v56 = vperm.slane %v11506_v12, 6 }
 0x746   : > { %3567 = vst [vmem:[#allocation1 + $0x6] ss:$9 sm:$0xff] %v3282_v23  ;;  %v3287_v23 = vperm.slane %v11506_v12, 3  ;;  %5030 = vmax.xlane.f32.xlu0 %v9765_v62 }
 0x747   : > { %3568 = vst [vmem:[#allocation1 + $0x7] ss:$9 sm:$0xff] %v3283_v59  ;;  %v3288_v59 = vperm.slane %v11506_v12, 4  ;;  %5034 = vmax.xlane.f32.xlu2 %v9759_v40  ;;  %v3292_v12 = vperm.slane %v9051_v58, 0 }
 0x748   : > { %v1447_v17 = vpop.f32.mrf.mxu1 }
 0x74e   : > { %v9755_v1 = vld [vmem:[#allocation1] sm:$0xff] }
 0x74f   : > { %11507 = vst [vmem:[#allocation41_spill] sm:$0xff] %v9755_v1 }
 0x750   : > { %3570 = vst [vmem:[#allocation1] ss:$9 sm:$0xff] %v3284_v3  ;;  %v9778_v3 = vadd.f32 %v1447_v17, %v9605_v4  ;;  %v3297_v17 = vperm.slane %v9051_v58, 5 }
 0x751   : > { %3571 = vst [vmem:[#allocation1 + $0x1] ss:$9 sm:$0xff] %v3285_v43  ;;  %v9782_v43 = vadd.f32 %v1445_v52, %v9605_v4  ;;  %v3295_v52 = vperm.slane %v9051_v58, 3 }
 0x752   : > { %3572 = vst [vmem:[#allocation1 + $0x2] ss:$9 sm:$0xff] %v3286_v61  ;;  %5038 = vmax.xlane.f32.xlu2 %v9778_v3 }
 0x753   : > { %3573 = vst [vmem:[#allocation1 + $0x3] ss:$9 sm:$0xff] %v3287_v23  ;;  %5036 = vmax.xlane.f32.xlu0 %v9782_v43  ;;  %v11510_v23 = vld [vmem:[#allocation25_spill] sm:$0xff] }
 0x754   : > { %3574 = vst [vmem:[#allocation1 + $0x4] ss:$9 sm:$0xff] %v3288_v59  ;;  %v9792_v59 = vadd.f32 %v11510_v23, %v9605_v4 }
 0x755   : > { %3575 = vst [vmem:[#allocation1 + $0x5] ss:$9 sm:$0xff] %v3289_v14  ;;  %v3294_v14 = vperm.slane %v9051_v58, 2 }
 0x756   : > { %3576 = vst [vmem:[#allocation1 + $0x6] ss:$9 sm:$0xff] %v3290_v56  ;;  %v3296_v56 = vperm.slane %v9051_v58, 4  ;;  %4984 = vmax.xlane.f32.xlu1 %v9792_v59 }
 0x757   : > { %3577 = vst [vmem:[#allocation1 + $0x7] ss:$9 sm:$0xff] %v3291_v29  ;;  %v3298_v29 = vperm.slane %v9051_v58, 6  ;;  %v9813_v58 = vadd.f32 %v9422_v28, %v9605_v4  ;;  %v9823_v28 = vadd.f32 %v9463_v22, %v9605_v4 }
 0x75e   : > { %v9788_v61 = vld [vmem:[#allocation1] sm:$0xff] }
 0x75f   : > { %11509 = vst [vmem:[#allocation29_spill] sm:$0xff] %v9788_v61 }
 0x760   : > { %3579 = vst [vmem:[#allocation1] ss:$9 sm:$0xff] %v3292_v12  ;;  %v11511_v12 = vld [vmem:[#allocation31_spill] sm:$0xff] }
 0x761   : > { %3580 = vst [vmem:[#allocation1 + $0x1] ss:$9 sm:$0xff] %v3293_v19  ;;  %v9803_v23 = vadd.f32 %v11511_v12, %v9605_v4  ;;  %v3300_v19 = vperm.slane %v9023_v16, 0  ;;  %v3307_v12 = vperm.slane %v9023_v16, 7 }
 0x762   : > { %3581 = vst [vmem:[#allocation1 + $0x2] ss:$9 sm:$0xff] %v3294_v14  ;;  %v3301_v14 = vperm.slane %v9023_v16, 1 }
 0x763   : > { %3582 = vst [vmem:[#allocation1 + $0x3] ss:$9 sm:$0xff] %v3295_v52  ;;  %4990 = vmax.xlane.f32.xlu1 %v9803_v23  ;;  %v3302_v52 = vperm.slane %v9023_v16, 2 }
 0x764   : > { %3583 = vst [vmem:[#allocation1 + $0x4] ss:$9 sm:$0xff] %v3296_v56  ;;  %v3303_v56 = vperm.slane %v9023_v16, 3 }
 0x765   : > { %3584 = vst [vmem:[#allocation1 + $0x5] ss:$9 sm:$0xff] %v3297_v17  ;;  %v3304_v17 = vperm.slane %v9023_v16, 4 }
 0x766   : > { %3585 = vst [vmem:[#allocation1 + $0x6] ss:$9 sm:$0xff] %v3298_v29  ;;  %v3305_v29 = vperm.slane %v9023_v16, 5 }
 0x767   : > { %3586 = vst [vmem:[#allocation1 + $0x7] ss:$9 sm:$0xff] %v3299_v26  ;;  %v3306_v26 = vperm.slane %v9023_v16, 6 }
 0x76b   : > { %4996 = vmax.xlane.f32.xlu1 %v9813_v58 }
 0x76e   : > { %v9808_v1 = vld [vmem:[#allocation1] sm:$0xff] }
 0x76f   : > { %11512 = vst [vmem:[#allocation48_spill] sm:$0xff] %v9808_v1 }
 0x770   : > { %3588 = vst [vmem:[#allocation1] ss:$9 sm:$0xff] %v3300_v19  ;;  %v11513_v19 = vld [vmem:[#allocation50_spill] sm:$0xff] }
 0x771   : > { %3589 = vst [vmem:[#allocation1 + $0x1] ss:$9 sm:$0xff] %v3301_v14  ;;  %v3308_v14 = vperm.slane %v11513_v19, 0  ;;  %v3310_v1 = vperm.slane %v11513_v19, 2  ;;  %v3311_v16 = vperm.slane %v11513_v19, 3  ;;  %v3312_v22 = vperm.slane %v11513_v19, 4 }
 0x772   : > { %3590 = vst [vmem:[#allocation1 + $0x2] ss:$9 sm:$0xff] %v3302_v52  ;;  %v3309_v52 = vperm.slane %v11513_v19, 1 }
 0x773   : > { %3591 = vst [vmem:[#allocation1 + $0x3] ss:$9 sm:$0xff] %v3303_v56  ;;  %5002 = vmax.xlane.f32.xlu1 %v9823_v28 }
 0x774   : > { %3592 = vst [vmem:[#allocation1 + $0x4] ss:$9 sm:$0xff] %v3304_v17  ;;  %v9834_v17 = vadd.f32 %v9502_v41, %v9605_v4  ;;  %v9843_v41 = vadd.f32 %v9543_v63, %v9605_v4  ;;  %v9855_v63 = vadd.f32 %v9586_v36, %v9605_v4 }
 0x775   : > { %3593 = vst [vmem:[#allocation1 + $0x5] ss:$9 sm:$0xff] %v3305_v29  ;;  %v3313_v29 = vperm.slane %v11513_v19, 5 }
 0x776   : > { %3594 = vst [vmem:[#allocation1 + $0x6] ss:$9 sm:$0xff] %v3306_v26  ;;  %v3314_v26 = vperm.slane %v11513_v19, 6 }
 0x777   : > { %3595 = vst [vmem:[#allocation1 + $0x7] ss:$9 sm:$0xff] %v3307_v12  ;;  %v3315_v12 = vperm.slane %v11513_v19, 7 }
 0x77b   : > { %5008 = vmax.xlane.f32.xlu1 %v9834_v17 }
 0x77e   : > { %v9828_v56 = vld [vmem:[#allocation1] sm:$0xff] }
 0x77f   : > { %11514 = vst [vmem:[#allocation20_spill] sm:$0xff] %v9828_v56 }
 0x780   : > { %3597 = vst [vmem:[#allocation1] ss:$9 sm:$0xff] %v3308_v14 }
 0x781   : > { %3598 = vst [vmem:[#allocation1 + $0x1] ss:$9 sm:$0xff] %v3309_v52 }
 0x782   : > { %3599 = vst [vmem:[#allocation1 + $0x2] ss:$9 sm:$0xff] %v3310_v1  ;;  %v11515_v1 = vld [vmem:[#allocation54_spill] sm:$0xff] }
 0x783   : > { %3600 = vst [vmem:[#allocation1 + $0x3] ss:$9 sm:$0xff] %v3311_v16  ;;  %5014 = vmax.xlane.f32.xlu1 %v9843_v41  ;;  %v3316_v14 = vperm.slane %v11515_v1, 0  ;;  %v3317_v52 = vperm.slane %v11515_v1, 1  ;;  %v3319_v19 = vperm.slane %v11515_v1, 3  ;;  %v3323_v56 = vperm.slane %v11515_v1, 7 }
 0x784   : > { %3601 = vst [vmem:[#allocation1 + $0x4] ss:$9 sm:$0xff] %v3312_v22  ;;  %v3318_v22 = vperm.slane %v11515_v1, 2 }
 0x785   : > { %3602 = vst [vmem:[#allocation1 + $0x5] ss:$9 sm:$0xff] %v3313_v29  ;;  %v3320_v29 = vperm.slane %v11515_v1, 4 }
 0x786   : > { %3603 = vst [vmem:[#allocation1 + $0x6] ss:$9 sm:$0xff] %v3314_v26  ;;  %v3321_v26 = vperm.slane %v11515_v1, 5 }
 0x787   : > { %3604 = vst [vmem:[#allocation1 + $0x7] ss:$9 sm:$0xff] %v3315_v12  ;;  %v3322_v12 = vperm.slane %v11515_v1, 6 }
 0x78b   : > { %5020 = vmax.xlane.f32.xlu1 %v9855_v63 }
 0x78e   : > { %v9848_v16 = vld [vmem:[#allocation1] sm:$0xff] }
 0x78f   : > { %11516 = vst [vmem:[#allocation18_spill] sm:$0xff] %v9848_v16 }
 0x790   : > { %3606 = vst [vmem:[#allocation1] ss:$9 sm:$0xff] %v3316_v14  ;;  %v9863_v14 = vadd.f32 %v9647_v2, %v9605_v4 }
 0x791   : > { %3607 = vst [vmem:[#allocation1 + $0x1] ss:$9 sm:$0xff] %v3317_v52  ;;  %v11517_v52 = vld [vmem:[#allocation53_spill] sm:$0xff] }
 0x792   : > { %3608 = vst [vmem:[#allocation1 + $0x2] ss:$9 sm:$0xff] %v3318_v22  ;;  %v3324_v36 = vperm.slane %v11517_v52, 0  ;;  %v3325_v22 = vperm.slane %v11517_v52, 1  ;;  %v3327_v1 = vperm.slane %v11517_v52, 3  ;;  %v3329_v2 = vperm.slane %v11517_v52, 5 }
 0x793   : > { %3609 = vst [vmem:[#allocation1 + $0x3] ss:$9 sm:$0xff] %v3319_v19  ;;  %5026 = vmax.xlane.f32.xlu1 %v9863_v14 }
 0x794   : > { %3610 = vst [vmem:[#allocation1 + $0x4] ss:$9 sm:$0xff] %v3320_v29  ;;  %v3326_v29 = vperm.slane %v11517_v52, 2 }
 0x795   : > { %3611 = vst [vmem:[#allocation1 + $0x5] ss:$9 sm:$0xff] %v3321_v26  ;;  %v9876_v26 = vadd.f32 %v9709_v46, %v9605_v4 }
 0x796   : > { %3612 = vst [vmem:[#allocation1 + $0x6] ss:$9 sm:$0xff] %v3322_v12  ;;  %v3330_v12 = vperm.slane %v11517_v52, 6 }
 0x797   : > { %3613 = vst [vmem:[#allocation1 + $0x7] ss:$9 sm:$0xff] %v3323_v56  ;;  %v3328_v56 = vperm.slane %v11517_v52, 4 }
 0x79b   : > { %5032 = vmax.xlane.f32.xlu1 %v9876_v26 }
 0x79e   : > { %v9868_v19 = vld [vmem:[#allocation1] sm:$0xff] }
 0x79f   : > { %11518 = vst [vmem:[#allocation28_spill] sm:$0xff] %v9868_v19  ;;  %v3331_v19 = vperm.slane %v11517_v52, 7 }
 0x7a0   : > { %3615 = vst [vmem:[#allocation1] ss:$9 sm:$0xff] %v3324_v36  ;;  %v11519_v36 = vld [vmem:[#allocation51_spill] sm:$0xff] }
 0x7a1   : > { %3616 = vst [vmem:[#allocation1 + $0x1] ss:$9 sm:$0xff] %v3325_v22  ;;  %v3332_v22 = vperm.slane %v11519_v36, 0  ;;  %v3335_v4 = vperm.slane %v11519_v36, 3  ;;  %v3336_v46 = vperm.slane %v11519_v36, 4  ;;  %v3337_v52 = vperm.slane %v11519_v36, 5 }
 0x7a2   : > { %3617 = vst [vmem:[#allocation1 + $0x2] ss:$9 sm:$0xff] %v3326_v29  ;;  %v3333_v29 = vperm.slane %v11519_v36, 1 }
 0x7a3   : > { %3618 = vst [vmem:[#allocation1 + $0x3] ss:$9 sm:$0xff] %v3327_v1  ;;  %v3334_v1 = vperm.slane %v11519_v36, 2 }
 0x7a4   : > { %3619 = vst [vmem:[#allocation1 + $0x4] ss:$9 sm:$0xff] %v3328_v56  ;;  %v3339_v56 = vperm.slane %v11519_v36, 7 }
 0x7a5   : > { %3620 = vst [vmem:[#allocation1 + $0x5] ss:$9 sm:$0xff] %v3329_v2  ;;  %v11521_v2 = vld [vmem:[#allocation57_spill] sm:$0xff] }
 0x7a6   : > { %3621 = vst [vmem:[#allocation1 + $0x6] ss:$9 sm:$0xff] %v3330_v12  ;;  %v3340_v12 = vperm.slane %v11521_v2, 0 }
 0x7a7   : > { %3622 = vst [vmem:[#allocation1 + $0x7] ss:$9 sm:$0xff] %v3331_v19  ;;  %v3338_v19 = vperm.slane %v11519_v36, 6  ;;  %v3345_v36 = vperm.slane %v11521_v2, 5 }
 0x7ae   : > { %v9883_v16 = vld [vmem:[#allocation1] sm:$0xff] }
 0x7af   : > { %11520 = vst [vmem:[#allocation19_spill] sm:$0xff] %v9883_v16 }
 0x7b0   : > { %3624 = vst [vmem:[#allocation1] ss:$9 sm:$0xff] %v3332_v22  ;;  %v3341_v22 = vperm.slane %v11521_v2, 1 }
 0x7b1   : > { %3625 = vst [vmem:[#allocation1 + $0x1] ss:$9 sm:$0xff] %v3333_v29  ;;  %v3342_v29 = vperm.slane %v11521_v2, 2 }
 0x7b2   : > { %3626 = vst [vmem:[#allocation1 + $0x2] ss:$9 sm:$0xff] %v3334_v1  ;;  %v3343_v1 = vperm.slane %v11521_v2, 3 }
 0x7b3   : > { %3627 = vst [vmem:[#allocation1 + $0x3] ss:$9 sm:$0xff] %v3335_v4  ;;  %v3344_v4 = vperm.slane %v11521_v2, 4 }
 0x7b4   : > { %3628 = vst [vmem:[#allocation1 + $0x4] ss:$9 sm:$0xff] %v3336_v46  ;;  %v3346_v46 = vperm.slane %v11521_v2, 6 }
 0x7b5   : > { %3629 = vst [vmem:[#allocation1 + $0x5] ss:$9 sm:$0xff] %v3337_v52  ;;  %v3347_v52 = vperm.slane %v11521_v2, 7 }
 0x7b6   : > { %3630 = vst [vmem:[#allocation1 + $0x6] ss:$9 sm:$0xff] %v3338_v19  ;;  %v11523_v19 = vld [vmem:[#allocation55_spill] sm:$0xff] }
 0x7b7   : > { %3631 = vst [vmem:[#allocation1 + $0x7] ss:$9 sm:$0xff] %v3339_v56  ;;  %v3348_v56 = vperm.slane %v11523_v19, 0  ;;  %v3353_v2 = vperm.slane %v11523_v19, 5 }
 0x7be   : > { %v9893_v16 = vld [vmem:[#allocation1] sm:$0xff] }
 0x7bf   : > { %11522 = vst [vmem:[#allocation25_spill] sm:$0xff] %v9893_v16 }
 0x7c0   : > { %3633 = vst [vmem:[#allocation1] ss:$9 sm:$0xff] %v3340_v12  ;;  %v3349_v12 = vperm.slane %v11523_v19, 1 }
 0x7c1   : > { %3634 = vst [vmem:[#allocation1 + $0x1] ss:$9 sm:$0xff] %v3341_v22  ;;  %v3350_v22 = vperm.slane %v11523_v19, 2 }
 0x7c2   : > { %3635 = vst [vmem:[#allocation1 + $0x2] ss:$9 sm:$0xff] %v3342_v29  ;;  %v3351_v29 = vperm.slane %v11523_v19, 3 }
 0x7c3   : > { %3636 = vst [vmem:[#allocation1 + $0x3] ss:$9 sm:$0xff] %v3343_v1  ;;  %v3352_v1 = vperm.slane %v11523_v19, 4 }
 0x7c4   : > { %3637 = vst [vmem:[#allocation1 + $0x4] ss:$9 sm:$0xff] %v3344_v4  ;;  %v3354_v4 = vperm.slane %v11523_v19, 6 }
 0x7c5   : > { %3638 = vst [vmem:[#allocation1 + $0x5] ss:$9 sm:$0xff] %v3345_v36  ;;  %v3355_v36 = vperm.slane %v11523_v19, 7  ;;  %v4169_v19 = vpop.xlane.xlu1 %4168 }
 0x7c6   : > { %3639 = vst [vmem:[#allocation1 + $0x6] ss:$9 sm:$0xff] %v3346_v46  ;;  %v4167_v46 = vpop.xlane.xlu2 %4166 }
 0x7c7   : > { %3640 = vst [vmem:[#allocation1 + $0x7] ss:$9 sm:$0xff] %v3347_v52  ;;  %v4262_v52 = vperm.slane %v4167_v46, 0  ;;  %v4265_v61 = vperm.slane %v4167_v46, 3  ;;  %v4268_v53 = vperm.slane %v4167_v46, 6 }
 0x7ce   : > { %v9903_v16 = vld [vmem:[#allocation1] sm:$0xff] }
 0x7cf   : > { %11524 = vst [vmem:[#allocation31_spill] sm:$0xff] %v9903_v16  ;;  %v4263_v16 = vperm.slane %v4167_v46, 1 }
 0x7d0   : > { %3642 = vst [vmem:[#allocation1] ss:$9 sm:$0xff] %v3348_v56 }
 0x7d1   : > { %3643 = vst [vmem:[#allocation1 + $0x1] ss:$9 sm:$0xff] %v3349_v12  ;;  %v4264_v12 = vperm.slane %v4167_v46, 2 }
 0x7d2   : > { %3644 = vst [vmem:[#allocation1 + $0x2] ss:$9 sm:$0xff] %v3350_v22  ;;  %v4266_v22 = vperm.slane %v4167_v46, 4 }
 0x7d3   : > { %3645 = vst [vmem:[#allocation1 + $0x3] ss:$9 sm:$0xff] %v3351_v29  ;;  %v4267_v29 = vperm.slane %v4167_v46, 5 }
 0x7d4   : > { %3646 = vst [vmem:[#allocation1 + $0x4] ss:$9 sm:$0xff] %v3352_v1  ;;  %v4269_v1 = vperm.slane %v4167_v46, 7 }
 0x7d5   : > { %3647 = vst [vmem:[#allocation1 + $0x5] ss:$9 sm:$0xff] %v3353_v2  ;;  %v4270_v2 = vperm.slane %v4169_v19, 0 }
 0x7d6   : > { %3648 = vst [vmem:[#allocation1 + $0x6] ss:$9 sm:$0xff] %v3354_v4 }
 0x7d7   : > { %3649 = vst [vmem:[#allocation1 + $0x7] ss:$9 sm:$0xff] %v3355_v36  ;;  %v4271_v36 = vperm.slane %v4169_v19, 1 }
 0x7de   : > { %v9911_v56 = vld [vmem:[#allocation1] sm:$0xff] }
 0x7df   : > { %11525 = vst [vmem:[#allocation50_spill] sm:$0xff] %v9911_v56  ;;  %v4272_v56 = vperm.slane %v4169_v19, 2 }
 0x7e0   : > { %4518 = vst [vmem:[#allocation1] ss:$9 sm:$0xff] %v4262_v52  ;;  %v4273_v52 = vperm.slane %v4169_v19, 3 }
 0x7e1   : > { %4520 = vst [vmem:[#allocation1 + $0x1] ss:$9 sm:$0xff] %v4263_v16  ;;  %v4274_v16 = vperm.slane %v4169_v19, 4 }
 0x7e2   : > { %4522 = vst [vmem:[#allocation1 + $0x2] ss:$9 sm:$0xff] %v4264_v12  ;;  %v4275_v12 = vperm.slane %v4169_v19, 5 }
 0x7e3   : > { %4524 = vst [vmem:[#allocation1 + $0x3] ss:$9 sm:$0xff] %v4265_v61  ;;  %v4276_v61 = vperm.slane %v4169_v19, 6 }
 0x7e4   : > { %4526 = vst [vmem:[#allocation1 + $0x4] ss:$9 sm:$0xff] %v4266_v22  ;;  %v4277_v22 = vperm.slane %v4169_v19, 7  ;;  %v4173_v19 = vpop.xlane.xlu2 %4172 }
 0x7e5   : > { %4528 = vst [vmem:[#allocation1 + $0x5] ss:$9 sm:$0xff] %v4267_v29 }
 0x7e6   : > { %4530 = vst [vmem:[#allocation1 + $0x6] ss:$9 sm:$0xff] %v4268_v53  ;;  %v4171_v53 = vpop.xlane.xlu0 %4170 }
 0x7e7   : > { %4532 = vst [vmem:[#allocation1 + $0x7] ss:$9 sm:$0xff] %v4269_v1  ;;  %v4278_v46 = vperm.slane %v4171_v53, 0  ;;  %v4279_v1 = vperm.slane %v4171_v53, 1 }
 0x7ee   : > { %v9913_v4 = vld [vmem:[#allocation1] sm:$0xff] }
 0x7ef   : > { %11526 = vst [vmem:[#allocation54_spill] sm:$0xff] %v9913_v4  ;;  %v4280_v4 = vperm.slane %v4171_v53, 2 }
 0x7f0   : > { %4534 = vst [vmem:[#allocation1] ss:$9 sm:$0xff] %v4270_v2  ;;  %v4281_v2 = vperm.slane %v4171_v53, 3 }
 0x7f1   : > { %4535 = vst [vmem:[#allocation1 + $0x1] ss:$9 sm:$0xff] %v4271_v36  ;;  %v4282_v36 = vperm.slane %v4171_v53, 4 }
 0x7f2   : > { %4536 = vst [vmem:[#allocation1 + $0x2] ss:$9 sm:$0xff] %v4272_v56  ;;  %v4283_v56 = vperm.slane %v4171_v53, 5 }
 0x7f3   : > { %4537 = vst [vmem:[#allocation1 + $0x3] ss:$9 sm:$0xff] %v4273_v52  ;;  %v4284_v52 = vperm.slane %v4171_v53, 6 }
 0x7f4   : > { %4538 = vst [vmem:[#allocation1 + $0x4] ss:$9 sm:$0xff] %v4274_v16  ;;  %v4285_v16 = vperm.slane %v4171_v53, 7  ;;  %v4175_v53 = vpop.xlane.xlu1 %4174 }
 0x7f5   : > { %4539 = vst [vmem:[#allocation1 + $0x5] ss:$9 sm:$0xff] %v4275_v12  ;;  %v4286_v12 = vperm.slane %v4173_v19, 0 }
 0x7f6   : > { %4540 = vst [vmem:[#allocation1 + $0x6] ss:$9 sm:$0xff] %v4276_v61  ;;  %v4287_v61 = vperm.slane %v4173_v19, 1 }
 0x7f7   : > { %4541 = vst [vmem:[#allocation1 + $0x7] ss:$9 sm:$0xff] %v4277_v22 }
 0x7fe   : > { %v9915_v29 = vld [vmem:[#allocation1] sm:$0xff] }
 0x7ff   : > { %11527 = vst [vmem:[#allocation53_spill] sm:$0xff] %v9915_v29  ;;  %v4288_v29 = vperm.slane %v4173_v19, 2 }
 0x800   : > { %4543 = vst [vmem:[#allocation1] ss:$9 sm:$0xff] %v4278_v46  ;;  %v4289_v46 = vperm.slane %v4173_v19, 3 }
 0x801   : > { %4544 = vst [vmem:[#allocation1 + $0x1] ss:$9 sm:$0xff] %v4279_v1  ;;  %v4290_v1 = vperm.slane %v4173_v19, 4 }
 0x802   : > { %4545 = vst [vmem:[#allocation1 + $0x2] ss:$9 sm:$0xff] %v4280_v4  ;;  %v4291_v4 = vperm.slane %v4173_v19, 5 }
 0x803   : > { %4546 = vst [vmem:[#allocation1 + $0x3] ss:$9 sm:$0xff] %v4281_v2  ;;  %v4292_v2 = vperm.slane %v4173_v19, 6 }
 0x804   : > { %4547 = vst [vmem:[#allocation1 + $0x4] ss:$9 sm:$0xff] %v4282_v36  ;;  %v4293_v36 = vperm.slane %v4173_v19, 7  ;;  %v4177_v19 = vpop.xlane.xlu0 %4176 }
 0x805   : > { %4548 = vst [vmem:[#allocation1 + $0x5] ss:$9 sm:$0xff] %v4283_v56  ;;  %v4294_v56 = vperm.slane %v4175_v53, 0 }
 0x806   : > { %4549 = vst [vmem:[#allocation1 + $0x6] ss:$9 sm:$0xff] %v4284_v52 }
 0x807   : > { %4550 = vst [vmem:[#allocation1 + $0x7] ss:$9 sm:$0xff] %v4285_v16  ;;  %v4295_v16 = vperm.slane %v4175_v53, 1 }
 0x80e   : > { %v9917_v22 = vld [vmem:[#allocation1] sm:$0xff] }
 0x80f   : > { %11528 = vst [vmem:[#allocation51_spill] sm:$0xff] %v9917_v22  ;;  %v4296_v22 = vperm.slane %v4175_v53, 2 }
 0x810   : > { %4552 = vst [vmem:[#allocation1] ss:$9 sm:$0xff] %v4286_v12  ;;  %v4297_v12 = vperm.slane %v4175_v53, 3 }
 0x811   : > { %4553 = vst [vmem:[#allocation1 + $0x1] ss:$9 sm:$0xff] %v4287_v61  ;;  %v4298_v61 = vperm.slane %v4175_v53, 4 }
 0x812   : > { %4554 = vst [vmem:[#allocation1 + $0x2] ss:$9 sm:$0xff] %v4288_v29  ;;  %v4299_v29 = vperm.slane %v4175_v53, 5 }
 0x813   : > { %4555 = vst [vmem:[#allocation1 + $0x3] ss:$9 sm:$0xff] %v4289_v46  ;;  %v4300_v46 = vperm.slane %v4175_v53, 6 }
 0x814   : > { %4556 = vst [vmem:[#allocation1 + $0x4] ss:$9 sm:$0xff] %v4290_v1  ;;  %v4301_v1 = vperm.slane %v4175_v53, 7  ;;  %v4179_v53 = vpop.xlane.xlu2 %4178 }
 0x815   : > { %4557 = vst [vmem:[#allocation1 + $0x5] ss:$9 sm:$0xff] %v4291_v4  ;;  %v4302_v4 = vperm.slane %v4177_v19, 0 }
 0x816   : > { %4558 = vst [vmem:[#allocation1 + $0x6] ss:$9 sm:$0xff] %v4292_v2 }
 0x817   : > { %4559 = vst [vmem:[#allocation1 + $0x7] ss:$9 sm:$0xff] %v4293_v36  ;;  %v4303_v36 = vperm.slane %v4177_v19, 1 }
 0x81e   : > { %v9919_v52 = vld [vmem:[#allocation1] sm:$0xff] }
 0x81f   : > { %11529 = vst [vmem:[#allocation57_spill] sm:$0xff] %v9919_v52  ;;  %v4304_v52 = vperm.slane %v4177_v19, 2 }
 0x820   : > { %4561 = vst [vmem:[#allocation1] ss:$9 sm:$0xff] %v4294_v56  ;;  %v4305_v56 = vperm.slane %v4177_v19, 3 }
 0x821   : > { %4562 = vst [vmem:[#allocation1 + $0x1] ss:$9 sm:$0xff] %v4295_v16  ;;  %v4306_v16 = vperm.slane %v4177_v19, 4 }
 0x822   : > { %4563 = vst [vmem:[#allocation1 + $0x2] ss:$9 sm:$0xff] %v4296_v22  ;;  %v4307_v22 = vperm.slane %v4177_v19, 5 }
 0x823   : > { %4564 = vst [vmem:[#allocation1 + $0x3] ss:$9 sm:$0xff] %v4297_v12  ;;  %v4308_v12 = vperm.slane %v4177_v19, 6 }
 0x824   : > { %4565 = vst [vmem:[#allocation1 + $0x4] ss:$9 sm:$0xff] %v4298_v61  ;;  %v4309_v61 = vperm.slane %v4177_v19, 7  ;;  %v4181_v19 = vpop.xlane.xlu1 %4180 }
 0x825   : > { %4566 = vst [vmem:[#allocation1 + $0x5] ss:$9 sm:$0xff] %v4299_v29  ;;  %v4310_v29 = vperm.slane %v4179_v53, 0 }
 0x826   : > { %4567 = vst [vmem:[#allocation1 + $0x6] ss:$9 sm:$0xff] %v4300_v46  ;;  %v4311_v46 = vperm.slane %v4179_v53, 1 }
 0x827   : > { %4568 = vst [vmem:[#allocation1 + $0x7] ss:$9 sm:$0xff] %v4301_v1 }
 0x82e   : > { %v9921_v2 = vld [vmem:[#allocation1] sm:$0xff] }
 0x82f   : > { %11530 = vst [vmem:[#allocation55_spill] sm:$0xff] %v9921_v2  ;;  %v4312_v2 = vperm.slane %v4179_v53, 2 }
 0x830   : > { %4570 = vst [vmem:[#allocation1] ss:$9 sm:$0xff] %v4302_v4  ;;  %v4313_v4 = vperm.slane %v4179_v53, 3 }
 0x831   : > { %4571 = vst [vmem:[#allocation1 + $0x1] ss:$9 sm:$0xff] %v4303_v36  ;;  %v4314_v36 = vperm.slane %v4179_v53, 4 }
 0x832   : > { %4572 = vst [vmem:[#allocation1 + $0x2] ss:$9 sm:$0xff] %v4304_v52  ;;  %v4315_v52 = vperm.slane %v4179_v53, 5 }
 0x833   : > { %4573 = vst [vmem:[#allocation1 + $0x3] ss:$9 sm:$0xff] %v4305_v56  ;;  %v4316_v56 = vperm.slane %v4179_v53, 6 }
 0x834   : > { %4574 = vst [vmem:[#allocation1 + $0x4] ss:$9 sm:$0xff] %v4306_v16  ;;  %v4317_v16 = vperm.slane %v4179_v53, 7  ;;  %v4183_v53 = vpop.xlane.xlu0 %4182 }
 0x835   : > { %4575 = vst [vmem:[#allocation1 + $0x5] ss:$9 sm:$0xff] %v4307_v22  ;;  %v4318_v22 = vperm.slane %v4181_v19, 0  ;;  %v4329_v38 = vperm.slane %v4183_v53, 3 }
 0x836   : > { %4576 = vst [vmem:[#allocation1 + $0x6] ss:$9 sm:$0xff] %v4308_v12 }
 0x837   : > { %4577 = vst [vmem:[#allocation1 + $0x7] ss:$9 sm:$0xff] %v4309_v61  ;;  %v4319_v61 = vperm.slane %v4181_v19, 1 }
 0x83e   : > { %v9923_v1 = vld [vmem:[#allocation1] sm:$0xff] }
 0x83f   : > { %11531 = vst [vmem:[#allocation85_spill] sm:$0xff] %v9923_v1  ;;  %v4320_v1 = vperm.slane %v4181_v19, 2 }
 0x840   : > { %4579 = vst [vmem:[#allocation1] ss:$9 sm:$0xff] %v4310_v29  ;;  %v4321_v29 = vperm.slane %v4181_v19, 3 }
 0x841   : > { %4580 = vst [vmem:[#allocation1 + $0x1] ss:$9 sm:$0xff] %v4311_v46  ;;  %v4322_v46 = vperm.slane %v4181_v19, 4 }
 0x842   : > { %4581 = vst [vmem:[#allocation1 + $0x2] ss:$9 sm:$0xff] %v4312_v2  ;;  %v4323_v2 = vperm.slane %v4181_v19, 5 }
 0x843   : > { %4582 = vst [vmem:[#allocation1 + $0x3] ss:$9 sm:$0xff] %v4313_v4  ;;  %v4324_v4 = vperm.slane %v4181_v19, 6 }
 0x844   : > { %4583 = vst [vmem:[#allocation1 + $0x4] ss:$9 sm:$0xff] %v4314_v36  ;;  %v4325_v36 = vperm.slane %v4181_v19, 7  ;;  %v4333_v19 = vperm.slane %v4183_v53, 7 }
 0x845   : > { %4584 = vst [vmem:[#allocation1 + $0x5] ss:$9 sm:$0xff] %v4315_v52  ;;  %v4326_v52 = vperm.slane %v4183_v53, 0 }
 0x846   : > { %4585 = vst [vmem:[#allocation1 + $0x6] ss:$9 sm:$0xff] %v4316_v56 }
 0x847   : > { %4586 = vst [vmem:[#allocation1 + $0x7] ss:$9 sm:$0xff] %v4317_v16  ;;  %v4327_v16 = vperm.slane %v4183_v53, 1 }
 0x84e   : > { %v9925_v12 = vld [vmem:[#allocation1] sm:$0xff] }
 0x84f   : > { %11532 = vst [vmem:[#allocation86_spill] sm:$0xff] %v9925_v12  ;;  %v4328_v12 = vperm.slane %v4183_v53, 2 }
 0x850   : > { %4588 = vst [vmem:[#allocation1] ss:$9 sm:$0xff] %v4318_v22  ;;  %v4185_v22 = vpop.xlane.xlu2 %4184 }
 0x851   : > { %4589 = vst [vmem:[#allocation1 + $0x1] ss:$9 sm:$0xff] %v4319_v61  ;;  %v4330_v61 = vperm.slane %v4183_v53, 4  ;;  %v4336_v34 = vperm.slane %v4185_v22, 2 }
 0x852   : > { %4590 = vst [vmem:[#allocation1 + $0x2] ss:$9 sm:$0xff] %v4320_v1  ;;  %v4331_v1 = vperm.slane %v4183_v53, 5 }
 0x853   : > { %4591 = vst [vmem:[#allocation1 + $0x3] ss:$9 sm:$0xff] %v4321_v29  ;;  %v4332_v29 = vperm.slane %v4183_v53, 6  ;;  %v4340_v53 = vperm.slane %v4185_v22, 6 }
 0x854   : > { %4592 = vst [vmem:[#allocation1 + $0x4] ss:$9 sm:$0xff] %v4322_v46 }
 0x855   : > { %4593 = vst [vmem:[#allocation1 + $0x5] ss:$9 sm:$0xff] %v4323_v2  ;;  %v4187_v2 = vpop.xlane.xlu1 %4186 }
 0x856   : > { %4594 = vst [vmem:[#allocation1 + $0x6] ss:$9 sm:$0xff] %v4324_v4  ;;  %v4334_v4 = vperm.slane %v4185_v22, 0  ;;  %v4344_v37 = vperm.slane %v4187_v2, 2  ;;  %v4349_v39 = vperm.slane %v4187_v2, 7 }
 0x857   : > { %4595 = vst [vmem:[#allocation1 + $0x7] ss:$9 sm:$0xff] %v4325_v36  ;;  %v4189_v36 = vpop.xlane.xlu0 %4188 }
 0x858   : > { %v9929_v46 = vpop.xlane.xlu2 %4190  ;;  %v4350_v45 = vperm.slane %v4189_v36, 0  ;;  %v4351_v31 = vperm.slane %v4189_v36, 1  ;;  %v4352_v5 = vperm.slane %v4189_v36, 2  ;;  %v4357_v13 = vperm.slane %v4189_v36, 7 }
 0x859   : > { %v4365_v55 = vperm.slane %v9929_v46, 7 }
 0x85e   : > { %v9927_v56 = vld [vmem:[#allocation1] sm:$0xff] }
 0x85f   : > { %11533 = vst [vmem:[#allocation87_spill] sm:$0xff] %v9927_v56  ;;  %v4335_v56 = vperm.slane %v4185_v22, 1 }
 0x860   : > { %4597 = vst [vmem:[#allocation1] ss:$9 sm:$0xff] %v4326_v52 }
 0x861   : > { %4598 = vst [vmem:[#allocation1 + $0x1] ss:$9 sm:$0xff] %v4327_v16  ;;  %v4337_v16 = vperm.slane %v4185_v22, 3 }
 0x862   : > { %4599 = vst [vmem:[#allocation1 + $0x2] ss:$9 sm:$0xff] %v4328_v12  ;;  %v4338_v12 = vperm.slane %v4185_v22, 4 }
 0x863   : > { %4600 = vst [vmem:[#allocation1 + $0x3] ss:$9 sm:$0xff] %v4329_v38  ;;  %v4339_v38 = vperm.slane %v4185_v22, 5 }
 0x864   : > { %4601 = vst [vmem:[#allocation1 + $0x4] ss:$9 sm:$0xff] %v4330_v61  ;;  %v9933_v61 = vpop.xlane.xlu2 %4196 }
 0x865   : > { %4602 = vst [vmem:[#allocation1 + $0x5] ss:$9 sm:$0xff] %v4331_v1  ;;  %v4341_v1 = vperm.slane %v4185_v22, 7 }
 0x866   : > { %4603 = vst [vmem:[#allocation1 + $0x6] ss:$9 sm:$0xff] %v4332_v29  ;;  %v9935_v29 = vpop.xlane.xlu1 %4192 }
 0x867   : > { %4604 = vst [vmem:[#allocation1 + $0x7] ss:$9 sm:$0xff] %v4333_v19  ;;  %v9937_v19 = vpop.xlane.xlu0 %4194  ;;  %v4368_v27 = vperm.slane %v9935_v29, 2  ;;  %v4372_v60 = vperm.slane %v9935_v29, 6  ;;  %v4373_v0 = vperm.slane %v9935_v29, 7 }
 0x86e   : > { %v9931_v52 = vld [vmem:[#allocation1] sm:$0xff] }
 0x86f   : > { %11534 = vst [vmem:[#allocation88_spill] sm:$0xff] %v9931_v52  ;;  %v9939_v52 = vpop.xlane.xlu2 %4202  ;;  %v9945_v22 = vpop.xlane.xlu0 %4200 }
 0x870   : > { %4606 = vst [vmem:[#allocation1] ss:$9 sm:$0xff] %v4334_v4  ;;  %v4342_v4 = vperm.slane %v4187_v2, 0 }
 0x871   : > { %4607 = vst [vmem:[#allocation1 + $0x1] ss:$9 sm:$0xff] %v4335_v56 }
 0x872   : > { %4608 = vst [vmem:[#allocation1 + $0x2] ss:$9 sm:$0xff] %v4336_v34  ;;  %v4343_v34 = vperm.slane %v4187_v2, 1 }
 0x873   : > { %4609 = vst [vmem:[#allocation1 + $0x3] ss:$9 sm:$0xff] %v4337_v16  ;;  %v9943_v16 = vpop.xlane.xlu1 %4198 }
 0x874   : > { %4610 = vst [vmem:[#allocation1 + $0x4] ss:$9 sm:$0xff] %v4338_v12  ;;  %v4345_v12 = vperm.slane %v4187_v2, 3 }
 0x875   : > { %4611 = vst [vmem:[#allocation1 + $0x5] ss:$9 sm:$0xff] %v4339_v38  ;;  %v4346_v38 = vperm.slane %v4187_v2, 4 }
 0x876   : > { %4612 = vst [vmem:[#allocation1 + $0x6] ss:$9 sm:$0xff] %v4340_v53  ;;  %v4347_v53 = vperm.slane %v4187_v2, 5 }
 0x877   : > { %4613 = vst [vmem:[#allocation1 + $0x7] ss:$9 sm:$0xff] %v4341_v1  ;;  %v4348_v1 = vperm.slane %v4187_v2, 6  ;;  %v4354_v2 = vperm.slane %v4189_v36, 4 }
 0x87b   : > { %v9949_v32 = vpop.xlane.xlu1 %4204 }
 0x87e   : > { %v9941_v56 = vld [vmem:[#allocation1] sm:$0xff] }
 0x87f   : > { %11535 = vst [vmem:[#allocation89_spill] sm:$0xff] %v9941_v56  ;;  %v9947_v56 = vpop.xlane.xlu2 %4208 }
 0x880   : > { %4615 = vst [vmem:[#allocation1] ss:$9 sm:$0xff] %v4342_v4  ;;  %v9951_v4 = vpop.xlane.xlu0 %4206 }
 0x881   : > { %4616 = vst [vmem:[#allocation1 + $0x1] ss:$9 sm:$0xff] %v4343_v34 }
 0x882   : > { %4617 = vst [vmem:[#allocation1 + $0x2] ss:$9 sm:$0xff] %v4344_v37 }
 0x883   : > { %4618 = vst [vmem:[#allocation1 + $0x3] ss:$9 sm:$0xff] %v4345_v12  ;;  %v4353_v12 = vperm.slane %v4189_v36, 3 }
 0x884   : > { %4619 = vst [vmem:[#allocation1 + $0x4] ss:$9 sm:$0xff] %v4346_v38  ;;  %v4355_v38 = vperm.slane %v4189_v36, 5 }
 0x885   : > { %4620 = vst [vmem:[#allocation1 + $0x5] ss:$9 sm:$0xff] %v4347_v53  ;;  %v4356_v53 = vperm.slane %v4189_v36, 6  ;;  %v4361_v36 = vperm.slane %v9929_v46, 3 }
 0x886   : > { %4621 = vst [vmem:[#allocation1 + $0x6] ss:$9 sm:$0xff] %v4348_v1 }
 0x887   : > { %4622 = vst [vmem:[#allocation1 + $0x7] ss:$9 sm:$0xff] %v4349_v39  ;;  %v9955_v37 = vpop.xlane.xlu2 %4214  ;;  %v9957_v39 = vpop.xlane.xlu1 %4210 }
 0x888   : > { %v9959_v1 = vpop.xlane.xlu0 %4212 }
 0x88e   : > { %v9953_v34 = vld [vmem:[#allocation1] sm:$0xff] }
 0x88f   : > { %11536 = vst [vmem:[#allocation90_spill] sm:$0xff] %v9953_v34  ;;  %v9961_v34 = vpop.xlane.xlu2 %4220 }
 0x890   : > { %4624 = vst [vmem:[#allocation1] ss:$9 sm:$0xff] %v4350_v45  ;;  %v9963_v45 = vpop.xlane.xlu1 %4216 }
 0x891   : > { %4625 = vst [vmem:[#allocation1 + $0x1] ss:$9 sm:$0xff] %v4351_v31  ;;  %v4358_v31 = vperm.slane %v9929_v46, 0 }
 0x892   : > { %4626 = vst [vmem:[#allocation1 + $0x2] ss:$9 sm:$0xff] %v4352_v5  ;;  %v4359_v5 = vperm.slane %v9929_v46, 1 }
 0x893   : > { %4627 = vst [vmem:[#allocation1 + $0x3] ss:$9 sm:$0xff] %v4353_v12  ;;  %v9969_v12 = vpop.xlane.xlu0 %4218 }
 0x894   : > { %4628 = vst [vmem:[#allocation1 + $0x4] ss:$9 sm:$0xff] %v4354_v2  ;;  %v4360_v2 = vperm.slane %v9929_v46, 2 }
 0x895   : > { %4629 = vst [vmem:[#allocation1 + $0x5] ss:$9 sm:$0xff] %v4355_v38  ;;  %v4363_v38 = vperm.slane %v9929_v46, 5 }
 0x896   : > { %4630 = vst [vmem:[#allocation1 + $0x6] ss:$9 sm:$0xff] %v4356_v53  ;;  %v4364_v53 = vperm.slane %v9929_v46, 6 }
 0x897   : > { %4631 = vst [vmem:[#allocation1 + $0x7] ss:$9 sm:$0xff] %v4357_v13  ;;  %v4362_v13 = vperm.slane %v9929_v46, 4  ;;  %v4369_v46 = vperm.slane %v9935_v29, 3 }
 0x898   : > { %v9979_v51 = vpop.xlane.xlu1 %4222 }
 0x89e   : > { %v9967_v9 = vld [vmem:[#allocation1] sm:$0xff] }
 0x89f   : > { %11537 = vst [vmem:[#allocation91_spill] sm:$0xff] %v9967_v9  ;;  %v9977_v9 = vpop.xlane.xlu2 %4226 }
 0x8a0   : > { %4633 = vst [vmem:[#allocation1] ss:$9 sm:$0xff] %v4358_v31  ;;  %v9981_v31 = vpop.xlane.xlu0 %4224 }
 0x8a1   : > { %4634 = vst [vmem:[#allocation1 + $0x1] ss:$9 sm:$0xff] %v4359_v5  ;;  %v4366_v5 = vperm.slane %v9935_v29, 0 }
 0x8a2   : > { %4635 = vst [vmem:[#allocation1 + $0x2] ss:$9 sm:$0xff] %v4360_v2 }
 0x8a3   : > { %4636 = vst [vmem:[#allocation1 + $0x3] ss:$9 sm:$0xff] %v4361_v36  ;;  %v4367_v36 = vperm.slane %v9935_v29, 1 }
 0x8a4   : > { %4637 = vst [vmem:[#allocation1 + $0x4] ss:$9 sm:$0xff] %v4362_v13 }
 0x8a5   : > { %4638 = vst [vmem:[#allocation1 + $0x5] ss:$9 sm:$0xff] %v4363_v38  ;;  %v9989_v38 = vpop.xlane.xlu1 %4228 }
 0x8a6   : > { %11538 = vst [vmem:[#allocation92_spill] sm:$0xff] %v9977_v9 }
 0x8a7   : > { %4639 = vst [vmem:[#allocation1 + $0x6] ss:$9 sm:$0xff] %v4364_v53  ;;  %v4981_v13 = vpop.xlane.xlu2 %4980  ;;  %v4370_v53 = vperm.slane %v9935_v29, 4 }
 0x8a8   : > { %4640 = vst [vmem:[#allocation1 + $0x7] ss:$9 sm:$0xff] %v4365_v55  ;;  %v4371_v55 = vperm.slane %v9935_v29, 5 }
 0x8a9   : > { %11540 = vst [vmem:[#allocation94_spill] sm:$0xff] %v9989_v38 }
 0x8ad   : > { %v4979_v50 = vpop.xlane.xlu1 %4978 }
 0x8af   : > { %v9984_v2 = vld [vmem:[#allocation1] sm:$0xff]  ;;  %v4987_v15 = vpop.xlane.xlu2 %4986 }
 0x8b0   : > { %11539 = vst [vmem:[#allocation93_spill] sm:$0xff] %v9984_v2  ;;  %v4977_v2 = vpop.xlane.xlu0 %4976 }
 0x8b1   : > { %4642 = vst [vmem:[#allocation1] ss:$9 sm:$0xff] %v4366_v5  ;;  %v5040_v5 = vsub.f32 %v9617_v10, %v4977_v2  ;;  %v4375_v10 = vperm.slane %v9937_v19, 1 }
 0x8b2   : > { %4643 = vst [vmem:[#allocation1 + $0x1] ss:$9 sm:$0xff] %v4367_v36  ;;  %v5042_v36 = vsub.f32 %v9611_v44, %v4981_v13  ;;  %v4376_v44 = vperm.slane %v9937_v19, 2 }
 0x8b3   : > { %4644 = vst [vmem:[#allocation1 + $0x2] ss:$9 sm:$0xff] %v4368_v27  ;;  %v5072_v6 = vmul.f32 1.442695, %v5040_v5 }
 0x8b4   : > { %4645 = vst [vmem:[#allocation1 + $0x3] ss:$9 sm:$0xff] %v4369_v46  ;;  %v5076_v27 = vmul.f32 1.442695, %v5042_v36  ;;  %v5041_v46 = vsub.f32 %v9775_v20, %v4979_v50  ;;  %v4377_v50 = vperm.slane %v9937_v19, 3  ;;  %v4379_v20 = vperm.slane %v9937_v19, 5 }
 0x8b5   : > { %4646 = vst [vmem:[#allocation1 + $0x4] ss:$9 sm:$0xff] %v4370_v53  ;;  %7068 = vpow2.f32 %v5072_v6  ;;  %v4374_v53 = vperm.slane %v9937_v19, 0  ;;  %v5045_v6 = vsub.f32 %v9626_v18, %v4987_v15  ;;  %v4985_v15 = vpop.xlane.xlu1 %4984 }
 0x8b6   : > { %4647 = vst [vmem:[#allocation1 + $0x5] ss:$9 sm:$0xff] %v4371_v55  ;;  %7070 = vpow2.f32 %v5076_v27  ;;  %v5044_v18 = vsub.f32 %v9792_v59, %v4985_v15 }
 0x8b7   : > { %4648 = vst [vmem:[#allocation1 + $0x6] ss:$9 sm:$0xff] %v4372_v60  ;;  %v5074_v60 = vmul.f32 1.442695, %v5041_v46  ;;  %v4993_v13 = vpop.xlane.xlu2 %4992  ;;  %v5082_v55 = vmul.f32 1.442695, %v5045_v6 }
 0x8b8   : > { %4649 = vst [vmem:[#allocation1 + $0x7] ss:$9 sm:$0xff] %v4373_v0  ;;  %v4983_v38 = vpop.xlane.xlu0 %4982  ;;  %v4382_v6 = vperm.slane %v9933_v61, 0 }
 0x8b9   : > { %v5043_v9 = vsub.f32 %v9630_v42, %v4983_v38  ;;  %7072 = vpow2.f32 %v5074_v60  ;;  %v4378_v42 = vperm.slane %v9937_v19, 4  ;;  %v4380_v38 = vperm.slane %v9937_v19, 6 }
 0x8ba   : > { %v5048_v60 = vsub.f32 %v9644_v25, %v4993_v13  ;;  %v4383_v25 = vperm.slane %v9933_v61, 1 }
 0x8bb   : > { %v10003_v0 = vpop.eup %7068  ;;  %v5078_v2 = vmul.f32 1.442695, %v5043_v9  ;;  %v4381_v9 = vperm.slane %v9937_v19, 7 }
 0x8bc   : > { %5136 = vadd.xlane.f32.xlu1 %v10003_v0  ;;  %v10014_v36 = vpop.eup %7070 }
 0x8bd   : > { %7074 = vpow2.f32 %v5078_v2  ;;  %v4991_v19 = vpop.xlane.xlu1 %4990 }
 0x8be   : > { %7076 = vpow2.f32 %v5082_v55  ;;  %v5047_v2 = vsub.f32 %v9803_v23, %v4991_v19  ;;  %v4384_v55 = vperm.slane %v9933_v61, 2 }
 0x8bf   : > { %v10000_v29 = vld [vmem:[#allocation1] sm:$0xff]  ;;  %v10017_v46 = vpop.eup %7072  ;;  %v4999_v59 = vpop.xlane.xlu2 %4998 }
 0x8c0   : > { %4651 = vst [vmem:[#allocation1] ss:$9 sm:$0xff] %v4374_v53  ;;  %v4989_v5 = vpop.xlane.xlu0 %4988  ;;  %v5080_v53 = vmul.f32 1.442695, %v5044_v18  ;;  %5138 = vadd.xlane.f32.xlu0 %v10017_v46  ;;  %v5086_v15 = vmul.f32 1.442695, %v5047_v2  ;;  %v5051_v23 = vsub.f32 %v9658_v49, %v4999_v59 }
 0x8c1   : > { %4652 = vst [vmem:[#allocation1 + $0x1] ss:$9 sm:$0xff] %v4375_v10  ;;  %v5046_v27 = vsub.f32 %v9652_v33, %v4989_v5  ;;  %v5088_v33 = vmul.f32 1.442695, %v5048_v60  ;;  %v4385_v18 = vperm.slane %v9933_v61, 3  ;;  %v4389_v49 = vperm.slane %v9933_v61, 7 }
 0x8c2   : > { %4653 = vst [vmem:[#allocation1 + $0x2] ss:$9 sm:$0xff] %v4376_v44  ;;  %7078 = vpow2.f32 %v5080_v53  ;;  %v4388_v53 = vperm.slane %v9933_v61, 6  ;;  %v5094_v60 = vmul.f32 1.442695, %v5051_v23  ;;  %v4391_v23 = vperm.slane %v9943_v16, 1 }
 0x8c3   : > { %4654 = vst [vmem:[#allocation1 + $0x3] ss:$9 sm:$0xff] %v4377_v50  ;;  %v10019_v10 = vpop.eup %7074  ;;  %v5084_v44 = vmul.f32 1.442695, %v5046_v27  ;;  %v4386_v27 = vperm.slane %v9933_v61, 4 }
 0x8c4   : > { %4655 = vst [vmem:[#allocation1 + $0x4] ss:$9 sm:$0xff] %v4378_v42  ;;  %5140 = vadd.xlane.f32.xlu1 %v10014_v36  ;;  %5142 = vadd.xlane.f32.xlu2 %v10019_v10  ;;  %v10027_v42 = vpop.eup %7076 }
 0x8c5   : > { %4656 = vst [vmem:[#allocation1 + $0x5] ss:$9 sm:$0xff] %v4379_v20  ;;  %7080 = vpow2.f32 %v5084_v44  ;;  %v4997_v44 = vpop.xlane.xlu1 %4996 }
 0x8c6   : > { %4657 = vst [vmem:[#allocation1 + $0x6] ss:$9 sm:$0xff] %v4380_v38  ;;  %7082 = vpow2.f32 %v5088_v33  ;;  %v5050_v33 = vsub.f32 %v9813_v58, %v4997_v44  ;;  %v4390_v58 = vperm.slane %v9943_v16, 0 }
 0x8c7   : > { %4658 = vst [vmem:[#allocation1 + $0x7] ss:$9 sm:$0xff] %v4381_v9  ;;  %7084 = vpow2.f32 %v5086_v15  ;;  %v5005_v59 = vpop.xlane.xlu2 %5004 }
 0x8c8   : > { %v4995_v50 = vpop.xlane.xlu0 %4994  ;;  %v10033_v38 = vpop.eup %7078 }
 0x8c9   : > { %v5049_v13 = vsub.f32 %v9663_v24, %v4995_v50  ;;  %5144 = vadd.xlane.f32.xlu0 %v10033_v38  ;;  %v4387_v24 = vperm.slane %v9933_v61, 5  ;;  %v5054_v61 = vsub.f32 %v9679_v8, %v5005_v59 }
 0x8cb   : > { %v10036_v9 = vpop.eup %7080  ;;  %v5090_v5 = vmul.f32 1.442695, %v5049_v13 }
 0x8cc   : > { %5146 = vadd.xlane.f32.xlu1 %v10027_v42  ;;  %5148 = vadd.xlane.f32.xlu2 %v10036_v9 }
 0x8cd   : > { %7086 = vpow2.f32 %v5090_v5  ;;  %v5003_v15 = vpop.xlane.xlu1 %5002 }
 0x8ce   : > { %v10030_v20 = vld [vmem:[#allocation1] sm:$0xff]  ;;  %7088 = vpow2.f32 %v5094_v60  ;;  %v5053_v5 = vsub.f32 %v9823_v28, %v5003_v15  ;;  %v4393_v60 = vperm.slane %v9943_v16, 3 }
 0x8cf   : > { %11541 = vst [vmem:[#allocation95_spill] sm:$0xff] %v10030_v20  ;;  %v5011_v44 = vpop.xlane.xlu2 %5010 }
 0x8d0   : > { %4660 = vst [vmem:[#allocation1] ss:$9 sm:$0xff] %v4382_v6  ;;  %v5001_v19 = vpop.xlane.xlu0 %5000  ;;  %v10048_v6 = vpop.eup %7082  ;;  %v5098_v59 = vmul.f32 1.442695, %v5053_v5 }
 0x8d1   : > { %4661 = vst [vmem:[#allocation1 + $0x1] ss:$9 sm:$0xff] %v4383_v25  ;;  %v5052_v2 = vsub.f32 %v9684_v11, %v5001_v19  ;;  %v10051_v50 = vpop.eup %7084  ;;  %v5092_v25 = vmul.f32 1.442695, %v5050_v33  ;;  %v5100_v11 = vmul.f32 1.442695, %v5054_v61 }
 0x8d2   : > { %4662 = vst [vmem:[#allocation1 + $0x2] ss:$9 sm:$0xff] %v4384_v55  ;;  %5150 = vadd.xlane.f32.xlu0 %v10051_v50  ;;  %v4394_v19 = vperm.slane %v9943_v16, 4  ;;  %v4397_v61 = vperm.slane %v9943_v16, 7 }
 0x8d3   : > { %4663 = vst [vmem:[#allocation1 + $0x3] ss:$9 sm:$0xff] %v4385_v18  ;;  %v10053_v13 = vpop.eup %7086  ;;  %v5096_v55 = vmul.f32 1.442695, %v5052_v2  ;;  %7090 = vpow2.f32 %v5092_v25  ;;  %v4395_v2 = vperm.slane %v9943_v16, 5  ;;  %v5057_v25 = vsub.f32 %v9692_v35, %v5011_v44 }
 0x8d4   : > { %4664 = vst [vmem:[#allocation1 + $0x4] ss:$9 sm:$0xff] %v4386_v27  ;;  %5152 = vadd.xlane.f32.xlu1 %v10048_v6  ;;  %5154 = vadd.xlane.f32.xlu2 %v10053_v13  ;;  %v10064_v27 = vpop.eup %7088  ;;  %v4400_v44 = vperm.slane %v9945_v22, 2 }
 0x8d5   : > { %4665 = vst [vmem:[#allocation1 + $0x5] ss:$9 sm:$0xff] %v4387_v24  ;;  %7092 = vpow2.f32 %v5096_v55  ;;  %v4392_v24 = vperm.slane %v9943_v16, 2  ;;  %v5009_v55 = vpop.xlane.xlu1 %5008  ;;  %v5106_v15 = vmul.f32 1.442695, %v5057_v25 }
 0x8d6   : > { %4666 = vst [vmem:[#allocation1 + $0x6] ss:$9 sm:$0xff] %v4388_v53  ;;  %7094 = vpow2.f32 %v5100_v11 }
 0x8d7   : > { %4667 = vst [vmem:[#allocation1 + $0x7] ss:$9 sm:$0xff] %v4389_v49  ;;  %7096 = vpow2.f32 %v5098_v59 }
 0x8d8   : > { %v5007_v8 = vpop.xlane.xlu0 %5006 }
 0x8d9   : > { %v5055_v53 = vsub.f32 %v9700_v57, %v5007_v8  ;;  %v10068_v49 = vpop.eup %7090  ;;  %v4396_v57 = vperm.slane %v9943_v16, 6 }
 0x8da   : > { %5156 = vadd.xlane.f32.xlu0 %v10068_v49 }
 0x8db   : > { %v10071_v33 = vpop.eup %7092  ;;  %v5102_v28 = vmul.f32 1.442695, %v5055_v53  ;;  %v4399_v53 = vperm.slane %v9945_v22, 1 }
 0x8dc   : > { %5158 = vadd.xlane.f32.xlu1 %v10064_v27  ;;  %5160 = vadd.xlane.f32.xlu2 %v10071_v33  ;;  %v10082_v11 = vpop.eup %7094 }
 0x8dd   : > { %7098 = vpow2.f32 %v5102_v28 }
 0x8de   : > { %v10060_v18 = vld [vmem:[#allocation1] sm:$0xff] }
 0x8df   : > { %11542 = vst [vmem:[#allocation96_spill] sm:$0xff] %v10060_v18 }
 0x8e0   : > { %4669 = vst [vmem:[#allocation1] ss:$9 sm:$0xff] %v4390_v58  ;;  %v5056_v58 = vsub.f32 %v9834_v17, %v5009_v55  ;;  %v5013_v8 = vpop.xlane.xlu0 %5012  ;;  %v4398_v17 = vperm.slane %v9945_v22, 0  ;;  %v4403_v55 = vperm.slane %v9945_v22, 5 }
 0x8e1   : > { %4670 = vst [vmem:[#allocation1 + $0x1] ss:$9 sm:$0xff] %v4391_v23  ;;  %v10084_v23 = vpop.eup %7096  ;;  %v5058_v35 = vsub.f32 %v9718_v30, %v5013_v8  ;;  %v4402_v30 = vperm.slane %v9945_v22, 4 }
 0x8e2   : > { %4671 = vst [vmem:[#allocation1 + $0x2] ss:$9 sm:$0xff] %v4392_v24  ;;  %v5104_v5 = vmul.f32 1.442695, %v5056_v58  ;;  %5162 = vadd.xlane.f32.xlu0 %v10084_v23  ;;  %v4404_v58 = vperm.slane %v9945_v22, 6 }
 0x8e3   : > { %4672 = vst [vmem:[#allocation1 + $0x3] ss:$9 sm:$0xff] %v4393_v60  ;;  %v10086_v24 = vpop.eup %7098  ;;  %v5015_v60 = vpop.xlane.xlu1 %5014  ;;  %v5108_v28 = vmul.f32 1.442695, %v5058_v35 }
 0x8e4   : > { %4673 = vst [vmem:[#allocation1 + $0x4] ss:$9 sm:$0xff] %v4394_v19  ;;  %7100 = vpow2.f32 %v5104_v5  ;;  %5164 = vadd.xlane.f32.xlu1 %v10082_v11  ;;  %5166 = vadd.xlane.f32.xlu2 %v10086_v24  ;;  %v5059_v59 = vsub.f32 %v9843_v41, %v5015_v60  ;;  %v4401_v19 = vperm.slane %v9945_v22, 3  ;;  %v4405_v41 = vperm.slane %v9945_v22, 7 }
 0x8e5   : > { %4674 = vst [vmem:[#allocation1 + $0x5] ss:$9 sm:$0xff] %v4395_v2  ;;  %7102 = vpow2.f32 %v5106_v15  ;;  %v4406_v22 = vperm.slane %v9939_v52, 0  ;;  %v4407_v60 = vperm.slane %v9939_v52, 1 }
 0x8e6   : > { %4675 = vst [vmem:[#allocation1 + $0x6] ss:$9 sm:$0xff] %v4396_v57  ;;  %v5017_v57 = vpop.xlane.xlu2 %5016  ;;  %v5110_v25 = vmul.f32 1.442695, %v5059_v59  ;;  %v4408_v59 = vperm.slane %v9939_v52, 2 }
 0x8e7   : > { %4676 = vst [vmem:[#allocation1 + $0x7] ss:$9 sm:$0xff] %v4397_v61  ;;  %v5060_v15 = vsub.f32 %v9714_v21, %v5017_v57  ;;  %v4411_v57 = vperm.slane %v9939_v52, 5 }
 0x8e8   : > { %7104 = vpow2.f32 %v5110_v25  ;;  %v10110_v5 = vpop.xlane.xlu0 %5018 }
 0x8e9   : > { %7106 = vpow2.f32 %v5108_v28  ;;  %v5112_v8 = vmul.f32 1.442695, %v5060_v15  ;;  %v4410_v28 = vperm.slane %v9939_v52, 4 }
 0x8ea   : > { %v10099_v2 = vpop.eup %7100 }
 0x8eb   : > { %v10102_v61 = vpop.eup %7102  ;;  %7108 = vpow2.f32 %v5112_v8 }
 0x8ec   : > { %5168 = vadd.xlane.f32.xlu1 %v10099_v2  ;;  %5170 = vadd.xlane.f32.xlu2 %v10102_v61 }
 0x8ee   : > { %v10093_v16 = vld [vmem:[#allocation1] sm:$0xff]  ;;  %v10112_v35 = vpop.eup %7104 }
 0x8ef   : > { %11543 = vst [vmem:[#allocation97_spill] sm:$0xff] %v10093_v16 }
 0x8f0   : > { %4678 = vst [vmem:[#allocation1] ss:$9 sm:$0xff] %v4398_v17  ;;  %v5021_v17 = vpop.xlane.xlu1 %5020  ;;  %v5025_v25 = vpop.xlane.xlu0 %5024 }
 0x8f1   : > { %4679 = vst [vmem:[#allocation1 + $0x1] ss:$9 sm:$0xff] %v4399_v53  ;;  %v10114_v53 = vpop.eup %7106  ;;  %v5062_v21 = vsub.f32 %v9855_v63, %v5021_v17  ;;  %v4412_v63 = vperm.slane %v9939_v52, 6  ;;  %v4414_v17 = vperm.slane %v9949_v32, 0 }
 0x8f2   : > { %4680 = vst [vmem:[#allocation1 + $0x2] ss:$9 sm:$0xff] %v4400_v44 }
 0x8f3   : > { %4681 = vst [vmem:[#allocation1 + $0x3] ss:$9 sm:$0xff] %v4401_v19  ;;  %v4409_v19 = vperm.slane %v9939_v52, 3 }
 0x8f4   : > { %4682 = vst [vmem:[#allocation1 + $0x4] ss:$9 sm:$0xff] %v4402_v30  ;;  %5174 = vadd.xlane.f32.xlu2 %v10112_v35  ;;  %5172 = vadd.xlane.f32.xlu1 %v10114_v53  ;;  %v5116_v30 = vmul.f32 1.442695, %v5062_v21  ;;  %v4415_v21 = vperm.slane %v9949_v32, 1 }
 0x8f5   : > { %4683 = vst [vmem:[#allocation1 + $0x5] ss:$9 sm:$0xff] %v4403_v55  ;;  %v10127_v55 = vpop.eup %7108 }
 0x8f6   : > { %4684 = vst [vmem:[#allocation1 + $0x6] ss:$9 sm:$0xff] %v4404_v58  ;;  %v4413_v58 = vperm.slane %v9939_v52, 7  ;;  %7110 = vpow2.f32 %v5116_v30  ;;  %v4416_v52 = vperm.slane %v9949_v32, 2  ;;  %v4421_v30 = vperm.slane %v9949_v32, 7 }
 0x8f7   : > { %4685 = vst [vmem:[#allocation1 + $0x7] ss:$9 sm:$0xff] %v4405_v41  ;;  %v5064_v41 = vsub.f32 %v9748_v7, %v5025_v25  ;;  %v4418_v7 = vperm.slane %v9949_v32, 4  ;;  %v4422_v25 = vperm.slane %v9951_v4, 0 }
 0x8f9   : > { %v5120_v15 = vmul.f32 1.442695, %v5064_v41  ;;  %v4424_v41 = vperm.slane %v9951_v4, 2 }
 0x8fb   : > { %7112 = vpow2.f32 %v5120_v15  ;;  %v4425_v15 = vperm.slane %v9951_v4, 3 }
 0x8fc   : > { %5176 = vadd.xlane.f32.xlu1 %v10127_v55  ;;  %v10133_v8 = vpop.eup %7110 }
 0x8fe   : > { %v10121_v44 = vld [vmem:[#allocation1] sm:$0xff] }
 0x8ff   : > { %11544 = vst [vmem:[#allocation98_spill] sm:$0xff] %v10121_v44 }
 0x900   : > { %4687 = vst [vmem:[#allocation1] ss:$9 sm:$0xff] %v4406_v22 }
 0x901   : > { %4688 = vst [vmem:[#allocation1 + $0x1] ss:$9 sm:$0xff] %v4407_v60  ;;  %v4417_v60 = vperm.slane %v9949_v32, 3 }
 0x902   : > { %4689 = vst [vmem:[#allocation1 + $0x2] ss:$9 sm:$0xff] %v4408_v59  ;;  %v4419_v59 = vperm.slane %v9949_v32, 5 }
 0x903   : > { %4690 = vst [vmem:[#allocation1 + $0x3] ss:$9 sm:$0xff] %v4409_v19  ;;  %v4420_v19 = vperm.slane %v9949_v32, 6  ;;  %v4426_v32 = vperm.slane %v9951_v4, 4 }
 0x904   : > { %4691 = vst [vmem:[#allocation1 + $0x4] ss:$9 sm:$0xff] %v4410_v28  ;;  %5180 = vadd.xlane.f32.xlu1 %v10133_v8  ;;  %v10145_v28 = vpop.eup %7112 }
 0x905   : > { %4692 = vst [vmem:[#allocation1 + $0x5] ss:$9 sm:$0xff] %v4411_v57  ;;  %v10149_v57 = vpop.xlane.xlu2 %5022 }
 0x906   : > { %4693 = vst [vmem:[#allocation1 + $0x6] ss:$9 sm:$0xff] %v4412_v63 }
 0x907   : > { %4694 = vst [vmem:[#allocation1 + $0x7] ss:$9 sm:$0xff] %v4413_v58  ;;  %v4423_v58 = vperm.slane %v9951_v4, 1 }
 0x90c   : > { %5184 = vadd.xlane.f32.xlu1 %v10145_v28 }
 0x90e   : > { %v10137_v22 = vld [vmem:[#allocation1] sm:$0xff] }
 0x90f   : > { %11545 = vst [vmem:[#allocation99_spill] sm:$0xff] %v10137_v22 }
 0x910   : > { %4696 = vst [vmem:[#allocation1] ss:$9 sm:$0xff] %v4414_v17  ;;  %v4427_v17 = vperm.slane %v9951_v4, 5 }
 0x911   : > { %4697 = vst [vmem:[#allocation1 + $0x1] ss:$9 sm:$0xff] %v4415_v21  ;;  %v4428_v21 = vperm.slane %v9951_v4, 6 }
 0x912   : > { %4698 = vst [vmem:[#allocation1 + $0x2] ss:$9 sm:$0xff] %v4416_v52  ;;  %v4429_v52 = vperm.slane %v9951_v4, 7  ;;  %v4433_v4 = vperm.slane %v9947_v56, 3 }
 0x913   : > { %4699 = vst [vmem:[#allocation1 + $0x3] ss:$9 sm:$0xff] %v4417_v60  ;;  %v10161_v60 = vpop.xlane.xlu2 %5028 }
 0x914   : > { %4700 = vst [vmem:[#allocation1 + $0x4] ss:$9 sm:$0xff] %v4418_v7  ;;  %v10163_v7 = vpop.xlane.xlu1 %5026 }
 0x915   : > { %4701 = vst [vmem:[#allocation1 + $0x5] ss:$9 sm:$0xff] %v4419_v59  ;;  %v4430_v59 = vperm.slane %v9947_v56, 0 }
 0x916   : > { %4702 = vst [vmem:[#allocation1 + $0x6] ss:$9 sm:$0xff] %v4420_v19  ;;  %v4431_v19 = vperm.slane %v9947_v56, 1 }
 0x917   : > { %4703 = vst [vmem:[#allocation1 + $0x7] ss:$9 sm:$0xff] %v4421_v30 }
 0x91e   : > { %v10152_v63 = vld [vmem:[#allocation1] sm:$0xff] }
 0x91f   : > { %11546 = vst [vmem:[#allocation100_spill] sm:$0xff] %v10152_v63  ;;  %v4440_v63 = vperm.slane %v9957_v39, 2 }
 0x920   : > { %4705 = vst [vmem:[#allocation1] ss:$9 sm:$0xff] %v4422_v25  ;;  %v4432_v25 = vperm.slane %v9947_v56, 2 }
 0x921   : > { %4706 = vst [vmem:[#allocation1 + $0x1] ss:$9 sm:$0xff] %v4423_v58  ;;  %v10170_v58 = vpop.xlane.xlu0 %5030 }
 0x922   : > { %4707 = vst [vmem:[#allocation1 + $0x2] ss:$9 sm:$0xff] %v4424_v41  ;;  %v10173_v41 = vpop.xlane.xlu2 %5034 }
 0x923   : > { %4708 = vst [vmem:[#allocation1 + $0x3] ss:$9 sm:$0xff] %v4425_v15  ;;  %v4434_v15 = vperm.slane %v9947_v56, 4 }
 0x924   : > { %4709 = vst [vmem:[#allocation1 + $0x4] ss:$9 sm:$0xff] %v4426_v32  ;;  %v4435_v32 = vperm.slane %v9947_v56, 5 }
 0x925   : > { %4710 = vst [vmem:[#allocation1 + $0x5] ss:$9 sm:$0xff] %v4427_v17  ;;  %v10177_v17 = vpop.xlane.xlu1 %5032 }
 0x926   : > { %4711 = vst [vmem:[#allocation1 + $0x6] ss:$9 sm:$0xff] %v4428_v21  ;;  %v4436_v21 = vperm.slane %v9947_v56, 6 }
 0x927   : > { %4712 = vst [vmem:[#allocation1 + $0x7] ss:$9 sm:$0xff] %v4429_v52  ;;  %v4437_v52 = vperm.slane %v9947_v56, 7  ;;  %v4441_v56 = vperm.slane %v9957_v39, 3 }
 0x92e   : > { %v10167_v30 = vld [vmem:[#allocation1] sm:$0xff] }
 0x92f   : > { %11547 = vst [vmem:[#allocation101_spill] sm:$0xff] %v10167_v30  ;;  %v5137_v30 = vpop.xlane.xlu1 %5136 }
 0x930   : > { %4714 = vst [vmem:[#allocation1] ss:$9 sm:$0xff] %v4430_v59  ;;  %v10181_v59 = vpop.xlane.xlu0 %5036  ;;  %7114 = vrcp.f32 %v5137_v30 }
 0x931   : > { %4715 = vst [vmem:[#allocation1 + $0x1] ss:$9 sm:$0xff] %v4431_v19  ;;  %v10183_v19 = vpop.xlane.xlu2 %5038 }
 0x932   : > { %4716 = vst [vmem:[#allocation1 + $0x2] ss:$9 sm:$0xff] %v4432_v25  ;;  %v4438_v25 = vperm.slane %v9957_v39, 0 }
 0x933   : > { %4717 = vst [vmem:[#allocation1 + $0x3] ss:$9 sm:$0xff] %v4433_v4  ;;  %v4439_v4 = vperm.slane %v9957_v39, 1 }
 0x934   : > { %4718 = vst [vmem:[#allocation1 + $0x4] ss:$9 sm:$0xff] %v4434_v15  ;;  %v4442_v15 = vperm.slane %v9957_v39, 4 }
 0x935   : > { %4719 = vst [vmem:[#allocation1 + $0x5] ss:$9 sm:$0xff] %v4435_v32 }
 0x936   : > { %4720 = vst [vmem:[#allocation1 + $0x6] ss:$9 sm:$0xff] %v4436_v21  ;;  %v7115_v32 = vpop.eup %7114  ;;  %v4443_v21 = vperm.slane %v9957_v39, 5 }
 0x937   : > { %4721 = vst [vmem:[#allocation1 + $0x7] ss:$9 sm:$0xff] %v4437_v52  ;;  %v4444_v52 = vperm.slane %v9957_v39, 6  ;;  %v5232_v18 = vmul.f32 %v7115_v32, %v10003_v0 }
 0x938   : > { %v5139_v30 = vpop.xlane.xlu0 %5138 }
 0x939   : > { %7116 = vrcp.f32 %v5139_v30  ;;  %v5143_v44 = vpop.xlane.xlu2 %5142 }
 0x93a   : > { %7118 = vrcp.f32 %v5143_v44 }
 0x93e   : > { %v10186_v22 = vld [vmem:[#allocation1] sm:$0xff] }
 0x93f   : > { %11548 = vst [vmem:[#allocation102_spill] sm:$0xff] %v10186_v22  ;;  %v5141_v22 = vpop.xlane.xlu1 %5140  ;;  %v7117_v16 = vpop.eup %7116 }
 0x940   : > { %4723 = vst [vmem:[#allocation1] ss:$9 sm:$0xff] %v4438_v25  ;;  %v4445_v25 = vperm.slane %v9957_v39, 7  ;;  %7120 = vrcp.f32 %v5141_v22  ;;  %v5233_v30 = vmul.f32 %v7117_v16, %v10017_v46  ;;  %v7119_v20 = vpop.eup %7118  ;;  %v4449_v16 = vperm.slane %v9959_v1, 3 }
 0x941   : > { %4724 = vst [vmem:[#allocation1 + $0x1] ss:$9 sm:$0xff] %v4439_v4  ;;  %v5264_v4 = vmax.f32 %v5232_v18, 0.001  ;;  %v5149_v32 = vpop.xlane.xlu2 %5148  ;;  %v5235_v18 = vmul.f32 %v7119_v20, %v10019_v10  ;;  %v4450_v10 = vperm.slane %v9959_v1, 4 }
 0x942   : > { %4725 = vst [vmem:[#allocation1 + $0x2] ss:$9 sm:$0xff] %v4440_v63  ;;  %v10196_v63 = vld [vmem:[#allocation8] ss:$0 sm:$0xff]  ;;  %v5265_v44 = vmax.f32 %v5233_v30, 0.001 }
 0x943   : > { %4726 = vst [vmem:[#allocation1 + $0x3] ss:$9 sm:$0xff] %v4441_v56  ;;  %v5296_v56 = vmul.f32 %v10196_v63, %v5264_v4  ;;  %v5267_v4 = vmax.f32 %v5235_v18, 0.001  ;;  %v4451_v30 = vperm.slane %v9959_v1, 5  ;;  %v4453_v18 = vperm.slane %v9959_v1, 7 }
 0x944   : > { %4727 = vst [vmem:[#allocation1 + $0x4] ss:$9 sm:$0xff] %v4442_v15  ;;  %v5145_v15 = vpop.xlane.xlu0 %5144  ;;  %v5297_v46 = vmul.f32 %v10196_v63, %v5265_v44 }
 0x945   : > { %4728 = vst [vmem:[#allocation1 + $0x5] ss:$9 sm:$0xff] %v4443_v21  ;;  %5328 = vadd.xlane.f32.xlu0 %v5296_v56  ;;  %7122 = vrcp.f32 %v5145_v15  ;;  %v4446_v21 = vperm.slane %v9959_v1, 0  ;;  %v5299_v20 = vmul.f32 %v10196_v63, %v5267_v4 }
 0x946   : > { %4729 = vst [vmem:[#allocation1 + $0x6] ss:$9 sm:$0xff] %v4444_v52  ;;  %v7121_v39 = vpop.eup %7120  ;;  %v4447_v52 = vperm.slane %v9959_v1, 1  ;;  %7124 = vrcp.f32 %v5149_v32  ;;  %v4452_v32 = vperm.slane %v9959_v1, 6 }
 0x947   : > { %4730 = vst [vmem:[#allocation1 + $0x7] ss:$9 sm:$0xff] %v4445_v25  ;;  %v5147_v0 = vpop.xlane.xlu1 %5146  ;;  %v4448_v25 = vperm.slane %v9959_v1, 2  ;;  %v5234_v56 = vmul.f32 %v7121_v39, %v10014_v36  ;;  %5334 = vadd.xlane.f32.xlu2 %v5299_v20 }
 0x948   : > { %7126 = vrcp.f32 %v5147_v0 }
 0x94b   : > { %v7123_v15 = vpop.eup %7122 }
 0x94c   : > { %v5151_v0 = vpop.xlane.xlu0 %5150  ;;  %v5236_v36 = vmul.f32 %v7123_v15, %v10033_v38  ;;  %v7125_v39 = vpop.eup %7124 }
 0x94d   : > { %5330 = vadd.xlane.f32.xlu0 %v5297_v46  ;;  %7128 = vrcp.f32 %v5151_v0  ;;  %v4455_v0 = vperm.slane %v9955_v37, 1 }
 0x94e   : > { %v10202_v22 = vld [vmem:[#allocation1] sm:$0xff]  ;;  %v5268_v4 = vmax.f32 %v5236_v36, 0.001  ;;  %v7127_v46 = vpop.eup %7126 }
 0x94f   : > { %4732 = vst [vmem:[#allocation1] ss:$9 sm:$0xff] %v4446_v21  ;;  %v5061_v21 = vsub.f32 %v9733_v47, %v10110_v5  ;;  %v5153_v44 = vpop.xlane.xlu1 %5152  ;;  %v10220_v5 = vpop.xlane.xlu2 %5154  ;;  %v5237_v20 = vmul.f32 %v7127_v46, %v10027_v42 }
 0x950   : > { %4733 = vst [vmem:[#allocation1 + $0x1] ss:$9 sm:$0xff] %v4447_v52  ;;  %v5266_v52 = vmax.f32 %v5234_v56, 0.001  ;;  %v5300_v47 = vmul.f32 %v10196_v63, %v5268_v4  ;;  %7130 = vrcp.f32 %v5153_v44 }
 0x951   : > { %4734 = vst [vmem:[#allocation1 + $0x2] ss:$9 sm:$0xff] %v4448_v25  ;;  %v5238_v25 = vmul.f32 %v7125_v39, %v10036_v9  ;;  %v5063_v9 = vsub.f32 %v9725_v54, %v10149_v57  ;;  %v5269_v36 = vmax.f32 %v5237_v20, 0.001  ;;  %v4456_v54 = vperm.slane %v9955_v37, 2 }
 0x952   : > { %4735 = vst [vmem:[#allocation1 + $0x3] ss:$9 sm:$0xff] %v4449_v16  ;;  %v5114_v16 = vmul.f32 1.442695, %v5061_v21  ;;  %v5298_v38 = vmul.f32 %v10196_v63, %v5266_v52  ;;  %5336 = vadd.xlane.f32.xlu2 %v5300_v47  ;;  %v4457_v57 = vperm.slane %v9955_v37, 3  ;;  %v4461_v47 = vperm.slane %v9955_v37, 7 }
 0x953   : > { %4736 = vst [vmem:[#allocation1 + $0x4] ss:$9 sm:$0xff] %v4450_v10  ;;  %v5270_v10 = vmax.f32 %v5238_v25, 0.001  ;;  %v7129_v56 = vpop.eup %7128  ;;  %v4459_v25 = vperm.slane %v9955_v37, 5  ;;  %v5301_v4 = vmul.f32 %v10196_v63, %v5269_v36 }
 0x954   : > { %4737 = vst [vmem:[#allocation1 + $0x5] ss:$9 sm:$0xff] %v4451_v30  ;;  %7132 = vpow2.f32 %v5114_v16  ;;  %v5239_v15 = vmul.f32 %v7129_v56, %v10051_v50  ;;  %v4454_v30 = vperm.slane %v9955_v37, 0  ;;  %v5118_v50 = vmul.f32 1.442695, %v5063_v9 }
 0x955   : > { %4738 = vst [vmem:[#allocation1 + $0x6] ss:$9 sm:$0xff] %v4452_v32  ;;  %v5302_v1 = vmul.f32 %v10196_v63, %v5270_v10  ;;  %5332 = vadd.xlane.f32.xlu0 %v5298_v38  ;;  %v5066_v32 = vsub.f32 %v9744_v48, %v10161_v60  ;;  %v4458_v48 = vperm.slane %v9955_v37, 4  ;;  %v4460_v16 = vperm.slane %v9955_v37, 6 }
 0x956   : > { %4739 = vst [vmem:[#allocation1 + $0x7] ss:$9 sm:$0xff] %v4453_v18  ;;  %v5271_v39 = vmax.f32 %v5239_v15, 0.001  ;;  %v7131_v18 = vpop.eup %7130  ;;  %v5065_v10 = vsub.f32 %v9863_v14, %v10163_v7  ;;  %7134 = vpow2.f32 %v5118_v50  ;;  %v5071_v38 = vsub.f32 %v9778_v3, %v10183_v19  ;;  %v5157_v15 = vpop.xlane.xlu0 %5156 }
 0x957   : > { %5340 = vadd.xlane.f32.xlu1 %v5302_v1  ;;  %v10230_v21 = vpop.xlane.xlu1 %5158  ;;  %v5124_v60 = vmul.f32 1.442695, %v5066_v32  ;;  %v5240_v46 = vmul.f32 %v7131_v18, %v10048_v6  ;;  %v5161_v1 = vpop.xlane.xlu2 %5160  ;;  %v5068_v6 = vsub.f32 %v9876_v26, %v10177_v17  ;;  %v4462_v26 = vperm.slane %v9963_v45, 0 }
 0x958   : > { %v5303_v44 = vmul.f32 %v10196_v63, %v5271_v39  ;;  %v5122_v7 = vmul.f32 1.442695, %v5065_v10  ;;  %v5134_v56 = vmul.f32 1.442695, %v5071_v38  ;;  %v5067_v17 = vsub.f32 %v9765_v62, %v10170_v58 }
 0x959   : > { %7136 = vpow2.f32 %v5124_v60  ;;  %v5272_v14 = vmax.f32 %v5240_v46, 0.001  ;;  %v5128_v37 = vmul.f32 1.442695, %v5068_v6  ;;  %v4463_v32 = vperm.slane %v9963_v45, 1 }
 0x95a   : > { %v10239_v52 = vpop.eup %7132  ;;  %5338 = vadd.xlane.f32.xlu2 %v5301_v4  ;;  %7138 = vrcp.f32 %v5161_v1  ;;  %v4464_v39 = vperm.slane %v9963_v45, 2  ;;  %v4465_v62 = vperm.slane %v9963_v45, 3  ;;  %v4466_v58 = vperm.slane %v9963_v45, 4 }
 0x95b   : > { %v5304_v3 = vmul.f32 %v10196_v63, %v5272_v14  ;;  %7140 = vpow2.f32 %v5122_v7  ;;  %v4469_v4 = vperm.slane %v9963_v45, 7  ;;  %v5069_v46 = vsub.f32 %v9759_v40, %v10173_v41 }
 0x95c   : > { %v10255_v9 = vpop.eup %7134  ;;  %7142 = vpow2.f32 %v5134_v56  ;;  %v4470_v7 = vperm.slane %v9969_v12, 0 }
 0x95d   : > { %v10233_v42 = vld [vmem:[#allocation1] sm:$0xff]  ;;  %5178 = vadd.xlane.f32.xlu0 %v10239_v52  ;;  %7144 = vpow2.f32 %v5128_v37 }
 0x95e   : > { %4741 = vst [vmem:[#allocation1] ss:$9 sm:$0xff] %v4454_v30  ;;  %7146 = vrcp.f32 %v5157_v15 }
 0x95f   : > { %4742 = vst [vmem:[#allocation1 + $0x1] ss:$9 sm:$0xff] %v4455_v0  ;;  %5342 = vadd.xlane.f32.xlu1 %v5303_v44  ;;  %v10253_v20 = vpop.xlane.xlu1 %5164  ;;  %v10258_v19 = vpop.eup %7136  ;;  %v5070_v0 = vsub.f32 %v9782_v43, %v10181_v59  ;;  %v4467_v44 = vperm.slane %v9963_v45, 5 }
 0x960   : > { %4743 = vst [vmem:[#allocation1 + $0x2] ss:$9 sm:$0xff] %v4456_v54  ;;  %v5167_v18 = vpop.xlane.xlu2 %5166  ;;  %v7139_v54 = vpop.eup %7138 }
 0x961   : > { %4744 = vst [vmem:[#allocation1 + $0x3] ss:$9 sm:$0xff] %v4457_v57  ;;  %v5126_v57 = vmul.f32 1.442695, %v5067_v17  ;;  %v10275_v50 = vpop.eup %7140  ;;  %v5132_v43 = vmul.f32 1.442695, %v5070_v0  ;;  %7148 = vrcp.f32 %v5167_v18  ;;  %v5244_v60 = vmul.f32 %v7139_v54, %v10071_v33 }
 0x962   : > { %4745 = vst [vmem:[#allocation1 + $0x4] ss:$9 sm:$0xff] %v4458_v48  ;;  %5188 = vadd.xlane.f32.xlu2 %v10258_v19  ;;  %v10278_v59 = vpop.eup %7142  ;;  %v4468_v48 = vperm.slane %v9963_v45, 6  ;;  %v5130_v45 = vmul.f32 1.442695, %v5069_v46  ;;  %v4474_v0 = vperm.slane %v9969_v12, 4 }
 0x963   : > { %4746 = vst [vmem:[#allocation1 + $0x5] ss:$9 sm:$0xff] %v4459_v25  ;;  %v10282_v25 = vpop.eup %7144  ;;  %7150 = vpow2.f32 %v5126_v57  ;;  %v4476_v18 = vperm.slane %v9969_v12, 6  ;;  %v4477_v54 = vperm.slane %v9969_v12, 7 }
 0x964   : > { %4747 = vst [vmem:[#allocation1 + $0x6] ss:$9 sm:$0xff] %v4460_v16  ;;  %7152 = vpow2.f32 %v5132_v43  ;;  %v5163_v16 = vpop.xlane.xlu0 %5162  ;;  %v7147_v33 = vpop.eup %7146 }
 0x965   : > { %4748 = vst [vmem:[#allocation1 + $0x7] ss:$9 sm:$0xff] %v4461_v47  ;;  %5182 = vadd.xlane.f32.xlu0 %v10255_v9  ;;  %v5276_v47 = vmax.f32 %v5244_v60, 0.001  ;;  %7154 = vrcp.f32 %v10220_v5  ;;  %v5242_v6 = vmul.f32 %v7147_v33, %v10068_v49  ;;  %v4471_v5 = vperm.slane %v9969_v12, 1 }
 0x966   : > { %7156 = vrcp.f32 %v5163_v16  ;;  %v4473_v49 = vperm.slane %v9969_v12, 3  ;;  %v4478_v16 = vperm.slane %v9961_v34, 0 }
 0x967   : > { %5344 = vadd.xlane.f32.xlu1 %v5304_v3  ;;  %v10270_v36 = vpop.xlane.xlu1 %5168  ;;  %v7149_v38 = vpop.eup %7148  ;;  %v5308_v40 = vmul.f32 %v10196_v63, %v5276_v47  ;;  %v5274_v17 = vmax.f32 %v5242_v6, 0.001  ;;  %v4482_v6 = vperm.slane %v9961_v34, 4 }
 0x968   : > { %v5247_v41 = vmul.f32 %v7149_v38, %v10086_v24  ;;  %v10303_v37 = vpop.xlane.xlu2 %5170  ;;  %v4472_v24 = vperm.slane %v9969_v12, 2  ;;  %v4479_v38 = vperm.slane %v9961_v34, 1 }
 0x969   : > { %v10291_v1 = vpop.eup %7150 }
 0x96a   : > { %5192 = vadd.xlane.f32.xlu2 %v10282_v25  ;;  %v10296_v14 = vpop.eup %7152 }
 0x96b   : > { %v7155_v3 = vpop.eup %7154 }
 0x96c   : > { %v10265_v30 = vld [vmem:[#allocation1] sm:$0xff]  ;;  %v7157_v15 = vpop.eup %7156 }
 0x96d   : > { %4750 = vst [vmem:[#allocation1] ss:$9 sm:$0xff] %v4462_v26  ;;  %5186 = vadd.xlane.f32.xlu0 %v10275_v50  ;;  %v5279_v26 = vmax.f32 %v5247_v41, 0.001 }
 0x96e   : > { %4751 = vst [vmem:[#allocation1 + $0x1] ss:$9 sm:$0xff] %v4463_v32 }
 0x96f   : > { %4752 = vst [vmem:[#allocation1 + $0x2] ss:$9 sm:$0xff] %v4464_v39  ;;  %5198 = vadd.xlane.f32.xlu1 %v10278_v59  ;;  %v5173_v10 = vpop.xlane.xlu1 %5172  ;;  %v4475_v39 = vperm.slane %v9969_v12, 5  ;;  %v5311_v57 = vmul.f32 %v10196_v63, %v5279_v26 }
 0x970   : > { %4753 = vst [vmem:[#allocation1 + $0x3] ss:$9 sm:$0xff] %v4465_v62  ;;  %7158 = vrcp.f32 %v5173_v10  ;;  %v5241_v62 = vmul.f32 %v7155_v3, %v10053_v13  ;;  %v4483_v3 = vperm.slane %v9961_v34, 5 }
 0x971   : > { %4754 = vst [vmem:[#allocation1 + $0x4] ss:$9 sm:$0xff] %v4466_v58  ;;  %7160 = vpow2.f32 %v5130_v45 }
 0x972   : > { %4755 = vst [vmem:[#allocation1 + $0x5] ss:$9 sm:$0xff] %v4467_v44  ;;  %5196 = vadd.xlane.f32.xlu2 %v10296_v14  ;;  %7162 = vrcp.f32 %v10230_v21  ;;  %v5306_v44 = vmul.f32 %v10196_v63, %v5274_v17  ;;  %v5245_v21 = vmul.f32 %v7157_v15, %v10084_v23 }
 0x973   : > { %4756 = vst [vmem:[#allocation1 + $0x6] ss:$9 sm:$0xff] %v4468_v48  ;;  %7164 = vrcp.f32 %v10270_v36  ;;  %v5273_v36 = vmax.f32 %v5241_v62, 0.001  ;;  %v5175_v48 = vpop.xlane.xlu2 %5174 }
 0x974   : > { %4757 = vst [vmem:[#allocation1 + $0x7] ss:$9 sm:$0xff] %v4469_v4  ;;  %v5277_v4 = vmax.f32 %v5245_v21, 0.001  ;;  %7166 = vrcp.f32 %v10253_v20  ;;  %v4480_v20 = vperm.slane %v9961_v34, 2  ;;  %v4489_v21 = vperm.slane %v9979_v51, 3 }
 0x975   : > { %5190 = vadd.xlane.f32.xlu0 %v10291_v1  ;;  %7168 = vrcp.f32 %v5175_v48 }
 0x976   : > { %v7159_v32 = vpop.eup %7158  ;;  %v5309_v10 = vmul.f32 %v10196_v63, %v5277_v4  ;;  %7170 = vrcp.f32 %v10303_v37 }
 0x977   : > { %5352 = vadd.xlane.f32.xlu1 %v5308_v40  ;;  %v10315_v58 = vpop.eup %7160  ;;  %v5250_v43 = vmul.f32 %v7159_v32, %v10114_v53  ;;  %v5177_v12 = vpop.xlane.xlu1 %5176  ;;  %v5305_v53 = vmul.f32 %v10196_v63, %v5273_v36 }
 0x978   : > { %v7163_v13 = vpop.eup %7162 }
 0x979   : > { %v5282_v60 = vmax.f32 %v5250_v43, 0.001  ;;  %v7165_v46 = vpop.eup %7164  ;;  %v5243_v23 = vmul.f32 %v7163_v13, %v10064_v27  ;;  %v4481_v27 = vperm.slane %v9961_v34, 3  ;;  %v4488_v43 = vperm.slane %v9979_v51, 2 }
 0x97a   : > { %5348 = vadd.xlane.f32.xlu2 %v5306_v44  ;;  %v5248_v47 = vmul.f32 %v7165_v46, %v10099_v2  ;;  %v7167_v41 = vpop.eup %7166  ;;  %v4491_v13 = vperm.slane %v9979_v51, 5 }
 0x97b   : > { %v10300_v56 = vld [vmem:[#allocation1] sm:$0xff]  ;;  %v5314_v33 = vmul.f32 %v10196_v63, %v5282_v60  ;;  %v5275_v40 = vmax.f32 %v5243_v23, 0.001  ;;  %v5246_v26 = vmul.f32 %v7167_v41, %v10082_v11  ;;  %v4492_v60 = vperm.slane %v9979_v51, 6  ;;  %v11549_v41 = vld [vmem:[#allocation92_spill] sm:$0xff] }
 0x97c   : > { %4759 = vst [vmem:[#allocation1] ss:$9 sm:$0xff] %v4470_v7  ;;  %v5280_v2 = vmax.f32 %v5248_v47, 0.001  ;;  %v4496_v47 = vperm.slane %v9981_v31, 2 }
 0x97d   : > { %4760 = vst [vmem:[#allocation1 + $0x1] ss:$9 sm:$0xff] %v4471_v5  ;;  %5194 = vadd.xlane.f32.xlu0 %v10315_v58  ;;  %v7169_v5 = vpop.eup %7168  ;;  %v5307_v15 = vmul.f32 %v10196_v63, %v5275_v40  ;;  %v4501_v40 = vperm.slane %v9981_v31, 7 }
 0x97e   : > { %4761 = vst [vmem:[#allocation1 + $0x2] ss:$9 sm:$0xff] %v4472_v24  ;;  %v4484_v24 = vperm.slane %v9961_v34, 6  ;;  %v5312_v17 = vmul.f32 %v10196_v63, %v5280_v2  ;;  %v5251_v32 = vmul.f32 %v7169_v5, %v10112_v35  ;;  %v4504_v5 = vperm.slane %v11549_v41, 2 }
 0x97f   : > { %4762 = vst [vmem:[#allocation1 + $0x3] ss:$9 sm:$0xff] %v4473_v49  ;;  %5358 = vadd.xlane.f32.xlu1 %v5311_v57  ;;  %v5181_v7 = vpop.xlane.xlu1 %5180  ;;  %v4485_v49 = vperm.slane %v9961_v34, 7  ;;  %v4486_v34 = vperm.slane %v9979_v51, 0  ;;  %v4487_v57 = vperm.slane %v9979_v51, 1 }
 0x980   : > { %4763 = vst [vmem:[#allocation1 + $0x4] ss:$9 sm:$0xff] %v4474_v0  ;;  %7172 = vrcp.f32 %v5181_v7  ;;  %v5278_v0 = vmax.f32 %v5246_v26, 0.001  ;;  %v4503_v7 = vperm.slane %v11549_v41, 1  ;;  %v11550_v26 = vld [vmem:[#allocation94_spill] sm:$0xff] }
 0x981   : > { %4764 = vst [vmem:[#allocation1 + $0x5] ss:$9 sm:$0xff] %v4475_v39  ;;  %v7171_v39 = vpop.eup %7170  ;;  %7174 = vrcp.f32 %v5177_v12  ;;  %v4490_v12 = vperm.slane %v9979_v51, 4 }
 0x982   : > { %4765 = vst [vmem:[#allocation1 + $0x6] ss:$9 sm:$0xff] %v4476_v18  ;;  %5354 = vadd.xlane.f32.xlu2 %v5309_v10  ;;  %v5283_v18 = vmax.f32 %v5251_v32, 0.001  ;;  %v5249_v62 = vmul.f32 %v7171_v39, %v10102_v61  ;;  %v4495_v10 = vperm.slane %v9981_v31, 1  ;;  %v4512_v39 = vperm.slane %v11550_v26, 2 }
 0x983   : > { %4766 = vst [vmem:[#allocation1 + $0x7] ss:$9 sm:$0xff] %v4477_v54  ;;  %v5310_v54 = vmul.f32 %v10196_v63, %v5278_v0  ;;  %v4511_v0 = vperm.slane %v11550_v26, 1 }
 0x984   : > { %v5315_v35 = vmul.f32 %v10196_v63, %v5283_v18  ;;  %v5281_v61 = vmax.f32 %v5249_v62, 0.001  ;;  %v4513_v18 = vperm.slane %v11550_v26, 3  ;;  %v4517_v62 = vperm.slane %v11550_v26, 7 }
 0x985   : > { %5346 = vadd.xlane.f32.xlu0 %v5305_v53 }
 0x986   : > { %v7173_v37 = vpop.eup %7172  ;;  %v5313_v4 = vmul.f32 %v10196_v63, %v5281_v61 }
 0x987   : > { %5364 = vadd.xlane.f32.xlu1 %v5314_v33  ;;  %v5254_v44 = vmul.f32 %v7173_v37, %v10133_v8  ;;  %v7175_v36 = vpop.eup %7174  ;;  %v4493_v8 = vperm.slane %v9979_v51, 7  ;;  %v4514_v37 = vperm.slane %v11550_v26, 4 }
 0x988   : > { %v5252_v46 = vmul.f32 %v7175_v36, %v10127_v55  ;;  %v4498_v55 = vperm.slane %v9981_v31, 4 }
 0x989   : > { %v5286_v48 = vmax.f32 %v5254_v44, 0.001 }
 0x98a   : > { %v10330_v45 = vld [vmem:[#allocation1] sm:$0xff]  ;;  %5360 = vadd.xlane.f32.xlu2 %v5312_v17  ;;  %v5284_v23 = vmax.f32 %v5252_v46, 0.001  ;;  %v4510_v17 = vperm.slane %v11550_v26, 0 }
 0x98b   : > { %4768 = vst [vmem:[#allocation1] ss:$9 sm:$0xff] %v4478_v16  ;;  %v5318_v53 = vmul.f32 %v10196_v63, %v5286_v48  ;;  %v4494_v16 = vperm.slane %v9981_v31, 0 }
 0x98c   : > { %4769 = vst [vmem:[#allocation1 + $0x1] ss:$9 sm:$0xff] %v4479_v38  ;;  %v5316_v51 = vmul.f32 %v10196_v63, %v5284_v23  ;;  %v4497_v38 = vperm.slane %v9981_v31, 3 }
 0x98d   : > { %4770 = vst [vmem:[#allocation1 + $0x2] ss:$9 sm:$0xff] %v4480_v20  ;;  %5350 = vadd.xlane.f32.xlu0 %v5307_v15  ;;  %v4499_v20 = vperm.slane %v9981_v31, 5  ;;  %v4509_v15 = vperm.slane %v11549_v41, 7 }
 0x98e   : > { %4771 = vst [vmem:[#allocation1 + $0x3] ss:$9 sm:$0xff] %v4481_v27  ;;  %v4500_v27 = vperm.slane %v9981_v31, 6  ;;  %v4507_v31 = vperm.slane %v11549_v41, 5 }
 0x98f   : > { %4772 = vst [vmem:[#allocation1 + $0x4] ss:$9 sm:$0xff] %v4482_v6  ;;  %v4502_v6 = vperm.slane %v11549_v41, 0 }
 0x990   : > { %4773 = vst [vmem:[#allocation1 + $0x5] ss:$9 sm:$0xff] %v4483_v3  ;;  %v4505_v3 = vperm.slane %v11549_v41, 3 }
 0x991   : > { %4774 = vst [vmem:[#allocation1 + $0x6] ss:$9 sm:$0xff] %v4484_v24  ;;  %v4506_v24 = vperm.slane %v11549_v41, 4 }
 0x992   : > { %4775 = vst [vmem:[#allocation1 + $0x7] ss:$9 sm:$0xff] %v4485_v49  ;;  %5366 = vadd.xlane.f32.xlu2 %v5315_v35  ;;  %v4508_v49 = vperm.slane %v11549_v41, 6 }
 0x995   : > { %5356 = vadd.xlane.f32.xlu0 %v5310_v54  ;;  %v4516_v54 = vperm.slane %v11550_v26, 6 }
 0x999   : > { %v10346_v11 = vld [vmem:[#allocation1] sm:$0xff] }
 0x99a   : > { %4777 = vst [vmem:[#allocation1] ss:$9 sm:$0xff] %v4486_v34  ;;  %5372 = vadd.xlane.f32.xlu2 %v5318_v53  ;;  %v4515_v34 = vperm.slane %v11550_v26, 5 }
 0x99b   : > { %4778 = vst [vmem:[#allocation1 + $0x1] ss:$9 sm:$0xff] %v4487_v57 }
 0x99c   : > { %4779 = vst [vmem:[#allocation1 + $0x2] ss:$9 sm:$0xff] %v4488_v43 }
 0x99d   : > { %4780 = vst [vmem:[#allocation1 + $0x3] ss:$9 sm:$0xff] %v4489_v21  ;;  %5362 = vadd.xlane.f32.xlu0 %v5313_v4 }
 0x99e   : > { %4781 = vst [vmem:[#allocation1 + $0x4] ss:$9 sm:$0xff] %v4490_v12 }
 0x99f   : > { %4782 = vst [vmem:[#allocation1 + $0x5] ss:$9 sm:$0xff] %v4491_v13 }
 0x9a0   : > { %4783 = vst [vmem:[#allocation1 + $0x6] ss:$9 sm:$0xff] %v4492_v60 }
 0x9a1   : > { %4784 = vst [vmem:[#allocation1 + $0x7] ss:$9 sm:$0xff] %v4493_v8 }
 0x9a5   : > { %5368 = vadd.xlane.f32.xlu0 %v5316_v51 }
 0x9a8   : > { %v10361_v33 = vld [vmem:[#allocation1] sm:$0xff] }
 0x9a9   : > { %4786 = vst [vmem:[#allocation1] ss:$9 sm:$0xff] %v4494_v16 }
 0x9aa   : > { %4787 = vst [vmem:[#allocation1 + $0x1] ss:$9 sm:$0xff] %v4495_v10 }
 0x9ab   : > { %4788 = vst [vmem:[#allocation1 + $0x2] ss:$9 sm:$0xff] %v4496_v47 }
 0x9ac   : > { %4789 = vst [vmem:[#allocation1 + $0x3] ss:$9 sm:$0xff] %v4497_v38 }
 0x9ad   : > { %4790 = vst [vmem:[#allocation1 + $0x4] ss:$9 sm:$0xff] %v4498_v55 }
 0x9ae   : > { %4791 = vst [vmem:[#allocation1 + $0x5] ss:$9 sm:$0xff] %v4499_v20 }
 0x9af   : > { %4792 = vst [vmem:[#allocation1 + $0x6] ss:$9 sm:$0xff] %v4500_v27 }
 0x9b0   : > { %4793 = vst [vmem:[#allocation1 + $0x7] ss:$9 sm:$0xff] %v4501_v40 }
 0x9b7   : > { %v10373_v2 = vld [vmem:[#allocation1] sm:$0xff] }
 0x9b8   : > { %4795 = vst [vmem:[#allocation1] ss:$9 sm:$0xff] %v4502_v6  ;;  %v5329_v57 = vpop.xlane.xlu0 %5328 }
 0x9b9   : > { %4796 = vst [vmem:[#allocation1 + $0x1] ss:$9 sm:$0xff] %v4503_v7  ;;  %v5424_v35 = vperm.slane %v5329_v57, 0  ;;  %v5425_v44 = vperm.slane %v5329_v57, 1  ;;  %v5426_v43 = vperm.slane %v5329_v57, 2  ;;  %v5427_v12 = vperm.slane %v5329_v57, 3 }
 0x9ba   : > { %4797 = vst [vmem:[#allocation1 + $0x2] ss:$9 sm:$0xff] %v4504_v5  ;;  %v5428_v61 = vperm.slane %v5329_v57, 4  ;;  %v5429_v36 = vperm.slane %v5329_v57, 5  ;;  %v5430_v13 = vperm.slane %v5329_v57, 6  ;;  %v5431_v48 = vperm.slane %v5329_v57, 7  ;;  %v5335_v6 = vpop.xlane.xlu2 %5334 }
 0x9bb   : > { %4798 = vst [vmem:[#allocation1 + $0x3] ss:$9 sm:$0xff] %v4505_v3  ;;  %v5449_v26 = vperm.slane %v5335_v6, 1  ;;  %v5455_v57 = vperm.slane %v5335_v6, 7 }
 0x9bc   : > { %4799 = vst [vmem:[#allocation1 + $0x4] ss:$9 sm:$0xff] %v4506_v24 }
 0x9bd   : > { %4800 = vst [vmem:[#allocation1 + $0x5] ss:$9 sm:$0xff] %v4507_v31 }
 0x9be   : > { %4801 = vst [vmem:[#allocation1 + $0x6] ss:$9 sm:$0xff] %v4508_v49  ;;  %v5185_v49 = vpop.xlane.xlu1 %5184 }
 0x9bf   : > { %4802 = vst [vmem:[#allocation1 + $0x7] ss:$9 sm:$0xff] %v4509_v15  ;;  %v5448_v15 = vperm.slane %v5335_v6, 0 }
 0x9c0   : > { %v5331_v60 = vpop.xlane.xlu0 %5330 }
 0x9c1   : > { %v5432_v8 = vperm.slane %v5331_v60, 0  ;;  %v5433_v4 = vperm.slane %v5331_v60, 1  ;;  %v5434_v46 = vperm.slane %v5331_v60, 2  ;;  %v5435_v23 = vperm.slane %v5331_v60, 3 }
 0x9c2   : > { %v5436_v16 = vperm.slane %v5331_v60, 4  ;;  %v5437_v10 = vperm.slane %v5331_v60, 5  ;;  %v5438_v51 = vperm.slane %v5331_v60, 6  ;;  %v5439_v47 = vperm.slane %v5331_v60, 7 }
 0x9c5   : > { %v5337_v31 = vpop.xlane.xlu2 %5336 }
 0x9c6   : > { %v10382_v32 = vld [vmem:[#allocation1] sm:$0xff] }
 0x9c7   : > { %4804 = vst [vmem:[#allocation1] ss:$9 sm:$0xff] %v4510_v17 }
 0x9c8   : > { %4805 = vst [vmem:[#allocation1 + $0x1] ss:$9 sm:$0xff] %v4511_v0  ;;  %v5333_v38 = vpop.xlane.xlu0 %5332  ;;  %v5450_v0 = vperm.slane %v5335_v6, 2 }
 0x9c9   : > { %4806 = vst [vmem:[#allocation1 + $0x2] ss:$9 sm:$0xff] %v4512_v39  ;;  %v5440_v55 = vperm.slane %v5333_v38, 0  ;;  %v5441_v20 = vperm.slane %v5333_v38, 1  ;;  %v5442_v27 = vperm.slane %v5333_v38, 2  ;;  %v5443_v41 = vperm.slane %v5333_v38, 3 }
 0x9ca   : > { %4807 = vst [vmem:[#allocation1 + $0x3] ss:$9 sm:$0xff] %v4513_v18  ;;  %v5444_v7 = vperm.slane %v5333_v38, 4  ;;  %v5445_v5 = vperm.slane %v5333_v38, 5  ;;  %v5446_v3 = vperm.slane %v5333_v38, 6  ;;  %v5447_v24 = vperm.slane %v5333_v38, 7 }
 0x9cb   : > { %4808 = vst [vmem:[#allocation1 + $0x4] ss:$9 sm:$0xff] %v4514_v37  ;;  %v5451_v39 = vperm.slane %v5335_v6, 3  ;;  %v5452_v18 = vperm.slane %v5335_v6, 4  ;;  %v5453_v37 = vperm.slane %v5335_v6, 5 }
 0x9cc   : > { %4809 = vst [vmem:[#allocation1 + $0x5] ss:$9 sm:$0xff] %v4515_v34 }
 0x9cd   : > { %4810 = vst [vmem:[#allocation1 + $0x6] ss:$9 sm:$0xff] %v4516_v54  ;;  %v5454_v54 = vperm.slane %v5335_v6, 6 }
 0x9ce   : > { %4811 = vst [vmem:[#allocation1 + $0x7] ss:$9 sm:$0xff] %v4517_v62  ;;  %v10399_v62 = vpop.xlane.xlu1 %5340 }
 0x9d0   : > { %v5179_v34 = vpop.xlane.xlu0 %5178 }
 0x9d1   : > { %7176 = vrcp.f32 %v5179_v34 }
 0x9d2   : > { %7178 = vrcp.f32 %v5185_v49 }
 0x9d5   : > { %v10391_v21 = vld [vmem:[#allocation1] sm:$0xff] }
 0x9d6   : > { %5680 = vst [vmem:[#allocation1] ss:$9 sm:$0xff] %v5424_v35  ;;  %v10401_v35 = vpop.xlane.xlu2 %5338 }
 0x9d7   : > { %5682 = vst [vmem:[#allocation1 + $0x1] ss:$9 sm:$0xff] %v5425_v44  ;;  %v7177_v44 = vpop.eup %7176  ;;  %v5464_v49 = vperm.slane %v10401_v35, 0  ;;  %v5469_v34 = vperm.slane %v10401_v35, 5 }
 0x9d8   : > { %5684 = vst [vmem:[#allocation1 + $0x2] ss:$9 sm:$0xff] %v5426_v43  ;;  %v5456_v43 = vperm.slane %v5337_v31, 0  ;;  %v5183_v60 = vpop.xlane.xlu0 %5182 }
 0x9d9   : > { %5686 = vst [vmem:[#allocation1 + $0x3] ss:$9 sm:$0xff] %v5427_v12  ;;  %v5457_v12 = vperm.slane %v5337_v31, 1  ;;  %7180 = vrcp.f32 %v5183_v60 }
 0x9da   : > { %5688 = vst [vmem:[#allocation1 + $0x4] ss:$9 sm:$0xff] %v5428_v61 }
 0x9db   : > { %5690 = vst [vmem:[#allocation1 + $0x5] ss:$9 sm:$0xff] %v5429_v36  ;;  %v10405_v36 = vpop.xlane.xlu1 %5342 }
 0x9dc   : > { %5692 = vst [vmem:[#allocation1 + $0x6] ss:$9 sm:$0xff] %v5430_v13  ;;  %v5458_v13 = vperm.slane %v5337_v31, 2 }
 0x9dd   : > { %5694 = vst [vmem:[#allocation1 + $0x7] ss:$9 sm:$0xff] %v5431_v48 }
 0x9de   : > { %v5189_v48 = vpop.xlane.xlu2 %5188 }
 0x9df   : > { %7182 = vrcp.f32 %v5189_v48 }
 0x9e3   : > { %v10411_v6 = vpop.xlane.xlu1 %5344 }
 0x9e4   : > { %v10393_v53 = vld [vmem:[#allocation1] sm:$0xff] }
 0x9e5   : > { %5696 = vst [vmem:[#allocation1] ss:$9 sm:$0xff] %v5432_v8  ;;  %v5253_v8 = vmul.f32 %v7177_v44, %v10239_v52 }
 0x9e6   : > { %5697 = vst [vmem:[#allocation1 + $0x1] ss:$9 sm:$0xff] %v5433_v4  ;;  %v7179_v4 = vpop.eup %7178 }
 0x9e7   : > { %5698 = vst [vmem:[#allocation1 + $0x2] ss:$9 sm:$0xff] %v5434_v46  ;;  %v5459_v46 = vperm.slane %v5337_v31, 3  ;;  %v5256_v38 = vmul.f32 %v7179_v4, %v10145_v28  ;;  %v7181_v52 = vpop.eup %7180 }
 0x9e8   : > { %5699 = vst [vmem:[#allocation1 + $0x3] ss:$9 sm:$0xff] %v5435_v23  ;;  %v5460_v23 = vperm.slane %v5337_v31, 4 }
 0x9e9   : > { %5700 = vst [vmem:[#allocation1 + $0x4] ss:$9 sm:$0xff] %v5436_v16  ;;  %v5285_v16 = vmax.f32 %v5253_v8, 0.001 }
 0x9ea   : > { %5701 = vst [vmem:[#allocation1 + $0x5] ss:$9 sm:$0xff] %v5437_v10  ;;  %v5461_v10 = vperm.slane %v5337_v31, 5 }
 0x9eb   : > { %5702 = vst [vmem:[#allocation1 + $0x6] ss:$9 sm:$0xff] %v5438_v51  ;;  %v5462_v51 = vperm.slane %v5337_v31, 6 }
 0x9ec   : > { %5703 = vst [vmem:[#allocation1 + $0x7] ss:$9 sm:$0xff] %v5439_v47  ;;  %v5317_v47 = vmul.f32 %v10196_v63, %v5285_v16  ;;  %v5473_v16 = vperm.slane %v10399_v62, 1 }
 0x9ee   : > { %5370 = vadd.xlane.f32.xlu1 %v5317_v47  ;;  %v5474_v47 = vperm.slane %v10399_v62, 2 }
 0x9f3   : > { %v10395_v40 = vld [vmem:[#allocation1] sm:$0xff] }
 0x9f4   : > { %5705 = vst [vmem:[#allocation1] ss:$9 sm:$0xff] %v5440_v55  ;;  %v5463_v55 = vperm.slane %v5337_v31, 7 }
 0x9f5   : > { %5706 = vst [vmem:[#allocation1 + $0x1] ss:$9 sm:$0xff] %v5441_v20  ;;  %v5288_v20 = vmax.f32 %v5256_v38, 0.001  ;;  %v5475_v38 = vperm.slane %v10399_v62, 3 }
 0x9f6   : > { %5707 = vst [vmem:[#allocation1 + $0x2] ss:$9 sm:$0xff] %v5442_v27  ;;  %v5255_v27 = vmul.f32 %v7181_v52, %v10255_v9  ;;  %v5466_v9 = vperm.slane %v10401_v35, 2 }
 0x9f7   : > { %5708 = vst [vmem:[#allocation1 + $0x3] ss:$9 sm:$0xff] %v5443_v41  ;;  %v7183_v41 = vpop.eup %7182 }
 0x9f8   : > { %5709 = vst [vmem:[#allocation1 + $0x4] ss:$9 sm:$0xff] %v5444_v7  ;;  %v5187_v7 = vpop.xlane.xlu0 %5186  ;;  %v5258_v31 = vmul.f32 %v7183_v41, %v10258_v19 }
 0x9f9   : > { %5710 = vst [vmem:[#allocation1 + $0x5] ss:$9 sm:$0xff] %v5445_v5  ;;  %v5287_v5 = vmax.f32 %v5255_v27, 0.001  ;;  %7184 = vrcp.f32 %v5187_v7  ;;  %v5477_v27 = vperm.slane %v10399_v62, 5  ;;  %v5478_v7 = vperm.slane %v10399_v62, 6 }
 0x9fa   : > { %5711 = vst [vmem:[#allocation1 + $0x6] ss:$9 sm:$0xff] %v5446_v3  ;;  %v5193_v3 = vpop.xlane.xlu2 %5192 }
 0x9fb   : > { %5712 = vst [vmem:[#allocation1 + $0x7] ss:$9 sm:$0xff] %v5447_v24  ;;  %v5320_v24 = vmul.f32 %v10196_v63, %v5288_v20  ;;  %v5319_v28 = vmul.f32 %v10196_v63, %v5287_v5  ;;  %7186 = vrcp.f32 %v5193_v3  ;;  %v5476_v20 = vperm.slane %v10399_v62, 4 }
 0x9fc   : > { %v5479_v3 = vperm.slane %v10399_v62, 7 }
 0x9fd   : > { %5376 = vadd.xlane.f32.xlu1 %v5320_v24  ;;  %5374 = vadd.xlane.f32.xlu0 %v5319_v28 }
 0xa00   : > { %v5191_v19 = vpop.xlane.xlu0 %5190 }
 0xa01   : > { %7188 = vrcp.f32 %v5191_v19  ;;  %v5485_v19 = vperm.slane %v10405_v36, 5 }
 0xa02   : > { %v10397_v17 = vld [vmem:[#allocation1] sm:$0xff] }
 0xa03   : > { %5714 = vst [vmem:[#allocation1] ss:$9 sm:$0xff] %v5448_v15  ;;  %v5465_v15 = vperm.slane %v10401_v35, 1 }
 0xa04   : > { %5715 = vst [vmem:[#allocation1 + $0x1] ss:$9 sm:$0xff] %v5449_v26 }
 0xa05   : > { %5716 = vst [vmem:[#allocation1 + $0x2] ss:$9 sm:$0xff] %v5450_v0  ;;  %v5467_v0 = vperm.slane %v10401_v35, 3 }
 0xa06   : > { %5717 = vst [vmem:[#allocation1 + $0x3] ss:$9 sm:$0xff] %v5451_v39  ;;  %v5290_v39 = vmax.f32 %v5258_v31, 0.001 }
 0xa07   : > { %5718 = vst [vmem:[#allocation1 + $0x4] ss:$9 sm:$0xff] %v5452_v18  ;;  %v7185_v18 = vpop.eup %7184 }
 0xa08   : > { %5719 = vst [vmem:[#allocation1 + $0x5] ss:$9 sm:$0xff] %v5453_v37  ;;  %v5468_v37 = vperm.slane %v10401_v35, 4  ;;  %v5257_v44 = vmul.f32 %v7185_v18, %v10275_v50  ;;  %v5195_v5 = vpop.xlane.xlu0 %5194  ;;  %v5483_v18 = vperm.slane %v10405_v36, 3 }
 0xa09   : > { %5720 = vst [vmem:[#allocation1 + $0x6] ss:$9 sm:$0xff] %v5454_v54  ;;  %v5470_v54 = vperm.slane %v10401_v35, 6 }
 0xa0a   : > { %5721 = vst [vmem:[#allocation1 + $0x7] ss:$9 sm:$0xff] %v5455_v57  ;;  %v5199_v57 = vpop.xlane.xlu1 %5198  ;;  %v5289_v48 = vmax.f32 %v5257_v44, 0.001 }
 0xa0b   : > { %7190 = vrcp.f32 %v5199_v57  ;;  %v5487_v57 = vperm.slane %v10405_v36, 7 }
 0xa0c   : > { %v5321_v60 = vmul.f32 %v10196_v63, %v5289_v48  ;;  %v5491_v48 = vperm.slane %v10411_v6, 3 }
 0xa0e   : > { %5378 = vadd.xlane.f32.xlu2 %v5321_v60  ;;  %v5492_v60 = vperm.slane %v10411_v6, 4 }
 0xa11   : > { %v10403_v61 = vld [vmem:[#allocation1] sm:$0xff] }
 0xa12   : > { %5723 = vst [vmem:[#allocation1] ss:$9 sm:$0xff] %v5456_v43  ;;  %v7187_v43 = vpop.eup %7186 }
 0xa13   : > { %5724 = vst [vmem:[#allocation1 + $0x1] ss:$9 sm:$0xff] %v5457_v12  ;;  %v5471_v12 = vperm.slane %v10401_v35, 7  ;;  %v5260_v8 = vmul.f32 %v7187_v43, %v10282_v25  ;;  %v7189_v4 = vpop.eup %7188  ;;  %v5472_v35 = vperm.slane %v10399_v62, 0  ;;  %v5481_v62 = vperm.slane %v10405_v36, 1 }
 0xa14   : > { %5725 = vst [vmem:[#allocation1 + $0x2] ss:$9 sm:$0xff] %v5458_v13  ;;  %v5322_v13 = vmul.f32 %v10196_v63, %v5290_v39  ;;  %v5482_v39 = vperm.slane %v10405_v36, 2  ;;  %v5488_v43 = vperm.slane %v10411_v6, 0 }
 0xa15   : > { %5726 = vst [vmem:[#allocation1 + $0x3] ss:$9 sm:$0xff] %v5459_v46  ;;  %v5197_v46 = vpop.xlane.xlu2 %5196  ;;  %v5292_v50 = vmax.f32 %v5260_v8, 0.001  ;;  %v5494_v8 = vperm.slane %v10411_v6, 6 }
 0xa16   : > { %5727 = vst [vmem:[#allocation1 + $0x4] ss:$9 sm:$0xff] %v5460_v23  ;;  %5380 = vadd.xlane.f32.xlu0 %v5322_v13  ;;  %v7191_v23 = vpop.eup %7190  ;;  %7192 = vrcp.f32 %v5197_v46  ;;  %v5490_v13 = vperm.slane %v10411_v6, 2  ;;  %v5347_v46 = vpop.xlane.xlu0 %5346 }
 0xa17   : > { %5728 = vst [vmem:[#allocation1 + $0x5] ss:$9 sm:$0xff] %v5461_v10  ;;  %v5324_v25 = vmul.f32 %v10196_v63, %v5292_v50  ;;  %v5263_v52 = vmul.f32 %v7191_v23, %v10278_v59  ;;  %7194 = vrcp.f32 %v5195_v5  ;;  %v5496_v50 = vperm.slane %v5347_v46, 0 }
 0xa18   : > { %5729 = vst [vmem:[#allocation1 + $0x6] ss:$9 sm:$0xff] %v5462_v51  ;;  %v5259_v51 = vmul.f32 %v7189_v4, %v10291_v1  ;;  %v7202_v1 = vld [vmem:[#allocation8] ss:$0 sm:$0xff]  ;;  %v5495_v4 = vperm.slane %v10411_v6, 7 }
 0xa19   : > { %5730 = vst [vmem:[#allocation1 + $0x7] ss:$9 sm:$0xff] %v5463_v55  ;;  %5384 = vadd.xlane.f32.xlu2 %v5324_v25  ;;  %v5295_v63 = vmax.f32 %v5263_v52, 0.001  ;;  %v5502_v25 = vperm.slane %v5347_v46, 6  ;;  %v7405_v52 = vmov 0  }
 0xa1a   : > { %v5291_v55 = vmax.f32 %v5259_v51, 0.001  ;;  %v5499_v51 = vperm.slane %v5347_v46, 3  ;;  %6678 = vset.pattern.permute.xlu0 %v7405_v52  ;;  %6680 = vset.pattern.permute.xlu2 %v7405_v52 }
 0xa1b   : > { %v5327_v59 = vmul.f32 %v7202_v1, %v5295_v63  ;;  %6679 = vset.pattern.permute.xlu1 %v7405_v52 }
 0xa1c   : > { %v5323_v41 = vmul.f32 %v7202_v1, %v5291_v55  ;;  %v7193_v24 = vpop.eup %7192  ;;  %v5503_v55 = vperm.slane %v5347_v46, 7 }
 0xa1d   : > { %v5262_v28 = vmul.f32 %v7193_v24, %v10296_v14  ;;  %v5484_v14 = vperm.slane %v10405_v36, 4 }
 0xa1e   : > { %5382 = vadd.xlane.f32.xlu1 %v5323_v41 }
 0xa1f   : > { %v5294_v31 = vmax.f32 %v5262_v28, 0.001 }
 0xa20   : > { %v10418_v26 = vld [vmem:[#allocation1] sm:$0xff] }
 0xa21   : > { %5732 = vst [vmem:[#allocation1] ss:$9 sm:$0xff] %v5464_v49  ;;  %5390 = vadd.xlane.f32.xlu2 %v5327_v59  ;;  %v7195_v49 = vpop.eup %7194 }
 0xa22   : > { %5733 = vst [vmem:[#allocation1 + $0x1] ss:$9 sm:$0xff] %v5465_v15  ;;  %v5480_v15 = vperm.slane %v10405_v36, 0 }
 0xa23   : > { %5734 = vst [vmem:[#allocation1 + $0x2] ss:$9 sm:$0xff] %v5466_v9  ;;  %v5326_v9 = vmul.f32 %v7202_v1, %v5294_v31  ;;  %v11557_v31 = vld [vmem:[#allocation42_spill] sm:$0xff] }
 0xa24   : > { %5735 = vst [vmem:[#allocation1 + $0x3] ss:$9 sm:$0xff] %v5467_v0 }
 0xa25   : > { %5736 = vst [vmem:[#allocation1 + $0x4] ss:$9 sm:$0xff] %v5468_v37  ;;  %v5261_v37 = vmul.f32 %v7195_v49, %v10315_v58 }
 0xa26   : > { %5737 = vst [vmem:[#allocation1 + $0x5] ss:$9 sm:$0xff] %v5469_v34  ;;  %5388 = vadd.xlane.f32.xlu1 %v5326_v9  ;;  %v11559_v9 = vld [vmem:[#allocation37_spill] sm:$0xff] }
 0xa27   : > { %5738 = vst [vmem:[#allocation1 + $0x6] ss:$9 sm:$0xff] %v5470_v54  ;;  %v5293_v34 = vmax.f32 %v5261_v37, 0.001  ;;  %v5486_v54 = vperm.slane %v10405_v36, 6  ;;  %v5493_v36 = vperm.slane %v10411_v6, 5 }
 0xa28   : > { %5739 = vst [vmem:[#allocation1 + $0x7] ss:$9 sm:$0xff] %v5471_v12  ;;  %v5489_v12 = vperm.slane %v10411_v6, 1  ;;  %v5349_v6 = vpop.xlane.xlu2 %5348  ;;  %v11561_v37 = vld [vmem:[#allocation38_spill] sm:$0xff] }
 0xa29   : > { %v5325_v44 = vmul.f32 %v7202_v1, %v5293_v34  ;;  %v11555_v1 = vld [vmem:[#allocation33_spill] sm:$0xff]  ;;  %v5504_v41 = vperm.slane %v5349_v6, 0  ;;  %v5507_v63 = vperm.slane %v5349_v6, 3  ;;  %v5508_v24 = vperm.slane %v5349_v6, 4 }
 0xa2a   : > { %v5509_v59 = vperm.slane %v5349_v6, 5  ;;  %v5510_v28 = vperm.slane %v5349_v6, 6  ;;  %v5511_v49 = vperm.slane %v5349_v6, 7 }
 0xa2b   : > { %5386 = vadd.xlane.f32.xlu0 %v5325_v44 }
 0xa2f   : > { %v10432_v10 = vld [vmem:[#allocation1] sm:$0xff] }
 0xa30   : > { %5741 = vst [vmem:[#allocation1] ss:$9 sm:$0xff] %v5472_v35  ;;  %v5497_v35 = vperm.slane %v5347_v46, 1 }
 0xa31   : > { %5742 = vst [vmem:[#allocation1 + $0x1] ss:$9 sm:$0xff] %v5473_v16  ;;  %v5498_v16 = vperm.slane %v5347_v46, 2 }
 0xa32   : > { %5743 = vst [vmem:[#allocation1 + $0x2] ss:$9 sm:$0xff] %v5474_v47  ;;  %v5500_v47 = vperm.slane %v5347_v46, 4 }
 0xa33   : > { %5744 = vst [vmem:[#allocation1 + $0x3] ss:$9 sm:$0xff] %v5475_v38  ;;  %v5501_v38 = vperm.slane %v5347_v46, 5 }
 0xa34   : > { %5745 = vst [vmem:[#allocation1 + $0x4] ss:$9 sm:$0xff] %v5476_v20  ;;  %v11553_v20 = vld [vmem:[#allocation36_spill] sm:$0xff] }
 0xa35   : > { %5746 = vst [vmem:[#allocation1 + $0x5] ss:$9 sm:$0xff] %v5477_v27  ;;  %v11554_v27 = vld [vmem:[#allocation32_spill] sm:$0xff] }
 0xa36   : > { %5747 = vst [vmem:[#allocation1 + $0x6] ss:$9 sm:$0xff] %v5478_v7  ;;  %v5505_v7 = vperm.slane %v5349_v6, 1 }
 0xa37   : > { %5748 = vst [vmem:[#allocation1 + $0x7] ss:$9 sm:$0xff] %v5479_v3  ;;  %v5506_v3 = vperm.slane %v5349_v6, 2 }
 0xa39   : > { %2460 = vperm.xlu2 %6680, %v11554_v27  }
 0xa3e   : > { %v10445_v0 = vld [vmem:[#allocation1] sm:$0xff] }
 0xa3f   : > { %5750 = vst [vmem:[#allocation1] ss:$9 sm:$0xff] %v5480_v15  ;;  %2454 = vperm.xlu0 %6678, %v11553_v20   ;;  %2457 = vperm.xlu1 %6679, %v11555_v1   ;;  %v11558_v15 = vld [vmem:[#allocation34_spill] sm:$0xff]  ;;  %v11571_v1 = vld [vmem:[#allocation61_spill] sm:$0xff] }
 0xa40   : > { %5751 = vst [vmem:[#allocation1 + $0x1] ss:$9 sm:$0xff] %v5481_v62  ;;  %v5351_v62 = vpop.xlane.xlu0 %5350 }
 0xa41   : > { %5752 = vst [vmem:[#allocation1 + $0x2] ss:$9 sm:$0xff] %v5482_v39  ;;  %2463 = vperm.xlu2 %6680, %v11558_v15   ;;  %v11560_v39 = vld [vmem:[#allocation22_spill] sm:$0xff]  ;;  %v5513_v34 = vperm.slane %v5351_v62, 1  ;;  %v5516_v44 = vperm.slane %v5351_v62, 4  ;;  %v11577_v15 = vld [vmem:[#allocation60_spill] sm:$0xff] }
 0xa42   : > { %5753 = vst [vmem:[#allocation1 + $0x3] ss:$9 sm:$0xff] %v5483_v18  ;;  %v5512_v18 = vperm.slane %v5351_v62, 0 }
 0xa43   : > { %5754 = vst [vmem:[#allocation1 + $0x4] ss:$9 sm:$0xff] %v5484_v14  ;;  %v11562_v14 = vld [vmem:[#allocation44_spill] sm:$0xff] }
 0xa44   : > { %5755 = vst [vmem:[#allocation1 + $0x5] ss:$9 sm:$0xff] %v5485_v19 }
 0xa45   : > { %5756 = vst [vmem:[#allocation1 + $0x6] ss:$9 sm:$0xff] %v5486_v54  ;;  %v5514_v54 = vperm.slane %v5351_v62, 2 }
 0xa46   : > { %5757 = vst [vmem:[#allocation1 + $0x7] ss:$9 sm:$0xff] %v5487_v57  ;;  %v5515_v57 = vperm.slane %v5351_v62, 3 }
 0xa47   : > { %2475 = vperm.xlu0 %6678, %v11557_v31   ;;  %2466 = vperm.xlu1 %6679, %v11559_v9  }
 0xa49   : > { %2469 = vperm.xlu2 %6680, %v11561_v37  }
 0xa4d   : > { %v10456_v58 = vld [vmem:[#allocation1] sm:$0xff] }
 0xa4e   : > { %11551 = vst [vmem:[#allocation92_spill] sm:$0xff] %v10456_v58 }
 0xa4f   : > { %5759 = vst [vmem:[#allocation1] ss:$9 sm:$0xff] %v5488_v43  ;;  %2484 = vperm.xlu0 %6678, %v11560_v39   ;;  %2472 = vperm.xlu1 %6679, %v11562_v14   ;;  %v5517_v43 = vperm.slane %v5351_v62, 5 }
 0xa50   : > { %5760 = vst [vmem:[#allocation1 + $0x1] ss:$9 sm:$0xff] %v5489_v12  ;;  %v5355_v12 = vpop.xlane.xlu2 %5354 }
 0xa51   : > { %5761 = vst [vmem:[#allocation1 + $0x2] ss:$9 sm:$0xff] %v5490_v13  ;;  %v5518_v13 = vperm.slane %v5351_v62, 6  ;;  %v5530_v31 = vperm.slane %v5355_v12, 2  ;;  %v5531_v9 = vperm.slane %v5355_v12, 3  ;;  %v5533_v39 = vperm.slane %v5355_v12, 5 }
 0xa52   : > { %5762 = vst [vmem:[#allocation1 + $0x3] ss:$9 sm:$0xff] %v5491_v48  ;;  %v5519_v48 = vperm.slane %v5351_v62, 7  ;;  %v5532_v62 = vperm.slane %v5355_v12, 4  ;;  %v5535_v14 = vperm.slane %v5355_v12, 7 }
 0xa53   : > { %5763 = vst [vmem:[#allocation1 + $0x4] ss:$9 sm:$0xff] %v5492_v60  ;;  %v11564_v60 = vld [vmem:[#allocation30_spill] sm:$0xff] }
 0xa54   : > { %5764 = vst [vmem:[#allocation1 + $0x5] ss:$9 sm:$0xff] %v5493_v36  ;;  %v11565_v36 = vld [vmem:[#allocation45_spill] sm:$0xff] }
 0xa55   : > { %5765 = vst [vmem:[#allocation1 + $0x6] ss:$9 sm:$0xff] %v5494_v8  ;;  %2478 = vperm.xlu2 %6680, %v11565_v36   ;;  %v11566_v8 = vld [vmem:[#allocation16_spill] sm:$0xff] }
 0xa56   : > { %5766 = vst [vmem:[#allocation1 + $0x7] ss:$9 sm:$0xff] %v5495_v4  ;;  %v5353_v4 = vpop.xlane.xlu1 %5352 }
 0xa57   : > { %2493 = vperm.xlu0 %6678, %v11564_v60   ;;  %2481 = vperm.xlu1 %6679, %v11566_v8   ;;  %v5520_v46 = vperm.slane %v5353_v4, 0  ;;  %v5524_v6 = vperm.slane %v5353_v4, 4  ;;  %v5525_v52 = vperm.slane %v5353_v4, 5  ;;  %v5526_v20 = vperm.slane %v5353_v4, 6 }
 0xa58   : > { %v5527_v27 = vperm.slane %v5353_v4, 7 }
 0xa5d   : > { %v10465_v23 = vld [vmem:[#allocation1] sm:$0xff] }
 0xa5e   : > { %11552 = vst [vmem:[#allocation94_spill] sm:$0xff] %v10465_v23 }
 0xa5f   : > { %5768 = vst [vmem:[#allocation1] ss:$9 sm:$0xff] %v5496_v50  ;;  %v11567_v50 = vld [vmem:[#allocation58_spill] sm:$0xff] }
 0xa60   : > { %5769 = vst [vmem:[#allocation1 + $0x1] ss:$9 sm:$0xff] %v5497_v35  ;;  %2502 = vperm.xlu0 %6678, %v11567_v50   ;;  %v5521_v35 = vperm.slane %v5353_v4, 1  ;;  %v11584_v50 = vld [vmem:[#allocation66_spill] sm:$0xff] }
 0xa61   : > { %5770 = vst [vmem:[#allocation1 + $0x2] ss:$9 sm:$0xff] %v5498_v16  ;;  %v10484_v16 = vpop.xlane.xlu2 %5360 }
 0xa62   : > { %5771 = vst [vmem:[#allocation1 + $0x3] ss:$9 sm:$0xff] %v5499_v51 }
 0xa63   : > { %5772 = vst [vmem:[#allocation1 + $0x4] ss:$9 sm:$0xff] %v5500_v47  ;;  %v11569_v47 = vld [vmem:[#allocation24_spill] sm:$0xff] }
 0xa64   : > { %5773 = vst [vmem:[#allocation1 + $0x5] ss:$9 sm:$0xff] %v5501_v38  ;;  %2487 = vperm.xlu2 %6680, %v11569_v47   ;;  %v11570_v38 = vld [vmem:[#allocation26_spill] sm:$0xff] }
 0xa65   : > { %5774 = vst [vmem:[#allocation1 + $0x6] ss:$9 sm:$0xff] %v5502_v25  ;;  %2490 = vperm.xlu1 %6679, %v11570_v38   ;;  %v5522_v25 = vperm.slane %v5353_v4, 2 }
 0xa66   : > { %5775 = vst [vmem:[#allocation1 + $0x7] ss:$9 sm:$0xff] %v5503_v55  ;;  %v5523_v55 = vperm.slane %v5353_v4, 3  ;;  %v11582_v4 = vld [vmem:[#allocation70_spill] sm:$0xff] }
 0xa68   : > { %2511 = vperm.xlu0 %6678, %v11571_v1   ;;  %v11588_v1 = vld [vmem:[#allocation69_spill] sm:$0xff] }
 0xa6d   : > { %v10470_v5 = vld [vmem:[#allocation1] sm:$0xff] }
 0xa6e   : > { %11556 = vst [vmem:[#allocation36_spill] sm:$0xff] %v10470_v5  ;;  %v11636_v5 = vld [vmem:[#allocation55_spill] sm:$0xff] }
 0xa6f   : > { %5777 = vst [vmem:[#allocation1] ss:$9 sm:$0xff] %v5504_v41  ;;  %v11572_v41 = vld [vmem:[#allocation52_spill] sm:$0xff] }
 0xa70   : > { %5778 = vst [vmem:[#allocation1 + $0x1] ss:$9 sm:$0xff] %v5505_v7  ;;  %2496 = vperm.xlu2 %6680, %v11572_v41   ;;  %v11573_v7 = vld [vmem:[#allocation56_spill] sm:$0xff] }
 0xa71   : > { %5779 = vst [vmem:[#allocation1 + $0x2] ss:$9 sm:$0xff] %v5506_v3  ;;  %2499 = vperm.xlu1 %6679, %v11573_v7   ;;  %v10493_v3 = vpop.xlane.xlu2 %5366 }
 0xa72   : > { %5780 = vst [vmem:[#allocation1 + $0x3] ss:$9 sm:$0xff] %v5507_v63  ;;  %v5528_v63 = vperm.slane %v5355_v12, 0 }
 0xa73   : > { %5781 = vst [vmem:[#allocation1 + $0x4] ss:$9 sm:$0xff] %v5508_v24  ;;  %v5529_v24 = vperm.slane %v5355_v12, 1 }
 0xa74   : > { %5782 = vst [vmem:[#allocation1 + $0x5] ss:$9 sm:$0xff] %v5509_v59  ;;  %v11574_v59 = vld [vmem:[#allocation64_spill] sm:$0xff] }
 0xa75   : > { %5783 = vst [vmem:[#allocation1 + $0x6] ss:$9 sm:$0xff] %v5510_v28  ;;  %2520 = vperm.xlu0 %6678, %v11574_v59  }
 0xa76   : > { %5784 = vst [vmem:[#allocation1 + $0x7] ss:$9 sm:$0xff] %v5511_v49  ;;  %v11576_v49 = vld [vmem:[#allocation59_spill] sm:$0xff] }
 0xa78   : > { %2505 = vperm.xlu2 %6680, %v11576_v49  }
 0xa79   : > { %2508 = vperm.xlu1 %6679, %v11577_v15   ;;  %v10500_v37 = vpop.xlane.xlu2 %5372  ;;  %v11590_v15 = vld [vmem:[#allocation47_spill] sm:$0xff] }
 0xa7d   : > { %v10478_v19 = vld [vmem:[#allocation1] sm:$0xff] }
 0xa7e   : > { %11563 = vst [vmem:[#allocation32_spill] sm:$0xff] %v10478_v19  ;;  %v11630_v19 = vld [vmem:[#allocation19_spill] sm:$0xff] }
 0xa7f   : > { %5786 = vst [vmem:[#allocation1] ss:$9 sm:$0xff] %v5512_v18  ;;  %v5534_v18 = vperm.slane %v5355_v12, 6 }
 0xa80   : > { %5787 = vst [vmem:[#allocation1 + $0x1] ss:$9 sm:$0xff] %v5513_v34  ;;  %v11578_v34 = vld [vmem:[#allocation67_spill] sm:$0xff] }
 0xa81   : > { %5788 = vst [vmem:[#allocation1 + $0x2] ss:$9 sm:$0xff] %v5514_v54  ;;  %2529 = vperm.xlu0 %6678, %v11578_v34   ;;  %v11579_v54 = vld [vmem:[#allocation62_spill] sm:$0xff] }
 0xa82   : > { %5789 = vst [vmem:[#allocation1 + $0x3] ss:$9 sm:$0xff] %v5515_v57  ;;  %2514 = vperm.xlu2 %6680, %v11579_v54   ;;  %v11580_v57 = vld [vmem:[#allocation63_spill] sm:$0xff] }
 0xa83   : > { %5790 = vst [vmem:[#allocation1 + $0x4] ss:$9 sm:$0xff] %v5516_v44  ;;  %2517 = vperm.xlu1 %6679, %v11580_v57   ;;  %v5357_v44 = vpop.xlane.xlu0 %5356 }
 0xa84   : > { %5791 = vst [vmem:[#allocation1 + $0x5] ss:$9 sm:$0xff] %v5517_v43  ;;  %v5359_v43 = vpop.xlane.xlu1 %5358  ;;  %v5537_v60 = vperm.slane %v5357_v44, 1  ;;  %v5538_v8 = vperm.slane %v5357_v44, 2  ;;  %v5539_v12 = vperm.slane %v5357_v44, 3  ;;  %v5541_v47 = vperm.slane %v5357_v44, 5 }
 0xa85   : > { %5792 = vst [vmem:[#allocation1 + $0x6] ss:$9 sm:$0xff] %v5518_v13  ;;  %v10505_v13 = vpop.xlane.xlu2 %5378  ;;  %v5542_v38 = vperm.slane %v5357_v44, 6  ;;  %v5544_v41 = vperm.slane %v5359_v43, 0  ;;  %v5545_v7 = vperm.slane %v5359_v43, 1  ;;  %v5550_v34 = vperm.slane %v5359_v43, 6 }
 0xa86   : > { %5793 = vst [vmem:[#allocation1 + $0x7] ss:$9 sm:$0xff] %v5519_v48  ;;  %v5536_v48 = vperm.slane %v5357_v44, 0  ;;  %v5551_v54 = vperm.slane %v5359_v43, 7 }
 0xa89   : > { %2538 = vperm.xlu0 %6678, %v11582_v4  }
 0xa8b   : > { %2526 = vperm.xlu1 %6679, %v11584_v50   ;;  %v5554_v50 = vperm.slane %v10484_v16, 2 }
 0xa8d   : > { %v10486_v51 = vld [vmem:[#allocation1] sm:$0xff] }
 0xa8e   : > { %11568 = vst [vmem:[#allocation33_spill] sm:$0xff] %v10486_v51 }
 0xa8f   : > { %5795 = vst [vmem:[#allocation1] ss:$9 sm:$0xff] %v5520_v46  ;;  %v11583_v46 = vld [vmem:[#allocation65_spill] sm:$0xff] }
 0xa90   : > { %5796 = vst [vmem:[#allocation1 + $0x1] ss:$9 sm:$0xff] %v5521_v35  ;;  %2523 = vperm.xlu2 %6680, %v11583_v46   ;;  %v5540_v35 = vperm.slane %v5357_v44, 4  ;;  %v5553_v46 = vperm.slane %v10484_v16, 1 }
 0xa91   : > { %5797 = vst [vmem:[#allocation1 + $0x2] ss:$9 sm:$0xff] %v5522_v25  ;;  %v5543_v25 = vperm.slane %v5357_v44, 7  ;;  %v11594_v44 = vld [vmem:[#allocation74_spill] sm:$0xff] }
 0xa92   : > { %5798 = vst [vmem:[#allocation1 + $0x3] ss:$9 sm:$0xff] %v5523_v55  ;;  %v10512_v55 = vpop.xlane.xlu0 %5362 }
 0xa93   : > { %5799 = vst [vmem:[#allocation1 + $0x4] ss:$9 sm:$0xff] %v5524_v6  ;;  %v10514_v6 = vpop.xlane.xlu1 %5364  ;;  %2535 = vperm.xlu1 %6679, %v11588_v1   ;;  %v11600_v1 = vld [vmem:[#allocation75_spill] sm:$0xff] }
 0xa94   : > { %5800 = vst [vmem:[#allocation1 + $0x5] ss:$9 sm:$0xff] %v5525_v52  ;;  %v10516_v52 = vpop.xlane.xlu2 %5384 }
 0xa95   : > { %5801 = vst [vmem:[#allocation1 + $0x6] ss:$9 sm:$0xff] %v5526_v20  ;;  %v11586_v20 = vld [vmem:[#allocation46_spill] sm:$0xff] }
 0xa96   : > { %5802 = vst [vmem:[#allocation1 + $0x7] ss:$9 sm:$0xff] %v5527_v27  ;;  %2547 = vperm.xlu0 %6678, %v11586_v20   ;;  %v11587_v27 = vld [vmem:[#allocation68_spill] sm:$0xff] }
 0xa97   : > { %11585 = vst [vmem:[#allocation37_spill] sm:$0xff] %v10516_v52 }
 0xa98   : > { %2532 = vperm.xlu2 %6680, %v11587_v27   ;;  %v11599_v27 = vld [vmem:[#allocation77_spill] sm:$0xff] }
 0xa9a   : > { %v10525_v49 = vpop.xlane.xlu0 %5368 }
 0xa9b   : > { %v10523_v59 = vpop.xlane.xlu1 %5370 }
 0xa9d   : > { %v10496_v28 = vld [vmem:[#allocation1] sm:$0xff] }
 0xa9e   : > { %11575 = vst [vmem:[#allocation42_spill] sm:$0xff] %v10496_v28  ;;  %3652 = vperm.xlu0 %6678, %v11590_v15   ;;  %v11601_v15 = vld [vmem:[#allocation79_spill] sm:$0xff]  ;;  %v11631_v28 = vld [vmem:[#allocation54_spill] sm:$0xff] }
 0xa9f   : > { %5804 = vst [vmem:[#allocation1] ss:$9 sm:$0xff] %v5528_v63 }
 0xaa0   : > { %5805 = vst [vmem:[#allocation1 + $0x1] ss:$9 sm:$0xff] %v5529_v24  ;;  %v5546_v24 = vperm.slane %v5359_v43, 2 }
 0xaa1   : > { %5806 = vst [vmem:[#allocation1 + $0x2] ss:$9 sm:$0xff] %v5530_v31  ;;  %v5547_v31 = vperm.slane %v5359_v43, 3 }
 0xaa2   : > { %5807 = vst [vmem:[#allocation1 + $0x3] ss:$9 sm:$0xff] %v5531_v9  ;;  %v5548_v9 = vperm.slane %v5359_v43, 4  ;;  %v10532_v57 = vpop.xlane.xlu0 %5374 }
 0xaa3   : > { %5808 = vst [vmem:[#allocation1 + $0x4] ss:$9 sm:$0xff] %v5532_v62  ;;  %v11591_v62 = vld [vmem:[#allocation71_spill] sm:$0xff] }
 0xaa4   : > { %5809 = vst [vmem:[#allocation1 + $0x5] ss:$9 sm:$0xff] %v5533_v39  ;;  %2541 = vperm.xlu2 %6680, %v11591_v62   ;;  %v11592_v39 = vld [vmem:[#allocation72_spill] sm:$0xff] }
 0xaa5   : > { %5810 = vst [vmem:[#allocation1 + $0x6] ss:$9 sm:$0xff] %v5534_v18  ;;  %2544 = vperm.xlu1 %6679, %v11592_v39   ;;  %v10530_v18 = vpop.xlane.xlu2 %5390  ;;  %v11602_v62 = vld [vmem:[#allocation80_spill] sm:$0xff]  ;;  %v11603_v39 = vld [vmem:[#allocation78_spill] sm:$0xff] }
 0xaa6   : > { %5811 = vst [vmem:[#allocation1 + $0x7] ss:$9 sm:$0xff] %v5535_v14  ;;  %v5549_v14 = vperm.slane %v5359_v43, 5  ;;  %3661 = vperm.xlu0 %6678, %v11594_v44  }
 0xaa7   : > { %11593 = vst [vmem:[#allocation38_spill] sm:$0xff] %v10530_v18 }
 0xaad   : > { %v10507_v36 = vld [vmem:[#allocation1] sm:$0xff]  ;;  %v10539_v4 = vpop.permute.xlu2 %2460 }
 0xaae   : > { %11581 = vst [vmem:[#allocation34_spill] sm:$0xff] %v10507_v36 }
 0xaaf   : > { %5813 = vst [vmem:[#allocation1] ss:$9 sm:$0xff] %v5536_v48  ;;  %v10535_v48 = vpop.xlane.xlu1 %5376 }
 0xab0   : > { %5814 = vst [vmem:[#allocation1 + $0x1] ss:$9 sm:$0xff] %v5537_v60  ;;  %v11595_v60 = vld [vmem:[#allocation73_spill] sm:$0xff] }
 0xab1   : > { %5815 = vst [vmem:[#allocation1 + $0x2] ss:$9 sm:$0xff] %v5538_v8  ;;  %3658 = vperm.xlu2 %6680, %v11595_v60   ;;  %v11596_v8 = vld [vmem:[#allocation49_spill] sm:$0xff] }
 0xab2   : > { %5816 = vst [vmem:[#allocation1 + $0x3] ss:$9 sm:$0xff] %v5539_v12  ;;  %3655 = vperm.xlu1 %6679, %v11596_v8   ;;  %v5552_v12 = vperm.slane %v10484_v16, 0  ;;  %v5562_v8 = vperm.slane %v10512_v55, 2 }
 0xab3   : > { %5817 = vst [vmem:[#allocation1 + $0x4] ss:$9 sm:$0xff] %v5540_v35  ;;  %v5555_v35 = vperm.slane %v10484_v16, 3 }
 0xab4   : > { %5818 = vst [vmem:[#allocation1 + $0x5] ss:$9 sm:$0xff] %v5541_v47  ;;  %v5556_v47 = vperm.slane %v10484_v16, 4 }
 0xab5   : > { %5819 = vst [vmem:[#allocation1 + $0x6] ss:$9 sm:$0xff] %v5542_v38  ;;  %v11598_v38 = vld [vmem:[#allocation76_spill] sm:$0xff] }
 0xab6   : > { %5820 = vst [vmem:[#allocation1 + $0x7] ss:$9 sm:$0xff] %v5543_v25  ;;  %3667 = vperm.xlu0 %6678, %v11598_v38   ;;  %v5557_v25 = vperm.slane %v10484_v16, 5 }
 0xab7   : > { %v10550_v20 = vpop.xlane.xlu1 %5382 }
 0xab9   : > { %3670 = vperm.xlu2 %6680, %v11599_v27  }
 0xaba   : > { %3664 = vperm.xlu1 %6679, %v11600_v1   ;;  %v11608_v1 = vld [vmem:[#allocation83_spill] sm:$0xff] }
 0xabd   : > { %v10521_v63 = vld [vmem:[#allocation1] sm:$0xff] }
 0xabe   : > { %11589 = vst [vmem:[#allocation22_spill] sm:$0xff] %v10521_v63  ;;  %3676 = vperm.xlu0 %6678, %v11601_v15  }
 0xabf   : > { %5822 = vst [vmem:[#allocation1] ss:$9 sm:$0xff] %v5544_v41  ;;  %v5558_v41 = vperm.slane %v10484_v16, 6 }
 0xac0   : > { %5823 = vst [vmem:[#allocation1 + $0x1] ss:$9 sm:$0xff] %v5545_v7  ;;  %v10555_v7 = vpop.xlane.xlu0 %5380 }
 0xac1   : > { %5824 = vst [vmem:[#allocation1 + $0x2] ss:$9 sm:$0xff] %v5546_v24  ;;  %v5559_v24 = vperm.slane %v10484_v16, 7  ;;  %3679 = vperm.xlu2 %6680, %v11602_v62   ;;  %v5561_v16 = vperm.slane %v10512_v55, 1 }
 0xac2   : > { %5825 = vst [vmem:[#allocation1 + $0x3] ss:$9 sm:$0xff] %v5547_v31  ;;  %v2464_v31 = vpop.permute.xlu2 %2463  ;;  %3673 = vperm.xlu1 %6679, %v11603_v39  }
 0xac3   : > { %5826 = vst [vmem:[#allocation1 + $0x4] ss:$9 sm:$0xff] %v5548_v9  ;;  %v11345_v9 = vlaneseq }
 0xac4   : > { %5827 = vst [vmem:[#allocation1 + $0x5] ss:$9 sm:$0xff] %v5549_v14 }
 0xac5   : > { %5828 = vst [vmem:[#allocation1 + $0x6] ss:$9 sm:$0xff] %v5550_v34  ;;  %v5560_v34 = vperm.slane %v10512_v55, 0 }
 0xac6   : > { %5829 = vst [vmem:[#allocation1 + $0x7] ss:$9 sm:$0xff] %v5551_v54  ;;  %v10564_v54 = vpop.xlane.xlu1 %5388 }
 0xac7   : > { %11605 = vst [vmem:[#allocation45_spill] sm:$0xff] %v10564_v54  ;;  %v5576_v54 = vperm.slane %v10493_v3, 0 }
 0xac8   : > { %v10561_v14 = vpop.xlane.xlu0 %5386 }
 0xac9   : > { %11604 = vst [vmem:[#allocation30_spill] sm:$0xff] %v10561_v14  ;;  %3688 = vperm.xlu2 %6680, %v11608_v1  }
 0xaca   : > { %v2470_v44 = vpop.permute.xlu2 %2469 }
 0xacd   : > { %v10543_v43 = vld [vmem:[#allocation1] sm:$0xff] }
 0xace   : > { %11597 = vst [vmem:[#allocation44_spill] sm:$0xff] %v10543_v43  ;;  %v2458_v39 = vpop.permute.xlu1 %2457 }
 0xacf   : > { %5831 = vst [vmem:[#allocation1] ss:$9 sm:$0xff] %v5552_v12  ;;  %v10571_v12 = vand.u32 127, %v11345_v9  ;;  %v5573_v9 = vperm.slane %v10514_v6, 5 }
 0xad0   : > { %5832 = vst [vmem:[#allocation1 + $0x1] ss:$9 sm:$0xff] %v5553_v46  ;;  %v5563_v46 = vperm.slane %v10512_v55, 3  ;;  %v2455_v62 = vpop.permute.xlu0 %2454 }
 0xad1   : > { %5833 = vst [vmem:[#allocation1 + $0x2] ss:$9 sm:$0xff] %v5554_v50  ;;  %v5564_v50 = vperm.slane %v10512_v55, 4  ;;  %v10578_v38 = vadd.s32 4294967288, %v10571_v12  ;;  %v10582_v27 = vadd.s32 4294967280, %v10571_v12  ;;  %v10588_v15 = vadd.s32 4294967272, %v10571_v12 }
 0xad2   : > { %5834 = vst [vmem:[#allocation1 + $0x3] ss:$9 sm:$0xff] %v5555_v35  ;;  %v5565_v35 = vperm.slane %v10512_v55, 5 }
 0xad3   : > { %5835 = vst [vmem:[#allocation1 + $0x4] ss:$9 sm:$0xff] %v5556_v47  ;;  %v11607_v47 = vld [vmem:[#allocation82_spill] sm:$0xff] }
 0xad4   : > { %5836 = vst [vmem:[#allocation1 + $0x5] ss:$9 sm:$0xff] %v5557_v25  ;;  %3685 = vperm.xlu0 %6678, %v11607_v47   ;;  %v5566_v25 = vperm.slane %v10512_v55, 6  ;;  %v11610_v47 = vld [vmem:[#allocation39_spill] sm:$0xff] }
 0xad5   : > { %5837 = vst [vmem:[#allocation1 + $0x6] ss:$9 sm:$0xff] %v5558_v41  ;;  %v11609_v41 = vld [vmem:[#allocation81_spill] sm:$0xff] }
 0xad6   : > { %5838 = vst [vmem:[#allocation1 + $0x7] ss:$9 sm:$0xff] %v5559_v24  ;;  %3682 = vperm.xlu1 %6679, %v11609_v41   ;;  %v5567_v24 = vperm.slane %v10512_v55, 7  ;;  %v2561_v55 = vperm.slane %v2464_v31, %v10588_v15  ;;  %v10605_v41 = vadd.s32 4294967256, %v10571_v12  ;;  %v5568_v31 = vperm.slane %v10514_v6, 0 }
 0xadc   : > { %3694 = vperm.xlu0 %6678, %v11610_v47   ;;  %v2569_v47 = vperm.slane %v2470_v44, %v10605_v41  ;;  %v5575_v44 = vperm.slane %v10514_v6, 7 }
 0xadd   : > { %v10567_v60 = vld [vmem:[#allocation1] sm:$0xff] }
 0xade   : > { %11606 = vst [vmem:[#allocation16_spill] sm:$0xff] %v10567_v60  ;;  %v5574_v60 = vperm.slane %v10514_v6, 6 }
 0xadf   : > { %5840 = vst [vmem:[#allocation1] ss:$9 sm:$0xff] %v5560_v34  ;;  %v10590_v34 = vpop.permute.xlu2 %2478 }
 0xae0   : > { %5841 = vst [vmem:[#allocation1 + $0x1] ss:$9 sm:$0xff] %v5561_v16  ;;  %v2551_v16 = vperm.slane %v2455_v62, %v10571_v12  ;;  %v2476_v62 = vpop.permute.xlu0 %2475 }
 0xae1   : > { %5842 = vst [vmem:[#allocation1 + $0x2] ss:$9 sm:$0xff] %v5562_v8  ;;  %v2553_v8 = vperm.slane %v2458_v39, %v10578_v38  ;;  %v5569_v39 = vperm.slane %v10514_v6, 1 }
 0xae2   : > { %5843 = vst [vmem:[#allocation1 + $0x3] ss:$9 sm:$0xff] %v5563_v46  ;;  %v2557_v46 = vperm.slane %v10539_v4, %v10582_v27  ;;  %v11612_v4 = vld [vmem:[#allocation84_spill] sm:$0xff] }
 0xae3   : > { %5844 = vst [vmem:[#allocation1 + $0x4] ss:$9 sm:$0xff] %v5564_v50  ;;  %v2555_v50 = vsel %vm2554_vm1, %v2553_v8, %v2551_v16  ;;  %3691 = vperm.xlu1 %6679, %v11612_v4   ;;  %v2467_v16 = vpop.permute.xlu1 %2466 }
 0xae4   : > { %5845 = vst [vmem:[#allocation1 + $0x5] ss:$9 sm:$0xff] %v5565_v35  ;;  %v2559_v35 = vsel %vm2558_vm2, %v2557_v46, %v2555_v50 }
 0xae5   : > { %5846 = vst [vmem:[#allocation1 + $0x6] ss:$9 sm:$0xff] %v5566_v25  ;;  %v10601_v25 = vadd.s32 4294967264, %v10571_v12  ;;  %v2563_v1 = vsel %vm2562_vm3, %v2561_v55, %v2559_v35  ;;  %v5570_v55 = vperm.slane %v10514_v6, 2  ;;  %v5571_v35 = vperm.slane %v10514_v6, 3 }
 0xae6   : > { %5847 = vst [vmem:[#allocation1 + $0x7] ss:$9 sm:$0xff] %v5567_v24  ;;  %v11611_v24 = vld [vmem:[#allocation35_spill] sm:$0xff] }
 0xae7   : > { %3697 = vperm.xlu2 %6680, %v11611_v24   ;;  %v10611_v8 = vpop.permute.xlu2 %2487  ;;  %v2565_v50 = vperm.slane %v2467_v16, %v10601_v25  ;;  %v5572_v24 = vperm.slane %v10514_v6, 4  ;;  %v11614_v16 = vld [vmem:[#allocation43_spill] sm:$0xff] }
 0xae8   : > { %3703 = vperm.xlu0 %6678, %v11614_v16  }
 0xae9   : > { %v2567_v4 = vsel %vm2566_vm4, %v2565_v50, %v2563_v1  ;;  %v11615_v1 = vld [vmem:[#allocation21_spill] sm:$0xff]  ;;  %v10635_v50 = vadd.s32 4294967232, %v10571_v12 }
 0xaea   : > { %v2571_v18 = vsel %vm2570_vm5, %v2569_v47, %v2567_v4 }
 0xaeb   : > { %v2473_v47 = vpop.permute.xlu1 %2472  ;;  %v2581_v16 = vperm.slane %v10590_v34, %v10635_v50  ;;  %v10658_v34 = vadd.s32 4294967208, %v10571_v12 }
 0xaed   : > { %v10613_v46 = vld [vmem:[#allocation1] sm:$0xff]  ;;  %v2593_v63 = vperm.slane %v10611_v8, %v10658_v34  ;;  %v10682_v8 = vadd.s32 4294967192, %v10571_v12 }
 0xaee   : > { %11613 = vst [vmem:[#allocation58_spill] sm:$0xff] %v10613_v46  ;;  %v11619_v46 = vld [vmem:[#allocation17_spill] sm:$0xff] }
 0xaef   : > { %5849 = vst [vmem:[#allocation1] ss:$9 sm:$0xff] %v5568_v31  ;;  %v10626_v31 = vadd.s32 4294967248, %v10571_v12  ;;  %3706 = vperm.xlu2 %6680, %v11615_v1   ;;  %v10637_v4 = vpop.permute.xlu2 %2496 }
 0xaf0   : > { %5850 = vst [vmem:[#allocation1 + $0x1] ss:$9 sm:$0xff] %v5569_v39  ;;  %v10630_v39 = vadd.s32 4294967240, %v10571_v12 }
 0xaf1   : > { %5851 = vst [vmem:[#allocation1 + $0x2] ss:$9 sm:$0xff] %v5570_v55  ;;  %v11616_v55 = vld [vmem:[#allocation40_spill] sm:$0xff]  ;;  %v2573_v6 = vperm.slane %v2473_v47, %v10626_v31  ;;  %v10652_v47 = vadd.s32 4294967216, %v10571_v12 }
 0xaf2   : > { %5852 = vst [vmem:[#allocation1 + $0x3] ss:$9 sm:$0xff] %v5571_v35  ;;  %3700 = vperm.xlu1 %6679, %v11616_v55   ;;  %v2485_v35 = vpop.permute.xlu0 %2484  ;;  %v11617_v55 = vld [vmem:[#allocation27_spill] sm:$0xff] }
 0xaf3   : > { %5853 = vst [vmem:[#allocation1 + $0x4] ss:$9 sm:$0xff] %v5572_v24  ;;  %v2577_v24 = vperm.slane %v2476_v62, %v10630_v39  ;;  %3712 = vperm.xlu0 %6678, %v11617_v55   ;;  %v11618_v62 = vld [vmem:[#allocation23_spill] sm:$0xff]  ;;  %v5579_v55 = vperm.slane %v10493_v3, 3  ;;  %v2589_v36 = vperm.slane %v2485_v35, %v10652_v47  ;;  %v10678_v35 = vadd.s32 4294967200, %v10571_v12 }
 0xaf4   : > { %5854 = vst [vmem:[#allocation1 + $0x5] ss:$9 sm:$0xff] %v5573_v9  ;;  %v2575_v9 = vsel %vm2574_vm6, %v2573_v6, %v2571_v18  ;;  %v5577_v18 = vperm.slane %v10493_v3, 1 }
 0xaf5   : > { %5855 = vst [vmem:[#allocation1 + $0x6] ss:$9 sm:$0xff] %v5574_v60  ;;  %v2579_v1 = vsel %vm2578_vm7, %v2577_v24, %v2575_v9  ;;  %v10647_v60 = vadd.s32 4294967224, %v10571_v12  ;;  %v5578_v9 = vperm.slane %v10493_v3, 2 }
 0xaf6   : > { %5856 = vst [vmem:[#allocation1 + $0x7] ss:$9 sm:$0xff] %v5575_v44  ;;  %v2583_v44 = vsel %vm2582_vm8, %v2581_v16, %v2579_v1  ;;  %v2482_v16 = vpop.permute.xlu1 %2481 }
 0xaf7   : > { %3715 = vperm.xlu2 %6680, %v11618_v62   ;;  %v10663_v1 = vpop.permute.xlu2 %2505  ;;  %v5580_v62 = vperm.slane %v10493_v3, 4 }
 0xafa   : > { %3709 = vperm.xlu1 %6679, %v11619_v46   ;;  %v2494_v6 = vpop.permute.xlu0 %2493  ;;  %v2585_v46 = vperm.slane %v2482_v16, %v10647_v60  ;;  %v11621_v16 = vld [vmem:[#allocation29_spill] sm:$0xff] }
 0xafb   : > { %3721 = vperm.xlu0 %6678, %v11621_v16   ;;  %v11625_v16 = vld [vmem:[#allocation28_spill] sm:$0xff] }
 0xafc   : > { %v2587_v43 = vsel %vm2586_vm9, %v2585_v46, %v2583_v44  ;;  %v11622_v44 = vld [vmem:[#allocation48_spill] sm:$0xff] }
 0xafd   : > { %v10660_v24 = vld [vmem:[#allocation1] sm:$0xff]  ;;  %v2591_v14 = vsel %vm11353_vm10, %v2589_v36, %v2587_v43 }
 0xafe   : > { %11620 = vst [vmem:[#allocation24_spill] sm:$0xff] %v10660_v24  ;;  %v5581_v24 = vperm.slane %v10493_v3, 5 }
 0xaff   : > { %5858 = vst [vmem:[#allocation1] ss:$9 sm:$0xff] %v5576_v54  ;;  %v5582_v54 = vperm.slane %v10493_v3, 6  ;;  %3724 = vperm.xlu2 %6680, %v11622_v44   ;;  %v10688_v43 = vpop.permute.xlu2 %2514  ;;  %v11626_v44 = vld [vmem:[#allocation20_spill] sm:$0xff] }
 0xb00   : > { %5859 = vst [vmem:[#allocation1 + $0x1] ss:$9 sm:$0xff] %v5577_v18  ;;  %v5583_v18 = vperm.slane %v10493_v3, 7  ;;  %v2491_v3 = vpop.permute.xlu1 %2490 }
 0xb01   : > { %5860 = vst [vmem:[#allocation1 + $0x2] ss:$9 sm:$0xff] %v5578_v9  ;;  %v2595_v9 = vsel %vm11354_vm11, %v2593_v63, %v2591_v14  ;;  %v2597_v46 = vperm.slane %v2491_v3, %v10678_v35  ;;  %v2601_v63 = vperm.slane %v2494_v6, %v10682_v8  ;;  %v5586_v3 = vperm.slane %v10525_v49, 2 }
 0xb02   : > { %5861 = vst [vmem:[#allocation1 + $0x3] ss:$9 sm:$0xff] %v5579_v55  ;;  %v11623_v55 = vld [vmem:[#allocation41_spill] sm:$0xff]  ;;  %v10686_v36 = vpop.permute.xlu0 %2502 }
 0xb03   : > { %5862 = vst [vmem:[#allocation1 + $0x4] ss:$9 sm:$0xff] %v5580_v62  ;;  %3718 = vperm.xlu1 %6679, %v11623_v55   ;;  %v2599_v14 = vsel %vm11352_vm12, %v2597_v46, %v2595_v9  ;;  %v5584_v62 = vperm.slane %v10525_v49, 0  ;;  %v5587_v9 = vperm.slane %v10525_v49, 3 }
 0xb04   : > { %5863 = vst [vmem:[#allocation1 + $0x5] ss:$9 sm:$0xff] %v5581_v24  ;;  %v10694_v24 = vsel %vm11351_vm13, %v2601_v63, %v2599_v14  ;;  %v5588_v14 = vperm.slane %v10525_v49, 4 }
 0xb05   : > { %5864 = vst [vmem:[#allocation1 + $0x6] ss:$9 sm:$0xff] %v5582_v54  ;;  %v11624_v54 = vld [vmem:[#allocation18_spill] sm:$0xff] }
 0xb06   : > { %5865 = vst [vmem:[#allocation1 + $0x7] ss:$9 sm:$0xff] %v5583_v18  ;;  %3730 = vperm.xlu0 %6678, %v11624_v54   ;;  %v5585_v18 = vperm.slane %v10525_v49, 1  ;;  %v5589_v54 = vperm.slane %v10525_v49, 5 }
 0xb07   : > { %3733 = vperm.xlu2 %6680, %v11625_v16   ;;  %v10707_v63 = vpop.permute.xlu2 %2523  ;;  %v5590_v16 = vperm.slane %v10525_v49, 6 }
 0xb08   : > { %v10705_v46 = vpop.permute.xlu1 %2499 }
 0xb0a   : > { %v2512_v6 = vpop.permute.xlu0 %2511 }
 0xb0b   : > { %3727 = vperm.xlu1 %6679, %v11626_v44   ;;  %v5591_v44 = vperm.slane %v10525_v49, 7 }
 0xb0d   : > { %v10701_v55 = vld [vmem:[#allocation1] sm:$0xff] }
 0xb0e   : > { %11627 = vst [vmem:[#allocation26_spill] sm:$0xff] %v10701_v55  ;;  %v11629_v55 = vld [vmem:[#allocation31_spill] sm:$0xff] }
 0xb0f   : > { %5867 = vst [vmem:[#allocation1] ss:$9 sm:$0xff] %v5584_v62  ;;  %v11628_v62 = vld [vmem:[#allocation25_spill] sm:$0xff]  ;;  %3742 = vperm.xlu2 %6680, %v11629_v55   ;;  %v10718_v51 = vpop.permute.xlu2 %2532  ;;  %v11634_v55 = vld [vmem:[#allocation50_spill] sm:$0xff] }
 0xb10   : > { %5868 = vst [vmem:[#allocation1 + $0x1] ss:$9 sm:$0xff] %v5585_v18  ;;  %3739 = vperm.xlu0 %6678, %v11628_v62   ;;  %v5596_v62 = vperm.slane %v10523_v59, 4 }
 0xb11   : > { %5869 = vst [vmem:[#allocation1 + $0x2] ss:$9 sm:$0xff] %v5586_v3  ;;  %v2509_v3 = vpop.permute.xlu1 %2508 }
 0xb12   : > { %5870 = vst [vmem:[#allocation1 + $0x3] ss:$9 sm:$0xff] %v5587_v9  ;;  %v10716_v18 = vpop.permute.xlu0 %2520  ;;  %v5592_v9 = vperm.slane %v10523_v59, 0 }
 0xb13   : > { %5871 = vst [vmem:[#allocation1 + $0x4] ss:$9 sm:$0xff] %v5588_v14  ;;  %3736 = vperm.xlu1 %6679, %v11630_v19   ;;  %v5593_v14 = vperm.slane %v10523_v59, 1  ;;  %v5595_v19 = vperm.slane %v10523_v59, 3 }
 0xb14   : > { %5872 = vst [vmem:[#allocation1 + $0x5] ss:$9 sm:$0xff] %v5589_v54  ;;  %v5594_v54 = vperm.slane %v10523_v59, 2 }
 0xb15   : > { %5873 = vst [vmem:[#allocation1 + $0x6] ss:$9 sm:$0xff] %v5590_v16  ;;  %v11633_v16 = vld [vmem:[#allocation53_spill] sm:$0xff] }
 0xb16   : > { %5874 = vst [vmem:[#allocation1 + $0x7] ss:$9 sm:$0xff] %v5591_v44 }
 0xb17   : > { %4817 = vperm.xlu2 %6680, %v11633_v16   ;;  %v10732_v23 = vpop.permute.xlu2 %2541  ;;  %v5599_v16 = vperm.slane %v10523_v59, 7 }
 0xb18   : > { %4814 = vperm.xlu0 %6678, %v11631_v28   ;;  %v5597_v28 = vperm.slane %v10523_v59, 5 }
 0xb19   : > { %v2518_v58 = vpop.permute.xlu1 %2517 }
 0xb1a   : > { %v10729_v44 = vpop.permute.xlu0 %2529 }
 0xb1b   : > { %3745 = vperm.xlu1 %6679, %v11634_v55   ;;  %v11635_v55 = vld [vmem:[#allocation57_spill] sm:$0xff] }
 0xb1d   : > { %v10723_v49 = vld [vmem:[#allocation1] sm:$0xff] }
 0xb1e   : > { %11632 = vst [vmem:[#allocation61_spill] sm:$0xff] %v10723_v49  ;;  %v5598_v49 = vperm.slane %v10523_v59, 6 }
 0xb1f   : > { %5876 = vst [vmem:[#allocation1] ss:$9 sm:$0xff] %v5592_v9  ;;  %v2613_v9 = vperm.slane %v10663_v1, %v10578_v38  ;;  %4826 = vperm.xlu2 %6680, %v11636_v5   ;;  %v10748_v52 = vpop.permute.xlu2 %3658  ;;  %v2621_v5 = vperm.slane %v2518_v58, %v10605_v41 }
 0xb20   : > { %5877 = vst [vmem:[#allocation1 + $0x1] ss:$9 sm:$0xff] %v5593_v14  ;;  %v2615_v14 = vperm.slane %v2509_v3, %v10582_v27  ;;  %4823 = vperm.xlu0 %6678, %v11635_v55   ;;  %v2617_v3 = vperm.slane %v2512_v6, %v10588_v15  ;;  %v5603_v6 = vperm.slane %v10500_v37, 3 }
 0xb21   : > { %5878 = vst [vmem:[#allocation1 + $0x2] ss:$9 sm:$0xff] %v5594_v54  ;;  %v2612_v54 = vperm.slane %v10686_v36, %v10571_v12 }
 0xb22   : > { %5879 = vst [vmem:[#allocation1 + $0x3] ss:$9 sm:$0xff] %v5595_v19  ;;  %v11637_v19 = vld [vmem:[#allocation51_spill] sm:$0xff] }
 0xb23   : > { %5880 = vst [vmem:[#allocation1 + $0x4] ss:$9 sm:$0xff] %v5596_v62  ;;  %4820 = vperm.xlu1 %6679, %v11637_v19   ;;  %v10745_v62 = vpop.permute.xlu0 %2538  ;;  %v2614_v59 = vsel %vm2554_vm1, %v2613_v9, %v2612_v54  ;;  %v5602_v19 = vperm.slane %v10500_v37, 2  ;;  %v2619_v9 = vperm.slane %v10688_v43, %v10601_v25  ;;  %v11639_v54 = vld [vmem:[#allocation85_spill] sm:$0xff] }
 0xb24   : > { %5881 = vst [vmem:[#allocation1 + $0x5] ss:$9 sm:$0xff] %v5597_v28  ;;  %v2527_v28 = vpop.permute.xlu1 %2526  ;;  %v2616_v1 = vsel %vm2558_vm2, %v2615_v14, %v2614_v59  ;;  %v11640_v14 = vld [vmem:[#allocation87_spill] sm:$0xff]  ;;  %v11641_v59 = vld [vmem:[#allocation86_spill] sm:$0xff] }
 0xb25   : > { %5882 = vst [vmem:[#allocation1 + $0x6] ss:$9 sm:$0xff] %v5598_v49  ;;  %v5600_v49 = vperm.slane %v10500_v37, 0  ;;  %v2618_v36 = vsel %vm2562_vm3, %v2617_v3, %v2616_v1  ;;  %v5604_v1 = vperm.slane %v10500_v37, 4 }
 0xb26   : > { %5883 = vst [vmem:[#allocation1 + $0x7] ss:$9 sm:$0xff] %v5599_v16  ;;  %v5601_v16 = vperm.slane %v10500_v37, 1  ;;  %v2620_v58 = vsel %vm2566_vm4, %v2619_v9, %v2618_v36  ;;  %v11642_v9 = vld [vmem:[#allocation88_spill] sm:$0xff] }
 0xb27   : > { %4835 = vperm.xlu2 %6680, %v11640_v14   ;;  %v2622_v43 = vsel %vm2570_vm5, %v2621_v5, %v2620_v58  ;;  %v5606_v14 = vperm.slane %v10500_v37, 6  ;;  %v2625_v5 = vperm.slane %v10707_v63, %v10630_v39  ;;  %v11643_v58 = vld [vmem:[#allocation90_spill] sm:$0xff]  ;;  %v5608_v63 = vperm.slane %v10532_v57, 0 }
 0xb28   : > { %4829 = vperm.xlu0 %6678, %v11639_v54  }
 0xb2b   : > { %4832 = vperm.xlu1 %6679, %v11641_v59   ;;  %v10767_v3 = vpop.permute.xlu0 %2547  ;;  %v5607_v59 = vperm.slane %v10500_v37, 7 }
 0xb2c   : > { %v2536_v54 = vpop.permute.xlu1 %2535 }
 0xb2d   : > { %v10756_v55 = vld [vmem:[#allocation1] sm:$0xff] }
 0xb2e   : > { %11638 = vst [vmem:[#allocation52_spill] sm:$0xff] %v10756_v55  ;;  %v5605_v55 = vperm.slane %v10500_v37, 5 }
 0xb2f   : > { %5885 = vst [vmem:[#allocation1] ss:$9 sm:$0xff] %v5600_v49  ;;  %v10771_v49 = vpop.permute.xlu2 %3670  ;;  %4844 = vperm.xlu2 %6680, %v11643_v58   ;;  %v5612_v58 = vperm.slane %v10532_v57, 4 }
 0xb30   : > { %5886 = vst [vmem:[#allocation1 + $0x1] ss:$9 sm:$0xff] %v5601_v16  ;;  %v2623_v16 = vperm.slane %v10716_v18, %v10626_v31  ;;  %4838 = vperm.xlu0 %6678, %v11642_v9   ;;  %v11644_v18 = vld [vmem:[#allocation89_spill] sm:$0xff] }
 0xb31   : > { %5887 = vst [vmem:[#allocation1 + $0x2] ss:$9 sm:$0xff] %v5602_v19  ;;  %v2627_v19 = vperm.slane %v2527_v28, %v10635_v50 }
 0xb32   : > { %5888 = vst [vmem:[#allocation1 + $0x3] ss:$9 sm:$0xff] %v5603_v6  ;;  %v2624_v36 = vsel %vm2574_vm6, %v2623_v16, %v2622_v43  ;;  %v2633_v16 = vperm.slane %v2536_v54, %v10658_v34 }
 0xb33   : > { %5889 = vst [vmem:[#allocation1 + $0x4] ss:$9 sm:$0xff] %v5604_v1  ;;  %v2626_v6 = vsel %vm2578_vm7, %v2625_v5, %v2624_v36  ;;  %4841 = vperm.xlu1 %6679, %v11644_v18   ;;  %v2629_v1 = vperm.slane %v10729_v44, %v10647_v60  ;;  %v2631_v36 = vperm.slane %v10718_v51, %v10652_v47  ;;  %v5611_v44 = vperm.slane %v10532_v57, 3  ;;  %v11646_v18 = vld [vmem:[#allocation93_spill] sm:$0xff] }
 0xb34   : > { %5890 = vst [vmem:[#allocation1 + $0x5] ss:$9 sm:$0xff] %v5605_v55  ;;  %v2628_v37 = vsel %vm2582_vm8, %v2627_v19, %v2626_v6  ;;  %v3653_v55 = vpop.permute.xlu0 %3652  ;;  %v2545_v28 = vpop.permute.xlu1 %2544  ;;  %v5610_v19 = vperm.slane %v10532_v57, 2  ;;  %v11645_v6 = vld [vmem:[#allocation91_spill] sm:$0xff]  ;;  %v5613_v51 = vperm.slane %v10532_v57, 5 }
 0xb35   : > { %5891 = vst [vmem:[#allocation1 + $0x6] ss:$9 sm:$0xff] %v5606_v14  ;;  %v2630_v14 = vsel %vm2586_vm9, %v2629_v1, %v2628_v37  ;;  %v10808_v37 = vadd.s32 4294967184, %v10571_v12  ;;  %v2635_v1 = vperm.slane %v10745_v62, %v10678_v35  ;;  %v2637_v62 = vperm.slane %v10732_v23, %v10682_v8 }
 0xb36   : > { %5892 = vst [vmem:[#allocation1 + $0x7] ss:$9 sm:$0xff] %v5607_v59  ;;  %v5609_v59 = vperm.slane %v10532_v57, 1  ;;  %v2632_v9 = vsel %vm11353_vm10, %v2631_v36, %v2630_v14  ;;  %v5614_v14 = vperm.slane %v10532_v57, 6 }
 0xb37   : > { %v10788_v43 = vpop.permute.xlu2 %3679  ;;  %v2634_v54 = vsel %vm11354_vm11, %v2633_v16, %v2632_v9  ;;  %4853 = vperm.xlu2 %6680, %v10000_v29   ;;  %v2639_v9 = vperm.slane %v2545_v28, %v10808_v37 }
 0xb38   : > { %4847 = vperm.xlu0 %6678, %v11645_v6   ;;  %v2636_v29 = vsel %vm11352_vm12, %v2635_v1, %v2634_v54  ;;  %v11648_v1 = vld [vmem:[#allocation97_spill] sm:$0xff] }
 0xb39   : > { %v2638_v28 = vsel %vm11351_vm13, %v2637_v62, %v2636_v29 }
 0xb3a   : > { %v2640_v23 = vsel %vm2606_vm14, %v2639_v9, %v2638_v28  ;;  %v3758_v28 = vperm.slane %v10771_v49, %v10626_v31 }
 0xb3b   : > { %4850 = vperm.xlu1 %6679, %v11646_v18   ;;  %v11647_v18 = vld [vmem:[#allocation95_spill] sm:$0xff] }
 0xb3c   : > { %v3656_v16 = vpop.permute.xlu1 %3655 }
 0xb3d   : > { %v10796_v5 = vld [vmem:[#allocation1] sm:$0xff]  ;;  %v3748_v6 = vperm.slane %v3656_v16, %v10578_v38 }
 0xb3e   : > { %5894 = vst [vmem:[#allocation1] ss:$9 sm:$0xff] %v5608_v63  ;;  %v3662_v63 = vpop.permute.xlu0 %3661 }
 0xb3f   : > { %5895 = vst [vmem:[#allocation1 + $0x1] ss:$9 sm:$0xff] %v5609_v59  ;;  %v5615_v59 = vperm.slane %v10532_v57, 7  ;;  %v10814_v36 = vpop.permute.xlu2 %3688  ;;  %v3752_v57 = vperm.slane %v3662_v63, %v10588_v15  ;;  %4862 = vperm.xlu2 %6680, %v11648_v1   ;;  %v11649_v63 = vld [vmem:[#allocation96_spill] sm:$0xff]  ;;  %v11650_v1 = vld [vmem:[#allocation98_spill] sm:$0xff] }
 0xb40   : > { %5896 = vst [vmem:[#allocation1 + $0x2] ss:$9 sm:$0xff] %v5610_v19  ;;  %v3747_v19 = vperm.slane %v3653_v55, %v10571_v12  ;;  %v10827_v55 = vadd.s32 4294967176, %v10571_v12  ;;  %4856 = vperm.xlu0 %6678, %v11647_v18   ;;  %v5619_v18 = vperm.slane %v10535_v48, 3 }
 0xb41   : > { %5897 = vst [vmem:[#allocation1 + $0x3] ss:$9 sm:$0xff] %v5611_v44  ;;  %v3750_v44 = vperm.slane %v10748_v52, %v10582_v27 }
 0xb42   : > { %5898 = vst [vmem:[#allocation1 + $0x4] ss:$9 sm:$0xff] %v5612_v58  ;;  %v3749_v58 = vsel %vm2554_vm1, %v3748_v6, %v3747_v19  ;;  %v5616_v19 = vperm.slane %v10535_v48, 0  ;;  %v5617_v6 = vperm.slane %v10535_v48, 1  ;;  %v2609_v62 = vperm.slane %v10705_v46, %v10827_v55 }
 0xb43   : > { %5899 = vst [vmem:[#allocation1 + $0x5] ss:$9 sm:$0xff] %v5613_v51  ;;  %v3751_v54 = vsel %vm2558_vm2, %v3750_v44, %v3749_v58  ;;  %v2641_v51 = vperm.slane %v10767_v3, %v10827_v55  ;;  %4859 = vperm.xlu1 %6679, %v11649_v63   ;;  %v5618_v3 = vperm.slane %v10535_v48, 2  ;;  %v2605_v58 = vperm.slane %v10637_v4, %v10808_v37 }
 0xb44   : > { %5900 = vst [vmem:[#allocation1 + $0x6] ss:$9 sm:$0xff] %v5614_v14  ;;  %v3753_v52 = vsel %vm2562_vm3, %v3752_v57, %v3751_v54  ;;  %v3665_v16 = vpop.permute.xlu1 %3664  ;;  %v5620_v46 = vperm.slane %v10535_v48, 4 }
 0xb45   : > { %5901 = vst [vmem:[#allocation1 + $0x7] ss:$9 sm:$0xff] %v5615_v59  ;;  %v2642_v59 = vsel %vm11350_vm15, %v2641_v51, %v2640_v23  ;;  %v3754_v9 = vperm.slane %v3665_v16, %v10601_v25  ;;  %v2607_v4 = vsel %vm2606_vm14, %v2605_v58, %v10694_v24  ;;  %v5622_v16 = vperm.slane %v10535_v48, 6  ;;  %v11656_v58 = vld [vmem:[#allocation101_spill] sm:$0xff] }
 0xb46   : > { %v3668_v14 = vpop.permute.xlu0 %3667  ;;  %v2643_v54 = vrot.slane %v2642_v59, 7  ;;  %v2611_v63 = vsel %vm11350_vm15, %v2609_v62, %v2607_v4  ;;  %v11652_v59 = vld [vmem:[#allocation99_spill] sm:$0xff]  ;;  %v11653_v62 = vlaneseq  ;;  %v5626_v4 = vperm.slane %v10505_v13, 2 }
 0xb47   : > { %v10839_v29 = vpop.permute.xlu2 %3697  ;;  %v3756_v44 = vperm.slane %v3668_v14, %v10605_v41  ;;  %v3755_v23 = vsel %vm2566_vm4, %v3754_v9, %v3753_v52  ;;  %v5621_v52 = vperm.slane %v10535_v48, 5  ;;  %v11651_v14 = vld [vmem:[#allocation100_spill] sm:$0xff] }
 0xb48   : > { %4865 = vperm.xlu0 %6678, %v11650_v1   ;;  %4871 = vperm.xlu2 %6680, %v11651_v14   ;;  %vm10881_vm15 = vcmp.lt.s32.totalorder %v11653_v62, 256  ;;  %v5627_v1 = vperm.slane %v10505_v13, 3 }
 0xb49   : > { %v3757_v51 = vsel %vm2570_vm5, %v3756_v44, %v3755_v23 }
 0xb4a   : > { %v10865_v49 = vsel %vm2574_vm6, %v3758_v28, %v3757_v51  ;;  %v11657_v28 = vld [vmem:[#allocation102_spill] sm:$0xff]  ;;  %v5625_v51 = vperm.slane %v10505_v13, 1 }
 0xb4b   : > { %4868 = vperm.xlu1 %6679, %v11652_v59   ;;  %v5631_v59 = vperm.slane %v10505_v13, 7 }
 0xb4c   : > { %v10849_v57 = vld [vmem:[#allocation1] sm:$0xff]  ;;  %v10875_v9 = vpop.permute.xlu1 %3673 }
 0xb4d   : > { %5903 = vst [vmem:[#allocation1] ss:$9 sm:$0xff] %v5616_v19  ;;  %v2645_v19 = vsel %vm2644_vm0, %v2611_v63, %v2643_v54  ;;  %v5630_v63 = vperm.slane %v10505_v13, 6 }
 0xb4e   : > { %5904 = vst [vmem:[#allocation1 + $0x1] ss:$9 sm:$0xff] %v5617_v6  ;;  %v10873_v24 = vpop.permute.xlu0 %3676 }
 0xb4f   : > { %5905 = vst [vmem:[#allocation1 + $0x2] ss:$9 sm:$0xff] %v5618_v3  ;;  %v10877_v6 = vpop.permute.xlu2 %3706  ;;  %v5623_v3 = vperm.slane %v10535_v48, 7 }
 0xb50   : > { %5906 = vst [vmem:[#allocation1 + $0x3] ss:$9 sm:$0xff] %v5619_v18  ;;  %4874 = vperm.xlu0 %6678, %v11656_v58   ;;  %4880 = vperm.xlu2 %6680, %v10202_v22   ;;  %v5624_v18 = vperm.slane %v10505_v13, 0  ;;  %v5628_v22 = vperm.slane %v10505_v13, 4  ;;  %v5634_v58 = vperm.slane %v10555_v7, 2 }
 0xb51   : > { %5907 = vst [vmem:[#allocation1 + $0x4] ss:$9 sm:$0xff] %v5620_v46 }
 0xb52   : > { %5908 = vst [vmem:[#allocation1 + $0x5] ss:$9 sm:$0xff] %v5621_v52  ;;  %v5629_v52 = vperm.slane %v10505_v13, 5  ;;  %v5633_v13 = vperm.slane %v10555_v7, 1 }
 0xb53   : > { %5909 = vst [vmem:[#allocation1 + $0x6] ss:$9 sm:$0xff] %v5622_v16  ;;  %4877 = vperm.xlu1 %6679, %v11657_v28   ;;  %v5635_v28 = vperm.slane %v10555_v7, 3 }
 0xb54   : > { %2651 = vst.msk [vmem:[%s10885_s20] ss:$4 sm:$0x3] %vm10881_vm15, %v2645_v19  ;;  %v10895_v54 = vpop.permute.xlu1 %3682 }
 0xb55   : > { %5910 = vst [vmem:[#allocation1 + $0x7] ss:$9 sm:$0xff] %v5623_v3 }
 0xb56   : > { %v10893_v48 = vpop.permute.xlu0 %3685 }
 0xb57   : > { %v10897_v23 = vpop.permute.xlu2 %3715 }
 0xb58   : > { %4883 = vperm.xlu0 %6678, %v10233_v42   ;;  %4889 = vperm.xlu2 %6680, %v10300_v56  }
 0xb5b   : > { %4886 = vperm.xlu1 %6679, %v10265_v30   ;;  %v5632_v30 = vperm.slane %v10555_v7, 0 }
 0xb5c   : > { %v10901_v46 = vld [vmem:[#allocation1] sm:$0xff]  ;;  %v10914_v16 = vpop.permute.xlu1 %3691 }
 0xb5d   : > { %5912 = vst [vmem:[#allocation1] ss:$9 sm:$0xff] %v5624_v18  ;;  %v5639_v18 = vperm.slane %v10555_v7, 7 }
 0xb5e   : > { %5913 = vst [vmem:[#allocation1 + $0x1] ss:$9 sm:$0xff] %v5625_v51  ;;  %v10911_v14 = vpop.permute.xlu0 %3694 }
 0xb5f   : > { %5914 = vst [vmem:[#allocation1 + $0x2] ss:$9 sm:$0xff] %v5626_v4  ;;  %v10916_v19 = vpop.permute.xlu2 %3724 }
 0xb60   : > { %5915 = vst [vmem:[#allocation1 + $0x3] ss:$9 sm:$0xff] %v5627_v1  ;;  %4892 = vperm.xlu0 %6678, %v10330_v45   ;;  %4898 = vperm.xlu2 %6680, %v10361_v33   ;;  %v5636_v45 = vperm.slane %v10555_v7, 4  ;;  %v5638_v33 = vperm.slane %v10555_v7, 6 }
 0xb61   : > { %5916 = vst [vmem:[#allocation1 + $0x4] ss:$9 sm:$0xff] %v5628_v22 }
 0xb62   : > { %5917 = vst [vmem:[#allocation1 + $0x5] ss:$9 sm:$0xff] %v5629_v52 }
 0xb63   : > { %5918 = vst [vmem:[#allocation1 + $0x6] ss:$9 sm:$0xff] %v5630_v63  ;;  %4895 = vperm.xlu1 %6679, %v10346_v11   ;;  %v5637_v11 = vperm.slane %v10555_v7, 5  ;;  %v5640_v63 = vperm.slane %v10550_v20, 0 }
 0xb64   : > { %5919 = vst [vmem:[#allocation1 + $0x7] ss:$9 sm:$0xff] %v5631_v59  ;;  %v3701_v56 = vpop.permute.xlu1 %3700 }
 0xb65   : > { %v3778_v51 = vperm.slane %v3701_v56, %v10571_v12 }
 0xb66   : > { %v3704_v42 = vpop.permute.xlu0 %3703 }
 0xb67   : > { %v10922_v3 = vpop.permute.xlu2 %3733 }
 0xb68   : > { %4901 = vperm.xlu0 %6678, %v10373_v2   ;;  %4907 = vperm.xlu2 %6680, %v10391_v21   ;;  %v3779_v2 = vperm.slane %v3704_v42, %v10578_v38 }
 0xb6a   : > { %v3780_v52 = vsel %vm2554_vm1, %v3779_v2, %v3778_v51  ;;  %v3760_v51 = vperm.slane %v10875_v9, %v10630_v39 }
 0xb6b   : > { %v10925_v62 = vld [vmem:[#allocation1] sm:$0xff]  ;;  %4904 = vperm.xlu1 %6679, %v10382_v32   ;;  %v3781_v32 = vperm.slane %v10877_v6, %v10582_v27 }
 0xb6c   : > { %5921 = vst [vmem:[#allocation1] ss:$9 sm:$0xff] %v5632_v30  ;;  %v3710_v1 = vpop.permute.xlu1 %3709  ;;  %v5641_v30 = vperm.slane %v10550_v20, 1 }
 0xb6d   : > { %5922 = vst [vmem:[#allocation1 + $0x1] ss:$9 sm:$0xff] %v5633_v13  ;;  %v3783_v21 = vperm.slane %v3710_v1, %v10588_v15  ;;  %v3782_v7 = vsel %vm2558_vm2, %v3781_v32, %v3780_v52  ;;  %v5647_v1 = vperm.slane %v10550_v20, 7 }
 0xb6e   : > { %5923 = vst [vmem:[#allocation1 + $0x2] ss:$9 sm:$0xff] %v5634_v58  ;;  %v3713_v4 = vpop.permute.xlu0 %3712 }
 0xb6f   : > { %5924 = vst [vmem:[#allocation1 + $0x3] ss:$9 sm:$0xff] %v5635_v28  ;;  %v10937_v22 = vpop.permute.xlu2 %3742  ;;  %v3784_v59 = vsel %vm2562_vm3, %v3783_v21, %v3782_v7  ;;  %v3785_v56 = vperm.slane %v3713_v4, %v10601_v25 }
 0xb70   : > { %5925 = vst [vmem:[#allocation1 + $0x4] ss:$9 sm:$0xff] %v5636_v45  ;;  %5976 = vperm.xlu0 %6678, %v10393_v53   ;;  %5982 = vperm.xlu2 %6680, %v10397_v17   ;;  %v5642_v53 = vperm.slane %v10550_v20, 2  ;;  %v5643_v17 = vperm.slane %v10550_v20, 3  ;;  %v5644_v45 = vperm.slane %v10550_v20, 4 }
 0xb71   : > { %5926 = vst [vmem:[#allocation1 + $0x5] ss:$9 sm:$0xff] %v5637_v11  ;;  %v3787_v11 = vperm.slane %v10897_v23, %v10605_v41 }
 0xb72   : > { %5927 = vst [vmem:[#allocation1 + $0x6] ss:$9 sm:$0xff] %v5638_v33  ;;  %v5645_v33 = vperm.slane %v10550_v20, 5 }
 0xb73   : > { %5928 = vst [vmem:[#allocation1 + $0x7] ss:$9 sm:$0xff] %v5639_v18  ;;  %5979 = vperm.xlu1 %6679, %v10395_v40   ;;  %v3786_v40 = vsel %vm2566_vm4, %v3785_v56, %v3784_v59  ;;  %v5646_v18 = vperm.slane %v10550_v20, 6 }
 0xb74   : > { %v3788_v4 = vsel %vm2570_vm5, %v3787_v11, %v3786_v40 }
 0xb75   : > { %v3719_v13 = vpop.permute.xlu1 %3718 }
 0xb76   : > { %v3722_v42 = vpop.permute.xlu0 %3721  ;;  %v3789_v28 = vperm.slane %v3719_v13, %v10626_v31  ;;  %v11659_v13 = vld [vmem:[#allocation36_spill] sm:$0xff] }
 0xb77   : > { %v10952_v58 = vpop.permute.xlu2 %4817  ;;  %v3791_v23 = vperm.slane %v3722_v42, %v10630_v39 }
 0xb78   : > { %5985 = vperm.xlu0 %6678, %v10403_v61   ;;  %v3790_v2 = vsel %vm2574_vm6, %v3789_v28, %v3788_v4  ;;  %5994 = vperm.xlu2 %6680, %v10445_v0   ;;  %v3761_v61 = vsel %vm2578_vm7, %v3760_v51, %v10865_v49  ;;  %v3762_v0 = vperm.slane %v10873_v24, %v10635_v50 }
 0xb79   : > { %v3792_v20 = vsel %vm2578_vm7, %v3791_v23, %v3790_v2  ;;  %v3764_v49 = vperm.slane %v10788_v43, %v10647_v60  ;;  %v3799_v51 = vperm.slane %v10922_v3, %v10658_v34  ;;  %v3770_v3 = vperm.slane %v10814_v36, %v10678_v35 }
 0xb7a   : > { %v10954_v6 = vld [vmem:[#allocation1] sm:$0xff]  ;;  %v3763_v7 = vsel %vm2582_vm8, %v3762_v0, %v3761_v61  ;;  %v11661_v0 = vld [vmem:[#allocation92_spill] sm:$0xff] }
 0xb7b   : > { %5930 = vst [vmem:[#allocation1] ss:$9 sm:$0xff] %v5640_v63  ;;  %5991 = vperm.xlu1 %6679, %v10432_v10   ;;  %v3793_v10 = vperm.slane %v10916_v19, %v10635_v50  ;;  %v3766_v63 = vperm.slane %v10895_v54, %v10652_v47  ;;  %v11660_v19 = vld [vmem:[#allocation94_spill] sm:$0xff]  ;;  %v3765_v54 = vsel %vm2586_vm9, %v3764_v49, %v3763_v7  ;;  %v11663_v7 = vld [vmem:[#allocation33_spill] sm:$0xff] }
 0xb7c   : > { %5931 = vst [vmem:[#allocation1 + $0x1] ss:$9 sm:$0xff] %v5641_v30  ;;  %v11658_v30 = vld [vmem:[#allocation37_spill] sm:$0xff]  ;;  %v3774_v49 = vperm.slane %v10911_v14, %v10808_v37  ;;  %v3776_v14 = vperm.slane %v10839_v29, %v10827_v55 }
 0xb7d   : > { %5932 = vst [vmem:[#allocation1 + $0x2] ss:$9 sm:$0xff] %v5642_v53  ;;  %v3728_v21 = vpop.permute.xlu1 %3727  ;;  %v3794_v59 = vsel %vm2582_vm8, %v3793_v10, %v3792_v20  ;;  %v5648_v56 = vperm.slane %v11658_v30, 0  ;;  %v5649_v53 = vperm.slane %v11658_v30, 1  ;;  %v5650_v43 = vperm.slane %v11658_v30, 2  ;;  %v11662_v10 = vld [vmem:[#allocation42_spill] sm:$0xff] }
 0xb7e   : > { %5933 = vst [vmem:[#allocation1 + $0x3] ss:$9 sm:$0xff] %v5643_v17  ;;  %v3731_v52 = vpop.permute.xlu0 %3730  ;;  %v3795_v32 = vperm.slane %v3728_v21, %v10647_v60  ;;  %v3767_v28 = vsel %vm11353_vm10, %v3766_v63, %v3765_v54  ;;  %v5653_v2 = vperm.slane %v11658_v30, 5  ;;  %v5655_v20 = vperm.slane %v11658_v30, 7 }
 0xb7f   : > { %5934 = vst [vmem:[#allocation1 + $0x4] ss:$9 sm:$0xff] %v5644_v45  ;;  %v10974_v9 = vpop.permute.xlu2 %4826  ;;  %v3797_v24 = vperm.slane %v3731_v52, %v10652_v47  ;;  %v3772_v52 = vperm.slane %v10914_v16, %v10682_v8 }
 0xb80   : > { %5935 = vst [vmem:[#allocation1 + $0x5] ss:$9 sm:$0xff] %v5645_v33  ;;  %v3796_v42 = vsel %vm2586_vm9, %v3795_v32, %v3794_v59  ;;  %5988 = vperm.xlu0 %6678, %v10418_v26   ;;  %6003 = vperm.xlu2 %6680, %v11659_v13   ;;  %v5651_v33 = vperm.slane %v11658_v30, 3 }
 0xb81   : > { %5936 = vst [vmem:[#allocation1 + $0x6] ss:$9 sm:$0xff] %v5646_v18  ;;  %v3798_v26 = vsel %vm11353_vm10, %v3797_v24, %v3796_v42  ;;  %v3768_v18 = vperm.slane %v10893_v48, %v10658_v34  ;;  %v5654_v48 = vperm.slane %v11658_v30, 6  ;;  %v3805_v42 = vperm.slane %v10937_v22, %v10808_v37 }
 0xb82   : > { %5937 = vst [vmem:[#allocation1 + $0x7] ss:$9 sm:$0xff] %v5647_v1  ;;  %v5652_v1 = vperm.slane %v11658_v30, 4  ;;  %v3800_v21 = vsel %vm11354_vm11, %v3799_v51, %v3798_v26  ;;  %v4910_v30 = vperm.slane %v10952_v58, %v10578_v38  ;;  %v11667_v26 = vld [vmem:[#allocation30_spill] sm:$0xff] }
 0xb83   : > { %6000 = vperm.xlu1 %6679, %v11660_v19   ;;  %v3769_v23 = vsel %vm11354_vm11, %v3768_v18, %v3767_v28  ;;  %v11666_v28 = vld [vmem:[#allocation32_spill] sm:$0xff]  ;;  %v11669_v51 = vld [vmem:[#allocation22_spill] sm:$0xff] }
 0xb84   : > { %v3771_v16 = vsel %vm11352_vm12, %v3770_v3, %v3769_v23  ;;  %v11668_v18 = vld [vmem:[#allocation44_spill] sm:$0xff] }
 0xb85   : > { %v3737_v45 = vpop.permute.xlu1 %3736  ;;  %v3773_v63 = vsel %vm11351_vm13, %v3772_v52, %v3771_v16  ;;  %v5659_v52 = vperm.slane %v11667_v26, 3 }
 0xb86   : > { %v3740_v17 = vpop.permute.xlu0 %3739  ;;  %v3801_v4 = vperm.slane %v3737_v45, %v10678_v35  ;;  %v3775_v19 = vsel %vm2606_vm14, %v3774_v49, %v3773_v63  ;;  %v5656_v45 = vperm.slane %v11667_v26, 0  ;;  %v11671_v63 = vld [vmem:[#allocation24_spill] sm:$0xff] }
 0xb87   : > { %v11003_v11 = vpop.permute.xlu2 %4835  ;;  %v3803_v32 = vperm.slane %v3740_v17, %v10682_v8 }
 0xb88   : > { %v3802_v61 = vsel %vm11352_vm12, %v3801_v4, %v3800_v21  ;;  %5997 = vperm.xlu0 %6678, %v11661_v0   ;;  %6012 = vperm.xlu2 %6680, %v11662_v10   ;;  %v5663_v10 = vperm.slane %v11667_v26, 7 }
 0xb89   : > { %v10998_v40 = vld [vmem:[#allocation1] sm:$0xff]  ;;  %v3804_v36 = vsel %vm11351_vm13, %v3803_v32, %v3802_v61  ;;  %vm11664_vm13 = vcmask 1048512   ;;  %v5661_v61 = vperm.slane %v11667_v26, 5  ;;  %v5662_v32 = vperm.slane %v11667_v26, 6 }
 0xb8a   : > { %5939 = vst [vmem:[#allocation1] ss:$9 sm:$0xff] %v5648_v56  ;;  %v3806_v54 = vsel %vm2606_vm14, %v3805_v42, %v3804_v36  ;;  %vm11665_vm12 = vmmov %vm11664_vm13  ;;  %v11672_v36 = vld [vmem:[#allocation58_spill] sm:$0xff]  ;;  %v11673_v42 = vld [vmem:[#allocation45_spill] sm:$0xff] }
 0xb8b   : > { %5940 = vst [vmem:[#allocation1 + $0x1] ss:$9 sm:$0xff] %v5649_v53  ;;  %6009 = vperm.xlu1 %6679, %v11663_v7   ;;  %v11670_v7 = vld [vmem:[#allocation34_spill] sm:$0xff] }
 0xb8c   : > { %5941 = vst [vmem:[#allocation1 + $0x2] ss:$9 sm:$0xff] %v5650_v43  ;;  %v3777_v43 = vsel %vm11665_vm12, %v3776_v14, %v3775_v19  ;;  %v11676_v19 = vld [vmem:[#allocation61_spill] sm:$0xff]  ;;  %v5666_v14 = vperm.slane %v11673_v42, 2  ;;  %vm11679_vm12 = vcmask 851712  }
 0xb8d   : > { %5942 = vst [vmem:[#allocation1 + $0x3] ss:$9 sm:$0xff] %v5651_v33  ;;  %v3746_v24 = vpop.permute.xlu1 %3745 }
 0xb8e   : > { %5943 = vst [vmem:[#allocation1 + $0x4] ss:$9 sm:$0xff] %v5652_v1  ;;  %v4815_v59 = vpop.permute.xlu0 %4814  ;;  %v3807_v13 = vperm.slane %v3746_v24, %v10827_v55  ;;  %v5657_v1 = vperm.slane %v11667_v26, 1  ;;  %v5665_v24 = vperm.slane %v11673_v42, 1 }
 0xb8f   : > { %5944 = vst [vmem:[#allocation1 + $0x5] ss:$9 sm:$0xff] %v5653_v2  ;;  %v4909_v56 = vperm.slane %v4815_v59, %v10571_v12  ;;  %v11040_v17 = vpop.permute.xlu2 %4844  ;;  %v5658_v2 = vperm.slane %v11667_v26, 2 }
 0xb90   : > { %5945 = vst [vmem:[#allocation1 + $0x6] ss:$9 sm:$0xff] %v5654_v48  ;;  %v3808_v22 = vsel %vm11664_vm13, %v3807_v13, %v3806_v54  ;;  %6006 = vperm.xlu0 %6678, %v11666_v28   ;;  %6021 = vperm.xlu2 %6680, %v11668_v18   ;;  %v5660_v48 = vperm.slane %v11667_v26, 4  ;;  %v11675_v13 = vld [vmem:[#allocation52_spill] sm:$0xff]  ;;  %v5668_v28 = vperm.slane %v11673_v42, 4  ;;  %v5669_v26 = vperm.slane %v11673_v42, 5  ;;  %vm11680_vm13 = vmmov %vm11679_vm12 }
 0xb91   : > { %5946 = vst [vmem:[#allocation1 + $0x7] ss:$9 sm:$0xff] %v5655_v20  ;;  %v4911_v53 = vsel %vm2554_vm1, %v4910_v30, %v4909_v56  ;;  %v3809_v58 = vrot.slane %v3808_v22, 7  ;;  %v5664_v30 = vperm.slane %v11673_v42, 0  ;;  %v11674_v56 = vld [vmem:[#allocation16_spill] sm:$0xff]  ;;  %v11677_v18 = vld [vmem:[#allocation26_spill] sm:$0xff] }
 0xb93   : > { %v3810_v33 = vsel %vm2644_vm0, %v3777_v43, %v3809_v58  ;;  %6018 = vperm.xlu1 %6679, %v11669_v51   ;;  %v5667_v58 = vperm.slane %v11673_v42, 3 }
 0xb94   : > { %6518 = vst.msk [vmem:[%s10885_s20 + $0x1] ss:$4 sm:$0x3] %vm10881_vm15, %v3810_v33  ;;  %v5671_v33 = vperm.slane %v11673_v42, 7 }
 0xb95   : > { %v4821_v23 = vpop.permute.xlu1 %4820 }
 0xb96   : > { %v4824_v29 = vpop.permute.xlu0 %4823  ;;  %v4912_v21 = vperm.slane %v4821_v23, %v10582_v27 }
 0xb97   : > { %v4914_v3 = vperm.slane %v4824_v29, %v10588_v15  ;;  %v11068_v16 = vpop.permute.xlu2 %4853 }
 0xb98   : > { %v11051_v4 = vld [vmem:[#allocation1] sm:$0xff]  ;;  %v4913_v20 = vsel %vm2558_vm2, %v4912_v21, %v4911_v53  ;;  %6015 = vperm.xlu0 %6678, %v11670_v7   ;;  %6030 = vperm.xlu2 %6680, %v11671_v63  }
 0xb99   : > { %5948 = vst [vmem:[#allocation1] ss:$9 sm:$0xff] %v5656_v45  ;;  %v11066_v0 = vsel %vm2562_vm3, %v4914_v3, %v4913_v20  ;;  %v5670_v45 = vperm.slane %v11673_v42, 6 }
 0xb9a   : > { %5949 = vst [vmem:[#allocation1 + $0x1] ss:$9 sm:$0xff] %v5657_v1 }
 0xb9b   : > { %5950 = vst [vmem:[#allocation1 + $0x2] ss:$9 sm:$0xff] %v5658_v2  ;;  %6027 = vperm.xlu1 %6679, %v11672_v36   ;;  %v11678_v2 = vld [vmem:[#allocation38_spill] sm:$0xff] }
 0xb9c   : > { %5951 = vst [vmem:[#allocation1 + $0x3] ss:$9 sm:$0xff] %v5659_v52  ;;  %v5672_v23 = vperm.slane %v11678_v2, 0  ;;  %v5673_v52 = vperm.slane %v11678_v2, 1  ;;  %v5676_v3 = vperm.slane %v11678_v2, 4  ;;  %v5678_v20 = vperm.slane %v11678_v2, 6 }
 0xb9d   : > { %5952 = vst [vmem:[#allocation1 + $0x4] ss:$9 sm:$0xff] %v5660_v48  ;;  %v11076_v49 = vpop.permute.xlu1 %4832  ;;  %v5674_v48 = vperm.slane %v11678_v2, 2 }
 0xb9e   : > { %5953 = vst [vmem:[#allocation1 + $0x5] ss:$9 sm:$0xff] %v5661_v61  ;;  %v11074_v59 = vpop.permute.xlu0 %4829 }
 0xb9f   : > { %5954 = vst [vmem:[#allocation1 + $0x6] ss:$9 sm:$0xff] %v5662_v32  ;;  %v4863_v53 = vpop.permute.xlu2 %4862 }
 0xba0   : > { %5955 = vst [vmem:[#allocation1 + $0x7] ss:$9 sm:$0xff] %v5663_v10  ;;  %6024 = vperm.xlu0 %6678, %v11674_v56   ;;  %6039 = vperm.xlu2 %6680, %v11675_v13   ;;  %v4940_v36 = vperm.slane %v4863_v53, %v10571_v12  ;;  %v4916_v53 = vperm.slane %v10974_v9, %v10601_v25 }
 0xba3   : > { %6036 = vperm.xlu1 %6679, %v11676_v19  }
 0xba5   : > { %v11087_v43 = vpop.permute.xlu1 %4841 }
 0xba6   : > { %v11084_v22 = vpop.permute.xlu0 %4838 }
 0xba7   : > { %v5956_v54 = vld [vmem:[#allocation1] sm:$0xff]  ;;  %v4872_v1 = vpop.permute.xlu2 %4871 }
 0xba8   : > { %5957 = vst [vmem:[#allocation1] ss:$9 sm:$0xff] %v5664_v30  ;;  %6033 = vperm.xlu0 %6678, %v11677_v18   ;;  %6048 = vperm.xlu2 %6680, %v10901_v46  }
 0xba9   : > { %5958 = vst [vmem:[#allocation1 + $0x1] ss:$9 sm:$0xff] %v5665_v24 }
 0xbaa   : > { %5959 = vst [vmem:[#allocation1 + $0x2] ss:$9 sm:$0xff] %v5666_v14 }
 0xbab   : > { %5960 = vst [vmem:[#allocation1 + $0x3] ss:$9 sm:$0xff] %v5667_v58  ;;  %6045 = vperm.xlu1 %6679, %v10849_v57   ;;  %v5675_v57 = vperm.slane %v11678_v2, 3 }
 0xbac   : > { %5961 = vst [vmem:[#allocation1 + $0x4] ss:$9 sm:$0xff] %v5668_v28  ;;  %v4917_v28 = vsel %vm2566_vm4, %v4916_v53, %v11066_v0 }
 0xbad   : > { %5962 = vst [vmem:[#allocation1 + $0x5] ss:$9 sm:$0xff] %v5669_v26  ;;  %v11098_v29 = vpop.permute.xlu1 %4850  ;;  %v4920_v26 = vperm.slane %v11076_v49, %v10626_v31 }
 0xbae   : > { %5963 = vst [vmem:[#allocation1 + $0x6] ss:$9 sm:$0xff] %v5670_v45  ;;  %v11096_v51 = vpop.permute.xlu0 %4847 }
 0xbaf   : > { %5964 = vst [vmem:[#allocation1 + $0x7] ss:$9 sm:$0xff] %v5671_v33  ;;  %v4881_v32 = vpop.permute.xlu2 %4880 }
 0xbb0   : > { %6042 = vperm.xlu0 %6678, %v10796_v5   ;;  %6057 = vperm.xlu2 %6680, %v10998_v40   ;;  %v5677_v5 = vperm.slane %v11678_v2, 5 }
 0xbb3   : > { %6054 = vperm.xlu1 %6679, %v10954_v6   ;;  %v5679_v6 = vperm.slane %v11678_v2, 7 }
 0xbb5   : > { %v11110_v61 = vpop.permute.xlu1 %4859 }
 0xbb6   : > { %v5965_v21 = vld [vmem:[#allocation1] sm:$0xff]  ;;  %v11107_v46 = vpop.permute.xlu0 %4856 }
 0xbb7   : > { %5966 = vst [vmem:[#allocation1] ss:$9 sm:$0xff] %v5672_v23  ;;  %v4890_v42 = vpop.permute.xlu2 %4889 }
 0xbb8   : > { %5967 = vst [vmem:[#allocation1 + $0x1] ss:$9 sm:$0xff] %v5673_v52  ;;  %6051 = vperm.xlu0 %6678, %v10925_v62   ;;  %6066 = vperm.xlu2 %6680, %v5965_v21   ;;  %v4945_v62 = vperm.slane %v4872_v1, %v10588_v15  ;;  %v4951_v1 = vperm.slane %v4881_v32, %v10626_v31 }
 0xbb9   : > { %5968 = vst [vmem:[#allocation1 + $0x2] ss:$9 sm:$0xff] %v5674_v48  ;;  %v4922_v21 = vperm.slane %v11003_v11, %v10630_v39  ;;  %v4924_v48 = vperm.slane %v11084_v22, %v10635_v50  ;;  %v4957_v32 = vperm.slane %v4890_v42, %v10647_v60 }
 0xbba   : > { %5969 = vst [vmem:[#allocation1 + $0x3] ss:$9 sm:$0xff] %v5675_v57 }
 0xbbb   : > { %5970 = vst [vmem:[#allocation1 + $0x4] ss:$9 sm:$0xff] %v5676_v3  ;;  %6063 = vperm.xlu1 %6679, %v5956_v54   ;;  %v4926_v3 = vperm.slane %v11087_v43, %v10647_v60  ;;  %v4928_v43 = vperm.slane %v11040_v17, %v10652_v47 }
 0xbbc   : > { %5971 = vst [vmem:[#allocation1 + $0x5] ss:$9 sm:$0xff] %v5677_v5 }
 0xbbd   : > { %5972 = vst [vmem:[#allocation1 + $0x6] ss:$9 sm:$0xff] %v5678_v20  ;;  %v4869_v10 = vpop.permute.xlu1 %4868 }
 0xbbe   : > { %5973 = vst [vmem:[#allocation1 + $0x7] ss:$9 sm:$0xff] %v5679_v6  ;;  %v4866_v40 = vpop.permute.xlu0 %4865  ;;  %v4943_v63 = vperm.slane %v4869_v10, %v10582_v27 }
 0xbbf   : > { %v4941_v7 = vperm.slane %v4866_v40, %v10578_v38  ;;  %v4899_v33 = vpop.permute.xlu2 %4898 }
 0xbc0   : > { %6060 = vperm.xlu0 %6678, %v11051_v4   ;;  %v4918_v4 = vperm.slane %v11074_v59, %v10605_v41 }
 0xbc1   : > { %v4942_v30 = vsel %vm2554_vm1, %v4941_v7, %v4940_v36 }
 0xbc2   : > { %v4944_v56 = vsel %vm2558_vm2, %v4943_v63, %v4942_v30  ;;  %v4919_v9 = vsel %vm2570_vm5, %v4918_v4, %v4917_v28  ;;  %v4930_v30 = vperm.slane %v11096_v51, %v10658_v34  ;;  %v4934_v51 = vperm.slane %v11068_v16, %v10682_v8 }
 0xbc3   : > { %v4946_v54 = vsel %vm2562_vm3, %v4945_v62, %v4944_v56  ;;  %v4921_v52 = vsel %vm2574_vm6, %v4920_v26, %v4919_v9  ;;  %v4932_v56 = vperm.slane %v11098_v29, %v10678_v35  ;;  %v4936_v4 = vperm.slane %v11107_v46, %v10808_v37 }
 0xbc4   : > { %v4923_v57 = vsel %vm2578_vm7, %v4922_v21, %v4921_v52  ;;  %v4938_v26 = vperm.slane %v11110_v61, %v10827_v55 }
 0xbc5   : > { %v4878_v13 = vpop.permute.xlu1 %4877  ;;  %v5974_v58 = vld [vmem:[#allocation1] sm:$0xff]  ;;  %v4925_v6 = vsel %vm2582_vm8, %v4924_v48, %v4923_v57 }
 0xbc6   : > { %v4875_v24 = vpop.permute.xlu0 %4874  ;;  %v4949_v14 = vperm.slane %v4878_v13, %v10605_v41  ;;  %v4927_v10 = vsel %vm2586_vm9, %v4926_v3, %v4925_v6  ;;  %v4963_v13 = vperm.slane %v4899_v33, %v10678_v35 }
 0xbc7   : > { %v4947_v19 = vperm.slane %v4875_v24, %v10601_v25  ;;  %v4908_v11 = vpop.permute.xlu2 %4907  ;;  %v4929_v42 = vsel %vm11353_vm10, %v4928_v43, %v4927_v10 }
 0xbc8   : > { %6069 = vperm.xlu0 %6678, %v5974_v58  }
 0xbc9   : > { %v4948_v45 = vsel %vm2566_vm4, %v4947_v19, %v4946_v54  ;;  %v4931_v19 = vsel %vm11354_vm11, %v4930_v30, %v4929_v42 }
 0xbca   : > { %v4950_v18 = vsel %vm2570_vm5, %v4949_v14, %v4948_v45  ;;  %v4933_v17 = vsel %vm11679_vm12, %v4932_v56, %v4931_v19  ;;  %v4969_v45 = vperm.slane %v4908_v11, %v10827_v55 }
 0xbcb   : > { %v4952_v0 = vsel %vm2574_vm6, %v4951_v1, %v4950_v18 }
 0xbcd   : > { %v4887_v23 = vpop.permute.xlu1 %4886 }
 0xbce   : > { %v4884_v2 = vpop.permute.xlu0 %4883  ;;  %v4955_v49 = vperm.slane %v4887_v23, %v10635_v50 }
 0xbcf   : > { %v4953_v59 = vperm.slane %v4884_v2, %v10630_v39  ;;  %v5983_v33 = vpop.permute.xlu2 %5982 }
 0xbd0   : > { %v6074_v48 = vperm.slane %v5983_v33, %v10582_v27 }
 0xbd1   : > { %v4954_v5 = vsel %vm2578_vm7, %v4953_v59, %v4952_v0 }
 0xbd2   : > { %v4956_v20 = vsel %vm2582_vm8, %v4955_v49, %v4954_v5 }
 0xbd3   : > { %v4958_v7 = vsel %vm2586_vm9, %v4957_v32, %v4956_v20 }
 0xbd5   : > { %v4896_v63 = vpop.permute.xlu1 %4895 }
 0xbd6   : > { %v4893_v40 = vpop.permute.xlu0 %4892  ;;  %v4961_v36 = vperm.slane %v4896_v63, %v10658_v34 }
 0xbd7   : > { %v4959_v22 = vperm.slane %v4893_v40, %v10652_v47  ;;  %v5995_v49 = vpop.permute.xlu2 %5994 }
 0xbd9   : > { %v4960_v24 = vsel %vm11353_vm10, %v4959_v22, %v4958_v7  ;;  %vm11681_vm10 = vcmask 917312  }
 0xbda   : > { %v4962_v62 = vsel %vm11354_vm11, %v4961_v36, %v4960_v24  ;;  %v4935_v28 = vsel %vm11681_vm10, %v4934_v51, %v4933_v17  ;;  %vm11682_vm12 = vmmov %vm11681_vm10 }
 0xbdb   : > { %v4964_v54 = vsel %vm11680_vm13, %v4963_v13, %v4962_v62  ;;  %vm11683_vm13 = vcmask 1048512   ;;  %v4937_v2 = vsel %vm2606_vm14, %v4936_v4, %v4935_v28 }
 0xbdc   : > { %vm11684_vm11 = vmmov %vm11683_vm13 }
 0xbdd   : > { %v4905_v29 = vpop.permute.xlu1 %4904  ;;  %v4939_v46 = vsel %vm11684_vm11, %v4938_v26, %v4937_v2 }
 0xbde   : > { %v4902_v14 = vpop.permute.xlu0 %4901  ;;  %v4967_v58 = vperm.slane %v4905_v29, %v10808_v37 }
 0xbdf   : > { %v4965_v53 = vperm.slane %v4902_v14, %v10682_v8  ;;  %v6004_v6 = vpop.permute.xlu2 %6003 }
 0xbe1   : > { %v4966_v18 = vsel %vm11682_vm12, %v4965_v53, %v4964_v54 }
 0xbe2   : > { %v4968_v16 = vsel %vm2606_vm14, %v4967_v58, %v4966_v18 }
 0xbe3   : > { %v4970_v1 = vsel %vm11683_vm13, %v4969_v45, %v4968_v16 }
 0xbe4   : > { %v4971_v9 = vrot.slane %v4970_v1, 7 }
 0xbe5   : > { %v5980_v61 = vpop.permute.xlu1 %5979 }
 0xbe6   : > { %v4972_v59 = vsel %vm2644_vm0, %v4939_v46, %v4971_v9  ;;  %v5977_v23 = vpop.permute.xlu0 %5976  ;;  %v6072_v52 = vperm.slane %v5980_v61, %v10578_v38 }
 0xbe7   : > { %6519 = vst.msk [vmem:[%s10885_s20 + $0x2] ss:$4 sm:$0x3] %vm10881_vm15, %v4972_v59  ;;  %v6071_v0 = vperm.slane %v5977_v23, %v10571_v12  ;;  %v11196_v7 = vpop.permute.xlu2 %6012 }
 0xbe9   : > { %v6073_v21 = vsel %vm2554_vm1, %v6072_v52, %v6071_v0 }
 0xbea   : > { %v6075_v57 = vsel %vm2558_vm2, %v6074_v48, %v6073_v21 }
 0xbed   : > { %v5992_v20 = vpop.permute.xlu1 %5991 }
 0xbee   : > { %v5986_v3 = vpop.permute.xlu0 %5985 }
 0xbef   : > { %v6076_v5 = vperm.slane %v5986_v3, %v10588_v15  ;;  %v11200_v36 = vpop.permute.xlu2 %6021  ;;  %v6088_v3 = vperm.slane %v6004_v6, %v10647_v60 }
 0xbf1   : > { %v6077_v32 = vsel %vm2562_vm3, %v6076_v5, %v6075_v57 }
 0xbf5   : > { %v6001_v10 = vpop.permute.xlu1 %6000 }
 0xbf6   : > { %v5989_v40 = vpop.permute.xlu0 %5988  ;;  %v6086_v21 = vperm.slane %v6001_v10, %v10635_v50 }
 0xbf7   : > { %v6031_v56 = vpop.permute.xlu2 %6030  ;;  %v6078_v29 = vperm.slane %v5989_v40, %v10601_v25 }
 0xbf8   : > { %v6105_v53 = vperm.slane %v6031_v56, %v10582_v27 }
 0xbf9   : > { %v6079_v33 = vsel %vm2566_vm4, %v6078_v29, %v6077_v32 }
 0xbfd   : > { %v6010_v22 = vpop.permute.xlu1 %6009 }
 0xbfe   : > { %v5998_v11 = vpop.permute.xlu0 %5997 }
 0xbff   : > { %v6040_v13 = vpop.permute.xlu2 %6039  ;;  %v6084_v1 = vperm.slane %v5998_v11, %v10630_v39  ;;  %v6092_v11 = vperm.slane %v6010_v22, %v10658_v34 }
 0xc00   : > { %v6111_v27 = vperm.slane %v6040_v13, %v10605_v41 }
 0xc05   : > { %v11198_v43 = vpop.permute.xlu1 %6018 }
 0xc06   : > { %v6007_v63 = vpop.permute.xlu0 %6006 }
 0xc0d   : > { %v6028_v42 = vpop.permute.xlu1 %6027 }
 0xc0e   : > { %v11202_v30 = vpop.permute.xlu0 %6015  ;;  %v6103_v54 = vperm.slane %v6028_v42, %v10578_v38 }
 0xc0f   : > { %v6096_v6 = vperm.slane %v11202_v30, %v10682_v8 }
 0xc15   : > { %v6037_v62 = vpop.permute.xlu1 %6036 }
 0xc16   : > { %v6025_v24 = vpop.permute.xlu0 %6024  ;;  %v6109_v26 = vperm.slane %v6037_v62, %v10601_v25  ;;  %v6082_v25 = vperm.slane %v5995_v49, %v10626_v31  ;;  %v6090_v49 = vperm.slane %v6007_v63, %v10652_v47 }
 0xc17   : > { %v6102_v19 = vperm.slane %v6025_v24, %v10571_v12  ;;  %v6049_v12 = vpop.permute.xlu2 %6048  ;;  %v6094_v24 = vperm.slane %v11196_v7, %v10678_v35 }
 0xc18   : > { %v6117_v48 = vperm.slane %v6049_v12, %v10635_v50 }
 0xc19   : > { %v6104_v14 = vsel %vm2554_vm1, %v6103_v54, %v6102_v19  ;;  %vm11685_vm1 = vcmask 720512  }
 0xc1a   : > { %v6106_v4 = vsel %vm2558_vm2, %v6105_v53, %v6104_v14  ;;  %vm11686_vm2 = vmmov %vm11685_vm1 }
 0xc1d   : > { %v6046_v58 = vpop.permute.xlu1 %6045 }
 0xc1e   : > { %v6034_v17 = vpop.permute.xlu0 %6033  ;;  %v6115_v46 = vperm.slane %v6046_v58, %v10630_v39 }
 0xc1f   : > { %v6107_v51 = vperm.slane %v6034_v17, %v10588_v15  ;;  %v6080_v15 = vperm.slane %v5992_v20, %v10605_v41  ;;  %v6058_v57 = vpop.permute.xlu2 %6057 }
 0xc20   : > { %v6123_v63 = vperm.slane %v6058_v57, %v10658_v34 }
 0xc21   : > { %v6108_v28 = vsel %vm2562_vm3, %v6107_v51, %v6106_v4  ;;  %v6081_v16 = vsel %vm2570_vm5, %v6080_v15, %v6079_v33  ;;  %vm11687_vm3 = vcmask 786112   ;;  %v6100_v51 = vperm.slane %v11200_v36, %v10827_v55 }
 0xc22   : > { %v6110_v38 = vsel %vm2566_vm4, %v6109_v26, %v6108_v28  ;;  %v6083_v59 = vsel %vm2574_vm6, %v6082_v25, %v6081_v16  ;;  %vm11688_vm4 = vmmov %vm11687_vm3 }
 0xc23   : > { %v6112_v2 = vsel %vm2570_vm5, %v6111_v27, %v6110_v38  ;;  %v6085_v52 = vsel %vm2578_vm7, %v6084_v1, %v6083_v59  ;;  %vm11689_vm5 = vcmask 851712  }
 0xc25   : > { %v6055_v23 = vpop.permute.xlu1 %6054 }
 0xc26   : > { %v6043_v45 = vpop.permute.xlu0 %6042  ;;  %v6121_v20 = vperm.slane %v6055_v23, %v10652_v47 }
 0xc27   : > { %v6113_v18 = vperm.slane %v6043_v45, %v10626_v31  ;;  %v6087_v31 = vsel %vm2582_vm8, %v6086_v21, %v6085_v52  ;;  %v6067_v22 = vpop.permute.xlu2 %6066 }
 0xc28   : > { %v6089_v32 = vsel %vm2586_vm9, %v6088_v3, %v6087_v31  ;;  %v6129_v7 = vperm.slane %v6067_v22, %v10808_v37 }
 0xc29   : > { %v6114_v9 = vsel %vm2574_vm6, %v6113_v18, %v6112_v2  ;;  %v6091_v40 = vsel %vm11685_vm1, %v6090_v49, %v6089_v32  ;;  %vm11690_vm6 = vmmov %vm11689_vm5 }
 0xc2a   : > { %v6116_v41 = vsel %vm2578_vm7, %v6115_v46, %v6114_v9  ;;  %vm11691_vm7 = vmmov %vm11681_vm10 }
 0xc2b   : > { %v6118_v39 = vsel %vm2582_vm8, %v6117_v48, %v6116_v41  ;;  %vm11692_vm8 = vmmov %vm11691_vm7 }
 0xc2d   : > { %v6064_v56 = vpop.permute.xlu1 %6063 }
 0xc2e   : > { %v6052_v61 = vpop.permute.xlu0 %6051  ;;  %v6127_v34 = vperm.slane %v6064_v56, %v10682_v8 }
 0xc2f   : > { %v6119_v0 = vperm.slane %v6052_v61, %v10647_v60  ;;  %v6093_v60 = vsel %vm11687_vm3, %v6092_v11, %v6091_v40 }
 0xc30   : > { %v6095_v13 = vsel %vm11690_vm6, %v6094_v24, %v6093_v60 }
 0xc31   : > { %v6120_v5 = vsel %vm2586_vm9, %v6119_v0, %v6118_v39  ;;  %v6097_v19 = vsel %vm11691_vm7, %v6096_v6, %v6095_v13  ;;  %vm11693_vm9 = vmmov %vm11684_vm11 }
 0xc32   : > { %v6122_v50 = vsel %vm11686_vm2, %v6121_v20, %v6120_v5  ;;  %vm11694_vm10 = vmmov %vm11693_vm9 }
 0xc33   : > { %v6124_v47 = vsel %vm11688_vm4, %v6123_v63, %v6122_v50 }
 0xc36   : > { %v6061_v10 = vpop.permute.xlu0 %6060 }
 0xc37   : > { %v6125_v42 = vperm.slane %v6061_v10, %v10678_v35  ;;  %v6098_v35 = vperm.slane %v11198_v43, %v10808_v37 }
 0xc39   : > { %v6126_v62 = vsel %vm11689_vm5, %v6125_v42, %v6124_v47  ;;  %v6099_v54 = vsel %vm2606_vm14, %v6098_v35, %v6097_v19 }
 0xc3a   : > { %v6128_v17 = vsel %vm11692_vm8, %v6127_v34, %v6126_v62  ;;  %v6101_v43 = vsel %vm11694_vm10, %v6100_v51, %v6099_v54 }
 0xc3b   : > { %v6130_v14 = vsel %vm2606_vm14, %v6129_v7, %v6128_v17 }
 0xc3e   : > { %v6070_v30 = vpop.permute.xlu0 %6069 }
 0xc3f   : > { %v6131_v8 = vperm.slane %v6070_v30, %v10827_v55 }
 0xc41   : > { %v6132_v53 = vsel %vm11693_vm9, %v6131_v8, %v6130_v14 }
 0xc42   : > { %v6133_v29 = vrot.slane %v6132_v53, 7 }
 0xc44   : > { %v6134_v37 = vsel %vm2644_vm0, %v6101_v43, %v6133_v29 }
 0xc45   : > { %6520 = vst.msk [vmem:[%s10885_s20 + $0x3] ss:$4 sm:$0x3] %vm10881_vm15, %v6134_v37 }
 0xc46   : > { %7350 = shalt.err (!%p7347_p8)
}
 0xc47   : > { %6611 = dma.vmem_to_hbm [thread:$0]  (%p7489_p5), %s6153_s9, 128, %s6155_s17, %s6139_s26  }
 0xc48 PF: > { %p6638_p9 = scmp.ge.s32.totalorder %s7397_s30, 2  ;;  %s6166_s24 = sand.u32 1, %s7385_s27  }
 0xc49   : > { %s6167_s10 = scalar_lea.sflag [#allocation4], %s6166_s24 }
 0xc4a   : > { %p6627_p10 = pnand %p6638_p9, %p7493_p6 }
 0xc4c   : > { %p6628_p11 = pneg %p6627_p10 }
 0xc4e   : > { %7380 = dma.done.wait (%p6628_p11), %s6167_s10, 128  }
 0xc4f   : > { %7382 = vsyncadd (%p6628_p11), %s6167_s10, 4294967168  ;;  %s11695_s20 = sld [smem:[#allocation15_spill]]  ;;  %p21_p12 = scmp.ge.s32.totalorder %s7476_s11, 4  }
 0xc50   : > { %s11696_s27 = smov %s7389_s28  ;;  %s11697_s28 = smov %s7393_s29 }
 0xc51   : > { %s11699_s30 = smov %s7476_s11  ;;  %23 = sbr.rel (!%p21_p12) target bundleno = 9 (0x9), region = 135 }
 0xc55   : > { %s11698_s29 = smov %s11695_s20 }
 0xc56   :  { %6173 = vsyncpa [#allocation3], 1 }
 0xc57   :  { %6175 = vsyncpa [#allocation3 + $0x1], 1 }
 0xc58   :  { %6176 = vsyncpa [#allocation6], 1 }
 0xc59   :  { %6177 = vsyncpa [#allocation9], 1 }
 0xc5a   :  { %6178 = vsyncpa [#allocation4], 1 }
 0xc5b   :  { %6180 = vsyncpa [#allocation4 + $0x1], 1 }

</bundles_post_ra>
